<compile_context>
chip_gen: v6e
topology: v6e:2x2x1
jax: 0.10.0
libtpu: 0.0.40
codegen_flags: <defaults>
</compile_context>

<pallas_src>
import functools

import jax
import jax.numpy as jnp
from jax import lax
from jax.experimental import pallas as pl
from jax.experimental.pallas import tpu as pltpu

H = 200      # logical LSTM hidden size (matches PyTorch)
FC = 240     # logical SPN fc output size (matches PyTorch)
HP = 256     # padded hidden size (multiple of 128)
FCP = 256    # padded fc size (multiple of 128)
APAD = 128   # padded action/output width (lane-dense final store)


def _round_up(x, m):
    return (x + m - 1) // m * m


# ---------------------------------------------------------------------------
# Fused kernel: LSTM recurrence (unrolled) + per-step fc + MLP head.
# ---------------------------------------------------------------------------
def _actor_kernel(T, BP,
                  x_ref, wih_ref, whh_ref, bl_ref, wfc_ref, bfc_ref,
                  b1_ref, b2_ref, b3_ref, b4_ref,
                  w1_hbm, w2_hbm, w3_hbm, w4_hbm,
                  out_ref,
                  xp_scr, z_scr, w1_v, w2_v, w3_v, w4_v, sems):
    f32 = jnp.float32
    bf16 = jnp.bfloat16

    # Start layer1..4 weight DMAs now; they complete while the latency-bound
    # recurrence runs instead of sitting exposed in the prologue.
    copies = [
        pltpu.make_async_copy(w1_hbm, w1_v, sems.at[0]),
        pltpu.make_async_copy(w2_hbm, w2_v, sems.at[1]),
        pltpu.make_async_copy(w3_hbm, w3_v, sems.at[2]),
        pltpu.make_async_copy(w4_hbm, w4_v, sems.at[3]),
    ]
    for cp in copies:
        cp.start()

    # Hoisted input projection for all T steps, parked in VMEM scratch so the
    # (T*BP, 4*HP) f32 slab never lives in vregs across the unrolled loop.
    xp_scr[...] = (jnp.dot(x_ref[...].astype(bf16), wih_ref[...],
                           preferred_element_type=f32) + bl_ref[...])

    whh = whh_ref[...]     # bf16 (HP, 4*HP)
    wfc = wfc_ref[...]     # bf16 (HP, FCP)
    bfc = bfc_ref[...]     # f32  (1, FCP)

    # PyTorch gate order [i, f, g, o]; each gate occupies a 128-aligned 256-wide
    # slab after padding.  Padded h/c lanes stay exactly 0 (zero-padded weights).
    def step(t, carry):
        h, c = carry
        off = pl.multiple_of(t * BP, BP)
        # v7x note: the compiler may fold this add into the MRB accumulator.
        gates = xp_scr[pl.ds(off, BP), :] + jnp.dot(
            h.astype(bf16), whh, preferred_element_type=f32)
        i_f = jax.nn.sigmoid(gates[:, :2 * HP])          # [i | f] in one slab
        g = jnp.tanh(gates[:, 2 * HP:3 * HP])
        o = jax.nn.sigmoid(gates[:, 3 * HP:])
        c = i_f[:, HP:] * c + i_f[:, :HP] * g
        h = o * jnp.tanh(c)
        # Per-step SPN.fc: independent MXU work that fills recurrence bubbles.
        z_scr[pl.ds(off, BP), :] = (
            jnp.dot(h.astype(bf16), wfc, preferred_element_type=f32) + bfc)
        return (h, c)

    h0 = jnp.zeros((BP, HP), f32)
    c0 = jnp.zeros((BP, HP), f32)
    lax.fori_loop(0, T, step, (h0, c0), unroll=True)

    # Head weights must be resident by now (DMA overlapped with the recurrence).
    for cp in copies:
        cp.wait()

    # MLP head on the whole (T*BP, FCP) slab.
    z = z_scr[...]
    z = jnp.maximum(jnp.dot(z.astype(bf16), w1_v[...],
                            preferred_element_type=f32) + b1_ref[...], 0.0)
    z = jnp.maximum(jnp.dot(z.astype(bf16), w2_v[...],
                            preferred_element_type=f32) + b2_ref[...], 0.0)
    z = jnp.maximum(jnp.dot(z.astype(bf16), w3_v[...],
                            preferred_element_type=f32) + b3_ref[...], 0.0)
    out_ref[...] = jnp.tanh(jnp.dot(z.astype(bf16), w4_v[...],
                                    preferred_element_type=f32) + b4_ref[...])


def run_actor(x_flat, p, T, BP):
    # Auto-pipelined (prologue) VMEM inputs: everything the recurrence needs.
    vmem_args = (x_flat, p["w_ih"], p["w_hh"], p["b_lstm"], p["w_fc"], p["b_fc"],
                 p["b1"], p["b2"], p["b3"], p["b4"])
    # Raw HBM refs: head weights, DMA'd manually behind the recurrence.
    hbm_args = (p["w1"], p["w2"], p["w3"], p["w4"])

    def full_spec(shape):
        zeros = (0,) * len(shape)
        return pl.BlockSpec(shape, lambda i, z=zeros: z)

    in_specs = ([full_spec(a.shape) for a in vmem_args]
                + [pl.BlockSpec(memory_space=pl.ANY) for _ in hbm_args])

    scratch_shapes = [
        pltpu.VMEM((T * BP, 4 * HP), jnp.float32),   # hoisted input projection
        pltpu.VMEM((T * BP, FCP), jnp.float32),      # per-step fc outputs
        pltpu.VMEM(p["w1"].shape, p["w1"].dtype),
        pltpu.VMEM(p["w2"].shape, p["w2"].dtype),
        pltpu.VMEM(p["w3"].shape, p["w3"].dtype),
        pltpu.VMEM(p["w4"].shape, p["w4"].dtype),
        pltpu.SemaphoreType.DMA((4,)),
    ]

    return pl.pallas_call(
        functools.partial(_actor_kernel, T, BP),
        out_shape=jax.ShapeDtypeStruct((T * BP, APAD), jnp.float32),
        grid_spec=pltpu.PrefetchScalarGridSpec(
            num_scalar_prefetch=0,
            grid=(1,),
            in_specs=in_specs,
            out_specs=full_spec((T * BP, APAD)),
            scratch_shapes=scratch_shapes,
        ),
        compiler_params=pltpu.CompilerParams(dimension_semantics=("arbitrary",)),
    )(*vmem_args, *hbm_args)


# ---------------------------------------------------------------------------
# Wrapper: full Actor forward (batch_first input, like the PyTorch module).
# ---------------------------------------------------------------------------
def actor_forward(state_btd, padded_params, action_dim):
    B, T, D = state_btd.shape
    BP = max(8, _round_up(B, 8))                            # pad batch to 8 sublanes
    DP = _round_up(D, 8)                                    # pad state_dim to 8
    x = jnp.transpose(state_btd, (1, 0, 2))                 # (T, B, D) time-major
    x = jnp.pad(x, ((0, 0), (0, BP - B), (0, DP - D)))      # (T, BP, DP)
    x = x.reshape(T * BP, DP)
    y = run_actor(x, padded_params, T, BP)                  # (T*BP, APAD)
    y = y.reshape(T, BP, APAD)[:, :B, :action_dim]
    return jnp.transpose(y, (1, 0, 2))                      # (B, T, action_dim)


# ---------------------------------------------------------------------------
# Parameter init (logical PyTorch shapes, stored transposed) + zero padding.
# ---------------------------------------------------------------------------
def init_params(key, state_dim, action_dim):
    ks = jax.random.split(key, 14)

    def uni(k, shape, fan_in):
        bound = 1.0 / jnp.sqrt(fan_in)
        return jax.random.uniform(k, shape, jnp.float32, -bound, bound)

    p = {}
    # LSTM (weights stored (in, 4H); PyTorch b_ih + b_hh folded into one bias).
    p["w_ih"] = uni(ks[0], (state_dim, 4 * H), H)
    p["w_hh"] = uni(ks[1], (H, 4 * H), H)
    p["b_lstm"] = uni(ks[2], (1, 4 * H), H) + uni(ks[3], (1, 4 * H), H)
    # SPN.fc : H -> FC
    p["w_fc"] = uni(ks[4], (H, FC), H)
    p["b_fc"] = uni(ks[5], (1, FC), H)
    # layer1..4
    p["w1"] = uni(ks[6], (FC, 512), FC)
    p["b1"] = uni(ks[7], (1, 512), FC)
    p["w2"] = uni(ks[8], (512, 256), 512)
    p["b2"] = uni(ks[9], (1, 256), 512)
    p["w3"] = uni(ks[10], (256, 128), 256)
    p["b3"] = uni(ks[11], (1, 128), 256)
    p["w4"] = uni(ks[12], (128, action_dim), 128)
    p["b4"] = uni(ks[13], (1, action_dim), 128)
    return p


def pad_params(p, state_dim):
    """Zero-pad to 128-aligned kernel shapes, assert padded regions are exactly
    zero (the h/c padded-lane invariants depend on it), then cast all weight
    matrices to bfloat16 (biases stay f32)."""
    DP = _round_up(state_dim, 8)

    def pad_gates(w, rows_pad):
        rows = w.shape[0]
        out = jnp.zeros((rows_pad, 4 * HP), jnp.float32)
        for g in range(4):
            out = out.at[:rows, g * HP:g * HP + H].set(w[:, g * H:(g + 1) * H])
        return out

    def pad2(w, r, c):
        out = jnp.zeros((r, c), jnp.float32)
        return out.at[:w.shape[0], :w.shape[1]].set(w)

    def assert_pad_zero(name, padded, valid):
        m = padded
        for rs, cs in valid:
            m = m.at[rs, cs].set(0.0)
        assert float(jnp.max(jnp.abs(m))) == 0.0, f"non-zero padding in {name}"

    gate_cols = [slice(g * HP, g * HP + H) for g in range(4)]

    w_ih = pad_gates(p["w_ih"], DP)
    w_hh = pad_gates(p["w_hh"], HP)
    b_l = pad_gates(p["b_lstm"], 1)
    w_fc = pad2(p["w_fc"], HP, FCP)
    b_fc = pad2(p["b_fc"], 1, FCP)
    w1 = pad2(p["w1"], FCP, 512)
    w4 = pad2(p["w4"], 128, APAD)
    b4 = pad2(p["b4"], 1, APAD)

    assert_pad_zero("w_ih", w_ih, [(slice(0, state_dim), c) for c in gate_cols])
    assert_pad_zero("w_hh", w_hh, [(slice(0, H), c) for c in gate_cols])
    assert_pad_zero("b_lstm", b_l, [(slice(0, 1), c) for c in gate_cols])
    assert_pad_zero("w_fc", w_fc, [(slice(0, H), slice(0, FC))])
    assert_pad_zero("b_fc", b_fc, [(slice(0, 1), slice(0, FC))])
    assert_pad_zero("w1", w1, [(slice(0, FC), slice(0, 512))])
    assert_pad_zero("w4", w4, [(slice(0, 128), slice(0, p["w4"].shape[1]))])
    assert_pad_zero("b4", b4, [(slice(0, 1), slice(0, p["b4"].shape[1]))])

    bf16 = jnp.bfloat16
    return {
        "w_ih": w_ih.astype(bf16), "w_hh": w_hh.astype(bf16), "b_lstm": b_l,
        "w_fc": w_fc.astype(bf16), "b_fc": b_fc,
        "w1": w1.astype(bf16), "b1": p["b1"],
        "w2": p["w2"].astype(bf16), "b2": p["b2"],
        "w3": p["w3"].astype(bf16), "b3": p["b3"],
        "w4": w4.astype(bf16), "b4": b4,
    }


# ---------------------------------------------------------------------------
# Pure-JAX reference (uses the unpadded logical f32 parameters).
# ---------------------------------------------------------------------------
def reference_forward(state_btd, p):
    x_tbd = jnp.transpose(state_btd, (1, 0, 2))

    def step(carry, x_t):
        h, c = carry
        gates = x_t @ p["w_ih"] + h @ p["w_hh"] + p["b_lstm"]
        i = jax.nn.sigmoid(gates[:, 0 * H:1 * H])
        f = jax.nn.sigmoid(gates[:, 1 * H:2 * H])
        g = jnp.tanh(gates[:, 2 * H:3 * H])
        o = jax.nn.sigmoid(gates[:, 3 * H:4 * H])
        c = f * c + i * g
        h = o * jnp.tanh(c)
        return (h, c), h

    B = state_btd.shape[0]
    init = (jnp.zeros((B, H), jnp.float32), jnp.zeros((B, H), jnp.float32))
    _, hs = jax.lax.scan(step, init, x_tbd)                     # (T, B, H)
    x = hs @ p["w_fc"] + p["b_fc"]
    x = jax.nn.relu(x @ p["w1"] + p["b1"])
    x = jax.nn.relu(x @ p["w2"] + p["b2"])
    x = jax.nn.relu(x @ p["w3"] + p["b3"])
    x = jnp.tanh(x @ p["w4"] + p["b4"])
    return jnp.transpose(x, (1, 0, 2))


if __name__ == "__main__":
    B, T, state_dim, action_dim = 2, 8, 16, 8

    key = jax.random.PRNGKey(0)
    k_param, k_state = jax.random.split(key)
    params = init_params(k_param, state_dim, action_dim)
    padded = pad_params(params, state_dim)
    state = jax.random.normal(k_state, (B, T, state_dim), jnp.float32)

    fwd = jax.jit(actor_forward, static_argnums=(2,))
    out = jax.block_until_ready(fwd(state, padded, action_dim))

    ref = reference_forward(state, params)
    assert out.shape == (B, T, action_dim)
    err = float(jnp.max(jnp.abs(out - ref)))
    assert err < 1e-2, f"mismatch vs pure-JAX reference: {err}"

    print("KERNEL_OK")
</pallas_src>

<mosaic_0001>
module attributes {stable_mosaic.version = 11 : i64} {
  func.func @_actor_kernel(%arg0: i32, %arg1: memref<64x16xf32, #tpu.memory_space<vmem>>, %arg2: memref<16x1024xbf16, #tpu.memory_space<vmem>>, %arg3: memref<256x1024xbf16, #tpu.memory_space<vmem>>, %arg4: memref<1x1024xf32, #tpu.memory_space<vmem>>, %arg5: memref<256x256xbf16, #tpu.memory_space<vmem>>, %arg6: memref<1x256xf32, #tpu.memory_space<vmem>>, %arg7: memref<1x512xf32, #tpu.memory_space<vmem>>, %arg8: memref<1x256xf32, #tpu.memory_space<vmem>>, %arg9: memref<1x128xf32, #tpu.memory_space<vmem>>, %arg10: memref<1x128xf32, #tpu.memory_space<vmem>>, %arg11: memref<256x512xbf16, #tpu.memory_space<any>>, %arg12: memref<512x256xbf16, #tpu.memory_space<any>>, %arg13: memref<256x128xbf16, #tpu.memory_space<any>>, %arg14: memref<128x128xbf16, #tpu.memory_space<any>>, %arg15: memref<64x128xf32, #tpu.memory_space<vmem>>, %arg16: memref<64x1024xf32, #tpu.memory_space<vmem>>, %arg17: memref<64x256xf32, #tpu.memory_space<vmem>>, %arg18: memref<256x512xbf16, #tpu.memory_space<vmem>>, %arg19: memref<512x256xbf16, #tpu.memory_space<vmem>>, %arg20: memref<256x128xbf16, #tpu.memory_space<vmem>>, %arg21: memref<128x128xbf16, #tpu.memory_space<vmem>>, %arg22: memref<4x!tpu.dma_semaphore, #tpu.memory_space<semaphore_mem>>) attributes {dimension_semantics = [#tpu.dimension_semantics<arbitrary>], iteration_bounds = array<i64: 1>, scalar_prefetch = 0 : i64, scratch_operands = 7 : i64, tpu.core_type = #tpu.core_type<tc>, window_params = [{pipeline_mode = #tpu.pipeline_mode<synchronous>, transform_indices = @transform_0, window_bounds = array<i64: 64, 16>}, {pipeline_mode = #tpu.pipeline_mode<synchronous>, transform_indices = @transform_1, window_bounds = array<i64: 16, 1024>}, {pipeline_mode = #tpu.pipeline_mode<synchronous>, transform_indices = @transform_2, window_bounds = array<i64: 256, 1024>}, {pipeline_mode = #tpu.pipeline_mode<synchronous>, transform_indices = @transform_3, window_bounds = array<i64: 1, 1024>}, {pipeline_mode = #tpu.pipeline_mode<synchronous>, transform_indices = @transform_4, window_bounds = array<i64: 256, 256>}, {pipeline_mode = #tpu.pipeline_mode<synchronous>, transform_indices = @transform_5, window_bounds = array<i64: 1, 256>}, {pipeline_mode = #tpu.pipeline_mode<synchronous>, transform_indices = @transform_6, window_bounds = array<i64: 1, 512>}, {pipeline_mode = #tpu.pipeline_mode<synchronous>, transform_indices = @transform_7, window_bounds = array<i64: 1, 256>}, {pipeline_mode = #tpu.pipeline_mode<synchronous>, transform_indices = @transform_8, window_bounds = array<i64: 1, 128>}, {pipeline_mode = #tpu.pipeline_mode<synchronous>, transform_indices = @transform_9, window_bounds = array<i64: 1, 128>}, {}, {}, {}, {}, {pipeline_mode = #tpu.pipeline_mode<synchronous>, transform_indices = @transform_14, window_bounds = array<i64: 64, 128>}]} {
    %c0_i32 = arith.constant 0 : i32
    %0 = tpu.memref_slice %arg22[%c0_i32] : memref<4x!tpu.dma_semaphore, #tpu.memory_space<semaphore_mem>> -> memref<1x!tpu.dma_semaphore, #tpu.memory_space<semaphore_mem>>
    %1 = tpu.memref_squeeze %0 : memref<1x!tpu.dma_semaphore, #tpu.memory_space<semaphore_mem>> -> memref<!tpu.dma_semaphore, #tpu.memory_space<semaphore_mem>>
    tpu.enqueue_dma source(%arg11 : memref<256x512xbf16, #tpu.memory_space<any>>) target(%arg18 : memref<256x512xbf16, #tpu.memory_space<vmem>>) target_semaphore(%1 : memref<!tpu.dma_semaphore, #tpu.memory_space<semaphore_mem>>)
    %c1_i32 = arith.constant 1 : i32
    %2 = tpu.memref_slice %arg22[%c1_i32] : memref<4x!tpu.dma_semaphore, #tpu.memory_space<semaphore_mem>> -> memref<1x!tpu.dma_semaphore, #tpu.memory_space<semaphore_mem>>
    %3 = tpu.memref_squeeze %2 : memref<1x!tpu.dma_semaphore, #tpu.memory_space<semaphore_mem>> -> memref<!tpu.dma_semaphore, #tpu.memory_space<semaphore_mem>>
    tpu.enqueue_dma source(%arg12 : memref<512x256xbf16, #tpu.memory_space<any>>) target(%arg19 : memref<512x256xbf16, #tpu.memory_space<vmem>>) target_semaphore(%3 : memref<!tpu.dma_semaphore, #tpu.memory_space<semaphore_mem>>)
    %c2_i32 = arith.constant 2 : i32
    %4 = tpu.memref_slice %arg22[%c2_i32] : memref<4x!tpu.dma_semaphore, #tpu.memory_space<semaphore_mem>> -> memref<1x!tpu.dma_semaphore, #tpu.memory_space<semaphore_mem>>
    %5 = tpu.memref_squeeze %4 : memref<1x!tpu.dma_semaphore, #tpu.memory_space<semaphore_mem>> -> memref<!tpu.dma_semaphore, #tpu.memory_space<semaphore_mem>>
    tpu.enqueue_dma source(%arg13 : memref<256x128xbf16, #tpu.memory_space<any>>) target(%arg20 : memref<256x128xbf16, #tpu.memory_space<vmem>>) target_semaphore(%5 : memref<!tpu.dma_semaphore, #tpu.memory_space<semaphore_mem>>)
    %c3_i32 = arith.constant 3 : i32
    %6 = tpu.memref_slice %arg22[%c3_i32] : memref<4x!tpu.dma_semaphore, #tpu.memory_space<semaphore_mem>> -> memref<1x!tpu.dma_semaphore, #tpu.memory_space<semaphore_mem>>
    %7 = tpu.memref_squeeze %6 : memref<1x!tpu.dma_semaphore, #tpu.memory_space<semaphore_mem>> -> memref<!tpu.dma_semaphore, #tpu.memory_space<semaphore_mem>>
    tpu.enqueue_dma source(%arg14 : memref<128x128xbf16, #tpu.memory_space<any>>) target(%arg21 : memref<128x128xbf16, #tpu.memory_space<vmem>>) target_semaphore(%7 : memref<!tpu.dma_semaphore, #tpu.memory_space<semaphore_mem>>)
    %c0 = arith.constant 0 : index
    %c0_0 = arith.constant 0 : index
    %8 = vector.load %arg1[%c0, %c0_0] : memref<64x16xf32, #tpu.memory_space<vmem>>, vector<64x16xf32>
    %9 = arith.truncf %8 : vector<64x16xf32> to vector<64x16xbf16>
    %c0_1 = arith.constant 0 : index
    %c0_2 = arith.constant 0 : index
    %10 = vector.load %arg2[%c0_1, %c0_2] : memref<16x1024xbf16, #tpu.memory_space<vmem>>, vector<16x1024xbf16>
    %cst = arith.constant dense<0.000000e+00> : vector<64x1024xf32>
    %11 = tpu.matmul %9, %10, %cst {dimension_numbers = #tpu.dot_dimension_numbers<[1], [0], [0], [1], [0, 0, 1, 1], [], []>} : vector<64x16xbf16>, vector<16x1024xbf16>, vector<64x1024xf32> -> vector<64x1024xf32>
    %c0_3 = arith.constant 0 : index
    %c0_4 = arith.constant 0 : index
    %12 = vector.load %arg4[%c0_3, %c0_4] : memref<1x1024xf32, #tpu.memory_space<vmem>>, vector<1x1024xf32>
    %13 = vector.broadcast %12 : vector<1x1024xf32> to vector<64x1024xf32>
    %14 = arith.addf %11, %13 : vector<64x1024xf32>
    %c0_5 = arith.constant 0 : index
    %c0_6 = arith.constant 0 : index
    %15 = vector.load %arg16[%c0_5, %c0_6] : memref<64x1024xf32, #tpu.memory_space<vmem>>, vector<64x1024xf32>
    tpu.vector_store %arg16[%c0_5, %c0_6], %14 {strides = array<i32>} : memref<64x1024xf32, #tpu.memory_space<vmem>>, vector<64x1024xf32>,
    %c0_7 = arith.constant 0 : index
    %c0_8 = arith.constant 0 : index
    %16 = vector.load %arg3[%c0_7, %c0_8] : memref<256x1024xbf16, #tpu.memory_space<vmem>>, vector<256x1024xbf16>
    %c0_9 = arith.constant 0 : index
    %c0_10 = arith.constant 0 : index
    %17 = vector.load %arg5[%c0_9, %c0_10] : memref<256x256xbf16, #tpu.memory_space<vmem>>, vector<256x256xbf16>
    %c0_11 = arith.constant 0 : index
    %c0_12 = arith.constant 0 : index
    %18 = vector.load %arg6[%c0_11, %c0_12] : memref<1x256xf32, #tpu.memory_space<vmem>>, vector<1x256xf32>
    %cst_13 = arith.constant 0.000000e+00 : f32
    %19 = vector.broadcast %cst_13 : f32 to vector<8x256xf32>
    %cst_14 = arith.constant 0.000000e+00 : f32
    %20 = vector.broadcast %cst_14 : f32 to vector<8x256xf32>
    %c0_i32_15 = arith.constant 0 : i32
    %c8_i32 = arith.constant 8 : i32
    %21 = arith.muli %c0_i32_15, %c8_i32 : i32
    %22 = tpu.assume_multiple %21, 8 : i32
    %23 = arith.index_cast %22 : i32 to index
    %c0_16 = arith.constant 0 : index
    %24 = vector.load %arg16[%23, %c0_16] : memref<64x1024xf32, #tpu.memory_space<vmem>>, vector<8x1024xf32>
    %25 = arith.truncf %19 : vector<8x256xf32> to vector<8x256xbf16>
    %cst_17 = arith.constant dense<0.000000e+00> : vector<8x1024xf32>
    %26 = tpu.matmul %25, %16, %cst_17 {dimension_numbers = #tpu.dot_dimension_numbers<[1], [0], [0], [1], [0, 0, 1, 1], [], []>} : vector<8x256xbf16>, vector<256x1024xbf16>, vector<8x1024xf32> -> vector<8x1024xf32>
    %27 = arith.addf %24, %26 : vector<8x1024xf32>
    %28 = vector.extract_strided_slice %27 {offsets = [0, 0], sizes = [8, 512], strides = [1, 1]} : vector<8x1024xf32> to vector<8x512xf32>
    %29 = arith.negf %28 : vector<8x512xf32>
    %30 = math.exp %29 : vector<8x512xf32>
    %cst_18 = arith.constant 1.000000e+00 : f32
    %31 = vector.broadcast %cst_18 : f32 to vector<8x512xf32>
    %32 = arith.addf %31, %30 : vector<8x512xf32>
    %33 = arith.divf %31, %32 : vector<8x512xf32>
    %34 = vector.extract_strided_slice %27 {offsets = [0, 512], sizes = [8, 256], strides = [1, 1]} : vector<8x1024xf32> to vector<8x256xf32>
    %35 = math.tanh %34 : vector<8x256xf32>
    %36 = vector.extract_strided_slice %27 {offsets = [0, 768], sizes = [8, 256], strides = [1, 1]} : vector<8x1024xf32> to vector<8x256xf32>
    %37 = arith.negf %36 : vector<8x256xf32>
    %38 = math.exp %37 : vector<8x256xf32>
    %cst_19 = arith.constant 1.000000e+00 : f32
    %39 = vector.broadcast %cst_19 : f32 to vector<8x256xf32>
    %40 = arith.addf %39, %38 : vector<8x256xf32>
    %41 = arith.divf %39, %40 : vector<8x256xf32>
    %42 = vector.extract_strided_slice %33 {offsets = [0, 256], sizes = [8, 256], strides = [1, 1]} : vector<8x512xf32> to vector<8x256xf32>
    %43 = arith.mulf %42, %20 : vector<8x256xf32>
    %44 = vector.extract_strided_slice %33 {offsets = [0, 0], sizes = [8, 256], strides = [1, 1]} : vector<8x512xf32> to vector<8x256xf32>
    %45 = arith.mulf %44, %35 : vector<8x256xf32>
    %46 = arith.addf %43, %45 : vector<8x256xf32>
    %47 = math.tanh %46 : vector<8x256xf32>
    %48 = arith.mulf %41, %47 : vector<8x256xf32>
    %49 = arith.truncf %48 : vector<8x256xf32> to vector<8x256xbf16>
    %cst_20 = arith.constant dense<0.000000e+00> : vector<8x256xf32>
    %50 = tpu.matmul %49, %17, %cst_20 {dimension_numbers = #tpu.dot_dimension_numbers<[1], [0], [0], [1], [0, 0, 1, 1], [], []>} : vector<8x256xbf16>, vector<256x256xbf16>, vector<8x256xf32> -> vector<8x256xf32>
    %51 = vector.broadcast %18 : vector<1x256xf32> to vector<8x256xf32>
    %52 = arith.addf %50, %51 : vector<8x256xf32>
    %53 = arith.index_cast %22 : i32 to index
    %c0_21 = arith.constant 0 : index
    %54 = vector.load %arg17[%53, %c0_21] : memref<64x256xf32, #tpu.memory_space<vmem>>, vector<8x256xf32>
    tpu.vector_store %arg17[%53, %c0_21], %52 {strides = array<i32>} : memref<64x256xf32, #tpu.memory_space<vmem>>, vector<8x256xf32>,
    %c1_i32_22 = arith.constant 1 : i32
    %c8_i32_23 = arith.constant 8 : i32
    %55 = arith.muli %c1_i32_22, %c8_i32_23 : i32
    %56 = tpu.assume_multiple %55, 8 : i32
    %57 = arith.index_cast %56 : i32 to index
    %c0_24 = arith.constant 0 : index
    %58 = vector.load %arg16[%57, %c0_24] : memref<64x1024xf32, #tpu.memory_space<vmem>>, vector<8x1024xf32>
    %59 = arith.truncf %48 : vector<8x256xf32> to vector<8x256xbf16>
    %cst_25 = arith.constant dense<0.000000e+00> : vector<8x1024xf32>
    %60 = tpu.matmul %59, %16, %cst_25 {dimension_numbers = #tpu.dot_dimension_numbers<[1], [0], [0], [1], [0, 0, 1, 1], [], []>} : vector<8x256xbf16>, vector<256x1024xbf16>, vector<8x1024xf32> -> vector<8x1024xf32>
    %61 = arith.addf %58, %60 : vector<8x1024xf32>
    %62 = vector.extract_strided_slice %61 {offsets = [0, 0], sizes = [8, 512], strides = [1, 1]} : vector<8x1024xf32> to vector<8x512xf32>
    %63 = arith.negf %62 : vector<8x512xf32>
    %64 = math.exp %63 : vector<8x512xf32>
    %cst_26 = arith.constant 1.000000e+00 : f32
    %65 = vector.broadcast %cst_26 : f32 to vector<8x512xf32>
    %66 = arith.addf %65, %64 : vector<8x512xf32>
    %67 = arith.divf %65, %66 : vector<8x512xf32>
    %68 = vector.extract_strided_slice %61 {offsets = [0, 512], sizes = [8, 256], strides = [1, 1]} : vector<8x1024xf32> to vector<8x256xf32>
    %69 = math.tanh %68 : vector<8x256xf32>
    %70 = vector.extract_strided_slice %61 {offsets = [0, 768], sizes = [8, 256], strides = [1, 1]} : vector<8x1024xf32> to vector<8x256xf32>
    %71 = arith.negf %70 : vector<8x256xf32>
    %72 = math.exp %71 : vector<8x256xf32>
    %cst_27 = arith.constant 1.000000e+00 : f32
    %73 = vector.broadcast %cst_27 : f32 to vector<8x256xf32>
    %74 = arith.addf %73, %72 : vector<8x256xf32>
    %75 = arith.divf %73, %74 : vector<8x256xf32>
    %76 = vector.extract_strided_slice %67 {offsets = [0, 256], sizes = [8, 256], strides = [1, 1]} : vector<8x512xf32> to vector<8x256xf32>
    %77 = arith.mulf %76, %46 : vector<8x256xf32>
    %78 = vector.extract_strided_slice %67 {offsets = [0, 0], sizes = [8, 256], strides = [1, 1]} : vector<8x512xf32> to vector<8x256xf32>
    %79 = arith.mulf %78, %69 : vector<8x256xf32>
    %80 = arith.addf %77, %79 : vector<8x256xf32>
    %81 = math.tanh %80 : vector<8x256xf32>
    %82 = arith.mulf %75, %81 : vector<8x256xf32>
    %83 = arith.truncf %82 : vector<8x256xf32> to vector<8x256xbf16>
    %cst_28 = arith.constant dense<0.000000e+00> : vector<8x256xf32>
    %84 = tpu.matmul %83, %17, %cst_28 {dimension_numbers = #tpu.dot_dimension_numbers<[1], [0], [0], [1], [0, 0, 1, 1], [], []>} : vector<8x256xbf16>, vector<256x256xbf16>, vector<8x256xf32> -> vector<8x256xf32>
    %85 = vector.broadcast %18 : vector<1x256xf32> to vector<8x256xf32>
    %86 = arith.addf %84, %85 : vector<8x256xf32>
    %87 = arith.index_cast %56 : i32 to index
    %c0_29 = arith.constant 0 : index
    %88 = vector.load %arg17[%87, %c0_29] : memref<64x256xf32, #tpu.memory_space<vmem>>, vector<8x256xf32>
    tpu.vector_store %arg17[%87, %c0_29], %86 {strides = array<i32>} : memref<64x256xf32, #tpu.memory_space<vmem>>, vector<8x256xf32>,
    %c2_i32_30 = arith.constant 2 : i32
    %c8_i32_31 = arith.constant 8 : i32
    %89 = arith.muli %c2_i32_30, %c8_i32_31 : i32
    %90 = tpu.assume_multiple %89, 8 : i32
    %91 = arith.index_cast %90 : i32 to index
    %c0_32 = arith.constant 0 : index
    %92 = vector.load %arg16[%91, %c0_32] : memref<64x1024xf32, #tpu.memory_space<vmem>>, vector<8x1024xf32>
    %93 = arith.truncf %82 : vector<8x256xf32> to vector<8x256xbf16>
    %cst_33 = arith.constant dense<0.000000e+00> : vector<8x1024xf32>
    %94 = tpu.matmul %93, %16, %cst_33 {dimension_numbers = #tpu.dot_dimension_numbers<[1], [0], [0], [1], [0, 0, 1, 1], [], []>} : vector<8x256xbf16>, vector<256x1024xbf16>, vector<8x1024xf32> -> vector<8x1024xf32>
    %95 = arith.addf %92, %94 : vector<8x1024xf32>
    %96 = vector.extract_strided_slice %95 {offsets = [0, 0], sizes = [8, 512], strides = [1, 1]} : vector<8x1024xf32> to vector<8x512xf32>
    %97 = arith.negf %96 : vector<8x512xf32>
    %98 = math.exp %97 : vector<8x512xf32>
    %cst_34 = arith.constant 1.000000e+00 : f32
    %99 = vector.broadcast %cst_34 : f32 to vector<8x512xf32>
    %100 = arith.addf %99, %98 : vector<8x512xf32>
    %101 = arith.divf %99, %100 : vector<8x512xf32>
    %102 = vector.extract_strided_slice %95 {offsets = [0, 512], sizes = [8, 256], strides = [1, 1]} : vector<8x1024xf32> to vector<8x256xf32>
    %103 = math.tanh %102 : vector<8x256xf32>
    %104 = vector.extract_strided_slice %95 {offsets = [0, 768], sizes = [8, 256], strides = [1, 1]} : vector<8x1024xf32> to vector<8x256xf32>
    %105 = arith.negf %104 : vector<8x256xf32>
    %106 = math.exp %105 : vector<8x256xf32>
    %cst_35 = arith.constant 1.000000e+00 : f32
    %107 = vector.broadcast %cst_35 : f32 to vector<8x256xf32>
    %108 = arith.addf %107, %106 : vector<8x256xf32>
    %109 = arith.divf %107, %108 : vector<8x256xf32>
    %110 = vector.extract_strided_slice %101 {offsets = [0, 256], sizes = [8, 256], strides = [1, 1]} : vector<8x512xf32> to vector<8x256xf32>
    %111 = arith.mulf %110, %80 : vector<8x256xf32>
    %112 = vector.extract_strided_slice %101 {offsets = [0, 0], sizes = [8, 256], strides = [1, 1]} : vector<8x512xf32> to vector<8x256xf32>
    %113 = arith.mulf %112, %103 : vector<8x256xf32>
    %114 = arith.addf %111, %113 : vector<8x256xf32>
    %115 = math.tanh %114 : vector<8x256xf32>
    %116 = arith.mulf %109, %115 : vector<8x256xf32>
    %117 = arith.truncf %116 : vector<8x256xf32> to vector<8x256xbf16>
    %cst_36 = arith.constant dense<0.000000e+00> : vector<8x256xf32>
    %118 = tpu.matmul %117, %17, %cst_36 {dimension_numbers = #tpu.dot_dimension_numbers<[1], [0], [0], [1], [0, 0, 1, 1], [], []>} : vector<8x256xbf16>, vector<256x256xbf16>, vector<8x256xf32> -> vector<8x256xf32>
    %119 = vector.broadcast %18 : vector<1x256xf32> to vector<8x256xf32>
    %120 = arith.addf %118, %119 : vector<8x256xf32>
    %121 = arith.index_cast %90 : i32 to index
    %c0_37 = arith.constant 0 : index
    %122 = vector.load %arg17[%121, %c0_37] : memref<64x256xf32, #tpu.memory_space<vmem>>, vector<8x256xf32>
    tpu.vector_store %arg17[%121, %c0_37], %120 {strides = array<i32>} : memref<64x256xf32, #tpu.memory_space<vmem>>, vector<8x256xf32>,
    %c3_i32_38 = arith.constant 3 : i32
    %c8_i32_39 = arith.constant 8 : i32
    %123 = arith.muli %c3_i32_38, %c8_i32_39 : i32
    %124 = tpu.assume_multiple %123, 8 : i32
    %125 = arith.index_cast %124 : i32 to index
    %c0_40 = arith.constant 0 : index
    %126 = vector.load %arg16[%125, %c0_40] : memref<64x1024xf32, #tpu.memory_space<vmem>>, vector<8x1024xf32>
    %127 = arith.truncf %116 : vector<8x256xf32> to vector<8x256xbf16>
    %cst_41 = arith.constant dense<0.000000e+00> : vector<8x1024xf32>
    %128 = tpu.matmul %127, %16, %cst_41 {dimension_numbers = #tpu.dot_dimension_numbers<[1], [0], [0], [1], [0, 0, 1, 1], [], []>} : vector<8x256xbf16>, vector<256x1024xbf16>, vector<8x1024xf32> -> vector<8x1024xf32>
    %129 = arith.addf %126, %128 : vector<8x1024xf32>
    %130 = vector.extract_strided_slice %129 {offsets = [0, 0], sizes = [8, 512], strides = [1, 1]} : vector<8x1024xf32> to vector<8x512xf32>
    %131 = arith.negf %130 : vector<8x512xf32>
    %132 = math.exp %131 : vector<8x512xf32>
    %cst_42 = arith.constant 1.000000e+00 : f32
    %133 = vector.broadcast %cst_42 : f32 to vector<8x512xf32>
    %134 = arith.addf %133, %132 : vector<8x512xf32>
    %135 = arith.divf %133, %134 : vector<8x512xf32>
    %136 = vector.extract_strided_slice %129 {offsets = [0, 512], sizes = [8, 256], strides = [1, 1]} : vector<8x1024xf32> to vector<8x256xf32>
    %137 = math.tanh %136 : vector<8x256xf32>
    %138 = vector.extract_strided_slice %129 {offsets = [0, 768], sizes = [8, 256], strides = [1, 1]} : vector<8x1024xf32> to vector<8x256xf32>
    %139 = arith.negf %138 : vector<8x256xf32>
    %140 = math.exp %139 : vector<8x256xf32>
    %cst_43 = arith.constant 1.000000e+00 : f32
    %141 = vector.broadcast %cst_43 : f32 to vector<8x256xf32>
    %142 = arith.addf %141, %140 : vector<8x256xf32>
    %143 = arith.divf %141, %142 : vector<8x256xf32>
    %144 = vector.extract_strided_slice %135 {offsets = [0, 256], sizes = [8, 256], strides = [1, 1]} : vector<8x512xf32> to vector<8x256xf32>
    %145 = arith.mulf %144, %114 : vector<8x256xf32>
    %146 = vector.extract_strided_slice %135 {offsets = [0, 0], sizes = [8, 256], strides = [1, 1]} : vector<8x512xf32> to vector<8x256xf32>
    %147 = arith.mulf %146, %137 : vector<8x256xf32>
    %148 = arith.addf %145, %147 : vector<8x256xf32>
    %149 = math.tanh %148 : vector<8x256xf32>
    %150 = arith.mulf %143, %149 : vector<8x256xf32>
    %151 = arith.truncf %150 : vector<8x256xf32> to vector<8x256xbf16>
    %cst_44 = arith.constant dense<0.000000e+00> : vector<8x256xf32>
    %152 = tpu.matmul %151, %17, %cst_44 {dimension_numbers = #tpu.dot_dimension_numbers<[1], [0], [0], [1], [0, 0, 1, 1], [], []>} : vector<8x256xbf16>, vector<256x256xbf16>, vector<8x256xf32> -> vector<8x256xf32>
    %153 = vector.broadcast %18 : vector<1x256xf32> to vector<8x256xf32>
    %154 = arith.addf %152, %153 : vector<8x256xf32>
    %155 = arith.index_cast %124 : i32 to index
    %c0_45 = arith.constant 0 : index
    %156 = vector.load %arg17[%155, %c0_45] : memref<64x256xf32, #tpu.memory_space<vmem>>, vector<8x256xf32>
    tpu.vector_store %arg17[%155, %c0_45], %154 {strides = array<i32>} : memref<64x256xf32, #tpu.memory_space<vmem>>, vector<8x256xf32>,
    %c4_i32 = arith.constant 4 : i32
    %c8_i32_46 = arith.constant 8 : i32
    %157 = arith.muli %c4_i32, %c8_i32_46 : i32
    %158 = tpu.assume_multiple %157, 8 : i32
    %159 = arith.index_cast %158 : i32 to index
    %c0_47 = arith.constant 0 : index
    %160 = vector.load %arg16[%159, %c0_47] : memref<64x1024xf32, #tpu.memory_space<vmem>>, vector<8x1024xf32>
    %161 = arith.truncf %150 : vector<8x256xf32> to vector<8x256xbf16>
    %cst_48 = arith.constant dense<0.000000e+00> : vector<8x1024xf32>
    %162 = tpu.matmul %161, %16, %cst_48 {dimension_numbers = #tpu.dot_dimension_numbers<[1], [0], [0], [1], [0, 0, 1, 1], [], []>} : vector<8x256xbf16>, vector<256x1024xbf16>, vector<8x1024xf32> -> vector<8x1024xf32>
    %163 = arith.addf %160, %162 : vector<8x1024xf32>
    %164 = vector.extract_strided_slice %163 {offsets = [0, 0], sizes = [8, 512], strides = [1, 1]} : vector<8x1024xf32> to vector<8x512xf32>
    %165 = arith.negf %164 : vector<8x512xf32>
    %166 = math.exp %165 : vector<8x512xf32>
    %cst_49 = arith.constant 1.000000e+00 : f32
    %167 = vector.broadcast %cst_49 : f32 to vector<8x512xf32>
    %168 = arith.addf %167, %166 : vector<8x512xf32>
    %169 = arith.divf %167, %168 : vector<8x512xf32>
    %170 = vector.extract_strided_slice %163 {offsets = [0, 512], sizes = [8, 256], strides = [1, 1]} : vector<8x1024xf32> to vector<8x256xf32>
    %171 = math.tanh %170 : vector<8x256xf32>
    %172 = vector.extract_strided_slice %163 {offsets = [0, 768], sizes = [8, 256], strides = [1, 1]} : vector<8x1024xf32> to vector<8x256xf32>
    %173 = arith.negf %172 : vector<8x256xf32>
    %174 = math.exp %173 : vector<8x256xf32>
    %cst_50 = arith.constant 1.000000e+00 : f32
    %175 = vector.broadcast %cst_50 : f32 to vector<8x256xf32>
    %176 = arith.addf %175, %174 : vector<8x256xf32>
    %177 = arith.divf %175, %176 : vector<8x256xf32>
    %178 = vector.extract_strided_slice %169 {offsets = [0, 256], sizes = [8, 256], strides = [1, 1]} : vector<8x512xf32> to vector<8x256xf32>
    %179 = arith.mulf %178, %148 : vector<8x256xf32>
    %180 = vector.extract_strided_slice %169 {offsets = [0, 0], sizes = [8, 256], strides = [1, 1]} : vector<8x512xf32> to vector<8x256xf32>
    %181 = arith.mulf %180, %171 : vector<8x256xf32>
    %182 = arith.addf %179, %181 : vector<8x256xf32>
    %183 = math.tanh %182 : vector<8x256xf32>
    %184 = arith.mulf %177, %183 : vector<8x256xf32>
    %185 = arith.truncf %184 : vector<8x256xf32> to vector<8x256xbf16>
    %cst_51 = arith.constant dense<0.000000e+00> : vector<8x256xf32>
    %186 = tpu.matmul %185, %17, %cst_51 {dimension_numbers = #tpu.dot_dimension_numbers<[1], [0], [0], [1], [0, 0, 1, 1], [], []>} : vector<8x256xbf16>, vector<256x256xbf16>, vector<8x256xf32> -> vector<8x256xf32>
    %187 = vector.broadcast %18 : vector<1x256xf32> to vector<8x256xf32>
    %188 = arith.addf %186, %187 : vector<8x256xf32>
    %189 = arith.index_cast %158 : i32 to index
    %c0_52 = arith.constant 0 : index
    %190 = vector.load %arg17[%189, %c0_52] : memref<64x256xf32, #tpu.memory_space<vmem>>, vector<8x256xf32>
    tpu.vector_store %arg17[%189, %c0_52], %188 {strides = array<i32>} : memref<64x256xf32, #tpu.memory_space<vmem>>, vector<8x256xf32>,
    %c5_i32 = arith.constant 5 : i32
    %c8_i32_53 = arith.constant 8 : i32
    %191 = arith.muli %c5_i32, %c8_i32_53 : i32
    %192 = tpu.assume_multiple %191, 8 : i32
    %193 = arith.index_cast %192 : i32 to index
    %c0_54 = arith.constant 0 : index
    %194 = vector.load %arg16[%193, %c0_54] : memref<64x1024xf32, #tpu.memory_space<vmem>>, vector<8x1024xf32>
    %195 = arith.truncf %184 : vector<8x256xf32> to vector<8x256xbf16>
    %cst_55 = arith.constant dense<0.000000e+00> : vector<8x1024xf32>
    %196 = tpu.matmul %195, %16, %cst_55 {dimension_numbers = #tpu.dot_dimension_numbers<[1], [0], [0], [1], [0, 0, 1, 1], [], []>} : vector<8x256xbf16>, vector<256x1024xbf16>, vector<8x1024xf32> -> vector<8x1024xf32>
    %197 = arith.addf %194, %196 : vector<8x1024xf32>
    %198 = vector.extract_strided_slice %197 {offsets = [0, 0], sizes = [8, 512], strides = [1, 1]} : vector<8x1024xf32> to vector<8x512xf32>
    %199 = arith.negf %198 : vector<8x512xf32>
    %200 = math.exp %199 : vector<8x512xf32>
    %cst_56 = arith.constant 1.000000e+00 : f32
    %201 = vector.broadcast %cst_56 : f32 to vector<8x512xf32>
    %202 = arith.addf %201, %200 : vector<8x512xf32>
    %203 = arith.divf %201, %202 : vector<8x512xf32>
    %204 = vector.extract_strided_slice %197 {offsets = [0, 512], sizes = [8, 256], strides = [1, 1]} : vector<8x1024xf32> to vector<8x256xf32>
    %205 = math.tanh %204 : vector<8x256xf32>
    %206 = vector.extract_strided_slice %197 {offsets = [0, 768], sizes = [8, 256], strides = [1, 1]} : vector<8x1024xf32> to vector<8x256xf32>
    %207 = arith.negf %206 : vector<8x256xf32>
    %208 = math.exp %207 : vector<8x256xf32>
    %cst_57 = arith.constant 1.000000e+00 : f32
    %209 = vector.broadcast %cst_57 : f32 to vector<8x256xf32>
    %210 = arith.addf %209, %208 : vector<8x256xf32>
    %211 = arith.divf %209, %210 : vector<8x256xf32>
    %212 = vector.extract_strided_slice %203 {offsets = [0, 256], sizes = [8, 256], strides = [1, 1]} : vector<8x512xf32> to vector<8x256xf32>
    %213 = arith.mulf %212, %182 : vector<8x256xf32>
    %214 = vector.extract_strided_slice %203 {offsets = [0, 0], sizes = [8, 256], strides = [1, 1]} : vector<8x512xf32> to vector<8x256xf32>
    %215 = arith.mulf %214, %205 : vector<8x256xf32>
    %216 = arith.addf %213, %215 : vector<8x256xf32>
    %217 = math.tanh %216 : vector<8x256xf32>
    %218 = arith.mulf %211, %217 : vector<8x256xf32>
    %219 = arith.truncf %218 : vector<8x256xf32> to vector<8x256xbf16>
    %cst_58 = arith.constant dense<0.000000e+00> : vector<8x256xf32>
    %220 = tpu.matmul %219, %17, %cst_58 {dimension_numbers = #tpu.dot_dimension_numbers<[1], [0], [0], [1], [0, 0, 1, 1], [], []>} : vector<8x256xbf16>, vector<256x256xbf16>, vector<8x256xf32> -> vector<8x256xf32>
    %221 = vector.broadcast %18 : vector<1x256xf32> to vector<8x256xf32>
    %222 = arith.addf %220, %221 : vector<8x256xf32>
    %223 = arith.index_cast %192 : i32 to index
    %c0_59 = arith.constant 0 : index
    %224 = vector.load %arg17[%223, %c0_59] : memref<64x256xf32, #tpu.memory_space<vmem>>, vector<8x256xf32>
    tpu.vector_store %arg17[%223, %c0_59], %222 {strides = array<i32>} : memref<64x256xf32, #tpu.memory_space<vmem>>, vector<8x256xf32>,
    %c6_i32 = arith.constant 6 : i32
    %c8_i32_60 = arith.constant 8 : i32
    %225 = arith.muli %c6_i32, %c8_i32_60 : i32
    %226 = tpu.assume_multiple %225, 8 : i32
    %227 = arith.index_cast %226 : i32 to index
    %c0_61 = arith.constant 0 : index
    %228 = vector.load %arg16[%227, %c0_61] : memref<64x1024xf32, #tpu.memory_space<vmem>>, vector<8x1024xf32>
    %229 = arith.truncf %218 : vector<8x256xf32> to vector<8x256xbf16>
    %cst_62 = arith.constant dense<0.000000e+00> : vector<8x1024xf32>
    %230 = tpu.matmul %229, %16, %cst_62 {dimension_numbers = #tpu.dot_dimension_numbers<[1], [0], [0], [1], [0, 0, 1, 1], [], []>} : vector<8x256xbf16>, vector<256x1024xbf16>, vector<8x1024xf32> -> vector<8x1024xf32>
    %231 = arith.addf %228, %230 : vector<8x1024xf32>
    %232 = vector.extract_strided_slice %231 {offsets = [0, 0], sizes = [8, 512], strides = [1, 1]} : vector<8x1024xf32> to vector<8x512xf32>
    %233 = arith.negf %232 : vector<8x512xf32>
    %234 = math.exp %233 : vector<8x512xf32>
    %cst_63 = arith.constant 1.000000e+00 : f32
    %235 = vector.broadcast %cst_63 : f32 to vector<8x512xf32>
    %236 = arith.addf %235, %234 : vector<8x512xf32>
    %237 = arith.divf %235, %236 : vector<8x512xf32>
    %238 = vector.extract_strided_slice %231 {offsets = [0, 512], sizes = [8, 256], strides = [1, 1]} : vector<8x1024xf32> to vector<8x256xf32>
    %239 = math.tanh %238 : vector<8x256xf32>
    %240 = vector.extract_strided_slice %231 {offsets = [0, 768], sizes = [8, 256], strides = [1, 1]} : vector<8x1024xf32> to vector<8x256xf32>
    %241 = arith.negf %240 : vector<8x256xf32>
    %242 = math.exp %241 : vector<8x256xf32>
    %cst_64 = arith.constant 1.000000e+00 : f32
    %243 = vector.broadcast %cst_64 : f32 to vector<8x256xf32>
    %244 = arith.addf %243, %242 : vector<8x256xf32>
    %245 = arith.divf %243, %244 : vector<8x256xf32>
    %246 = vector.extract_strided_slice %237 {offsets = [0, 256], sizes = [8, 256], strides = [1, 1]} : vector<8x512xf32> to vector<8x256xf32>
    %247 = arith.mulf %246, %216 : vector<8x256xf32>
    %248 = vector.extract_strided_slice %237 {offsets = [0, 0], sizes = [8, 256], strides = [1, 1]} : vector<8x512xf32> to vector<8x256xf32>
    %249 = arith.mulf %248, %239 : vector<8x256xf32>
    %250 = arith.addf %247, %249 : vector<8x256xf32>
    %251 = math.tanh %250 : vector<8x256xf32>
    %252 = arith.mulf %245, %251 : vector<8x256xf32>
    %253 = arith.truncf %252 : vector<8x256xf32> to vector<8x256xbf16>
    %cst_65 = arith.constant dense<0.000000e+00> : vector<8x256xf32>
    %254 = tpu.matmul %253, %17, %cst_65 {dimension_numbers = #tpu.dot_dimension_numbers<[1], [0], [0], [1], [0, 0, 1, 1], [], []>} : vector<8x256xbf16>, vector<256x256xbf16>, vector<8x256xf32> -> vector<8x256xf32>
    %255 = vector.broadcast %18 : vector<1x256xf32> to vector<8x256xf32>
    %256 = arith.addf %254, %255 : vector<8x256xf32>
    %257 = arith.index_cast %226 : i32 to index
    %c0_66 = arith.constant 0 : index
    %258 = vector.load %arg17[%257, %c0_66] : memref<64x256xf32, #tpu.memory_space<vmem>>, vector<8x256xf32>
    tpu.vector_store %arg17[%257, %c0_66], %256 {strides = array<i32>} : memref<64x256xf32, #tpu.memory_space<vmem>>, vector<8x256xf32>,
    %c7_i32 = arith.constant 7 : i32
    %c8_i32_67 = arith.constant 8 : i32
    %259 = arith.muli %c7_i32, %c8_i32_67 : i32
    %260 = tpu.assume_multiple %259, 8 : i32
    %261 = arith.index_cast %260 : i32 to index
    %c0_68 = arith.constant 0 : index
    %262 = vector.load %arg16[%261, %c0_68] : memref<64x1024xf32, #tpu.memory_space<vmem>>, vector<8x1024xf32>
    %263 = arith.truncf %252 : vector<8x256xf32> to vector<8x256xbf16>
    %cst_69 = arith.constant dense<0.000000e+00> : vector<8x1024xf32>
    %264 = tpu.matmul %263, %16, %cst_69 {dimension_numbers = #tpu.dot_dimension_numbers<[1], [0], [0], [1], [0, 0, 1, 1], [], []>} : vector<8x256xbf16>, vector<256x1024xbf16>, vector<8x1024xf32> -> vector<8x1024xf32>
    %265 = arith.addf %262, %264 : vector<8x1024xf32>
    %266 = vector.extract_strided_slice %265 {offsets = [0, 0], sizes = [8, 512], strides = [1, 1]} : vector<8x1024xf32> to vector<8x512xf32>
    %267 = arith.negf %266 : vector<8x512xf32>
    %268 = math.exp %267 : vector<8x512xf32>
    %cst_70 = arith.constant 1.000000e+00 : f32
    %269 = vector.broadcast %cst_70 : f32 to vector<8x512xf32>
    %270 = arith.addf %269, %268 : vector<8x512xf32>
    %271 = arith.divf %269, %270 : vector<8x512xf32>
    %272 = vector.extract_strided_slice %265 {offsets = [0, 512], sizes = [8, 256], strides = [1, 1]} : vector<8x1024xf32> to vector<8x256xf32>
    %273 = math.tanh %272 : vector<8x256xf32>
    %274 = vector.extract_strided_slice %265 {offsets = [0, 768], sizes = [8, 256], strides = [1, 1]} : vector<8x1024xf32> to vector<8x256xf32>
    %275 = arith.negf %274 : vector<8x256xf32>
    %276 = math.exp %275 : vector<8x256xf32>
    %cst_71 = arith.constant 1.000000e+00 : f32
    %277 = vector.broadcast %cst_71 : f32 to vector<8x256xf32>
    %278 = arith.addf %277, %276 : vector<8x256xf32>
    %279 = arith.divf %277, %278 : vector<8x256xf32>
    %280 = vector.extract_strided_slice %271 {offsets = [0, 256], sizes = [8, 256], strides = [1, 1]} : vector<8x512xf32> to vector<8x256xf32>
    %281 = arith.mulf %280, %250 : vector<8x256xf32>
    %282 = vector.extract_strided_slice %271 {offsets = [0, 0], sizes = [8, 256], strides = [1, 1]} : vector<8x512xf32> to vector<8x256xf32>
    %283 = arith.mulf %282, %273 : vector<8x256xf32>
    %284 = arith.addf %281, %283 : vector<8x256xf32>
    %285 = math.tanh %284 : vector<8x256xf32>
    %286 = arith.mulf %279, %285 : vector<8x256xf32>
    %287 = arith.truncf %286 : vector<8x256xf32> to vector<8x256xbf16>
    %cst_72 = arith.constant dense<0.000000e+00> : vector<8x256xf32>
    %288 = tpu.matmul %287, %17, %cst_72 {dimension_numbers = #tpu.dot_dimension_numbers<[1], [0], [0], [1], [0, 0, 1, 1], [], []>} : vector<8x256xbf16>, vector<256x256xbf16>, vector<8x256xf32> -> vector<8x256xf32>
    %289 = vector.broadcast %18 : vector<1x256xf32> to vector<8x256xf32>
    %290 = arith.addf %288, %289 : vector<8x256xf32>
    %291 = arith.index_cast %260 : i32 to index
    %c0_73 = arith.constant 0 : index
    %292 = vector.load %arg17[%291, %c0_73] : memref<64x256xf32, #tpu.memory_space<vmem>>, vector<8x256xf32>
    tpu.vector_store %arg17[%291, %c0_73], %290 {strides = array<i32>} : memref<64x256xf32, #tpu.memory_space<vmem>>, vector<8x256xf32>,
    %c8_i32_74 = arith.constant 8 : i32
    %c0_i32_75 = arith.constant 0 : i32
    %293 = tpu.memref_slice %arg22[%c0_i32_75] : memref<4x!tpu.dma_semaphore, #tpu.memory_space<semaphore_mem>> -> memref<1x!tpu.dma_semaphore, #tpu.memory_space<semaphore_mem>>
    %294 = tpu.memref_squeeze %293 : memref<1x!tpu.dma_semaphore, #tpu.memory_space<semaphore_mem>> -> memref<!tpu.dma_semaphore, #tpu.memory_space<semaphore_mem>>
    tpu.wait_dma2 semaphore(%294 : memref<!tpu.dma_semaphore, #tpu.memory_space<semaphore_mem>>) src(%arg11 : memref<256x512xbf16, #tpu.memory_space<any>>) dst(%arg18 : memref<256x512xbf16, #tpu.memory_space<vmem>>)
    %c1_i32_76 = arith.constant 1 : i32
    %295 = tpu.memref_slice %arg22[%c1_i32_76] : memref<4x!tpu.dma_semaphore, #tpu.memory_space<semaphore_mem>> -> memref<1x!tpu.dma_semaphore, #tpu.memory_space<semaphore_mem>>
    %296 = tpu.memref_squeeze %295 : memref<1x!tpu.dma_semaphore, #tpu.memory_space<semaphore_mem>> -> memref<!tpu.dma_semaphore, #tpu.memory_space<semaphore_mem>>
    tpu.wait_dma2 semaphore(%296 : memref<!tpu.dma_semaphore, #tpu.memory_space<semaphore_mem>>) src(%arg12 : memref<512x256xbf16, #tpu.memory_space<any>>) dst(%arg19 : memref<512x256xbf16, #tpu.memory_space<vmem>>)
    %c2_i32_77 = arith.constant 2 : i32
    %297 = tpu.memref_slice %arg22[%c2_i32_77] : memref<4x!tpu.dma_semaphore, #tpu.memory_space<semaphore_mem>> -> memref<1x!tpu.dma_semaphore, #tpu.memory_space<semaphore_mem>>
    %298 = tpu.memref_squeeze %297 : memref<1x!tpu.dma_semaphore, #tpu.memory_space<semaphore_mem>> -> memref<!tpu.dma_semaphore, #tpu.memory_space<semaphore_mem>>
    tpu.wait_dma2 semaphore(%298 : memref<!tpu.dma_semaphore, #tpu.memory_space<semaphore_mem>>) src(%arg13 : memref<256x128xbf16, #tpu.memory_space<any>>) dst(%arg20 : memref<256x128xbf16, #tpu.memory_space<vmem>>)
    %c3_i32_78 = arith.constant 3 : i32
    %299 = tpu.memref_slice %arg22[%c3_i32_78] : memref<4x!tpu.dma_semaphore, #tpu.memory_space<semaphore_mem>> -> memref<1x!tpu.dma_semaphore, #tpu.memory_space<semaphore_mem>>
    %300 = tpu.memref_squeeze %299 : memref<1x!tpu.dma_semaphore, #tpu.memory_space<semaphore_mem>> -> memref<!tpu.dma_semaphore, #tpu.memory_space<semaphore_mem>>
    tpu.wait_dma2 semaphore(%300 : memref<!tpu.dma_semaphore, #tpu.memory_space<semaphore_mem>>) src(%arg14 : memref<128x128xbf16, #tpu.memory_space<any>>) dst(%arg21 : memref<128x128xbf16, #tpu.memory_space<vmem>>)
    %c0_79 = arith.constant 0 : index
    %c0_80 = arith.constant 0 : index
    %301 = vector.load %arg17[%c0_79, %c0_80] : memref<64x256xf32, #tpu.memory_space<vmem>>, vector<64x256xf32>
    %302 = arith.truncf %301 : vector<64x256xf32> to vector<64x256xbf16>
    %c0_81 = arith.constant 0 : index
    %c0_82 = arith.constant 0 : index
    %303 = vector.load %arg18[%c0_81, %c0_82] : memref<256x512xbf16, #tpu.memory_space<vmem>>, vector<256x512xbf16>
    %cst_83 = arith.constant dense<0.000000e+00> : vector<64x512xf32>
    %304 = tpu.matmul %302, %303, %cst_83 {dimension_numbers = #tpu.dot_dimension_numbers<[1], [0], [0], [1], [0, 0, 1, 1], [], []>} : vector<64x256xbf16>, vector<256x512xbf16>, vector<64x512xf32> -> vector<64x512xf32>
    %c0_84 = arith.constant 0 : index
    %c0_85 = arith.constant 0 : index
    %305 = vector.load %arg7[%c0_84, %c0_85] : memref<1x512xf32, #tpu.memory_space<vmem>>, vector<1x512xf32>
    %306 = vector.broadcast %305 : vector<1x512xf32> to vector<64x512xf32>
    %307 = arith.addf %304, %306 : vector<64x512xf32>
    %cst_86 = arith.constant 0.000000e+00 : f32
    %308 = vector.broadcast %cst_86 : f32 to vector<64x512xf32>
    %309 = arith.maximumf %307, %308 : vector<64x512xf32>
    %310 = arith.truncf %309 : vector<64x512xf32> to vector<64x512xbf16>
    %c0_87 = arith.constant 0 : index
    %c0_88 = arith.constant 0 : index
    %311 = vector.load %arg19[%c0_87, %c0_88] : memref<512x256xbf16, #tpu.memory_space<vmem>>, vector<512x256xbf16>
    %cst_89 = arith.constant dense<0.000000e+00> : vector<64x256xf32>
    %312 = tpu.matmul %310, %311, %cst_89 {dimension_numbers = #tpu.dot_dimension_numbers<[1], [0], [0], [1], [0, 0, 1, 1], [], []>} : vector<64x512xbf16>, vector<512x256xbf16>, vector<64x256xf32> -> vector<64x256xf32>
    %c0_90 = arith.constant 0 : index
    %c0_91 = arith.constant 0 : index
    %313 = vector.load %arg8[%c0_90, %c0_91] : memref<1x256xf32, #tpu.memory_space<vmem>>, vector<1x256xf32>
    %314 = vector.broadcast %313 : vector<1x256xf32> to vector<64x256xf32>
    %315 = arith.addf %312, %314 : vector<64x256xf32>
    %cst_92 = arith.constant 0.000000e+00 : f32
    %316 = vector.broadcast %cst_92 : f32 to vector<64x256xf32>
    %317 = arith.maximumf %315, %316 : vector<64x256xf32>
    %318 = arith.truncf %317 : vector<64x256xf32> to vector<64x256xbf16>
    %c0_93 = arith.constant 0 : index
    %c0_94 = arith.constant 0 : index
    %319 = vector.load %arg20[%c0_93, %c0_94] : memref<256x128xbf16, #tpu.memory_space<vmem>>, vector<256x128xbf16>
    %cst_95 = arith.constant dense<0.000000e+00> : vector<64x128xf32>
    %320 = tpu.matmul %318, %319, %cst_95 {dimension_numbers = #tpu.dot_dimension_numbers<[1], [0], [0], [1], [0, 0, 1, 1], [], []>} : vector<64x256xbf16>, vector<256x128xbf16>, vector<64x128xf32> -> vector<64x128xf32>
    %c0_96 = arith.constant 0 : index
    %c0_97 = arith.constant 0 : index
    %321 = vector.load %arg9[%c0_96, %c0_97] : memref<1x128xf32, #tpu.memory_space<vmem>>, vector<1x128xf32>
    %322 = vector.broadcast %321 : vector<1x128xf32> to vector<64x128xf32>
    %323 = arith.addf %320, %322 : vector<64x128xf32>
    %cst_98 = arith.constant 0.000000e+00 : f32
    %324 = vector.broadcast %cst_98 : f32 to vector<64x128xf32>
    %325 = arith.maximumf %323, %324 : vector<64x128xf32>
    %326 = arith.truncf %325 : vector<64x128xf32> to vector<64x128xbf16>
    %c0_99 = arith.constant 0 : index
    %c0_100 = arith.constant 0 : index
    %327 = vector.load %arg21[%c0_99, %c0_100] : memref<128x128xbf16, #tpu.memory_space<vmem>>, vector<128x128xbf16>
    %cst_101 = arith.constant dense<0.000000e+00> : vector<64x128xf32>
    %328 = tpu.matmul %326, %327, %cst_101 {dimension_numbers = #tpu.dot_dimension_numbers<[1], [0], [0], [1], [0, 0, 1, 1], [], []>} : vector<64x128xbf16>, vector<128x128xbf16>, vector<64x128xf32> -> vector<64x128xf32>
    %c0_102 = arith.constant 0 : index
    %c0_103 = arith.constant 0 : index
    %329 = vector.load %arg10[%c0_102, %c0_103] : memref<1x128xf32, #tpu.memory_space<vmem>>, vector<1x128xf32>
    %330 = vector.broadcast %329 : vector<1x128xf32> to vector<64x128xf32>
    %331 = arith.addf %328, %330 : vector<64x128xf32>
    %332 = math.tanh %331 : vector<64x128xf32>
    %c0_104 = arith.constant 0 : index
    %c0_105 = arith.constant 0 : index
    %333 = vector.load %arg15[%c0_104, %c0_105] : memref<64x128xf32, #tpu.memory_space<vmem>>, vector<64x128xf32>
    tpu.vector_store %arg15[%c0_104, %c0_105], %332 {strides = array<i32>} : memref<64x128xf32, #tpu.memory_space<vmem>>, vector<64x128xf32>,
    return
  }
  func.func @transform_0(%arg0: i32) -> (i32, i32) {
    %c0_i32 = arith.constant 0 : i32
    %c0_i32_0 = arith.constant 0 : i32
    %c0_i32_1 = arith.constant 0 : i32
    return %c0_i32, %c0_i32_0 : i32, i32
  }
  func.func @transform_1(%arg0: i32) -> (i32, i32) {
    %c0_i32 = arith.constant 0 : i32
    %c0_i32_0 = arith.constant 0 : i32
    %c0_i32_1 = arith.constant 0 : i32
    return %c0_i32, %c0_i32_0 : i32, i32
  }
  func.func @transform_2(%arg0: i32) -> (i32, i32) {
    %c0_i32 = arith.constant 0 : i32
    %c0_i32_0 = arith.constant 0 : i32
    %c0_i32_1 = arith.constant 0 : i32
    return %c0_i32, %c0_i32_0 : i32, i32
  }
  func.func @transform_3(%arg0: i32) -> (i32, i32) {
    %c0_i32 = arith.constant 0 : i32
    %c0_i32_0 = arith.constant 0 : i32
    %c0_i32_1 = arith.constant 0 : i32
    return %c0_i32, %c0_i32_0 : i32, i32
  }
  func.func @transform_4(%arg0: i32) -> (i32, i32) {
    %c0_i32 = arith.constant 0 : i32
    %c0_i32_0 = arith.constant 0 : i32
    %c0_i32_1 = arith.constant 0 : i32
    return %c0_i32, %c0_i32_0 : i32, i32
  }
  func.func @transform_5(%arg0: i32) -> (i32, i32) {
    %c0_i32 = arith.constant 0 : i32
    %c0_i32_0 = arith.constant 0 : i32
    %c0_i32_1 = arith.constant 0 : i32
    return %c0_i32, %c0_i32_0 : i32, i32
  }
  func.func @transform_6(%arg0: i32) -> (i32, i32) {
    %c0_i32 = arith.constant 0 : i32
    %c0_i32_0 = arith.constant 0 : i32
    %c0_i32_1 = arith.constant 0 : i32
    return %c0_i32, %c0_i32_0 : i32, i32
  }
  func.func @transform_7(%arg0: i32) -> (i32, i32) {
    %c0_i32 = arith.constant 0 : i32
    %c0_i32_0 = arith.constant 0 : i32
    %c0_i32_1 = arith.constant 0 : i32
    return %c0_i32, %c0_i32_0 : i32, i32
  }
  func.func @transform_8(%arg0: i32) -> (i32, i32) {
    %c0_i32 = arith.constant 0 : i32
    %c0_i32_0 = arith.constant 0 : i32
    %c0_i32_1 = arith.constant 0 : i32
    return %c0_i32, %c0_i32_0 : i32, i32
  }
  func.func @transform_9(%arg0: i32) -> (i32, i32) {
    %c0_i32 = arith.constant 0 : i32
    %c0_i32_0 = arith.constant 0 : i32
    %c0_i32_1 = arith.constant 0 : i32
    return %c0_i32, %c0_i32_0 : i32, i32
  }
  func.func @transform_14(%arg0: i32) -> (i32, i32) {
    %c0_i32 = arith.constant 0 : i32
    %c0_i32_0 = arith.constant 0 : i32
    %c0_i32_1 = arith.constant 0 : i32
    return %c0_i32, %c0_i32_0 : i32, i32
  }
}

</mosaic_0001>

<bundles_post_ra>
// kernel: actor_forward.1
= control target key start
LH: loop header
LB: loop body
LE: loop exit
PB: predicated region body
PF: predicated region fallthrough
CT: control target
= control target key end

     0   :  { %19 = vsyncpa [#allocation10], 0  ;;  %s9487_s0 = inlined_call_operand.vmem [shape: f32[64,16], index: 0, kind: input, shape index: {}]   ;;  %s9488_s1 = inlined_call_operand.hbm [shape: bf16[16,1024], index: 1, kind: input, shape index: {}]   ;;  %s9489_s2 = inlined_call_operand.hbm [shape: bf16[256,1024], index: 2, kind: input, shape index: {}]   ;;  %s9490_s3 = inlined_call_operand.hbm [shape: f32[1,1024], index: 3, kind: input, shape index: {}]   ;;  %s9491_s4 = inlined_call_operand.hbm [shape: bf16[256,256], index: 4, kind: input, shape index: {}]   ;;  %s9492_s5 = inlined_call_operand.vmem [shape: f32[1,256], index: 5, kind: input, shape index: {}]   ;;  %s9493_s6 = inlined_call_operand.hbm [shape: f32[1,512], index: 6, kind: input, shape index: {}]   ;;  %s9494_s7 = inlined_call_operand.hbm [shape: f32[1,256], index: 7, kind: input, shape index: {}]   ;;  %s9495_s8 = inlined_call_operand.hbm [shape: f32[1,128], index: 8, kind: input, shape index: {}]   ;;  %s9496_s9 = inlined_call_operand.hbm [shape: f32[1,128], index: 9, kind: input, shape index: {}]   ;;  %s9497_s10 = inlined_call_operand.hbm [shape: bf16[256,512], index: 10, kind: input, shape index: {}]   ;;  %s9498_s11 = inlined_call_operand.hbm [shape: bf16[512,256], index: 11, kind: input, shape index: {}]   ;;  %s9499_s12 = inlined_call_operand.vmem [shape: bf16[256,128], index: 12, kind: input, shape index: {}]   ;;  %s9500_s13 = inlined_call_operand.hbm [shape: bf16[128,128], index: 13, kind: input, shape index: {}]   ;;  %s9501_s14 = inlined_call_operand.vmem [shape: f32[64,128], index: 14, kind: output, shape index: {}]  }
   0x1   :  { %20 = vsyncpa [#allocation12], 0 }
   0x2   :  { %21 = vsyncpa [#allocation15], 0 }
   0x3   :  { %22 = vsyncpa [#allocation18], 0 }
   0x4   :  { %23 = vsyncpa [#allocation21], 0  ;;  %s6872_s29 = smov [#allocation11]   ;;  %s6873_s15 = smov [#allocation14]  }
   0x5   :  { %s43_s30 = sshll.u32 %s6872_s29, 4  ;;  %s65_s16 = sshll.u32 %s6873_s15, 4  ;;  %s44_s30 = int_to_ptr.vmem [resolvable:$true] %s43_s30  ;;  %s66_s16 = int_to_ptr.vmem [resolvable:$true] %s65_s16 }
   0x6   :  { %s6642_s17 = scalar_lea.vmem %s44_s30, 16384  ;;  %p6647_p1 = scmp.lt.s32.totalorder %s44_s30, %s44_s30 }
   0x7   :  { %p6643_p0 = scmp.ne.s32.totalorder %s44_s30, %s6642_s17  ;;  %p6648_p2 = scmp.lt.s32.totalorder %s6642_s17, %s6642_s17 }
   0x9   :  { %p6649_p3 = por %p6648_p2, %p6647_p1 }
   0xb   :  { %p6650_p4 = pnand %p6649_p3, %p6643_p0 }
   0xd   :  { %6653 = shalt.err (!%p6650_p4)
}
   0xe   :  { %s6874_s18 = smov 512   ;;  %s6875_s19 = smov 32  }
   0xf   :  { %49 = dma.hbm_to_vmem [thread:$0]  %s9489_s2, 16384, %s44_s30, [#allocation12], %s6874_s18, %s6874_s18, %s6875_s19  }
  0x10   :  { %s6662_s22 = scalar_lea.vmem %s66_s16, 4096  ;;  %p6667_p6 = scmp.lt.s32.totalorder %s66_s16, %s66_s16 }
  0x11   :  { %p6663_p5 = scmp.ne.s32.totalorder %s66_s16, %s6662_s22  ;;  %p6668_p7 = scmp.lt.s32.totalorder %s6662_s22, %s6662_s22 }
  0x13   :  { %p6669_p8 = por %p6668_p7, %p6667_p6 }
  0x15   :  { %p6670_p9 = pnand %p6669_p8, %p6663_p5 }
  0x17   :  { %6673 = shalt.err (!%p6670_p9)
}
  0x18   :  { %s6876_s23 = smov 128   ;;  %s6877_s24 = smov 8  }
  0x19   :  { %71 = dma.hbm_to_vmem [thread:$0]  %s9491_s4, 4096, %s66_s16, [#allocation15], %s6876_s23, %s6876_s23, %s6877_s24  }
  0x1a   :  { %s6878_s27 = smov [#allocation17]   ;;  %s6879_s29 = smov [#allocation9]  }
  0x1b   :  { %s90_s28 = sshll.u32 %s6878_s27, 4  ;;  %s31_s15 = sshll.u32 %s6879_s29, 4  ;;  %s91_s28 = int_to_ptr.vmem [resolvable:$true] %s90_s28  ;;  %s32_s15 = int_to_ptr.vmem [resolvable:$true] %s31_s15 }
  0x1c   :  { %s6682_s2 = scalar_lea.vmem %s91_s28, 32  ;;  %p6687_p11 = scmp.lt.s32.totalorder %s91_s28, %s91_s28 }
  0x1d   :  { %p6683_p10 = scmp.ne.s32.totalorder %s91_s28, %s6682_s2  ;;  %p6688_p12 = scmp.lt.s32.totalorder %s6682_s2, %s6682_s2 }
  0x1f   :  { %p6689_p13 = por %p6688_p12, %p6687_p11 }
  0x21   :  { %p6690_p0 = pnand %p6689_p13, %p6683_p10 }
  0x23   :  { %6693 = shalt.err (!%p6690_p0)
}
  0x24   :  { %93 = dma.hbm_to_vmem [thread:$0]  %s9494_s7, 32, %s91_s28, [#allocation18]  }
  0x25   :  { %s6702_s20 = scalar_lea.vmem %s32_s15, 1024  ;;  %p6707_p2 = scmp.lt.s32.totalorder %s32_s15, %s32_s15 }
  0x26   :  { %p6703_p1 = scmp.ne.s32.totalorder %s32_s15, %s6702_s20  ;;  %p6708_p3 = scmp.lt.s32.totalorder %s6702_s20, %s6702_s20 }
  0x28   :  { %p6709_p4 = por %p6708_p3, %p6707_p2 }
  0x2a   :  { %p6710_p5 = pnand %p6709_p4, %p6703_p1 }
  0x2c   :  { %6713 = shalt.err (!%p6710_p5)
}
  0x2d   :  { %37 = dma.hbm_to_vmem [thread:$0]  %s9488_s1, 1024, %s32_s15, [#allocation10], %s6874_s18, %s6874_s18, %s6875_s19  }
  0x2e   :  { %s6880_s21 = smov [#allocation13]   ;;  %s6881_s23 = smov [#allocation16]  }
  0x2f   :  { %s56_s22 = sshll.u32 %s6880_s21, 4  ;;  %s80_s24 = sshll.u32 %s6881_s23, 4  ;;  %s57_s22 = int_to_ptr.vmem [resolvable:$true] %s56_s22  ;;  %s81_s24 = int_to_ptr.vmem [resolvable:$true] %s80_s24 }
  0x30   :  { %s6722_s7 = scalar_lea.vmem %s57_s22, 128  ;;  %p6727_p7 = scmp.lt.s32.totalorder %s57_s22, %s57_s22 }
  0x31   :  { %p6723_p6 = scmp.ne.s32.totalorder %s57_s22, %s6722_s7  ;;  %p6728_p8 = scmp.lt.s32.totalorder %s6722_s7, %s6722_s7 }
  0x33   :  { %p6729_p9 = por %p6728_p8, %p6727_p7 }
  0x35   :  { %p6730_p10 = pnand %p6729_p9, %p6723_p6 }
  0x37   :  { %6733 = shalt.err (!%p6730_p10)
}
  0x38   :  { %59 = dma.hbm_to_vmem [thread:$0]  %s9490_s3, 128, %s57_s22, [#allocation12]  }
  0x39   :  { %s6742_s27 = scalar_lea.vmem %s81_s24, 64  ;;  %p6747_p12 = scmp.lt.s32.totalorder %s81_s24, %s81_s24 }
  0x3a   :  { %p6743_p11 = scmp.ne.s32.totalorder %s81_s24, %s6742_s27  ;;  %p6748_p13 = scmp.lt.s32.totalorder %s6742_s27, %s6742_s27 }
  0x3c   :  { %p6749_p0 = por %p6748_p13, %p6747_p12 }
  0x3e   :  { %p6750_p1 = pnand %p6749_p0, %p6743_p11 }
  0x40   :  { %6753 = shalt.err (!%p6750_p1)
}
  0x41   :  { %83 = dma.hbm_to_vmem [thread:$0]  %s9493_s6, 64, %s81_s24, [#allocation15]  }
  0x42   :  { %s6882_s19 = smov [#allocation19]   ;;  %s6883_s29 = smov [#allocation20]  }
  0x43   :  { %s100_s28 = sshll.u32 %s6882_s19, 4  ;;  %s110_s15 = sshll.u32 %s6883_s29, 4  ;;  %s101_s28 = int_to_ptr.vmem [resolvable:$true] %s100_s28  ;;  %s111_s15 = int_to_ptr.vmem [resolvable:$true] %s110_s15 }
  0x44   :  { %s6762_s2 = scalar_lea.vmem %s101_s28, 16  ;;  %s6766_s3 = scalar_lea.vmem %s101_s28, 32 }
  0x45   :  { %p6763_p2 = scmp.ne.s32.totalorder %s101_s28, %s6762_s2  ;;  %p6767_p3 = scmp.lt.s32.totalorder %s101_s28, %s101_s28 }
  0x46   :  { %p6768_p4 = scmp.lt.s32.totalorder %s6766_s3, %s6762_s2 }
  0x48   :  { %p6769_p5 = por %p6768_p4, %p6767_p3 }
  0x4a   :  { %p6770_p6 = pnand %p6769_p5, %p6763_p2 }
  0x4c   :  { %6773 = shalt.err (!%p6770_p6)
}
  0x4d   :  { %103 = dma.hbm_to_vmem [thread:$0]  %s9495_s8, 16, %s101_s28, [#allocation18]  }
  0x4e   :  { %s6782_s20 = scalar_lea.vmem %s111_s15, 16  ;;  %s6786_s6 = scalar_lea.vmem %s111_s15, 32 }
  0x4f   :  { %p6783_p7 = scmp.ne.s32.totalorder %s111_s15, %s6782_s20  ;;  %p6787_p8 = scmp.lt.s32.totalorder %s111_s15, %s111_s15 }
  0x50   :  { %p6788_p9 = scmp.lt.s32.totalorder %s6786_s6, %s6782_s20 }
  0x52   :  { %p6789_p10 = por %p6788_p9, %p6787_p8 }
  0x54   :  { %p6790_p11 = pnand %p6789_p10, %p6783_p7 }
  0x56   :  { %6793 = shalt.err (!%p6790_p11)
}
  0x57   :  { %113 = dma.hbm_to_vmem [thread:$0]  %s9496_s9, 16, %s111_s15, [#allocation21]  }
  0x58   :  { %6854 = dma.done.wait [#allocation10], 1024  }
  0x59   :  { %6855 = vsyncadd [#allocation10], 4294966272 }
  0x5a   :  { %6856 = dma.done.wait [#allocation12], 16512  }
  0x5b   :  { %6857 = vsyncadd [#allocation12], 4294950784 }
  0x5c   :  { %6858 = dma.done.wait [#allocation15], 4160  }
  0x5d   :  { %6859 = vsyncadd [#allocation15], 4294963136 }
  0x5e   :  { %6860 = dma.done.wait [#allocation18], 48  }
  0x5f   :  { %6861 = vsyncadd [#allocation18], 4294967248 }
  0x60   :  { %6862 = dma.done.wait [#allocation21], 16  }
  0x61   :  { %6863 = vsyncadd [#allocation21], 4294967280  ;;  %s6884_s8 = smov [#allocation4]   ;;  %s6885_s22 = smov [#allocation5]  }
  0x62   :  { %s146_s21 = sshll.u32 %s6884_s8, 4  ;;  %s158_s23 = sshll.u32 %s6885_s22, 4  ;;  %s147_s21 = int_to_ptr.vmem [resolvable:$true] %s146_s21  ;;  %s159_s23 = int_to_ptr.vmem [resolvable:$true] %s158_s23 }
  0x63   :  { %s6802_s24 = scalar_lea.vmem %s147_s21, 8192  ;;  %p6807_p13 = scmp.lt.s32.totalorder %s147_s21, %s147_s21 }
  0x64   :  { %p6803_p12 = scmp.ne.s32.totalorder %s147_s21, %s6802_s24  ;;  %p6808_p0 = scmp.lt.s32.totalorder %s6802_s24, %s6802_s24 }
  0x66   :  { %p6809_p1 = por %p6808_p0, %p6807_p13 }
  0x68   :  { %p6810_p2 = pnand %p6809_p1, %p6803_p12 }
  0x6a   :  { %6813 = shalt.err (!%p6810_p2)  }
  0x6b   :  { %149 = dma.hbm_to_vmem [thread:$0]  %s9497_s10, 8192, %s147_s21, [#allocation8] }
  0x6c   :  { %s6822_s25 = scalar_lea.vmem %s159_s23, 8192  ;;  %p6827_p4 = scmp.lt.s32.totalorder %s159_s23, %s159_s23 }
  0x6d   :  { %p6823_p3 = scmp.ne.s32.totalorder %s159_s23, %s6822_s25  ;;  %p6828_p5 = scmp.lt.s32.totalorder %s6822_s25, %s6822_s25 }
  0x6f   :  { %p6829_p6 = por %p6828_p5, %p6827_p4 }
  0x71   :  { %p6830_p7 = pnand %p6829_p6, %p6823_p3 }
  0x73   :  { %6833 = shalt.err (!%p6830_p7)  }
  0x74   :  { %161 = dma.hbm_to_vmem [thread:$0]  %s9498_s11, 8192, %s159_s23, [#allocation8 + $0x1]  ;;  %v196_v0 = vld [vmem:[%s9499_s12] sm:$0xff]  ;;  %v198_v1 = vld [vmem:[%s9499_s12 + $0x8] sm:$0xff]  ;;  %v200_v2 = vld [vmem:[%s9499_s12 + $0x10] sm:$0xff]  ;;  %v9502_v21 = vmov 0  }
  0x75   :  { %197 = vst [vmem:[#allocation6] sm:$0xff] %v196_v0  ;;  %199 = vst [vmem:[#allocation6 + $0x8] sm:$0xff] %v198_v1  ;;  %v202_v3 = vld [vmem:[%s9499_s12 + $0x18] sm:$0xff]  ;;  %v204_v4 = vld [vmem:[%s9499_s12 + $0x20] sm:$0xff]  ;;  %395 = vmatprep.mubr.bf16.mxu0 %v9502_v21  ;;  %425 = vmatprep.mubr.bf16.mxu1 %v9502_v21  ;;  %vm350_vm0 = vcmask 130048  }
  0x76   :  { %201 = vst [vmem:[#allocation6 + $0x10] sm:$0xff] %v200_v2  ;;  %v206_v5 = vld [vmem:[%s9499_s12 + $0x28] sm:$0xff]  ;;  %203 = vst [vmem:[#allocation6 + $0x18] sm:$0xff] %v202_v3  ;;  %v208_v6 = vld [vmem:[%s9499_s12 + $0x30] sm:$0xff] }
  0x77   :  { %205 = vst [vmem:[#allocation6 + $0x20] sm:$0xff] %v204_v4  ;;  %207 = vst [vmem:[#allocation6 + $0x28] sm:$0xff] %v206_v5  ;;  %v210_v7 = vld [vmem:[%s9499_s12 + $0x38] sm:$0xff]  ;;  %v212_v8 = vld [vmem:[%s9499_s12 + $0x40] sm:$0xff] }
  0x78   :  { %209 = vst [vmem:[#allocation6 + $0x30] sm:$0xff] %v208_v6  ;;  %211 = vst [vmem:[#allocation6 + $0x38] sm:$0xff] %v210_v7  ;;  %v214_v9 = vld [vmem:[%s9499_s12 + $0x48] sm:$0xff]  ;;  %v216_v10 = vld [vmem:[%s9499_s12 + $0x50] sm:$0xff] }
  0x79   :  { %213 = vst [vmem:[#allocation6 + $0x40] sm:$0xff] %v212_v8  ;;  %v218_v11 = vld [vmem:[%s9499_s12 + $0x58] sm:$0xff]  ;;  %215 = vst [vmem:[#allocation6 + $0x48] sm:$0xff] %v214_v9  ;;  %v220_v12 = vld [vmem:[%s9499_s12 + $0x60] sm:$0xff] }
  0x7a   :  { %217 = vst [vmem:[#allocation6 + $0x50] sm:$0xff] %v216_v10  ;;  %219 = vst [vmem:[#allocation6 + $0x58] sm:$0xff] %v218_v11  ;;  %v222_v13 = vld [vmem:[%s9499_s12 + $0x68] sm:$0xff]  ;;  %v224_v14 = vld [vmem:[%s9499_s12 + $0x70] sm:$0xff] }
  0x7b   :  { %221 = vst [vmem:[#allocation6 + $0x60] sm:$0xff] %v220_v12  ;;  %223 = vst [vmem:[#allocation6 + $0x68] sm:$0xff] %v222_v13  ;;  %v226_v15 = vld [vmem:[%s9499_s12 + $0x78] sm:$0xff]  ;;  %v260_v16 = vld [vmem:[#allocation9] sm:$0xff] }
  0x7c   :  { %225 = vst [vmem:[#allocation6 + $0x70] sm:$0xff] %v224_v14  ;;  %227 = vst [vmem:[#allocation6 + $0x78] sm:$0xff] %v226_v15  ;;  %v264_v17 = vld [vmem:[#allocation9 + $0x20] sm:$0xff]  ;;  %v249_v22 = vld [vmem:[%s9487_s0 + $0x8] sm:$0xff] }
  0x7d   :  { %v248_v18 = vld [vmem:[%s9487_s0] sm:$0xff]  ;;  %v5551_v19 = vcombine.high %v260_v16, %v264_v17  ;;  %v5550_v20 = vcombine.low %v260_v16, %v264_v17  ;;  %v254_v23 = vld [vmem:[%s9487_s0 + $0x30] sm:$0xff]  ;;  %v255_v24 = vld [vmem:[%s9487_s0 + $0x38] sm:$0xff] }
  0x7e   :  { %v261_v25 = vld [vmem:[#allocation9 + $0x8] sm:$0xff]  ;;  %v7061_v27 = vpack.c.bf16 %v249_v22, %v248_v18  ;;  %v7063_v28 = vpack.c.bf16 %v255_v24, %v254_v23  ;;  %v263_v30 = vld [vmem:[#allocation9 + $0x18] sm:$0xff]  ;;  %v262_v33 = vld [vmem:[#allocation9 + $0x10] sm:$0xff] }
  0x7f   :  { %v265_v26 = vld [vmem:[#allocation9 + $0x28] sm:$0xff]  ;;  %377 = vmatprep.subr.bf16.mxu0 %v5551_v19  ;;  %6016 = vmatprep.subr.bf16.mxu1 %v5551_v19  ;;  %v267_v31 = vld [vmem:[#allocation9 + $0x38] sm:$0xff]  ;;  %v266_v35 = vld [vmem:[#allocation9 + $0x30] sm:$0xff] }
  0x80   :  { %v5553_v29 = vcombine.high %v261_v25, %v265_v26  ;;  %378 = vmatpush1.bf16.msra.mxu0 %v5550_v20  ;;  %6017 = vmatpush1.bf16.msra.mxu1 %v5550_v20  ;;  %v5552_v32 = vcombine.low %v261_v25, %v265_v26  ;;  %v5557_v34 = vcombine.high %v263_v30, %v267_v31  ;;  %v775_v36 = vld [vmem:[#allocation11 + $0x1c0] sm:$0xff]  ;;  %v250_v40 = vld [vmem:[%s9487_s0 + $0x10] sm:$0xff]  ;;  %v251_v41 = vld [vmem:[%s9487_s0 + $0x18] sm:$0xff] }
  0x81   :  { %v779_v37 = vld [vmem:[#allocation11 + $0x1e0] sm:$0xff]  ;;  %v5555_v38 = vcombine.high %v262_v33, %v266_v35  ;;  %v5554_v39 = vcombine.low %v262_v33, %v266_v35  ;;  %v776_v43 = vld [vmem:[#allocation11 + $0x1c8] sm:$0xff]  ;;  %v7079_v45 = vpack.c.bf16 %v251_v41, %v250_v40  ;;  %v5556_v46 = vcombine.low %v263_v30, %v267_v31 }
  0x82   :  { %450 = vmatprep.subr.bf16.mxu1 %v5553_v29  ;;  %v7076_v42 = vcombine.high %v775_v36, %v779_v37  ;;  %v780_v44 = vld [vmem:[#allocation11 + $0x1e8] sm:$0xff]  ;;  %v252_v48 = vld [vmem:[%s9487_s0 + $0x20] sm:$0xff]  ;;  %v7105_v53 = vcombine.low %v775_v36, %v779_v37 }
  0x83   :  { %5558 = vmatmul.mubr.msk.bf16.vlgmr.msra.gmra.mxu0 %vm350_vm0, %v7061_v27  ;;  %5561 = vmatmul.mubr.msk.bf16.vlgmr.msra.gmra.mxu1 %vm350_vm0, %v7063_v28  ;;  %v7082_v47 = vcombine.high %v776_v43, %v780_v44  ;;  %v253_v49 = vld [vmem:[%s9487_s0 + $0x28] sm:$0xff]  ;;  %v767_v51 = vld [vmem:[#allocation11 + $0x180] sm:$0xff]  ;;  %v7142_v8 = vcombine.low %v776_v43, %v780_v44 }
  0x84   :  { %451 = vmatpush1.bf16.msra.mxu1 %v5552_v32  ;;  %405 = vmatprep.mubr.bf16.mxu0 %v9502_v21  ;;  %9913 = vst [vmem:[#allocation40_spill] sm:$0xff] %v7076_v42  ;;  %v7097_v50 = vpack.c.bf16 %v253_v49, %v252_v48  ;;  %v771_v52 = vld [vmem:[#allocation11 + $0x1a0] sm:$0xff]  ;;  %9915 = vst [vmem:[#allocation42_spill] sm:$0xff] %v7105_v53  ;;  %v768_v5 = vld [vmem:[#allocation11 + $0x188] sm:$0xff] }
  0x85   :  { %468 = vmatprep.mubr.bf16.mxu1 %v9502_v21  ;;  %596 = vmatprep.subr.bf16.mxu1 %v5557_v34  ;;  %9914 = vst [vmem:[#allocation41_spill] sm:$0xff] %v7082_v47  ;;  %v7107_v54 = vcombine.high %v767_v51, %v771_v52  ;;  %v759_v55 = vld [vmem:[#allocation11 + $0x140] sm:$0xff]  ;;  %v7114_v57 = vcombine.low %v767_v51, %v771_v52  ;;  %v772_v6 = vld [vmem:[#allocation11 + $0x1a8] sm:$0xff] }
  0x86   :  { %523 = vmatprep.subr.bf16.mxu0 %v5555_v38  ;;  %v763_v56 = vld [vmem:[#allocation11 + $0x160] sm:$0xff]  ;;  %v7147_v10 = vcombine.high %v768_v5, %v772_v6  ;;  %v760_v13 = vld [vmem:[#allocation11 + $0x148] sm:$0xff]  ;;  %v7157_v16 = vcombine.low %v768_v5, %v772_v6 }
  0x87   :  { %524 = vmatpush1.bf16.msra.mxu0 %v5554_v39  ;;  %9916 = vst [vmem:[#allocation43_spill] sm:$0xff] %v7107_v54  ;;  %9917 = vst [vmem:[#allocation44_spill] sm:$0xff] %v7114_v57  ;;  %v7118_v58 = vcombine.high %v759_v55, %v763_v56  ;;  %v751_v59 = vld [vmem:[#allocation11 + $0x100] sm:$0xff]  ;;  %v7122_v61 = vcombine.low %v759_v55, %v763_v56  ;;  %v764_v14 = vld [vmem:[#allocation11 + $0x168] sm:$0xff] }
  0x88   :  { %1531 = vmatprep.subr.bf16.mxu0 %v7076_v42  ;;  %v755_v60 = vld [vmem:[#allocation11 + $0x120] sm:$0xff]  ;;  %v752_v19 = vld [vmem:[#allocation11 + $0x108] sm:$0xff]  ;;  %v7163_v23 = vcombine.high %v760_v13, %v764_v14  ;;  %v7171_v25 = vcombine.low %v760_v13, %v764_v14 }
  0x89   :  { %9918 = vst [vmem:[#allocation45_spill] sm:$0xff] %v7118_v58  ;;  %9919 = vst [vmem:[#allocation46_spill] sm:$0xff] %v7122_v61  ;;  %v7125_v62 = vcombine.high %v751_v59, %v755_v60  ;;  %v743_v63 = vld [vmem:[#allocation11 + $0xc0] sm:$0xff]  ;;  %v7132_v1 = vcombine.low %v751_v59, %v755_v60  ;;  %v756_v20 = vld [vmem:[#allocation11 + $0x128] sm:$0xff] }
  0x8a   :  { %v747_v0 = vld [vmem:[#allocation11 + $0xe0] sm:$0xff]  ;;  %v744_v29 = vld [vmem:[#allocation11 + $0xc8] sm:$0xff]  ;;  %v7177_v32 = vcombine.high %v752_v19, %v756_v20  ;;  %v7187_v34 = vcombine.low %v752_v19, %v756_v20 }
  0x8b   :  { %5559 = vmatmul.mubr.msk.bf16.gmra.mxu0 %vm350_vm0, %v7079_v45  ;;  %5562 = vmatmul.mubr.msk.bf16.vlgmr.msra.gmra.mxu1 %vm350_vm0, %v7061_v27  ;;  %9920 = vst [vmem:[#allocation47_spill] sm:$0xff] %v7125_v62  ;;  %9921 = vst [vmem:[#allocation48_spill] sm:$0xff] %v7132_v1  ;;  %v7136_v2 = vcombine.high %v743_v63, %v747_v0  ;;  %v735_v3 = vld [vmem:[#allocation11 + $0x80] sm:$0xff]  ;;  %v7140_v7 = vcombine.low %v743_v63, %v747_v0  ;;  %v748_v30 = vld [vmem:[#allocation11 + $0xe8] sm:$0xff] }
  0x8c   :  { %597 = vmatpush1.bf16.msra.mxu1 %v5556_v46  ;;  %415 = vmatprep.mubr.bf16.mxu0 %v9502_v21  ;;  %v739_v4 = vld [vmem:[#allocation11 + $0xa0] sm:$0xff]  ;;  %9929 = vst [vmem:[#allocation56_spill] sm:$0xff] %v7177_v32  ;;  %9931 = vst [vmem:[#allocation58_spill] sm:$0xff] %v7187_v34  ;;  %v736_v37 = vld [vmem:[#allocation11 + $0x88] sm:$0xff]  ;;  %v7193_v40 = vcombine.high %v744_v29, %v748_v30 }
  0x8d   :  { %478 = vmatprep.mubr.bf16.mxu1 %v9502_v21  ;;  %1572 = vmatprep.subr.bf16.mxu1 %v7082_v47  ;;  %9922 = vst [vmem:[#allocation49_spill] sm:$0xff] %v7136_v2  ;;  %9923 = vst [vmem:[#allocation50_spill] sm:$0xff] %v7140_v7  ;;  %v7145_v9 = vcombine.high %v735_v3, %v739_v4  ;;  %v727_v11 = vld [vmem:[#allocation11 + $0x40] sm:$0xff]  ;;  %v7155_v15 = vcombine.low %v735_v3, %v739_v4  ;;  %v740_v38 = vld [vmem:[#allocation11 + $0xa8] sm:$0xff] }
  0x8e   :  { %v731_v12 = vld [vmem:[#allocation11 + $0x60] sm:$0xff]  ;;  %9933 = vst [vmem:[#allocation60_spill] sm:$0xff] %v7193_v40 }
  0x8f   :  { %9924 = vst [vmem:[#allocation51_spill] sm:$0xff] %v7145_v9  ;;  %9925 = vst [vmem:[#allocation52_spill] sm:$0xff] %v7155_v15  ;;  %v719_v17 = vld [vmem:[#allocation11] sm:$0xff]  ;;  %v7161_v22 = vcombine.high %v727_v11, %v731_v12  ;;  %v7169_v24 = vcombine.low %v727_v11, %v731_v12 }
  0x90   :  { %v723_v18 = vld [vmem:[#allocation11 + $0x20] sm:$0xff] }
  0x91   :  { %9926 = vst [vmem:[#allocation53_spill] sm:$0xff] %v7161_v22  ;;  %9927 = vst [vmem:[#allocation54_spill] sm:$0xff] %v7169_v24  ;;  %v839_v26 = vld [vmem:[#allocation11 + $0x3c0] sm:$0xff]  ;;  %v7175_v31 = vcombine.high %v719_v17, %v723_v18  ;;  %v7185_v33 = vcombine.low %v719_v17, %v723_v18 }
  0x92   :  { %v831_v35 = vld [vmem:[#allocation11 + $0x380] sm:$0xff] }
  0x93   :  { %5560 = vmatmul.mubr.msk.bf16.gmra.mxu0 %vm350_vm0, %v7097_v50  ;;  %5563 = vmatmul.mubr.msk.bf16.gmra.mxu1 %vm350_vm0, %v7079_v45  ;;  %9928 = vst [vmem:[#allocation55_spill] sm:$0xff] %v7175_v31  ;;  %9930 = vst [vmem:[#allocation57_spill] sm:$0xff] %v7185_v33  ;;  %v835_v36 = vld [vmem:[#allocation11 + $0x3a0] sm:$0xff] }
  0x94   :  { %488 = vmatprep.mubr.bf16.mxu1 %v9502_v21  ;;  %541 = vmatprep.mubr.bf16.mxu0 %v9502_v21 }
  0x9b   :  { %5564 = vmatmul.mubr.msk.bf16.gmra.mxu1 %vm350_vm0, %v7097_v50  ;;  %5566 = vmatmul.mubr.msk.bf16.vlgmr.msra.gmra.mxu0 %vm350_vm0, %v7061_v27 }
  0x9c   :  { %1532 = vmatpush1.bf16.msra.mxu0 %v7105_v53  ;;  %498 = vmatprep.mubr.bf16.mxu1 %v9502_v21 }
  0x9d   :  { %1533 = vmatprep.subr.bf16.mxu0 %v7107_v54  ;;  %551 = vmatprep.mubr.bf16.mxu0 %v9502_v21 }
  0xa0   :  { %1534 = vmatpush1.bf16.msra.mxu0 %v7114_v57 }
  0xa1   :  { %1535 = vmatprep.subr.bf16.mxu0 %v7118_v58 }
  0xa3   :  { %5565 = vmatmul.mubr.msk.bf16.gmra.mxu1 %vm350_vm0, %v7063_v28  ;;  %5567 = vmatmul.mubr.msk.bf16.gmra.mxu0 %vm350_vm0, %v7079_v45 }
  0xa4   :  { %1536 = vmatpush1.bf16.msra.mxu0 %v7122_v61  ;;  %614 = vmatprep.mubr.bf16.mxu1 %v9502_v21 }
  0xa5   :  { %1537 = vmatprep.subr.bf16.mxu0 %v7125_v62  ;;  %561 = vmatprep.mubr.bf16.mxu0 %v9502_v21 }
  0xa8   :  { %1538 = vmatpush1.bf16.msra.mxu0 %v7132_v1 }
  0xa9   :  { %1539 = vmatprep.subr.bf16.mxu0 %v7136_v2 }
  0xab   :  { %5570 = vmatmul.mubr.msk.bf16.vlgmr.msra.gmra.mxu1 %vm350_vm0, %v7061_v27  ;;  %5568 = vmatmul.mubr.msk.bf16.gmra.mxu0 %vm350_vm0, %v7097_v50  ;;  %v843_v27 = vld [vmem:[#allocation11 + $0x3e0] sm:$0xff] }
  0xac   :  { %1540 = vmatpush1.bf16.msra.mxu0 %v7140_v7  ;;  %1573 = vmatpush1.bf16.msra.mxu1 %v7142_v8  ;;  %v7191_v39 = vcombine.high %v839_v26, %v843_v27 }
  0xad   :  { %1541 = vmatprep.subr.bf16.mxu0 %v7145_v9  ;;  %1574 = vmatprep.subr.bf16.mxu1 %v7147_v10 }
  0xae   :  { %624 = vmatprep.mubr.bf16.mxu1 %v9502_v21  ;;  %571 = vmatprep.mubr.bf16.mxu0 %v9502_v21  ;;  %9932 = vst [vmem:[#allocation59_spill] sm:$0xff] %v7191_v39 }
  0xb0   :  { %1542 = vmatpush1.bf16.msra.mxu0 %v7155_v15  ;;  %1575 = vmatpush1.bf16.msra.mxu1 %v7157_v16 }
  0xb1   :  { %1543 = vmatprep.subr.bf16.mxu0 %v7161_v22  ;;  %1576 = vmatprep.subr.bf16.mxu1 %v7163_v23 }
  0xb3   :  { %5571 = vmatmul.mubr.msk.bf16.gmra.mxu1 %vm350_vm0, %v7079_v45  ;;  %5569 = vmatmul.mubr.msk.bf16.gmra.mxu0 %vm350_vm0, %v7063_v28 }
  0xb4   :  { %1544 = vmatpush1.bf16.msra.mxu0 %v7169_v24  ;;  %1577 = vmatpush1.bf16.msra.mxu1 %v7171_v25 }
  0xb5   :  { %1545 = vmatprep.subr.bf16.mxu0 %v7175_v31  ;;  %1578 = vmatprep.subr.bf16.mxu1 %v7177_v32 }
  0xb6   :  { %634 = vmatprep.mubr.bf16.mxu1 %v9502_v21  ;;  %1563 = vmatprep.mubr.bf16.mxu0 %v9502_v21 }
  0xb7   :  { %235 = vsyncadd [#allocation8 + $0x2], 2048  ;;  %v7199_v41 = vcombine.low %v839_v26, %v843_v27  ;;  %v7201_v43 = vcombine.low %v744_v29, %v748_v30  ;;  %v7205_v44 = vcombine.high %v831_v35, %v835_v36  ;;  %v7207_v45 = vcombine.high %v736_v37, %v740_v38  ;;  %v823_v46 = vld [vmem:[#allocation11 + $0x340] sm:$0xff]  ;;  %v728_v49 = vld [vmem:[#allocation11 + $0x48] sm:$0xff] }
  0xb8   :  { %1546 = vmatpush1.bf16.msra.mxu0 %v7185_v33  ;;  %1579 = vmatpush1.bf16.msra.mxu1 %v7187_v34  ;;  %v827_v48 = vld [vmem:[#allocation11 + $0x360] sm:$0xff]  ;;  %v732_v51 = vld [vmem:[#allocation11 + $0x68] sm:$0xff]  ;;  %v7213_v52 = vcombine.low %v831_v35, %v835_v36  ;;  %v7215_v55 = vcombine.low %v736_v37, %v740_v38  ;;  %v770_v34 = vld [vmem:[#allocation11 + $0x198] sm:$0xff] }
  0xb9   :  { %9934 = vst [vmem:[#allocation61_spill] sm:$0xff] %v7199_v41  ;;  %9935 = vst [vmem:[#allocation62_spill] sm:$0xff] %v7201_v43  ;;  %1547 = vmatprep.subr.bf16.mxu0 %v7191_v39  ;;  %1580 = vmatprep.subr.bf16.mxu1 %v7193_v40  ;;  %v7219_v56 = vcombine.high %v823_v46, %v827_v48  ;;  %v7221_v59 = vcombine.high %v728_v49, %v732_v51  ;;  %v815_v60 = vld [vmem:[#allocation11 + $0x300] sm:$0xff]  ;;  %v720_v0 = vld [vmem:[#allocation11 + $0x8] sm:$0xff] }
  0xba   :  { %9936 = vst [vmem:[#allocation63_spill] sm:$0xff] %v7205_v44  ;;  %9937 = vst [vmem:[#allocation64_spill] sm:$0xff] %v7207_v45  ;;  %v819_v63 = vld [vmem:[#allocation11 + $0x320] sm:$0xff]  ;;  %v7226_v3 = vcombine.low %v823_v46, %v827_v48  ;;  %v7228_v4 = vcombine.low %v728_v49, %v732_v51  ;;  %v840_v13 = vld [vmem:[#allocation11 + $0x3c8] sm:$0xff] }
  0xbb   :  { %5572 = vmatmul.mubr.msk.bf16.gmra.mxu1 %vm350_vm0, %v7097_v50  ;;  %9938 = vst [vmem:[#allocation65_spill] sm:$0xff] %v7213_v52  ;;  %9939 = vst [vmem:[#allocation66_spill] sm:$0xff] %v7215_v55  ;;  %v724_v50 = vld [vmem:[#allocation11 + $0x28] sm:$0xff]  ;;  %v7232_v5 = vcombine.high %v815_v60, %v819_v63  ;;  %v807_v11 = vld [vmem:[#allocation11 + $0x2c0] sm:$0xff]  ;;  %v7240_v17 = vcombine.low %v815_v60, %v819_v63 }
  0xbc   :  { %1548 = vmatpush2.bf16.msra.mxu0 %v7199_v41  ;;  %1581 = vmatpush1.bf16.msra.mxu1 %v7201_v43  ;;  %9940 = vst [vmem:[#allocation67_spill] sm:$0xff] %v7219_v56  ;;  %9941 = vst [vmem:[#allocation68_spill] sm:$0xff] %v7221_v59  ;;  %v7234_v6 = vcombine.high %v720_v0, %v724_v50  ;;  %v811_v12 = vld [vmem:[#allocation11 + $0x2e0] sm:$0xff]  ;;  %v844_v14 = vld [vmem:[#allocation11 + $0x3e8] sm:$0xff]  ;;  %v7242_v18 = vcombine.low %v720_v0, %v724_v50 }
  0xbd   :  { %1549 = vmatprep.subr.bf16.mxu0 %v7205_v44  ;;  %1582 = vmatprep.subr.bf16.mxu1 %v7207_v45  ;;  %9942 = vst [vmem:[#allocation69_spill] sm:$0xff] %v7226_v3  ;;  %9943 = vst [vmem:[#allocation70_spill] sm:$0xff] %v7228_v4  ;;  %v7246_v19 = vcombine.high %v807_v11, %v811_v12  ;;  %v7248_v20 = vcombine.high %v840_v13, %v844_v14  ;;  %v799_v26 = vld [vmem:[#allocation11 + $0x280] sm:$0xff]  ;;  %v832_v29 = vld [vmem:[#allocation11 + $0x388] sm:$0xff] }
  0xbe   :  { %644 = vmatprep.mubr.bf16.mxu1 %v9502_v21  ;;  %9944 = vst [vmem:[#allocation71_spill] sm:$0xff] %v7232_v5  ;;  %9945 = vst [vmem:[#allocation72_spill] sm:$0xff] %v7234_v6  ;;  %v803_v27 = vld [vmem:[#allocation11 + $0x2a0] sm:$0xff]  ;;  %v7253_v30 = vcombine.low %v807_v11, %v811_v12  ;;  %v7255_v35 = vcombine.low %v840_v13, %v844_v14  ;;  %v824_v48 = vld [vmem:[#allocation11 + $0x348] sm:$0xff] }
  0xbf   :  { %9946 = vst [vmem:[#allocation73_spill] sm:$0xff] %v7240_v17  ;;  %9947 = vst [vmem:[#allocation74_spill] sm:$0xff] %v7242_v18  ;;  %v7259_v36 = vcombine.high %v799_v26, %v803_v27  ;;  %v791_v38 = vld [vmem:[#allocation11 + $0x240] sm:$0xff]  ;;  %v828_v49 = vld [vmem:[#allocation11 + $0x368] sm:$0xff]  ;;  %v7265_v51 = vcombine.low %v799_v26, %v803_v27 }
  0xc0   :  { %1550 = vmatpush2.bf16.msra.mxu0 %v7213_v52  ;;  %1583 = vmatpush1.bf16.msra.mxu1 %v7215_v55  ;;  %9948 = vst [vmem:[#allocation75_spill] sm:$0xff] %v7246_v19  ;;  %9949 = vst [vmem:[#allocation76_spill] sm:$0xff] %v7248_v20  ;;  %v795_v46 = vld [vmem:[#allocation11 + $0x260] sm:$0xff]  ;;  %v7273_v0 = vcombine.high %v824_v48, %v828_v49  ;;  %v816_v12 = vld [vmem:[#allocation11 + $0x308] sm:$0xff]  ;;  %v7279_v26 = vcombine.low %v824_v48, %v828_v49 }
  0xc1   :  { %1551 = vmatprep.subr.bf16.mxu0 %v7219_v56  ;;  %1584 = vmatprep.subr.bf16.mxu1 %v7221_v59  ;;  %9950 = vst [vmem:[#allocation77_spill] sm:$0xff] %v7253_v30  ;;  %9951 = vst [vmem:[#allocation78_spill] sm:$0xff] %v7255_v35  ;;  %v7271_v63 = vcombine.high %v791_v38, %v795_v46  ;;  %v783_v50 = vld [vmem:[#allocation11 + $0x200] sm:$0xff]  ;;  %v820_v13 = vld [vmem:[#allocation11 + $0x328] sm:$0xff]  ;;  %v7277_v14 = vcombine.low %v791_v38, %v795_v46  ;;  %v9968_v59 = vmov 0  }
  0xc2   :  { %9952 = vst [vmem:[#allocation79_spill] sm:$0xff] %v7259_v36  ;;  %9954 = vst [vmem:[#allocation81_spill] sm:$0xff] %v7265_v51  ;;  %v787_v11 = vld [vmem:[#allocation11 + $0x220] sm:$0xff]  ;;  %v7291_v46 = vcombine.low %v816_v12, %v820_v13  ;;  %v753_v55 = vld [vmem:[#allocation11 + $0x110] sm:$0xff] }
  0xc3   :  { %5573 = vmatmul.mubr.msk.bf16.gmra.mxu1 %vm350_vm0, %v7063_v28  ;;  %v836_v28 = vld [vmem:[#allocation11 + $0x3a8] sm:$0xff]  ;;  %9956 = vst [vmem:[#allocation83_spill] sm:$0xff] %v7271_v63  ;;  %9957 = vst [vmem:[#allocation84_spill] sm:$0xff] %v7273_v0  ;;  %v7283_v27 = vcombine.high %v783_v50, %v787_v11  ;;  %v7289_v38 = vcombine.low %v783_v50, %v787_v11  ;;  %v757_v45 = vld [vmem:[#allocation11 + $0x130] sm:$0xff] }
  0xc4   :  { %1552 = vmatpush2.bf16.msra.mxu0 %v7226_v3  ;;  %1585 = vmatpush1.bf16.msra.mxu1 %v7228_v4  ;;  %v7261_v37 = vcombine.high %v832_v29, %v836_v28  ;;  %v7267_v60 = vcombine.low %v832_v29, %v836_v28  ;;  %9958 = vst [vmem:[#allocation85_spill] sm:$0xff] %v7277_v14  ;;  %9959 = vst [vmem:[#allocation86_spill] sm:$0xff] %v7279_v26  ;;  %v808_v28 = vld [vmem:[#allocation11 + $0x2c8] sm:$0xff]  ;;  %v765_v4 = vld [vmem:[#allocation11 + $0x170] sm:$0xff] }
  0xc5   :  { %1553 = vmatprep.subr.bf16.mxu0 %v7232_v5  ;;  %1586 = vmatprep.subr.bf16.mxu1 %v7234_v6  ;;  %9960 = vst [vmem:[#allocation87_spill] sm:$0xff] %v7283_v27  ;;  %v7285_v29 = vcombine.high %v816_v12, %v820_v13  ;;  %9962 = vst [vmem:[#allocation89_spill] sm:$0xff] %v7289_v38  ;;  %v761_v6 = vld [vmem:[#allocation11 + $0x150] sm:$0xff]  ;;  %v778_v43 = vld [vmem:[#allocation11 + $0x1d8] sm:$0xff] }
  0xc6   :  { %1604 = vmatprep.mubr.bf16.mxu1 %v9502_v21  ;;  %9953 = vst [vmem:[#allocation80_spill] sm:$0xff] %v7261_v37  ;;  %9955 = vst [vmem:[#allocation82_spill] sm:$0xff] %v7267_v60  ;;  %v812_v21 = vld [vmem:[#allocation11 + $0x2e8] sm:$0xff]  ;;  %v782_v40 = vld [vmem:[#allocation11 + $0x1f8] sm:$0xff] }
  0xc7   :  { %9961 = vst [vmem:[#allocation88_spill] sm:$0xff] %v7285_v29  ;;  %9963 = vst [vmem:[#allocation90_spill] sm:$0xff] %v7291_v46  ;;  %v7295_v48 = vcombine.high %v808_v28, %v812_v21  ;;  %v7301_v50 = vcombine.low %v808_v28, %v812_v21  ;;  %v7322_v28 = vcombine.high %v761_v6, %v765_v4  ;;  %v774_v32 = vld [vmem:[#allocation11 + $0x1b8] sm:$0xff] }
  0xc8   :  { %1554 = vmatpush2.bf16.msra.mxu0 %v7240_v17  ;;  %1587 = vmatpush1.bf16.msra.mxu1 %v7242_v18  ;;  %v773_v18 = vld [vmem:[#allocation11 + $0x1b0] sm:$0xff] }
  0xc9   :  { %1555 = vmatprep.subr.bf16.mxu0 %v7246_v19  ;;  %1588 = vmatprep.subr.bf16.mxu1 %v7248_v20  ;;  %9964 = vst [vmem:[#allocation91_spill] sm:$0xff] %v7295_v48  ;;  %v769_v20 = vld [vmem:[#allocation11 + $0x190] sm:$0xff]  ;;  %9966 = vst [vmem:[#allocation93_spill] sm:$0xff] %v7301_v50 }
  0xca   :  { %v7309_v13 = vcombine.high %v769_v20, %v773_v18 }
  0xcc   :  { %1556 = vmatpush2.bf16.msra.mxu0 %v7253_v30  ;;  %1589 = vmatpush2.bf16.msra.mxu1 %v7255_v35  ;;  %v781_v35 = vld [vmem:[#allocation11 + $0x1f0] sm:$0xff] }
  0xcd   :  { %1557 = vmatprep.subr.bf16.mxu0 %v7259_v36  ;;  %1590 = vmatprep.subr.bf16.mxu1 %v7261_v37  ;;  %v777_v37 = vld [vmem:[#allocation11 + $0x1d0] sm:$0xff] }
  0xce   :  { %v7297_v49 = vcombine.high %v777_v37, %v781_v35  ;;  %v7303_v11 = vcombine.low %v777_v37, %v781_v35  ;;  %v7316_v35 = vcombine.low %v769_v20, %v773_v18  ;;  %v7329_v20 = vcombine.low %v761_v6, %v765_v4 }
  0xcf   :  { %v7341_v4 = vcombine.low %v753_v55, %v757_v45 }
  0xd0   :  { %1558 = vmatpush2.bf16.msra.mxu0 %v7265_v51  ;;  %1591 = vmatpush2.bf16.msra.mxu1 %v7267_v60  ;;  %9965 = vst [vmem:[#allocation92_spill] sm:$0xff] %v7297_v49  ;;  %v804_v60 = vld [vmem:[#allocation11 + $0x2a8] sm:$0xff]  ;;  %9972 = vst [vmem:[#allocation98_spill] sm:$0xff] %v7329_v20 }
  0xd1   :  { %1559 = vmatprep.subr.bf16.mxu0 %v7271_v63  ;;  %1592 = vmatprep.subr.bf16.mxu1 %v7273_v0  ;;  %v800_v0 = vld [vmem:[#allocation11 + $0x288] sm:$0xff]  ;;  %9976 = vst [vmem:[#allocation102_spill] sm:$0xff] %v7341_v4 }
  0xd2   :  { %v7307_v12 = vcombine.high %v800_v0, %v804_v60  ;;  %v7314_v21 = vcombine.low %v800_v0, %v804_v60  ;;  %v7335_v0 = vcombine.high %v753_v55, %v757_v45  ;;  %v7353_v45 = vcombine.low %v778_v43, %v782_v40 }
  0xd4   :  { %1560 = vmatpush2.bf16.msra.mxu0 %v7277_v14  ;;  %1593 = vmatpush2.bf16.msra.mxu1 %v7279_v26  ;;  %9967 = vst [vmem:[#allocation94_spill] sm:$0xff] %v7307_v12  ;;  %v796_v26 = vld [vmem:[#allocation11 + $0x268] sm:$0xff]  ;;  %9969 = vst [vmem:[#allocation95_spill] sm:$0xff] %v7314_v21 }
  0xd5   :  { %1561 = vmatprep.subr.bf16.mxu0 %v7283_v27  ;;  %1594 = vmatprep.subr.bf16.mxu1 %v7285_v29  ;;  %v792_v29 = vld [vmem:[#allocation11 + $0x248] sm:$0xff]  ;;  %9974 = vst [vmem:[#allocation100_spill] sm:$0xff] %v7335_v0  ;;  %9980 = vst [vmem:[#allocation106_spill] sm:$0xff] %v7353_v45 }
  0xd6   :  { %v7320_v37 = vcombine.high %v792_v29, %v796_v26  ;;  %v7327_v18 = vcombine.low %v792_v29, %v796_v26  ;;  %v7347_v29 = vcombine.high %v778_v43, %v782_v40  ;;  %v7366_v43 = vcombine.low %v770_v34, %v774_v32 }
  0xd8   :  { %1562 = vmatpush2.bf16.msra.mxu0 %v7289_v38  ;;  %1595 = vmatpush2.bf16.msra.mxu1 %v7291_v46  ;;  %9970 = vst [vmem:[#allocation96_spill] sm:$0xff] %v7320_v37  ;;  %v788_v46 = vld [vmem:[#allocation11 + $0x228] sm:$0xff]  ;;  %9971 = vst [vmem:[#allocation97_spill] sm:$0xff] %v7327_v18 }
  0xd9   :  { %1596 = vmatprep.subr.bf16.mxu1 %v7295_v48  ;;  %1613 = vmatprep.subr.bf16.mxu0 %v7297_v49  ;;  %v784_v48 = vld [vmem:[#allocation11 + $0x208] sm:$0xff]  ;;  %9978 = vst [vmem:[#allocation104_spill] sm:$0xff] %v7347_v29  ;;  %9984 = vst [vmem:[#allocation110_spill] sm:$0xff] %v7366_v43 }
  0xda   :  { %v7333_v60 = vcombine.high %v784_v48, %v788_v46  ;;  %v7339_v26 = vcombine.low %v784_v48, %v788_v46  ;;  %v7359_v48 = vcombine.high %v770_v34, %v774_v32 }
  0xdb   :  { %1564 = vmatmul.mubr.bf16.vlgmr.msra.gmra.mxu0 %v9968_v59 }
  0xdc   :  { %1597 = vmatpush2.bf16.msra.mxu1 %v7301_v50  ;;  %1614 = vmatpush1.bf16.msra.mxu0 %v7303_v11  ;;  %9973 = vst [vmem:[#allocation99_spill] sm:$0xff] %v7333_v60  ;;  %v749_v50 = vld [vmem:[#allocation11 + $0xf0] sm:$0xff]  ;;  %9975 = vst [vmem:[#allocation101_spill] sm:$0xff] %v7339_v26 }
  0xdd   :  { %1598 = vmatprep.subr.bf16.mxu1 %v7307_v12  ;;  %1615 = vmatprep.subr.bf16.mxu0 %v7309_v13  ;;  %v745_v12 = vld [vmem:[#allocation11 + $0xd0] sm:$0xff]  ;;  %9982 = vst [vmem:[#allocation108_spill] sm:$0xff] %v7359_v48 }
  0xde   :  { %1645 = vmatprep.mubr.bf16.mxu0 %v9968_v59  ;;  %v7345_v6 = vcombine.high %v745_v12, %v749_v50  ;;  %v7351_v46 = vcombine.low %v745_v12, %v749_v50 }
  0xe0   :  { %1599 = vmatpush2.bf16.msra.mxu1 %v7314_v21  ;;  %1616 = vmatpush1.bf16.msra.mxu0 %v7316_v35  ;;  %9977 = vst [vmem:[#allocation103_spill] sm:$0xff] %v7345_v6  ;;  %v741_v21 = vld [vmem:[#allocation11 + $0xb0] sm:$0xff]  ;;  %9979 = vst [vmem:[#allocation105_spill] sm:$0xff] %v7351_v46 }
  0xe1   :  { %1600 = vmatprep.subr.bf16.mxu1 %v7320_v37  ;;  %1617 = vmatprep.subr.bf16.mxu0 %v7322_v28  ;;  %v737_v37 = vld [vmem:[#allocation11 + $0x90] sm:$0xff] }
  0xe2   :  { %v7357_v55 = vcombine.high %v737_v37, %v741_v21  ;;  %v7364_v40 = vcombine.low %v737_v37, %v741_v21 }
  0xe4   :  { %1601 = vmatpush2.bf16.msra.mxu1 %v7327_v18  ;;  %1618 = vmatpush1.bf16.msra.mxu0 %v7329_v20  ;;  %9981 = vst [vmem:[#allocation107_spill] sm:$0xff] %v7357_v55  ;;  %v733_v18 = vld [vmem:[#allocation11 + $0x70] sm:$0xff]  ;;  %v766_v20 = vld [vmem:[#allocation11 + $0x178] sm:$0xff]  ;;  %9983 = vst [vmem:[#allocation109_spill] sm:$0xff] %v7364_v40 }
  0xe5   :  { %1602 = vmatprep.subr.bf16.mxu1 %v7333_v60  ;;  %1619 = vmatprep.subr.bf16.mxu0 %v7335_v0  ;;  %v729_v60 = vld [vmem:[#allocation11 + $0x50] sm:$0xff]  ;;  %v762_v0 = vld [vmem:[#allocation11 + $0x158] sm:$0xff] }
  0xe6   :  { %v7370_v50 = vcombine.high %v729_v60, %v733_v18  ;;  %v7372_v12 = vcombine.high %v762_v0, %v766_v20  ;;  %v7377_v32 = vcombine.low %v729_v60, %v733_v18  ;;  %v7379_v34 = vcombine.low %v762_v0, %v766_v20 }
  0xe8   :  { %1603 = vmatpush2.bf16.msra.mxu1 %v7339_v26  ;;  %1620 = vmatpush1.bf16.msra.mxu0 %v7341_v4  ;;  %9985 = vst [vmem:[#allocation111_spill] sm:$0xff] %v7370_v50  ;;  %9986 = vst [vmem:[#allocation112_spill] sm:$0xff] %v7372_v12  ;;  %v725_v26 = vld [vmem:[#allocation11 + $0x30] sm:$0xff]  ;;  %v758_v4 = vld [vmem:[#allocation11 + $0x138] sm:$0xff] }
  0xe9   :  { %1621 = vmatprep.subr.bf16.mxu0 %v7345_v6  ;;  %1654 = vmatprep.subr.bf16.mxu1 %v7347_v29  ;;  %v721_v29 = vld [vmem:[#allocation11 + $0x10] sm:$0xff]  ;;  %v754_v6 = vld [vmem:[#allocation11 + $0x118] sm:$0xff]  ;;  %9987 = vst [vmem:[#allocation113_spill] sm:$0xff] %v7377_v32  ;;  %9988 = vst [vmem:[#allocation114_spill] sm:$0xff] %v7379_v34 }
  0xea   :  { %v7383_v21 = vcombine.high %v721_v29, %v725_v26  ;;  %v7385_v37 = vcombine.high %v754_v6, %v758_v4  ;;  %v7389_v18 = vcombine.low %v721_v29, %v725_v26  ;;  %v7391_v20 = vcombine.low %v754_v6, %v758_v4 }
  0xeb   :  { %1605 = vmatmul.mubr.bf16.vlgmr.msra.gmra.mxu1 %v9968_v59 }
  0xec   :  { %1622 = vmatpush1.bf16.msra.mxu0 %v7351_v46  ;;  %1655 = vmatpush1.bf16.msra.mxu1 %v7353_v45  ;;  %9989 = vst [vmem:[#allocation115_spill] sm:$0xff] %v7383_v21  ;;  %9990 = vst [vmem:[#allocation116_spill] sm:$0xff] %v7385_v37  ;;  %v845_v45 = vld [vmem:[#allocation11 + $0x3f0] sm:$0xff]  ;;  %v750_v46 = vld [vmem:[#allocation11 + $0xf8] sm:$0xff] }
  0xed   :  { %1623 = vmatprep.subr.bf16.mxu0 %v7357_v55  ;;  %1656 = vmatprep.subr.bf16.mxu1 %v7359_v48  ;;  %v841_v48 = vld [vmem:[#allocation11 + $0x3d0] sm:$0xff]  ;;  %v746_v55 = vld [vmem:[#allocation11 + $0xd8] sm:$0xff]  ;;  %9991 = vst [vmem:[#allocation117_spill] sm:$0xff] %v7389_v18  ;;  %9992 = vst [vmem:[#allocation118_spill] sm:$0xff] %v7391_v20 }
  0xee   :  { %1686 = vmatprep.mubr.bf16.mxu1 %v9968_v59  ;;  %v7395_v60 = vcombine.high %v841_v48, %v845_v45  ;;  %v7397_v0 = vcombine.high %v746_v55, %v750_v46  ;;  %v7401_v26 = vcombine.low %v841_v48, %v845_v45  ;;  %v7403_v4 = vcombine.low %v746_v55, %v750_v46 }
  0xf0   :  { %1624 = vmatpush1.bf16.msra.mxu0 %v7364_v40  ;;  %1657 = vmatpush1.bf16.msra.mxu1 %v7366_v43  ;;  %9993 = vst [vmem:[#allocation119_spill] sm:$0xff] %v7395_v60  ;;  %9994 = vst [vmem:[#allocation120_spill] sm:$0xff] %v7397_v0  ;;  %v837_v43 = vld [vmem:[#allocation11 + $0x3b0] sm:$0xff]  ;;  %v742_v40 = vld [vmem:[#allocation11 + $0xb8] sm:$0xff] }
  0xf1   :  { %1625 = vmatprep.subr.bf16.mxu0 %v7370_v50  ;;  %1658 = vmatprep.subr.bf16.mxu1 %v7372_v12  ;;  %v833_v12 = vld [vmem:[#allocation11 + $0x390] sm:$0xff]  ;;  %v738_v50 = vld [vmem:[#allocation11 + $0x98] sm:$0xff]  ;;  %9995 = vst [vmem:[#allocation121_spill] sm:$0xff] %v7401_v26  ;;  %9996 = vst [vmem:[#allocation122_spill] sm:$0xff] %v7403_v4 }
  0xf2   :  { %v7407_v6 = vcombine.high %v833_v12, %v837_v43  ;;  %v7409_v29 = vcombine.high %v738_v50, %v742_v40  ;;  %v7413_v45 = vcombine.low %v833_v12, %v837_v43  ;;  %v7415_v46 = vcombine.low %v738_v50, %v742_v40 }
  0xf4   :  { %1626 = vmatpush1.bf16.msra.mxu0 %v7377_v32  ;;  %1659 = vmatpush1.bf16.msra.mxu1 %v7379_v34  ;;  %9997 = vst [vmem:[#allocation123_spill] sm:$0xff] %v7407_v6  ;;  %9998 = vst [vmem:[#allocation124_spill] sm:$0xff] %v7409_v29  ;;  %v829_v34 = vld [vmem:[#allocation11 + $0x370] sm:$0xff]  ;;  %v734_v32 = vld [vmem:[#allocation11 + $0x78] sm:$0xff] }
  0xf5   :  { %1627 = vmatprep.subr.bf16.mxu0 %v7383_v21  ;;  %1660 = vmatprep.subr.bf16.mxu1 %v7385_v37  ;;  %v825_v37 = vld [vmem:[#allocation11 + $0x350] sm:$0xff]  ;;  %v730_v21 = vld [vmem:[#allocation11 + $0x58] sm:$0xff]  ;;  %9999 = vst [vmem:[#allocation125_spill] sm:$0xff] %v7413_v45  ;;  %10000 = vst [vmem:[#allocation126_spill] sm:$0xff] %v7415_v46 }
  0xf6   :  { %v7419_v55 = vcombine.high %v825_v37, %v829_v34  ;;  %v7421_v48 = vcombine.high %v730_v21, %v734_v32  ;;  %v7425_v43 = vcombine.low %v825_v37, %v829_v34  ;;  %v7427_v40 = vcombine.low %v730_v21, %v734_v32 }
  0xf8   :  { %1628 = vmatpush1.bf16.msra.mxu0 %v7389_v18  ;;  %1661 = vmatpush1.bf16.msra.mxu1 %v7391_v20  ;;  %10001 = vst [vmem:[#allocation127_spill] sm:$0xff] %v7419_v55  ;;  %10002 = vst [vmem:[#allocation128_spill] sm:$0xff] %v7421_v48  ;;  %v821_v20 = vld [vmem:[#allocation11 + $0x330] sm:$0xff]  ;;  %v726_v18 = vld [vmem:[#allocation11 + $0x38] sm:$0xff] }
  0xf9   :  { %1629 = vmatprep.subr.bf16.mxu0 %v7395_v60  ;;  %1662 = vmatprep.subr.bf16.mxu1 %v7397_v0  ;;  %v817_v0 = vld [vmem:[#allocation11 + $0x310] sm:$0xff]  ;;  %v722_v60 = vld [vmem:[#allocation11 + $0x18] sm:$0xff]  ;;  %10003 = vst [vmem:[#allocation129_spill] sm:$0xff] %v7425_v43  ;;  %10004 = vst [vmem:[#allocation130_spill] sm:$0xff] %v7427_v40 }
  0xfa   :  { %v7431_v50 = vcombine.high %v817_v0, %v821_v20  ;;  %v7433_v12 = vcombine.high %v722_v60, %v726_v18  ;;  %v7437_v34 = vcombine.low %v817_v0, %v821_v20  ;;  %v7439_v32 = vcombine.low %v722_v60, %v726_v18 }
  0xfc   :  { %1630 = vmatpush2.bf16.msra.mxu0 %v7401_v26  ;;  %1663 = vmatpush1.bf16.msra.mxu1 %v7403_v4  ;;  %10005 = vst [vmem:[#allocation131_spill] sm:$0xff] %v7431_v50  ;;  %10006 = vst [vmem:[#allocation132_spill] sm:$0xff] %v7433_v12  ;;  %v813_v4 = vld [vmem:[#allocation11 + $0x2f0] sm:$0xff]  ;;  %v846_v26 = vld [vmem:[#allocation11 + $0x3f8] sm:$0xff] }
  0xfd   :  { %1631 = vmatprep.subr.bf16.mxu0 %v7407_v6  ;;  %1664 = vmatprep.subr.bf16.mxu1 %v7409_v29  ;;  %v809_v29 = vld [vmem:[#allocation11 + $0x2d0] sm:$0xff]  ;;  %v842_v6 = vld [vmem:[#allocation11 + $0x3d8] sm:$0xff]  ;;  %10007 = vst [vmem:[#allocation133_spill] sm:$0xff] %v7437_v34  ;;  %10008 = vst [vmem:[#allocation134_spill] sm:$0xff] %v7439_v32 }
  0xfe   :  { %v7443_v21 = vcombine.high %v809_v29, %v813_v4  ;;  %v7445_v37 = vcombine.high %v842_v6, %v846_v26  ;;  %v7449_v20 = vcombine.low %v809_v29, %v813_v4  ;;  %v7451_v18 = vcombine.low %v842_v6, %v846_v26 }
 0x100   :  { %1632 = vmatpush2.bf16.msra.mxu0 %v7413_v45  ;;  %1665 = vmatpush1.bf16.msra.mxu1 %v7415_v46  ;;  %10009 = vst [vmem:[#allocation135_spill] sm:$0xff] %v7443_v21  ;;  %10010 = vst [vmem:[#allocation136_spill] sm:$0xff] %v7445_v37  ;;  %v805_v46 = vld [vmem:[#allocation11 + $0x2b0] sm:$0xff]  ;;  %v838_v45 = vld [vmem:[#allocation11 + $0x3b8] sm:$0xff] }
 0x101   :  { %1633 = vmatprep.subr.bf16.mxu0 %v7419_v55  ;;  %1666 = vmatprep.subr.bf16.mxu1 %v7421_v48  ;;  %v801_v48 = vld [vmem:[#allocation11 + $0x290] sm:$0xff]  ;;  %v834_v55 = vld [vmem:[#allocation11 + $0x398] sm:$0xff]  ;;  %10011 = vst [vmem:[#allocation137_spill] sm:$0xff] %v7449_v20  ;;  %10012 = vst [vmem:[#allocation138_spill] sm:$0xff] %v7451_v18 }
 0x102   :  { %v7455_v60 = vcombine.high %v801_v48, %v805_v46  ;;  %v7457_v0 = vcombine.high %v834_v55, %v838_v45  ;;  %v7461_v4 = vcombine.low %v801_v48, %v805_v46  ;;  %v7463_v26 = vcombine.low %v834_v55, %v838_v45 }
 0x104   :  { %1634 = vmatpush2.bf16.msra.mxu0 %v7425_v43  ;;  %1667 = vmatpush1.bf16.msra.mxu1 %v7427_v40  ;;  %10013 = vst [vmem:[#allocation139_spill] sm:$0xff] %v7455_v60  ;;  %10014 = vst [vmem:[#allocation140_spill] sm:$0xff] %v7457_v0  ;;  %v797_v40 = vld [vmem:[#allocation11 + $0x270] sm:$0xff]  ;;  %v830_v43 = vld [vmem:[#allocation11 + $0x378] sm:$0xff] }
 0x105   :  { %1635 = vmatprep.subr.bf16.mxu0 %v7431_v50  ;;  %1668 = vmatprep.subr.bf16.mxu1 %v7433_v12  ;;  %v793_v12 = vld [vmem:[#allocation11 + $0x250] sm:$0xff]  ;;  %v826_v50 = vld [vmem:[#allocation11 + $0x358] sm:$0xff]  ;;  %10015 = vst [vmem:[#allocation141_spill] sm:$0xff] %v7461_v4  ;;  %10016 = vst [vmem:[#allocation142_spill] sm:$0xff] %v7463_v26 }
 0x106   :  { %v7467_v6 = vcombine.high %v793_v12, %v797_v40  ;;  %v7469_v29 = vcombine.high %v826_v50, %v830_v43  ;;  %v7473_v46 = vcombine.low %v793_v12, %v797_v40  ;;  %v7475_v45 = vcombine.low %v826_v50, %v830_v43  ;;  %v802_v50 = vld [vmem:[#allocation11 + $0x298] sm:$0xff] }
 0x107   :  { %v806_v12 = vld [vmem:[#allocation11 + $0x2b8] sm:$0xff] }
 0x108   :  { %1636 = vmatpush2.bf16.msra.mxu0 %v7437_v34  ;;  %1669 = vmatpush1.bf16.msra.mxu1 %v7439_v32  ;;  %10017 = vst [vmem:[#allocation143_spill] sm:$0xff] %v7467_v6  ;;  %10018 = vst [vmem:[#allocation144_spill] sm:$0xff] %v7469_v29  ;;  %v789_v32 = vld [vmem:[#allocation11 + $0x230] sm:$0xff]  ;;  %v822_v34 = vld [vmem:[#allocation11 + $0x338] sm:$0xff] }
 0x109   :  { %1637 = vmatprep.subr.bf16.mxu0 %v7443_v21  ;;  %1670 = vmatprep.subr.bf16.mxu1 %v7445_v37  ;;  %v785_v37 = vld [vmem:[#allocation11 + $0x210] sm:$0xff]  ;;  %v818_v21 = vld [vmem:[#allocation11 + $0x318] sm:$0xff]  ;;  %10019 = vst [vmem:[#allocation145_spill] sm:$0xff] %v7473_v46  ;;  %10020 = vst [vmem:[#allocation146_spill] sm:$0xff] %v7475_v45 }
 0x10a   :  { %v7479_v55 = vcombine.high %v785_v37, %v789_v32  ;;  %v7481_v48 = vcombine.high %v818_v21, %v822_v34  ;;  %v7487_v40 = vcombine.low %v818_v21, %v822_v34  ;;  %v794_v34 = vld [vmem:[#allocation11 + $0x258] sm:$0xff] }
 0x10b   :  { %v798_v21 = vld [vmem:[#allocation11 + $0x278] sm:$0xff] }
 0x10c   :  { %1638 = vmatpush2.bf16.msra.mxu0 %v7449_v20  ;;  %1671 = vmatpush2.bf16.msra.mxu1 %v7451_v18  ;;  %10021 = vst [vmem:[#allocation147_spill] sm:$0xff] %v7479_v55  ;;  %10022 = vst [vmem:[#allocation148_spill] sm:$0xff] %v7481_v48  ;;  %v814_v18 = vld [vmem:[#allocation11 + $0x2f8] sm:$0xff] }
 0x10d   :  { %1639 = vmatprep.subr.bf16.mxu0 %v7455_v60  ;;  %1672 = vmatprep.subr.bf16.mxu1 %v7457_v0  ;;  %v810_v0 = vld [vmem:[#allocation11 + $0x2d8] sm:$0xff]  ;;  %10024 = vst [vmem:[#allocation150_spill] sm:$0xff] %v7487_v40 }
 0x10e   :  { %v7491_v43 = vcombine.high %v810_v0, %v814_v18 }
 0x110   :  { %1640 = vmatpush2.bf16.msra.mxu0 %v7461_v4  ;;  %1673 = vmatpush2.bf16.msra.mxu1 %v7463_v26  ;;  %v7485_v4 = vcombine.low %v785_v37, %v789_v32  ;;  %10025 = vst [vmem:[#allocation151_spill] sm:$0xff] %v7491_v43  ;;  %v7498_v32 = vcombine.high %v802_v50, %v806_v12 }
 0x111   :  { %1641 = vmatprep.subr.bf16.mxu0 %v7467_v6  ;;  %1674 = vmatprep.subr.bf16.mxu1 %v7469_v29  ;;  %v7495_v29 = vcombine.low %v810_v0, %v814_v18  ;;  %v7502_v37 = vcombine.low %v802_v50, %v806_v12  ;;  %v7508_v18 = vcombine.low %v794_v34, %v798_v21  ;;  %v270_v50 = vlaneseq }
 0x112   :  { %10023 = vst [vmem:[#allocation149_spill] sm:$0xff] %v7485_v4  ;;  %10027 = vst [vmem:[#allocation153_spill] sm:$0xff] %v7498_v32 }
 0x113   :  { %10026 = vst [vmem:[#allocation152_spill] sm:$0xff] %v7495_v29  ;;  %10028 = vst [vmem:[#allocation154_spill] sm:$0xff] %v7502_v37 }
 0x114   :  { %1642 = vmatpush2.bf16.msra.mxu0 %v7473_v46  ;;  %1675 = vmatpush2.bf16.msra.mxu1 %v7475_v45  ;;  %v786_v45 = vld [vmem:[#allocation11 + $0x218] sm:$0xff]  ;;  %10030 = vst [vmem:[#allocation156_spill] sm:$0xff] %v7508_v18 }
 0x115   :  { %1643 = vmatprep.subr.bf16.mxu0 %v7479_v55  ;;  %1676 = vmatprep.subr.bf16.mxu1 %v7481_v48  ;;  %v7505_v48 = vcombine.high %v794_v34, %v798_v21 }
 0x117   :  { %10029 = vst [vmem:[#allocation155_spill] sm:$0xff] %v7505_v48 }
 0x118   :  { %1644 = vmatpush2.bf16.msra.mxu0 %v7485_v4  ;;  %1677 = vmatpush2.bf16.msra.mxu1 %v7487_v40  ;;  %v790_v40 = vld [vmem:[#allocation11 + $0x238] sm:$0xff] }
 0x119   :  { %1678 = vmatprep.subr.bf16.mxu1 %v7491_v43  ;;  %v7511_v0 = vcombine.high %v786_v45, %v790_v40  ;;  %v7514_v43 = vcombine.low %v786_v45, %v790_v40  ;;  %v7526_v45 = vshrl.u32 %v270_v50, 7  ;;  %v7534_v40 = vld [vmem:[#allocation13] sm:$0xff] }
 0x11b   :  { %1646 = vmatmul.mubr.bf16.vlgmr.msra.gmra.mxu0 %v9968_v59  ;;  %10031 = vst [vmem:[#allocation157_spill] sm:$0xff] %v7511_v0  ;;  %10032 = vst [vmem:[#allocation158_spill] sm:$0xff] %v7514_v43  ;;  %v7538_v12 = vsub.s32 1, %v7526_v45 }
 0x11c   :  { %1679 = vmatpush2.bf16.msra.mxu1 %v7495_v29  ;;  %10033 = vst [vmem:[#allocation159_spill] sm:$0xff] %v7526_v45  ;;  %v7843_v29 = vld [vmem:[#allocation14 + $0xb0] ss:$8 sps:$4 sm:$0xff]  }
 0x11d   :  { %1680 = vmatprep.subr.bf16.mxu1 %v7498_v32  ;;  %10035 = vst [vmem:[#allocation161_spill] sm:$0xff] %v7538_v12  ;;  %v7548_v21 = vrot.slane %v7534_v40, %v7538_v12  ;;  %10099 = vst [vmem:[#allocation224_spill] sm:$0xff] %v7843_v29 }
 0x11f   :  { %10036 = vst [vmem:[#allocation162_spill] sm:$0xff] %v7548_v21 }
 0x120   :  { %1681 = vmatpush2.bf16.msra.mxu1 %v7502_v37 }
 0x121   :  { %1682 = vmatprep.subr.bf16.mxu1 %v7505_v48  ;;  %v7807_v48 = vld [vmem:[#allocation14 + $0xe0] ss:$8 sps:$4 sm:$0xff]  }
 0x122   :  { %10087 = vst [vmem:[#allocation212_spill] sm:$0xff] %v7807_v48 }
 0x124   :  { %1683 = vmatpush2.bf16.msra.mxu1 %v7508_v18 }
 0x125   :  { %1684 = vmatprep.subr.bf16.mxu1 %v7511_v0 }
 0x128   :  { %1685 = vmatpush2.bf16.msra.mxu1 %v7514_v43 }
 0x129   :  { %1981 = vmatprep.subr.bf16.mxu1 %v7076_v42 }
 0x12b   :  { %1687 = vmatmul.mubr.bf16.vlgmr.msra.gmra.mxu1 %v9968_v59  ;;  %v7531_v59 = vsub.s32 0, %v7526_v45 }
 0x12c   :  { %1982 = vmatpush1.bf16.msra.mxu1 %v7105_v53  ;;  %v7760_v53 = vld [vmem:[#allocation14 + $0x4] ss:$8 sps:$4 sm:$0xff]  }
 0x12d   :  { %1983 = vmatprep.subr.bf16.mxu1 %v7107_v54  ;;  %10034 = vst [vmem:[#allocation160_spill] sm:$0xff] %v7531_v59  ;;  %v7542_v34 = vrot.slane %v7534_v40, %v7531_v59 }
 0x130   :  { %1984 = vmatpush1.bf16.msra.mxu1 %v7114_v57  ;;  %v7707_v57 = vld [vmem:[#allocation14 + $0x30] ss:$8 sps:$4 sm:$0xff]  }
 0x131   :  { %1985 = vmatprep.subr.bf16.mxu1 %v7118_v58  ;;  %v7687_v58 = vld [vmem:[#allocation14 + $0x40] ss:$8 sps:$4 sm:$0xff]  }
 0x134   :  { %1986 = vmatpush1.bf16.msra.mxu1 %v7122_v61  ;;  %v7627_v61 = vld [vmem:[#allocation14 + $0x60] ss:$8 sps:$4 sm:$0xff]  }
 0x135   :  { %1987 = vmatprep.subr.bf16.mxu1 %v7125_v62 }
 0x138   :  { %1988 = vmatpush1.bf16.msra.mxu1 %v7132_v1 }
 0x139   :  { %1989 = vmatprep.subr.bf16.mxu1 %v7136_v2 }
 0x13c   :  { %1990 = vmatpush1.bf16.msra.mxu1 %v7140_v7 }
 0x13d   :  { %1991 = vmatprep.subr.bf16.mxu1 %v7145_v9 }
 0x140   :  { %1992 = vmatpush1.bf16.msra.mxu1 %v7155_v15 }
 0x141   :  { %1993 = vmatprep.subr.bf16.mxu1 %v7161_v22 }
 0x143   :  { %v427_v50 = vpop.f32.mrf.mxu1  ;;  %v7550_v7 = vpop.f32.mrf.mxu0 }
 0x144   :  { %v7553_v9 = vadd.f32 %v427_v50, %v7542_v34  ;;  %1994 = vmatpush1.bf16.msra.mxu1 %v7169_v24 }
 0x145   :  { %v429_v2 = vpop.f32.mrf.mxu1  ;;  %v7556_v1 = vpop.f32.mrf.mxu0  ;;  %1995 = vmatprep.subr.bf16.mxu1 %v7175_v31  ;;  %v9672_v31 = vsub.s32 2, %v7526_v45 }
 0x146   :  { %10037 = vst [vmem:[#allocation163_spill] sm:$0xff] %v7553_v9  ;;  %v7560_v59 = vadd.f32 %v429_v2, %v7548_v21 }
 0x147   :  { %v431_v22 = vpop.f32.mrf.mxu1  ;;  %v401_v15 = vpop.f32.mrf.mxu0 }
 0x148   :  { %10038 = vst [vmem:[#allocation164_spill] sm:$0xff] %v7560_v59  ;;  %v7563_v12 = vadd.f32 %v431_v22, %v7542_v34  ;;  %v7566_v62 = vadd.f32 %v401_v15, %v7542_v34  ;;  %1996 = vmatpush1.bf16.msra.mxu1 %v7185_v33  ;;  %v7606_v33 = vld [vmem:[#allocation14 + $0x74] ss:$8 sps:$4 sm:$0xff]  }
 0x149   :  { %v7569_v50 = vpop.f32.mrf.mxu1  ;;  %v403_v9 = vpop.f32.mrf.mxu0  ;;  %1997 = vmatprep.subr.bf16.mxu1 %v7191_v39  ;;  %1924 = vmatprep.subr.bf16.mxu0 %v7606_v33 }
 0x14a   :  { %10039 = vst [vmem:[#allocation165_spill] sm:$0xff] %v7563_v12  ;;  %10040 = vst [vmem:[#allocation166_spill] sm:$0xff] %v7566_v62  ;;  %v7574_v2 = vadd.f32 %v403_v9, %v7548_v21  ;;  %v7589_v9 = vrot.slane %v7534_v40, %v9672_v31 }
 0x14b   :  { %10041 = vst [vmem:[#allocation167_spill] sm:$0xff] %v7569_v50  ;;  %v7576_v59 = vpop.f32.mrf.mxu1  ;;  %v407_v24 = vpop.f32.mrf.mxu0 }
 0x14c   :  { %10042 = vst [vmem:[#allocation168_spill] sm:$0xff] %v7574_v2  ;;  %v7580_v15 = vadd.f32 %v407_v24, %v7542_v34  ;;  %1998 = vmatpush2.bf16.msra.mxu1 %v7199_v41  ;;  %v10045_v24 = vsub.s32 3, %v7526_v45  ;;  %v471_v26 = vadd.f32 %v7576_v59, %v7589_v9 }
 0x14d   :  { %v7583_v12 = vpop.f32.mrf.mxu1  ;;  %v409_v50 = vpop.f32.mrf.mxu0  ;;  %1999 = vmatprep.subr.bf16.mxu1 %v7205_v44 }
 0x14e   :  { %10043 = vst [vmem:[#allocation169_spill] sm:$0xff] %v7580_v15  ;;  %v7592_v2 = vadd.f32 %v409_v50, %v7548_v21  ;;  %v7597_v15 = vrot.slane %v7534_v40, %v10045_v24  ;;  %v7608_v50 = vld [vmem:[#allocation14 + $0x70] ss:$8 sps:$4 sm:$0xff]  }
 0x14f   :  { %v474_v62 = vpop.f32.mrf.mxu1  ;;  %v411_v22 = vpop.f32.mrf.mxu0  ;;  %1925 = vmatpush1.bf16.msra.mxu0 %v7608_v50 }
 0x150   :  { %10044 = vst [vmem:[#allocation170_spill] sm:$0xff] %v7592_v2  ;;  %v7600_v41 = vadd.f32 %v474_v62, %v7589_v9  ;;  %v7603_v44 = vadd.f32 %v411_v22, %v7542_v34  ;;  %2000 = vmatpush2.bf16.msra.mxu1 %v7213_v52  ;;  %v7610_v2 = vld [vmem:[#allocation14 + $0x64] ss:$8 sps:$4 sm:$0xff]  }
 0x151   :  { %v476_v31 = vpop.f32.mrf.mxu1  ;;  %v413_v39 = vpop.f32.mrf.mxu0  ;;  %2001 = vmatprep.subr.bf16.mxu1 %v7219_v56  ;;  %1926 = vmatprep.subr.bf16.mxu0 %v7610_v2 }
 0x152   :  { %10046 = vst [vmem:[#allocation171_spill] sm:$0xff] %v7600_v41  ;;  %10047 = vst [vmem:[#allocation172_spill] sm:$0xff] %v7603_v44  ;;  %v7614_v24 = vadd.f32 %v476_v31, %v7597_v15  ;;  %v7617_v62 = vadd.f32 %v413_v39, %v7548_v21 }
 0x153   :  { %v480_v22 = vpop.f32.mrf.mxu1  ;;  %v417_v44 = vpop.f32.mrf.mxu0  ;;  %1927 = vmatpush1.bf16.msra.mxu0 %v7627_v61 }
 0x154   :  { %10048 = vst [vmem:[#allocation173_spill] sm:$0xff] %v7614_v24  ;;  %10049 = vst [vmem:[#allocation174_spill] sm:$0xff] %v7617_v62  ;;  %v7621_v41 = vadd.f32 %v480_v22, %v7589_v9  ;;  %v7624_v52 = vadd.f32 %v417_v44, %v7542_v34  ;;  %2002 = vmatpush2.bf16.msra.mxu1 %v7226_v3  ;;  %v288_v3 = vsub.s32 4, %v7526_v45 }
 0x155   :  { %v482_v31 = vpop.f32.mrf.mxu1  ;;  %v419_v24 = vpop.f32.mrf.mxu0  ;;  %2003 = vmatprep.subr.bf16.mxu1 %v7232_v5 }
 0x156   :  { %10050 = vst [vmem:[#allocation175_spill] sm:$0xff] %v7621_v41  ;;  %10051 = vst [vmem:[#allocation176_spill] sm:$0xff] %v7624_v52  ;;  %v7633_v39 = vadd.f32 %v482_v31, %v7597_v15  ;;  %v7636_v22 = vadd.f32 %v419_v24, %v7548_v21 }
 0x157   :  { %v484_v44 = vpop.f32.mrf.mxu1  ;;  %v421_v52 = vpop.f32.mrf.mxu0 }
 0x158   :  { %10052 = vst [vmem:[#allocation177_spill] sm:$0xff] %v7633_v39  ;;  %10053 = vst [vmem:[#allocation178_spill] sm:$0xff] %v7636_v22  ;;  %v7639_v62 = vadd.f32 %v484_v44, %v7589_v9  ;;  %v7642_v41 = vadd.f32 %v421_v52, %v7542_v34  ;;  %2004 = vmatpush2.bf16.msra.mxu1 %v7240_v17  ;;  %v292_v44 = vsub.s32 5, %v7526_v45 }
 0x159   :  { %v486_v5 = vpop.f32.mrf.mxu1  ;;  %v423_v31 = vpop.f32.mrf.mxu0  ;;  %2005 = vmatprep.subr.bf16.mxu1 %v7246_v19  ;;  %v7663_v17 = vrot.slane %v7534_v40, %v288_v3  ;;  %v7665_v19 = vld [vmem:[#allocation14 + $0x50] ss:$8 sps:$4 sm:$0xff]  }
 0x15a   :  { %10054 = vst [vmem:[#allocation179_spill] sm:$0xff] %v7639_v62  ;;  %10055 = vst [vmem:[#allocation180_spill] sm:$0xff] %v7642_v41  ;;  %v7649_v24 = vadd.f32 %v486_v5, %v7597_v15  ;;  %v7652_v22 = vadd.f32 %v423_v31, %v7548_v21  ;;  %v7657_v62 = vld [vmem:[#allocation14 + $0x54] ss:$8 sps:$4 sm:$0xff]  }
 0x15b   :  { %v490_v52 = vpop.f32.mrf.mxu1  ;;  %v7655_v41 = vpop.f32.mrf.mxu0  ;;  %1928 = vmatprep.subr.bf16.mxu0 %v7657_v62 }
 0x15c   :  { %10056 = vst [vmem:[#allocation181_spill] sm:$0xff] %v7649_v24  ;;  %10057 = vst [vmem:[#allocation182_spill] sm:$0xff] %v7652_v22  ;;  %v7660_v39 = vadd.f32 %v490_v52, %v7589_v9  ;;  %2006 = vmatpush2.bf16.msra.mxu1 %v7253_v30  ;;  %v7676_v52 = vrot.slane %v7534_v40, %v292_v44  ;;  %1929 = vmatpush1.bf16.msra.mxu0 %v7665_v19  ;;  %v7679_v24 = vld [vmem:[#allocation14 + $0x44] ss:$8 sps:$4 sm:$0xff]  }
 0x15d   :  { %v492_v5 = vpop.f32.mrf.mxu1  ;;  %v7668_v31 = vpop.f32.mrf.mxu0  ;;  %2007 = vmatprep.subr.bf16.mxu1 %v7259_v36  ;;  %1930 = vmatprep.subr.bf16.mxu0 %v7679_v24 }
 0x15e   :  { %10058 = vst [vmem:[#allocation183_spill] sm:$0xff] %v7660_v39  ;;  %v7673_v22 = vadd.f32 %v492_v5, %v7597_v15 }
 0x15f   :  { %v494_v3 = vpop.f32.mrf.mxu1  ;;  %v547_v39 = vpop.f32.mrf.mxu0 }
 0x160   :  { %10059 = vst [vmem:[#allocation184_spill] sm:$0xff] %v7673_v22  ;;  %v7682_v30 = vadd.f32 %v494_v3, %v7589_v9  ;;  %v7685_v56 = vadd.f32 %v547_v39, %v7663_v17  ;;  %2008 = vmatpush2.bf16.msra.mxu1 %v7265_v51  ;;  %1931 = vmatpush1.bf16.msra.mxu0 %v7687_v58 }
 0x161   :  { %v496_v5 = vpop.f32.mrf.mxu1  ;;  %v549_v22 = vpop.f32.mrf.mxu0  ;;  %2009 = vmatprep.subr.bf16.mxu1 %v7271_v63  ;;  %v7727_v63 = vld [vmem:[#allocation14 + $0x20] ss:$8 sps:$4 sm:$0xff]  }
 0x162   :  { %10060 = vst [vmem:[#allocation185_spill] sm:$0xff] %v7682_v30  ;;  %10061 = vst [vmem:[#allocation186_spill] sm:$0xff] %v7685_v56  ;;  %v7693_v44 = vadd.f32 %v496_v5, %v7597_v15  ;;  %v7696_v36 = vadd.f32 %v549_v22, %v7676_v52  ;;  %v7699_v30 = vld [vmem:[#allocation14 + $0x34] ss:$8 sps:$4 sm:$0xff]  }
 0x163   :  { %v500_v39 = vpop.f32.mrf.mxu1  ;;  %v553_v3 = vpop.f32.mrf.mxu0  ;;  %1932 = vmatprep.subr.bf16.mxu0 %v7699_v30 }
 0x164   :  { %10062 = vst [vmem:[#allocation187_spill] sm:$0xff] %v7693_v44  ;;  %10063 = vst [vmem:[#allocation188_spill] sm:$0xff] %v7696_v36  ;;  %v7702_v56 = vadd.f32 %v500_v39, %v7589_v9  ;;  %v7705_v51 = vadd.f32 %v553_v3, %v7663_v17  ;;  %2010 = vmatpush2.bf16.msra.mxu1 %v7277_v14  ;;  %1933 = vmatpush1.bf16.msra.mxu0 %v7707_v57 }
 0x165   :  { %v502_v5 = vpop.f32.mrf.mxu1  ;;  %v555_v44 = vpop.f32.mrf.mxu0  ;;  %2011 = vmatprep.subr.bf16.mxu1 %v7283_v27 }
 0x166   :  { %10064 = vst [vmem:[#allocation189_spill] sm:$0xff] %v7702_v56  ;;  %10065 = vst [vmem:[#allocation190_spill] sm:$0xff] %v7705_v51  ;;  %v7713_v22 = vadd.f32 %v502_v5, %v7597_v15  ;;  %v7716_v36 = vadd.f32 %v555_v44, %v7676_v52  ;;  %v7719_v56 = vld [vmem:[#allocation14 + $0x24] ss:$8 sps:$4 sm:$0xff]  }
 0x167   :  { %v504_v39 = vpop.f32.mrf.mxu1  ;;  %v557_v3 = vpop.f32.mrf.mxu0  ;;  %1934 = vmatprep.subr.bf16.mxu0 %v7719_v56 }
 0x168   :  { %10066 = vst [vmem:[#allocation191_spill] sm:$0xff] %v7713_v22  ;;  %10067 = vst [vmem:[#allocation192_spill] sm:$0xff] %v7716_v36  ;;  %v7722_v51 = vadd.f32 %v504_v39, %v7589_v9  ;;  %v7725_v14 = vadd.f32 %v557_v3, %v7663_v17  ;;  %2012 = vmatpush2.bf16.msra.mxu1 %v7289_v38  ;;  %v296_v36 = vsub.s32 6, %v7526_v45  ;;  %1935 = vmatpush1.bf16.msra.mxu0 %v7727_v63 }
 0x169   :  { %v506_v5 = vpop.f32.mrf.mxu1  ;;  %v559_v22 = vpop.f32.mrf.mxu0  ;;  %2063 = vmatprep.subr.bf16.mxu1 %v7297_v49  ;;  %v300_v38 = vsub.s32 7, %v7526_v45  ;;  %v7748_v49 = vld [vmem:[#allocation14 + $0x10] ss:$8 sps:$4 sm:$0xff]  }
 0x16a   :  { %10068 = vst [vmem:[#allocation193_spill] sm:$0xff] %v7722_v51  ;;  %10069 = vst [vmem:[#allocation194_spill] sm:$0xff] %v7725_v14  ;;  %v7733_v44 = vadd.f32 %v506_v5, %v7597_v15  ;;  %v7737_v39 = vadd.f32 %v559_v22, %v7676_v52  ;;  %v7742_v14 = vld [vmem:[#allocation14 + $0x14] ss:$8 sps:$4 sm:$0xff]   ;;  %v7754_v22 = vrot.slane %v7534_v40, %v296_v36  ;;  %v7771_v36 = vld [vmem:[#allocation14] ss:$8 sps:$4 sm:$0xff]  }
 0x16b   :  { %v7740_v3 = vpop.f32.mrf.mxu1  ;;  %v563_v51 = vpop.f32.mrf.mxu0  ;;  %1936 = vmatprep.subr.bf16.mxu0 %v7742_v14 }
 0x16c   :  { %10070 = vst [vmem:[#allocation195_spill] sm:$0xff] %v7733_v44  ;;  %10071 = vst [vmem:[#allocation196_spill] sm:$0xff] %v7737_v39  ;;  %v7746_v27 = vadd.f32 %v563_v51, %v7663_v17  ;;  %1937 = vmatpush1.bf16.msra.mxu0 %v7748_v49  ;;  %v7763_v51 = vrot.slane %v7534_v40, %v300_v38  ;;  %v7781_v40 = vld [vmem:[#allocation14 + $0xf4] ss:$8 sps:$4 sm:$0xff]  }
 0x16d   :  { %v7750_v5 = vpop.f32.mrf.mxu1  ;;  %v565_v44 = vpop.f32.mrf.mxu0  ;;  %1938 = vmatprep.subr.bf16.mxu0 %v7760_v53  ;;  %10078 = vst [vmem:[#allocation203_spill] sm:$0xff] %v7781_v40 }
 0x16e   :  { %10072 = vst [vmem:[#allocation197_spill] sm:$0xff] %v7746_v27  ;;  %v7757_v39 = vadd.f32 %v565_v44, %v7676_v52 }
 0x16f   :  { %v620_v54 = vpop.f32.mrf.mxu1  ;;  %v567_v45 = vpop.f32.mrf.mxu0 }
 0x170   :  { %10073 = vst [vmem:[#allocation198_spill] sm:$0xff] %v7757_v39  ;;  %v7766_v27 = vadd.f32 %v620_v54, %v7754_v22  ;;  %v7769_v42 = vadd.f32 %v567_v45, %v7663_v17  ;;  %1939 = vmatpush1.bf16.msra.mxu0 %v7771_v36 }
 0x171   :  { %v622_v43 = vpop.f32.mrf.mxu1  ;;  %v569_v44 = vpop.f32.mrf.mxu0  ;;  %1940 = vmatprep.subr.bf16.mxu0 %v7781_v40 }
 0x172   :  { %10074 = vst [vmem:[#allocation199_spill] sm:$0xff] %v7766_v27  ;;  %10075 = vst [vmem:[#allocation200_spill] sm:$0xff] %v7769_v42  ;;  %v7775_v39 = vadd.f32 %v622_v43, %v7763_v51  ;;  %v7778_v0 = vadd.f32 %v569_v44, %v7676_v52  ;;  %v7789_v27 = vld [vmem:[#allocation14 + $0xf0] ss:$8 sps:$4 sm:$0xff]  }
 0x173   :  { %v626_v38 = vpop.f32.mrf.mxu1  ;;  %v573_v54 = vpop.f32.mrf.mxu0  ;;  %10081 = vst [vmem:[#allocation206_spill] sm:$0xff] %v7789_v27 }
 0x174   :  { %10076 = vst [vmem:[#allocation201_spill] sm:$0xff] %v7775_v39  ;;  %10077 = vst [vmem:[#allocation202_spill] sm:$0xff] %v7778_v0  ;;  %v7784_v45 = vadd.f32 %v626_v38, %v7754_v22  ;;  %v7787_v42 = vadd.f32 %v573_v54, %v7663_v17  ;;  %1941 = vmatpush2.bf16.msra.mxu0 %v7789_v27 }
 0x175   :  { %v628_v18 = vpop.f32.mrf.mxu1  ;;  %v575_v43 = vpop.f32.mrf.mxu0 }
 0x176   :  { %10079 = vst [vmem:[#allocation204_spill] sm:$0xff] %v7784_v45  ;;  %10080 = vst [vmem:[#allocation205_spill] sm:$0xff] %v7787_v42  ;;  %v7793_v44 = vadd.f32 %v628_v18, %v7763_v51  ;;  %v7796_v0 = vadd.f32 %v575_v43, %v7676_v52  ;;  %v7799_v45 = vld [vmem:[#allocation14 + $0xe4] ss:$8 sps:$4 sm:$0xff]  }
 0x177   :  { %v630_v39 = vpop.f32.mrf.mxu1  ;;  %v577_v38 = vpop.f32.mrf.mxu0  ;;  %10084 = vst [vmem:[#allocation209_spill] sm:$0xff] %v7799_v45  ;;  %1942 = vmatprep.subr.bf16.mxu0 %v7799_v45 }
 0x178   :  { %10082 = vst [vmem:[#allocation207_spill] sm:$0xff] %v7793_v44  ;;  %10083 = vst [vmem:[#allocation208_spill] sm:$0xff] %v7796_v0  ;;  %v7802_v54 = vadd.f32 %v630_v39, %v7754_v22  ;;  %v7805_v42 = vadd.f32 %v577_v38, %v7663_v17  ;;  %1943 = vmatpush2.bf16.msra.mxu0 %v7807_v48  ;;  %v7817_v39 = vld [vmem:[#allocation14 + $0xd4] ss:$8 sps:$4 sm:$0xff]  }
 0x179   :  { %v632_v37 = vpop.f32.mrf.mxu1  ;;  %v579_v18 = vpop.f32.mrf.mxu0  ;;  %10090 = vst [vmem:[#allocation215_spill] sm:$0xff] %v7817_v39  ;;  %1944 = vmatprep.subr.bf16.mxu0 %v7817_v39 }
 0x17a   :  { %10085 = vst [vmem:[#allocation210_spill] sm:$0xff] %v7802_v54  ;;  %10086 = vst [vmem:[#allocation211_spill] sm:$0xff] %v7805_v42  ;;  %v7811_v43 = vadd.f32 %v632_v37, %v7763_v51  ;;  %v7814_v0 = vadd.f32 %v579_v18, %v7676_v52  ;;  %v7822_v42 = vld [vmem:[#allocation14 + $0xd0] ss:$8 sps:$4 sm:$0xff]   ;;  %v7829_v18 = vld [vmem:[#allocation14 + $0xc4] ss:$8 sps:$4 sm:$0xff]  }
 0x17b   :  { %v636_v44 = vpop.f32.mrf.mxu1  ;;  %10092 = vst [vmem:[#allocation217_spill] sm:$0xff] %v7822_v42  ;;  %10094 = vst [vmem:[#allocation219_spill] sm:$0xff] %v7829_v18 }
 0x17c   :  { %10088 = vst [vmem:[#allocation213_spill] sm:$0xff] %v7811_v43  ;;  %10089 = vst [vmem:[#allocation214_spill] sm:$0xff] %v7814_v0  ;;  %v7820_v38 = vadd.f32 %v636_v44, %v7754_v22  ;;  %1945 = vmatpush2.bf16.msra.mxu0 %v7822_v42  ;;  %v7834_v43 = vld [vmem:[#allocation14 + $0xc0] ss:$8 sps:$4 sm:$0xff]   ;;  %v7845_v42 = vld [vmem:[#allocation14 + $0xa4] ss:$8 sps:$4 sm:$0xff]  }
 0x17d   :  { %v638_v54 = vpop.f32.mrf.mxu1  ;;  %10096 = vst [vmem:[#allocation221_spill] sm:$0xff] %v7834_v43  ;;  %1946 = vmatprep.subr.bf16.mxu0 %v7829_v18  ;;  %10100 = vst [vmem:[#allocation225_spill] sm:$0xff] %v7845_v42 }
 0x17e   :  { %10091 = vst [vmem:[#allocation216_spill] sm:$0xff] %v7820_v38  ;;  %v7826_v32 = vadd.f32 %v638_v54, %v7763_v51 }
 0x17f   :  { %v640_v37 = vpop.f32.mrf.mxu1 }
 0x180   :  { %10093 = vst [vmem:[#allocation218_spill] sm:$0xff] %v7826_v32  ;;  %v7832_v0 = vadd.f32 %v640_v37, %v7754_v22  ;;  %1947 = vmatpush2.bf16.msra.mxu0 %v7834_v43  ;;  %v7841_v32 = vld [vmem:[#allocation14 + $0xb4] ss:$8 sps:$4 sm:$0xff]  }
 0x181   :  { %v642_v44 = vpop.f32.mrf.mxu1  ;;  %10098 = vst [vmem:[#allocation223_spill] sm:$0xff] %v7841_v32  ;;  %1948 = vmatprep.subr.bf16.mxu0 %v7841_v32  ;;  %v7858_v43 = vld [vmem:[#allocation14 + $0x94] ss:$8 sps:$4 sm:$0xff]  }
 0x182   :  { %10095 = vst [vmem:[#allocation220_spill] sm:$0xff] %v7832_v0  ;;  %v7838_v38 = vadd.f32 %v642_v44, %v7763_v51  ;;  %v7855_v44 = vld [vmem:[#allocation14 + $0xa0] ss:$8 sps:$4 sm:$0xff]   ;;  %10104 = vst [vmem:[#allocation229_spill] sm:$0xff] %v7858_v43 }
 0x183   :  { %v646_v54 = vpop.f32.mrf.mxu1  ;;  %10103 = vst [vmem:[#allocation228_spill] sm:$0xff] %v7855_v44 }
 0x184   :  { %10097 = vst [vmem:[#allocation222_spill] sm:$0xff] %v7838_v38  ;;  %v7848_v37 = vadd.f32 %v646_v54, %v7754_v22  ;;  %1949 = vmatpush2.bf16.msra.mxu0 %v7843_v29 }
 0x185   :  { %v648_v0 = vpop.f32.mrf.mxu1  ;;  %1950 = vmatprep.subr.bf16.mxu0 %v7845_v42  ;;  %v7873_v42 = vld [vmem:[#allocation14 + $0x80] ss:$8 sps:$4 sm:$0xff]  }
 0x186   :  { %10101 = vst [vmem:[#allocation226_spill] sm:$0xff] %v7848_v37  ;;  %v7852_v18 = vadd.f32 %v648_v0, %v7763_v51  ;;  %v7867_v0 = vld [vmem:[#allocation14 + $0x90] ss:$8 sps:$4 sm:$0xff]   ;;  %10109 = vst [vmem:[#allocation234_spill] sm:$0xff] %v7873_v42 }
 0x187   :  { %v650_v38 = vpop.f32.mrf.mxu1  ;;  %10107 = vst [vmem:[#allocation232_spill] sm:$0xff] %v7867_v0 }
 0x188   :  { %10102 = vst [vmem:[#allocation227_spill] sm:$0xff] %v7852_v18  ;;  %v7861_v39 = vadd.f32 %v650_v38, %v7754_v22  ;;  %1951 = vmatpush2.bf16.msra.mxu0 %v7855_v44  ;;  %v7870_v18 = vld [vmem:[#allocation14 + $0x84] ss:$8 sps:$4 sm:$0xff]   ;;  %v398_v38 = vadd.f32 %v7550_v7, %v7542_v34 }
 0x189   :  { %v652_v54 = vpop.f32.mrf.mxu1  ;;  %1952 = vmatprep.subr.bf16.mxu0 %v7858_v43  ;;  %10108 = vst [vmem:[#allocation233_spill] sm:$0xff] %v7870_v18 }
 0x18a   :  { %10105 = vst [vmem:[#allocation230_spill] sm:$0xff] %v7861_v39  ;;  %v7864_v37 = vadd.f32 %v652_v54, %v7763_v51 }
 0x18c   :  { %10106 = vst [vmem:[#allocation231_spill] sm:$0xff] %v7864_v37  ;;  %1953 = vmatpush2.bf16.msra.mxu0 %v7867_v0 }
 0x18d   :  { %1954 = vmatprep.subr.bf16.mxu0 %v7870_v18 }
 0x190   :  { %1955 = vmatpush2.bf16.msra.mxu0 %v7873_v42  ;;  %v473_v42 = vadd.f32 %v7583_v12, %v7597_v15 }
 0x191   :  { %2022 = vmatprep.subr.bf16.mxu0 %v7082_v47  ;;  %v400_v47 = vadd.f32 %v7556_v1, %v7548_v21  ;;  %v544_v1 = vadd.f32 %v7655_v41, %v7663_v17  ;;  %v617_v41 = vadd.f32 %v7740_v3, %v7754_v22  ;;  %v10136_v21 = vld [vmem:[#allocation123_spill] sm:$0xff] }
 0x19b   :  { %v1565_v54 = vpop.f32.mrf.mxu0 }
 0x19c   :  { %v1695_v37 = vadd.f32 %v1565_v54, %v398_v38 }
 0x19d   :  { %v1567_v39 = vpop.f32.mrf.mxu0 }
 0x19e   :  { %v5702_v34 = vmul.f32 -1.442695, %v1695_v37  ;;  %v1696_v38 = vadd.f32 %v1567_v39, %v400_v47 }
 0x19f   :  { %v1569_v44 = vpop.f32.mrf.mxu0 }
 0x1a0   :  { %6082 = vpow2.f32 %v5702_v34 }
 0x1a1   :  { %v1570_v43 = vpop.f32.mrf.mxu0 }
 0x1a2   :  { %v5703_v43 = vmul.f32 -1.442695, %v1696_v38 }
 0x1ab   :  { %v1606_v29 = vpop.f32.mrf.mxu1 }
 0x1ac   :  { %v1697_v18 = vadd.f32 %v1606_v29, %v471_v26  ;;  %v546_v29 = vadd.f32 %v7668_v31, %v7676_v52  ;;  %v619_v31 = vadd.f32 %v7750_v5, %v7763_v51 }
 0x1ad   :  { %v1608_v32 = vpop.f32.mrf.mxu1 }
 0x1ae   :  { %v1698_v7 = vadd.f32 %v1608_v32, %v473_v42  ;;  %v5704_v54 = vmul.f32 -1.442695, %v1697_v18 }
 0x1af   :  { %v1610_v48 = vpop.f32.mrf.mxu1 }
 0x1b0   :  { %v5705_v44 = vmul.f32 -1.442695, %v1698_v7  ;;  %6084 = vpow2.f32 %v5704_v54  ;;  %v6083_v48 = vpop.eup %6082 }
 0x1b1   :  { %v1611_v0 = vpop.f32.mrf.mxu1  ;;  %v1715_v9 = vadd.f32 1.0, %v6083_v48 }
 0x1b2   :  { %6086 = vpow2.f32 %v5705_v44 }
 0x1b3   :  { %6088 = vpow2.f32 %v5703_v43 }
 0x1b4   :  { %6090 = vrcp.f32 %v1715_v9 }
 0x1bd   :  { %v6085_v0 = vpop.eup %6084 }
 0x1be   :  { %v1717_v12 = vadd.f32 1.0, %v6085_v0 }
 0x1bf   :  { %v6087_v59 = vpop.eup %6086 }
 0x1c0   :  { %v6089_v45 = vpop.eup %6088  ;;  %v1718_v26 = vadd.f32 1.0, %v6087_v59  ;;  %6092 = vrcp.f32 %v1717_v12 }
 0x1c1   :  { %v1716_v42 = vadd.f32 1.0, %v6089_v45  ;;  %v6091_v7 = vpop.eup %6090 }
 0x1c2   :  { %6094 = vrcp.f32 %v1718_v26 }
 0x1cd   :  { %v6093_v34 = vpop.eup %6092 }
 0x1ce   :  { %v1741_v52 = vmul.f32 0.0, %v6093_v34 }
 0x1cf   :  { %v6095_v38 = vpop.eup %6094 }
 0x1d0   :  { %v1742_v0 = vmul.f32 0.0, %v6095_v38 }
 0x1db   :  { %v1647_v47 = vpop.f32.mrf.mxu0 }
 0x1dc   :  { %v1699_v32 = vadd.f32 %v1647_v47, %v544_v1 }
 0x1dd   :  { %v1649_v15 = vpop.f32.mrf.mxu0 }
 0x1de   :  { %6096 = vtanh.f32 %v1699_v32  ;;  %v1700_v39 = vadd.f32 %v1649_v15, %v546_v29 }
 0x1df   :  { %6098 = vrcp.f32 %v1716_v42  ;;  %v1651_v18 = vpop.f32.mrf.mxu0 }
 0x1e0   :  { %6100 = vtanh.f32 %v1700_v39 }
 0x1e1   :  { %v1652_v37 = vpop.f32.mrf.mxu0 }
 0x1eb   :  { %v6097_v17 = vpop.eup %6096  ;;  %v1688_v45 = vpop.f32.mrf.mxu1 }
 0x1ec   :  { %v6099_v54 = vpop.eup %6098  ;;  %v1743_v44 = vmul.f32 %v6097_v17, %v6091_v7  ;;  %v1701_v43 = vadd.f32 %v1688_v45, %v617_v41  ;;  %v10110_v17 = vld [vmem:[#allocation98_spill] sm:$0xff]  ;;  %v10111_v45 = vld [vmem:[#allocation56_spill] sm:$0xff] }
 0x1ed   :  { %v6101_v48 = vpop.eup %6100  ;;  %v1690_v59 = vpop.f32.mrf.mxu1 }
 0x1ee   :  { %v7894_v9 = vadd.f32 %v1743_v44, %v1741_v52  ;;  %v1744_v12 = vmul.f32 %v6101_v48, %v6099_v54  ;;  %v5706_v26 = vmul.f32 -1.442695, %v1701_v43  ;;  %v1702_v1 = vadd.f32 %v1690_v59, %v619_v31  ;;  %v10112_v54 = vld [vmem:[#allocation100_spill] sm:$0xff]  ;;  %v10113_v31 = vld [vmem:[#allocation58_spill] sm:$0xff]  ;;  %v10116_v43 = vld [vmem:[#allocation103_spill] sm:$0xff] }
 0x1ef   :  { %v1692_v42 = vpop.f32.mrf.mxu1  ;;  %v10114_v52 = vld [vmem:[#allocation102_spill] sm:$0xff]  ;;  %v10115_v44 = vld [vmem:[#allocation60_spill] sm:$0xff] }
 0x1f0   :  { %v7896_v47 = vadd.f32 %v1744_v12, %v1742_v0  ;;  %v5707_v3 = vmul.f32 -1.442695, %v1702_v1  ;;  %6102 = vpow2.f32 %v5706_v26  ;;  %v10117_v48 = vld [vmem:[#allocation62_spill] sm:$0xff]  ;;  %v10118_v0 = vld [vmem:[#allocation105_spill] sm:$0xff]  ;;  %v10119_v59 = vld [vmem:[#allocation64_spill] sm:$0xff] }
 0x1f1   :  { %v1693_v22 = vpop.f32.mrf.mxu1  ;;  %v10120_v12 = vld [vmem:[#allocation107_spill] sm:$0xff]  ;;  %v10121_v26 = vld [vmem:[#allocation66_spill] sm:$0xff]  ;;  %v10122_v1 = vld [vmem:[#allocation109_spill] sm:$0xff] }
 0x1f2   :  { %6104 = vpow2.f32 %v5707_v3  ;;  %v10123_v42 = vld [vmem:[#allocation68_spill] sm:$0xff]  ;;  %v10124_v3 = vld [vmem:[#allocation111_spill] sm:$0xff]  ;;  %v10125_v22 = vld [vmem:[#allocation70_spill] sm:$0xff] }
 0x1f3   :  { %6106 = vtanh.f32 %v7894_v9 }
 0x1fd   :  { %v6103_v29 = vpop.eup %6102 }
 0x1fe   :  { %v1735_v5 = vadd.f32 1.0, %v6103_v29  ;;  %v10126_v29 = vld [vmem:[#allocation113_spill] sm:$0xff] }
 0x1ff   :  { %v6105_v51 = vpop.eup %6104 }
 0x200   :  { %6108 = vrcp.f32 %v1735_v5  ;;  %v1736_v32 = vadd.f32 1.0, %v6105_v51  ;;  %v6107_v15 = vpop.eup %6106  ;;  %v10127_v5 = vld [vmem:[#allocation72_spill] sm:$0xff]  ;;  %v10128_v51 = vld [vmem:[#allocation115_spill] sm:$0xff] }
 0x201   :  { %6110 = vtanh.f32 %v7896_v47 }
 0x202   :  { %6112 = vrcp.f32 %v1736_v32  ;;  %v10129_v32 = vld [vmem:[#allocation74_spill] sm:$0xff] }
 0x20d   :  { %v6109_v39 = vpop.eup %6108 }
 0x20e   :  { %v6111_v18 = vpop.eup %6110  ;;  %v1749_v7 = vmul.f32 %v6109_v39, %v6107_v15  ;;  %v10130_v15 = vld [vmem:[#allocation117_spill] sm:$0xff]  ;;  %v10131_v39 = vld [vmem:[#allocation76_spill] sm:$0xff] }
 0x20f   :  { %v6113_v37 = vpop.eup %6112 }
 0x210   :  { %v1750_v34 = vmul.f32 %v6113_v37, %v6111_v18  ;;  %v7902_v41 = vpack.c.bf16 %v1749_v7, %v1749_v7  ;;  %v10132_v18 = vld [vmem:[#allocation119_spill] sm:$0xff]  ;;  %v10133_v37 = vld [vmem:[#allocation78_spill] sm:$0xff]  ;;  %v10134_v7 = vld [vmem:[#allocation121_spill] sm:$0xff] }
 0x212   :  { %v7900_v38 = vpack.c.bf16 %v1750_v34, %v1750_v34  ;;  %v10135_v34 = vld [vmem:[#allocation80_spill] sm:$0xff] }
 0x214   :  { %1956 = vmatprep.mubr.bf16.mxu0 %v7900_v38  ;;  %2013 = vmatprep.mubr.bf16.mxu1 %v7900_v38 }
 0x215   :  { %1957 = vmatmul.mubr.bf16.vlgmr.msra.gmra.mxu0 %v7902_v41  ;;  %2014 = vmatmul.mubr.bf16.vlgmr.msra.gmra.mxu1 %v7902_v41 }
 0x216   :  { %2023 = vmatpush1.bf16.msra.mxu0 %v7142_v8  ;;  %2064 = vmatpush1.bf16.msra.mxu1 %v7303_v11 }
 0x217   :  { %2054 = vmatprep.mubr.bf16.mxu0 %v7900_v38  ;;  %2095 = vmatprep.mubr.bf16.mxu1 %v7900_v38 }
 0x218   :  { %2024 = vmatprep.subr.bf16.mxu0 %v7147_v10  ;;  %2065 = vmatprep.subr.bf16.mxu1 %v7309_v13 }
 0x21a   :  { %2025 = vmatpush1.bf16.msra.mxu0 %v7157_v16  ;;  %2066 = vmatpush1.bf16.msra.mxu1 %v7316_v35 }
 0x21b   :  { %2026 = vmatprep.subr.bf16.mxu0 %v7163_v23  ;;  %2067 = vmatprep.subr.bf16.mxu1 %v7322_v28 }
 0x21e   :  { %2027 = vmatpush1.bf16.msra.mxu0 %v7171_v25  ;;  %2068 = vmatpush1.bf16.msra.mxu1 %v10110_v17 }
 0x21f   :  { %2028 = vmatprep.subr.bf16.mxu0 %v10111_v45  ;;  %2069 = vmatprep.subr.bf16.mxu1 %v10112_v54 }
 0x222   :  { %2029 = vmatpush1.bf16.msra.mxu0 %v10113_v31  ;;  %2070 = vmatpush1.bf16.msra.mxu1 %v10114_v52 }
 0x223   :  { %2030 = vmatprep.subr.bf16.mxu0 %v10115_v44  ;;  %2071 = vmatprep.subr.bf16.mxu1 %v10116_v43 }
 0x226   :  { %2031 = vmatpush1.bf16.msra.mxu0 %v10117_v48  ;;  %2072 = vmatpush1.bf16.msra.mxu1 %v10118_v0 }
 0x227   :  { %2032 = vmatprep.subr.bf16.mxu0 %v10119_v59  ;;  %2073 = vmatprep.subr.bf16.mxu1 %v10120_v12 }
 0x22a   :  { %2033 = vmatpush1.bf16.msra.mxu0 %v10121_v26  ;;  %2074 = vmatpush1.bf16.msra.mxu1 %v10122_v1 }
 0x22b   :  { %2034 = vmatprep.subr.bf16.mxu0 %v10123_v42  ;;  %2075 = vmatprep.subr.bf16.mxu1 %v10124_v3 }
 0x22e   :  { %2035 = vmatpush1.bf16.msra.mxu0 %v10125_v22  ;;  %2076 = vmatpush1.bf16.msra.mxu1 %v10126_v29  ;;  %v10137_v29 = vld [vmem:[#allocation82_spill] sm:$0xff] }
 0x22f   :  { %2036 = vmatprep.subr.bf16.mxu0 %v10127_v5  ;;  %2077 = vmatprep.subr.bf16.mxu1 %v10128_v51  ;;  %v10138_v5 = vld [vmem:[#allocation125_spill] sm:$0xff]  ;;  %v10139_v51 = vld [vmem:[#allocation84_spill] sm:$0xff] }
 0x232   :  { %2037 = vmatpush1.bf16.msra.mxu0 %v10129_v32  ;;  %2078 = vmatpush1.bf16.msra.mxu1 %v10130_v15  ;;  %v10140_v32 = vld [vmem:[#allocation127_spill] sm:$0xff]  ;;  %v10141_v15 = vld [vmem:[#allocation86_spill] sm:$0xff] }
 0x233   :  { %2038 = vmatprep.subr.bf16.mxu0 %v10131_v39  ;;  %2079 = vmatprep.subr.bf16.mxu1 %v10132_v18  ;;  %v10142_v39 = vld [vmem:[#allocation129_spill] sm:$0xff]  ;;  %v10143_v18 = vld [vmem:[#allocation88_spill] sm:$0xff] }
 0x236   :  { %2039 = vmatpush2.bf16.msra.mxu0 %v10133_v37  ;;  %2080 = vmatpush2.bf16.msra.mxu1 %v10134_v7  ;;  %v10144_v37 = vld [vmem:[#allocation131_spill] sm:$0xff]  ;;  %v10145_v7 = vld [vmem:[#allocation90_spill] sm:$0xff] }
 0x237   :  { %2040 = vmatprep.subr.bf16.mxu0 %v10135_v34  ;;  %2081 = vmatprep.subr.bf16.mxu1 %v10136_v21  ;;  %v10146_v34 = vld [vmem:[#allocation133_spill] sm:$0xff]  ;;  %v10147_v21 = vld [vmem:[#allocation91_spill] sm:$0xff] }
 0x23a   :  { %2041 = vmatpush2.bf16.msra.mxu0 %v10137_v29  ;;  %2082 = vmatpush2.bf16.msra.mxu1 %v10138_v5  ;;  %v10148_v29 = vld [vmem:[#allocation135_spill] sm:$0xff]  ;;  %v10149_v5 = vld [vmem:[#allocation93_spill] sm:$0xff] }
 0x23b   :  { %2042 = vmatprep.subr.bf16.mxu0 %v10139_v51  ;;  %2083 = vmatprep.subr.bf16.mxu1 %v10140_v32  ;;  %v10150_v32 = vld [vmem:[#allocation94_spill] sm:$0xff] }
 0x23e   :  { %2043 = vmatpush2.bf16.msra.mxu0 %v10141_v15  ;;  %2084 = vmatpush2.bf16.msra.mxu1 %v10142_v39  ;;  %v10151_v39 = vld [vmem:[#allocation95_spill] sm:$0xff] }
 0x23f   :  { %2044 = vmatprep.subr.bf16.mxu0 %v10143_v18  ;;  %2085 = vmatprep.subr.bf16.mxu1 %v10144_v37  ;;  %v10152_v18 = vld [vmem:[#allocation141_spill] sm:$0xff]  ;;  %v10153_v37 = vld [vmem:[#allocation96_spill] sm:$0xff] }
 0x242   :  { %2045 = vmatpush2.bf16.msra.mxu0 %v10145_v7  ;;  %2086 = vmatpush2.bf16.msra.mxu1 %v10146_v34  ;;  %v10154_v34 = vld [vmem:[#allocation97_spill] sm:$0xff] }
 0x243   :  { %2046 = vmatprep.subr.bf16.mxu0 %v10147_v21  ;;  %2087 = vmatprep.subr.bf16.mxu1 %v10148_v29  ;;  %v10155_v29 = vld [vmem:[#allocation99_spill] sm:$0xff] }
 0x246   :  { %2047 = vmatpush2.bf16.msra.mxu0 %v10149_v5  ;;  %2088 = vmatpush2.bf16.msra.mxu1 %v7449_v20  ;;  %v10156_v20 = vld [vmem:[#allocation101_spill] sm:$0xff] }
 0x247   :  { %2048 = vmatprep.subr.bf16.mxu0 %v10150_v32  ;;  %2089 = vmatprep.subr.bf16.mxu1 %v7455_v60  ;;  %v10157_v60 = vld [vmem:[#allocation104_spill] sm:$0xff] }
 0x24a   :  { %2049 = vmatpush2.bf16.msra.mxu0 %v10151_v39  ;;  %2090 = vmatpush2.bf16.msra.mxu1 %v10152_v18 }
 0x24b   :  { %2050 = vmatprep.subr.bf16.mxu0 %v10153_v37  ;;  %2091 = vmatprep.subr.bf16.mxu1 %v7467_v6  ;;  %v10158_v6 = vld [vmem:[#allocation106_spill] sm:$0xff] }
 0x24e   :  { %2051 = vmatpush2.bf16.msra.mxu0 %v10154_v34  ;;  %2092 = vmatpush2.bf16.msra.mxu1 %v7473_v46  ;;  %v10159_v46 = vld [vmem:[#allocation108_spill] sm:$0xff] }
 0x24f   :  { %2052 = vmatprep.subr.bf16.mxu0 %v10155_v29  ;;  %2093 = vmatprep.subr.bf16.mxu1 %v7479_v55 }
 0x252   :  { %2053 = vmatpush2.bf16.msra.mxu0 %v10156_v20  ;;  %2094 = vmatpush2.bf16.msra.mxu1 %v7485_v4  ;;  %v10160_v20 = vld [vmem:[#allocation110_spill] sm:$0xff]  ;;  %v10161_v4 = vld [vmem:[#allocation112_spill] sm:$0xff] }
 0x253   :  { %2104 = vmatprep.subr.bf16.mxu0 %v10157_v60  ;;  %2203 = vmatprep.subr.bf16.mxu1 %v7606_v33  ;;  %v10162_v33 = vld [vmem:[#allocation114_spill] sm:$0xff]  ;;  %v10163_v60 = vld [vmem:[#allocation116_spill] sm:$0xff] }
 0x255   :  { %2055 = vmatmul.mubr.bf16.vlgmr.msra.gmra.mxu0 %v7902_v41  ;;  %2096 = vmatmul.mubr.bf16.vlgmr.msra.gmra.mxu1 %v7902_v41 }
 0x256   :  { %2105 = vmatpush1.bf16.msra.mxu0 %v10158_v6  ;;  %2136 = vmatprep.mubr.bf16.mxu0 %v7900_v38  ;;  %v10164_v38 = vld [vmem:[#allocation118_spill] sm:$0xff] }
 0x257   :  { %2106 = vmatprep.subr.bf16.mxu0 %v10159_v46  ;;  %2204 = vmatpush1.bf16.msra.mxu1 %v7608_v50  ;;  %v10165_v50 = vld [vmem:[#allocation120_spill] sm:$0xff] }
 0x258   :  { %2205 = vmatprep.subr.bf16.mxu1 %v7610_v2  ;;  %v10166_v2 = vld [vmem:[#allocation122_spill] sm:$0xff] }
 0x25a   :  { %2107 = vmatpush1.bf16.msra.mxu0 %v10160_v20 }
 0x25b   :  { %2108 = vmatprep.subr.bf16.mxu0 %v10161_v4  ;;  %2206 = vmatpush1.bf16.msra.mxu1 %v7627_v61  ;;  %v10167_v61 = vld [vmem:[#allocation124_spill] sm:$0xff] }
 0x25c   :  { %2207 = vmatprep.subr.bf16.mxu1 %v7657_v62  ;;  %v10168_v62 = vld [vmem:[#allocation126_spill] sm:$0xff] }
 0x25e   :  { %2109 = vmatpush1.bf16.msra.mxu0 %v10162_v33 }
 0x25f   :  { %2110 = vmatprep.subr.bf16.mxu0 %v10163_v60  ;;  %2208 = vmatpush1.bf16.msra.mxu1 %v7665_v19  ;;  %v10169_v19 = vld [vmem:[#allocation128_spill] sm:$0xff]  ;;  %v10245_v60 = vld [vmem:[#allocation171_spill] sm:$0xff] }
 0x260   :  { %2209 = vmatprep.subr.bf16.mxu1 %v7679_v24  ;;  %v10170_v24 = vld [vmem:[#allocation130_spill] sm:$0xff] }
 0x262   :  { %2111 = vmatpush1.bf16.msra.mxu0 %v10164_v38 }
 0x263   :  { %2112 = vmatprep.subr.bf16.mxu0 %v10165_v50  ;;  %2210 = vmatpush1.bf16.msra.mxu1 %v7687_v58  ;;  %v10171_v58 = vld [vmem:[#allocation132_spill] sm:$0xff] }
 0x264   :  { %2211 = vmatprep.subr.bf16.mxu1 %v7699_v30  ;;  %v10172_v30 = vld [vmem:[#allocation134_spill] sm:$0xff] }
 0x266   :  { %2113 = vmatpush1.bf16.msra.mxu0 %v10166_v2 }
 0x267   :  { %2114 = vmatprep.subr.bf16.mxu0 %v10167_v61  ;;  %2212 = vmatpush1.bf16.msra.mxu1 %v7707_v57  ;;  %v10173_v57 = vld [vmem:[#allocation136_spill] sm:$0xff] }
 0x268   :  { %2213 = vmatprep.subr.bf16.mxu1 %v7719_v56  ;;  %v10174_v56 = vld [vmem:[#allocation138_spill] sm:$0xff] }
 0x26a   :  { %2115 = vmatpush1.bf16.msra.mxu0 %v10168_v62 }
 0x26b   :  { %2116 = vmatprep.subr.bf16.mxu0 %v10169_v19  ;;  %2214 = vmatpush1.bf16.msra.mxu1 %v7727_v63  ;;  %v10175_v63 = vld [vmem:[#allocation140_spill] sm:$0xff] }
 0x26c   :  { %2215 = vmatprep.subr.bf16.mxu1 %v7742_v14  ;;  %v10176_v14 = vld [vmem:[#allocation209_spill] sm:$0xff] }
 0x26e   :  { %2117 = vmatpush1.bf16.msra.mxu0 %v10170_v24 }
 0x26f   :  { %2118 = vmatprep.subr.bf16.mxu0 %v10171_v58  ;;  %2216 = vmatpush1.bf16.msra.mxu1 %v7748_v49  ;;  %v10177_v58 = vld [vmem:[#allocation142_spill] sm:$0xff]  ;;  %v10178_v49 = vld [vmem:[#allocation144_spill] sm:$0xff] }
 0x270   :  { %2217 = vmatprep.subr.bf16.mxu1 %v7760_v53  ;;  %v10179_v53 = vld [vmem:[#allocation212_spill] sm:$0xff] }
 0x272   :  { %2119 = vmatpush1.bf16.msra.mxu0 %v10172_v30  ;;  %v10180_v30 = vld [vmem:[#allocation215_spill] sm:$0xff] }
 0x273   :  { %2120 = vmatprep.subr.bf16.mxu0 %v10173_v57  ;;  %2218 = vmatpush1.bf16.msra.mxu1 %v7771_v36  ;;  %v10181_v57 = vld [vmem:[#allocation146_spill] sm:$0xff]  ;;  %v10182_v36 = vld [vmem:[#allocation148_spill] sm:$0xff] }
 0x274   :  { %2219 = vmatprep.subr.bf16.mxu1 %v7781_v40  ;;  %v10183_v40 = vld [vmem:[#allocation217_spill] sm:$0xff] }
 0x276   :  { %2121 = vmatpush2.bf16.msra.mxu0 %v10174_v56  ;;  %v10184_v56 = vld [vmem:[#allocation219_spill] sm:$0xff] }
 0x277   :  { %2122 = vmatprep.subr.bf16.mxu0 %v10175_v63  ;;  %2220 = vmatpush2.bf16.msra.mxu1 %v7789_v27  ;;  %v10185_v63 = vld [vmem:[#allocation150_spill] sm:$0xff]  ;;  %v10186_v27 = vld [vmem:[#allocation151_spill] sm:$0xff] }
 0x278   :  { %2221 = vmatprep.subr.bf16.mxu1 %v10176_v14  ;;  %v10187_v14 = vld [vmem:[#allocation221_spill] sm:$0xff] }
 0x27a   :  { %2123 = vmatpush2.bf16.msra.mxu0 %v10177_v58  ;;  %v10188_v58 = vld [vmem:[#allocation223_spill] sm:$0xff] }
 0x27b   :  { %2124 = vmatprep.subr.bf16.mxu0 %v10178_v49  ;;  %2222 = vmatpush2.bf16.msra.mxu1 %v10179_v53  ;;  %v10189_v49 = vld [vmem:[#allocation152_spill] sm:$0xff]  ;;  %v10190_v53 = vld [vmem:[#allocation153_spill] sm:$0xff] }
 0x27c   :  { %2223 = vmatprep.subr.bf16.mxu1 %v10180_v30  ;;  %v10191_v30 = vld [vmem:[#allocation224_spill] sm:$0xff] }
 0x27e   :  { %2125 = vmatpush2.bf16.msra.mxu0 %v10181_v57  ;;  %v10192_v57 = vld [vmem:[#allocation225_spill] sm:$0xff] }
 0x27f   :  { %2126 = vmatprep.subr.bf16.mxu0 %v10182_v36  ;;  %2224 = vmatpush2.bf16.msra.mxu1 %v10183_v40  ;;  %v10193_v36 = vld [vmem:[#allocation154_spill] sm:$0xff]  ;;  %v10194_v40 = vld [vmem:[#allocation155_spill] sm:$0xff] }
 0x280   :  { %2225 = vmatprep.subr.bf16.mxu1 %v10184_v56  ;;  %v10195_v56 = vld [vmem:[#allocation228_spill] sm:$0xff] }
 0x282   :  { %2127 = vmatpush2.bf16.msra.mxu0 %v10185_v63  ;;  %v10196_v63 = vld [vmem:[#allocation229_spill] sm:$0xff] }
 0x283   :  { %2128 = vmatprep.subr.bf16.mxu0 %v10186_v27  ;;  %2226 = vmatpush2.bf16.msra.mxu1 %v10187_v14  ;;  %v10197_v27 = vld [vmem:[#allocation156_spill] sm:$0xff]  ;;  %v10198_v14 = vld [vmem:[#allocation157_spill] sm:$0xff] }
 0x284   :  { %2227 = vmatprep.subr.bf16.mxu1 %v10188_v58  ;;  %v10199_v58 = vld [vmem:[#allocation232_spill] sm:$0xff] }
 0x286   :  { %2129 = vmatpush2.bf16.msra.mxu0 %v10189_v49  ;;  %v10200_v49 = vld [vmem:[#allocation233_spill] sm:$0xff] }
 0x287   :  { %2130 = vmatprep.subr.bf16.mxu0 %v10190_v53  ;;  %2228 = vmatpush2.bf16.msra.mxu1 %v10191_v30  ;;  %v10201_v53 = vld [vmem:[#allocation158_spill] sm:$0xff]  ;;  %v10202_v30 = vld [vmem:[#allocation40_spill] sm:$0xff] }
 0x288   :  { %2229 = vmatprep.subr.bf16.mxu1 %v10192_v57  ;;  %v10203_v57 = vld [vmem:[#allocation234_spill] sm:$0xff] }
 0x28a   :  { %2131 = vmatpush2.bf16.msra.mxu0 %v10193_v36  ;;  %v10204_v36 = vld [vmem:[#allocation41_spill] sm:$0xff] }
 0x28b   :  { %2132 = vmatprep.subr.bf16.mxu0 %v10194_v40  ;;  %2230 = vmatpush2.bf16.msra.mxu1 %v10195_v56  ;;  %v10205_v56 = vld [vmem:[#allocation42_spill] sm:$0xff] }
 0x28c   :  { %2231 = vmatprep.subr.bf16.mxu1 %v10196_v63  ;;  %v10206_v63 = vld [vmem:[#allocation43_spill] sm:$0xff]  ;;  %v10242_v40 = vld [vmem:[#allocation166_spill] sm:$0xff] }
 0x28e   :  { %2133 = vmatpush2.bf16.msra.mxu0 %v10197_v27  ;;  %v10207_v27 = vld [vmem:[#allocation44_spill] sm:$0xff] }
 0x28f   :  { %2134 = vmatprep.subr.bf16.mxu0 %v10198_v14  ;;  %2232 = vmatpush2.bf16.msra.mxu1 %v10199_v58  ;;  %v10208_v14 = vld [vmem:[#allocation45_spill] sm:$0xff]  ;;  %v10209_v58 = vld [vmem:[#allocation46_spill] sm:$0xff] }
 0x290   :  { %2233 = vmatprep.subr.bf16.mxu1 %v10200_v49  ;;  %v10210_v49 = vld [vmem:[#allocation47_spill] sm:$0xff] }
 0x292   :  { %2135 = vmatpush2.bf16.msra.mxu0 %v10201_v53  ;;  %v10211_v53 = vld [vmem:[#allocation48_spill] sm:$0xff] }
 0x293   :  { %2260 = vmatprep.subr.bf16.mxu0 %v10202_v30  ;;  %2234 = vmatpush2.bf16.msra.mxu1 %v10203_v57  ;;  %v10212_v30 = vld [vmem:[#allocation49_spill] sm:$0xff]  ;;  %v10213_v57 = vld [vmem:[#allocation50_spill] sm:$0xff] }
 0x294   :  { %2301 = vmatprep.subr.bf16.mxu1 %v10204_v36  ;;  %v10214_v36 = vld [vmem:[#allocation51_spill] sm:$0xff] }
 0x295   :  { %2137 = vmatmul.mubr.bf16.vlgmr.msra.gmra.mxu0 %v7902_v41  ;;  %v10215_v41 = vld [vmem:[#allocation52_spill] sm:$0xff] }
 0x296   :  { %2261 = vmatpush1.bf16.msra.mxu0 %v10205_v56  ;;  %v10216_v56 = vld [vmem:[#allocation53_spill] sm:$0xff] }
 0x297   :  { %2262 = vmatprep.subr.bf16.mxu0 %v10206_v63  ;;  %v10217_v63 = vld [vmem:[#allocation54_spill] sm:$0xff] }
 0x29a   :  { %2263 = vmatpush1.bf16.msra.mxu0 %v10207_v27  ;;  %v10218_v27 = vld [vmem:[#allocation55_spill] sm:$0xff] }
 0x29b   :  { %2264 = vmatprep.subr.bf16.mxu0 %v10208_v14  ;;  %v10219_v14 = vld [vmem:[#allocation57_spill] sm:$0xff] }
 0x29e   :  { %2265 = vmatpush1.bf16.msra.mxu0 %v10209_v58  ;;  %v10220_v58 = vld [vmem:[#allocation59_spill] sm:$0xff] }
 0x29f   :  { %2266 = vmatprep.subr.bf16.mxu0 %v10210_v49  ;;  %v10221_v49 = vld [vmem:[#allocation61_spill] sm:$0xff] }
 0x2a2   :  { %2267 = vmatpush1.bf16.msra.mxu0 %v10211_v53  ;;  %v10222_v53 = vld [vmem:[#allocation63_spill] sm:$0xff] }
 0x2a3   :  { %2268 = vmatprep.subr.bf16.mxu0 %v10212_v30  ;;  %v10223_v30 = vld [vmem:[#allocation65_spill] sm:$0xff] }
 0x2a6   :  { %2269 = vmatpush1.bf16.msra.mxu0 %v10213_v57  ;;  %v10224_v57 = vld [vmem:[#allocation67_spill] sm:$0xff] }
 0x2a7   :  { %2270 = vmatprep.subr.bf16.mxu0 %v10214_v36  ;;  %v10225_v36 = vld [vmem:[#allocation69_spill] sm:$0xff] }
 0x2aa   :  { %2271 = vmatpush1.bf16.msra.mxu0 %v10215_v41  ;;  %v10226_v41 = vld [vmem:[#allocation71_spill] sm:$0xff] }
 0x2ab   :  { %2272 = vmatprep.subr.bf16.mxu0 %v10216_v56  ;;  %v10227_v56 = vld [vmem:[#allocation73_spill] sm:$0xff] }
 0x2ae   :  { %2273 = vmatpush1.bf16.msra.mxu0 %v10217_v63  ;;  %v10228_v63 = vld [vmem:[#allocation75_spill] sm:$0xff] }
 0x2af   :  { %2274 = vmatprep.subr.bf16.mxu0 %v10218_v27  ;;  %v10229_v27 = vld [vmem:[#allocation77_spill] sm:$0xff] }
 0x2b2   :  { %2275 = vmatpush1.bf16.msra.mxu0 %v10219_v14  ;;  %v10230_v14 = vld [vmem:[#allocation79_spill] sm:$0xff] }
 0x2b3   :  { %2276 = vmatprep.subr.bf16.mxu0 %v10220_v58  ;;  %v10231_v58 = vld [vmem:[#allocation81_spill] sm:$0xff] }
 0x2b6   :  { %2277 = vmatpush2.bf16.msra.mxu0 %v10221_v49  ;;  %v10232_v49 = vld [vmem:[#allocation83_spill] sm:$0xff] }
 0x2b7   :  { %2278 = vmatprep.subr.bf16.mxu0 %v10222_v53  ;;  %v10233_v53 = vld [vmem:[#allocation85_spill] sm:$0xff] }
 0x2ba   :  { %2279 = vmatpush2.bf16.msra.mxu0 %v10223_v30 }
 0x2bb   :  { %2280 = vmatprep.subr.bf16.mxu0 %v10224_v57  ;;  %v10234_v57 = vld [vmem:[#allocation87_spill] sm:$0xff] }
 0x2be   :  { %2281 = vmatpush2.bf16.msra.mxu0 %v10225_v36  ;;  %v879_v36 = vld [vmem:[%s9492_s5] sm:$0x3]  ;;  %s6887_s5 = smov [#allocation7]  }
 0x2bf   :  { %2282 = vmatprep.subr.bf16.mxu0 %v10226_v41  ;;  %v10235_v41 = vld [vmem:[#allocation160_spill] sm:$0xff]  ;;  %s244_s7 = sshll.u32 %s6887_s5, 4  ;;  %s245_s7 = int_to_ptr.vmem [resolvable:$true] %s244_s7 }
 0x2c0   :  { %s6842_s25 = scalar_lea.vmem %s245_s7, 1024  ;;  %p6847_p9 = scmp.lt.s32.totalorder %s245_s7, %s245_s7 }
 0x2c1   :  { %p6843_p8 = scmp.ne.s32.totalorder %s245_s7, %s6842_s25  ;;  %p6848_p10 = scmp.lt.s32.totalorder %s6842_s25, %s6842_s25 }
 0x2c2   :  { %2283 = vmatpush2.bf16.msra.mxu0 %v10227_v56  ;;  %v8076_v56 = vrot.slane %v879_v36, %v10235_v41  ;;  %v10244_v41 = vld [vmem:[#allocation168_spill] sm:$0xff] }
 0x2c3   :  { %2284 = vmatprep.subr.bf16.mxu0 %v10228_v63  ;;  %v10237_v63 = vld [vmem:[#allocation89_spill] sm:$0xff]  ;;  %p6849_p11 = por %p6848_p10, %p6847_p9 }
 0x2c4   :  { %10236 = vst [vmem:[#allocation98_spill] sm:$0xff] %v8076_v56 }
 0x2c5   :  { %p6850_p12 = pnand %p6849_p11, %p6843_p8 }
 0x2c6   :  { %2285 = vmatpush2.bf16.msra.mxu0 %v10229_v27  ;;  %v10238_v27 = vld [vmem:[#allocation92_spill] sm:$0xff] }
 0x2c7   :  { %2286 = vmatprep.subr.bf16.mxu0 %v10230_v14  ;;  %v10239_v14 = vld [vmem:[#allocation161_spill] sm:$0xff] }
 0x2c8   :  { %v8081_v30 = vrot.slane %v879_v36, %v10239_v14 }
 0x2ca   :  { %2287 = vmatpush2.bf16.msra.mxu0 %v10231_v58  ;;  %10240 = vst [vmem:[#allocation56_spill] sm:$0xff] %v8081_v30 }
 0x2cb   :  { %2288 = vmatprep.subr.bf16.mxu0 %v10232_v49 }
 0x2ce   :  { %2289 = vmatpush2.bf16.msra.mxu0 %v10233_v53 }
 0x2cf   :  { %2290 = vmatprep.subr.bf16.mxu0 %v10234_v57 }
 0x2d2   :  { %2291 = vmatpush2.bf16.msra.mxu0 %v10237_v63 }
 0x2d3   :  { %2342 = vmatprep.subr.bf16.mxu0 %v10238_v27 }
 0x2d5   :  { %v1958_v58 = vpop.f32.mrf.mxu0  ;;  %v2015_v49 = vpop.f32.mrf.mxu1 }
 0x2d6   :  { %v8084_v53 = vadd.f32 %v1958_v58, %v8076_v56  ;;  %v2145_v24 = vadd.f32 %v2015_v49, %v10242_v40 }
 0x2d7   :  { %v1960_v19 = vpop.f32.mrf.mxu0  ;;  %v2017_v62 = vpop.f32.mrf.mxu1 }
 0x2d8   :  { %10241 = vst [vmem:[#allocation100_spill] sm:$0xff] %v8084_v53  ;;  %v8088_v57 = vadd.f32 %v1960_v19, %v8081_v30  ;;  %v2146_v61 = vadd.f32 %v2017_v62, %v10244_v41  ;;  %v5740_v36 = vmul.f32 -1.442695, %v2145_v24  ;;  %v10246_v19 = vld [vmem:[#allocation186_spill] sm:$0xff] }
 0x2d9   :  { %v1962_v63 = vpop.f32.mrf.mxu0  ;;  %v2019_v2 = vpop.f32.mrf.mxu1 }
 0x2da   :  { %10243 = vst [vmem:[#allocation58_spill] sm:$0xff] %v8088_v57  ;;  %v5741_v14 = vmul.f32 -1.442695, %v2146_v61  ;;  %6114 = vpow2.f32 %v5740_v36  ;;  %v10248_v61 = vld [vmem:[#allocation188_spill] sm:$0xff] }
 0x2db   :  { %v1963_v27 = vpop.f32.mrf.mxu0  ;;  %v2020_v50 = vpop.f32.mrf.mxu1 }
 0x2dc   :  { %6116 = vpow2.f32 %v5741_v14  ;;  %v10247_v27 = vld [vmem:[#allocation173_spill] sm:$0xff] }
 0x2e7   :  { %v6115_v38 = vpop.eup %6114 }
 0x2e8   :  { %v2165_v53 = vadd.f32 1.0, %v6115_v38 }
 0x2e9   :  { %v6117_v58 = vpop.eup %6116 }
 0x2ea   :  { %v2166_v56 = vadd.f32 1.0, %v6117_v58  ;;  %6118 = vrcp.f32 %v2165_v53 }
 0x315   :  { %v2056_v40 = vpop.f32.mrf.mxu0  ;;  %v2097_v49 = vpop.f32.mrf.mxu1 }
 0x316   :  { %v2147_v33 = vadd.f32 %v2056_v40, %v10245_v60  ;;  %v2149_v57 = vadd.f32 %v2097_v49, %v10246_v19  ;;  %v6119_v60 = vpop.eup %6118 }
 0x317   :  { %v2058_v62 = vpop.f32.mrf.mxu0  ;;  %v2099_v63 = vpop.f32.mrf.mxu1 }
 0x318   :  { %v5742_v2 = vmul.f32 -1.442695, %v2147_v33  ;;  %6120 = vtanh.f32 %v2149_v57  ;;  %v2148_v50 = vadd.f32 %v2058_v62, %v10247_v27  ;;  %v2150_v24 = vadd.f32 %v2099_v63, %v10248_v61 }
 0x319   :  { %6122 = vrcp.f32 %v2166_v56  ;;  %v2060_v14 = vpop.f32.mrf.mxu0  ;;  %v2101_v41 = vpop.f32.mrf.mxu1 }
 0x31a   :  { %6124 = vpow2.f32 %v5742_v2  ;;  %v5743_v38 = vmul.f32 -1.442695, %v2148_v50  ;;  %v10249_v41 = vld [vmem:[#allocation199_spill] sm:$0xff] }
 0x31b   :  { %6126 = vtanh.f32 %v2150_v24  ;;  %v2061_v36 = vpop.f32.mrf.mxu0  ;;  %v2102_v58 = vpop.f32.mrf.mxu1 }
 0x31c   :  { %6128 = vpow2.f32 %v5743_v38 }
 0x325   :  { %v6121_v40 = vpop.eup %6120 }
 0x326   :  { %v6123_v53 = vpop.eup %6122  ;;  %v2193_v49 = vmul.f32 %v6121_v40, %v6119_v60  ;;  %v10250_v60 = vld [vmem:[#allocation201_spill] sm:$0xff] }
 0x327   :  { %v6125_v19 = vpop.eup %6124 }
 0x328   :  { %v6127_v33 = vpop.eup %6126  ;;  %v2167_v57 = vadd.f32 1.0, %v6125_v19 }
 0x329   :  { %v6129_v30 = vpop.eup %6128  ;;  %v2194_v62 = vmul.f32 %v6127_v33, %v6123_v53 }
 0x32a   :  { %6130 = vrcp.f32 %v2167_v57  ;;  %v2168_v63 = vadd.f32 1.0, %v6129_v30 }
 0x32c   :  { %6132 = vrcp.f32 %v2168_v63 }
 0x337   :  { %v6131_v56 = vpop.eup %6130 }
 0x338   :  { %v2191_v2 = vmul.f32 %v6131_v56, %v7894_v9 }
 0x339   :  { %v6133_v27 = vpop.eup %6132 }
 0x33a   :  { %v8096_v50 = vadd.f32 %v2193_v49, %v2191_v2  ;;  %v2192_v61 = vmul.f32 %v6133_v27, %v7896_v47 }
 0x33c   :  { %v8099_v24 = vadd.f32 %v2194_v62, %v2192_v61 }
 0x355   :  { %v2138_v14 = vpop.f32.mrf.mxu0 }
 0x356   :  { %v2151_v38 = vadd.f32 %v2138_v14, %v10249_v41  ;;  %v10251_v41 = vld [vmem:[#allocation113_spill] sm:$0xff] }
 0x357   :  { %v2140_v36 = vpop.f32.mrf.mxu0 }
 0x358   :  { %v5744_v58 = vmul.f32 -1.442695, %v2151_v38  ;;  %v2152_v40 = vadd.f32 %v2140_v36, %v10250_v60  ;;  %v10252_v38 = vld [vmem:[#allocation72_spill] sm:$0xff]  ;;  %v10253_v36 = vld [vmem:[#allocation115_spill] sm:$0xff]  ;;  %v10255_v60 = vld [vmem:[#allocation117_spill] sm:$0xff] }
 0x359   :  { %v2142_v53 = vpop.f32.mrf.mxu0 }
 0x35a   :  { %6134 = vpow2.f32 %v5744_v58  ;;  %v5745_v30 = vmul.f32 -1.442695, %v2152_v40  ;;  %v10254_v58 = vld [vmem:[#allocation74_spill] sm:$0xff]  ;;  %v10256_v40 = vld [vmem:[#allocation76_spill] sm:$0xff]  ;;  %v10257_v53 = vld [vmem:[#allocation119_spill] sm:$0xff] }
 0x35b   :  { %v2143_v19 = vpop.f32.mrf.mxu0 }
 0x35c   :  { %6136 = vpow2.f32 %v5745_v30  ;;  %v10258_v30 = vld [vmem:[#allocation78_spill] sm:$0xff]  ;;  %v10259_v19 = vld [vmem:[#allocation121_spill] sm:$0xff] }
 0x35d   :  { %6138 = vtanh.f32 %v8096_v50 }
 0x367   :  { %v6135_v9 = vpop.eup %6134 }
 0x368   :  { %v2185_v33 = vadd.f32 1.0, %v6135_v9  ;;  %v10260_v9 = vld [vmem:[#allocation80_spill] sm:$0xff] }
 0x369   :  { %v6137_v49 = vpop.eup %6136 }
 0x36a   :  { %6140 = vrcp.f32 %v2185_v33  ;;  %v2186_v47 = vadd.f32 1.0, %v6137_v49  ;;  %v6139_v57 = vpop.eup %6138  ;;  %v10261_v33 = vld [vmem:[#allocation123_spill] sm:$0xff]  ;;  %v10262_v49 = vld [vmem:[#allocation82_spill] sm:$0xff] }
 0x36b   :  { %6142 = vtanh.f32 %v8099_v24 }
 0x36c   :  { %6144 = vrcp.f32 %v2186_v47  ;;  %v10263_v47 = vld [vmem:[#allocation125_spill] sm:$0xff] }
 0x377   :  { %v6141_v62 = vpop.eup %6140 }
 0x378   :  { %v6143_v63 = vpop.eup %6142  ;;  %v2199_v2 = vmul.f32 %v6141_v62, %v6139_v57  ;;  %v10264_v57 = vld [vmem:[#allocation127_spill] sm:$0xff]  ;;  %v10265_v62 = vld [vmem:[#allocation129_spill] sm:$0xff] }
 0x379   :  { %v6145_v56 = vpop.eup %6144 }
 0x37a   :  { %v2200_v27 = vmul.f32 %v6145_v56, %v6143_v63  ;;  %v8107_v14 = vpack.c.bf16 %v2199_v2, %v2199_v2  ;;  %v10266_v63 = vld [vmem:[#allocation88_spill] sm:$0xff]  ;;  %v10267_v56 = vld [vmem:[#allocation131_spill] sm:$0xff]  ;;  %v10268_v2 = vld [vmem:[#allocation133_spill] sm:$0xff] }
 0x37c   :  { %v8105_v61 = vpack.c.bf16 %v2200_v27, %v2200_v27  ;;  %v10269_v27 = vld [vmem:[#allocation135_spill] sm:$0xff] }
 0x37e   :  { %2235 = vmatprep.mubr.bf16.mxu1 %v8105_v61  ;;  %2292 = vmatprep.mubr.bf16.mxu0 %v8105_v61 }
 0x37f   :  { %2236 = vmatmul.mubr.bf16.vlgmr.msra.gmra.mxu1 %v8107_v14  ;;  %2293 = vmatmul.mubr.bf16.vlgmr.msra.gmra.mxu0 %v8107_v14 }
 0x380   :  { %2302 = vmatpush1.bf16.msra.mxu1 %v7142_v8  ;;  %2343 = vmatpush1.bf16.msra.mxu0 %v7303_v11 }
 0x381   :  { %2333 = vmatprep.mubr.bf16.mxu1 %v8105_v61  ;;  %2374 = vmatprep.mubr.bf16.mxu0 %v8105_v61 }
 0x382   :  { %2303 = vmatprep.subr.bf16.mxu1 %v7147_v10  ;;  %2344 = vmatprep.subr.bf16.mxu0 %v7309_v13 }
 0x384   :  { %2304 = vmatpush1.bf16.msra.mxu1 %v7157_v16  ;;  %2345 = vmatpush1.bf16.msra.mxu0 %v7316_v35 }
 0x385   :  { %2305 = vmatprep.subr.bf16.mxu1 %v7163_v23  ;;  %2346 = vmatprep.subr.bf16.mxu0 %v7322_v28 }
 0x388   :  { %2306 = vmatpush1.bf16.msra.mxu1 %v7171_v25  ;;  %2347 = vmatpush1.bf16.msra.mxu0 %v10110_v17 }
 0x389   :  { %2307 = vmatprep.subr.bf16.mxu1 %v10111_v45  ;;  %2348 = vmatprep.subr.bf16.mxu0 %v10112_v54 }
 0x38c   :  { %2308 = vmatpush1.bf16.msra.mxu1 %v10113_v31  ;;  %2349 = vmatpush1.bf16.msra.mxu0 %v10114_v52 }
 0x38d   :  { %2309 = vmatprep.subr.bf16.mxu1 %v10115_v44  ;;  %2350 = vmatprep.subr.bf16.mxu0 %v10116_v43 }
 0x390   :  { %2310 = vmatpush1.bf16.msra.mxu1 %v10117_v48  ;;  %2351 = vmatpush1.bf16.msra.mxu0 %v10118_v0 }
 0x391   :  { %2311 = vmatprep.subr.bf16.mxu1 %v10119_v59  ;;  %2352 = vmatprep.subr.bf16.mxu0 %v10120_v12 }
 0x394   :  { %2312 = vmatpush1.bf16.msra.mxu1 %v10121_v26  ;;  %2353 = vmatpush1.bf16.msra.mxu0 %v10122_v1 }
 0x395   :  { %2313 = vmatprep.subr.bf16.mxu1 %v10123_v42  ;;  %2354 = vmatprep.subr.bf16.mxu0 %v10124_v3 }
 0x398   :  { %2314 = vmatpush1.bf16.msra.mxu1 %v10125_v22  ;;  %2355 = vmatpush1.bf16.msra.mxu0 %v10251_v41 }
 0x399   :  { %2315 = vmatprep.subr.bf16.mxu1 %v10252_v38  ;;  %2356 = vmatprep.subr.bf16.mxu0 %v10253_v36 }
 0x39c   :  { %2316 = vmatpush1.bf16.msra.mxu1 %v10254_v58  ;;  %2357 = vmatpush1.bf16.msra.mxu0 %v10255_v60 }
 0x39d   :  { %2317 = vmatprep.subr.bf16.mxu1 %v10256_v40  ;;  %2358 = vmatprep.subr.bf16.mxu0 %v10257_v53 }
 0x3a0   :  { %2318 = vmatpush2.bf16.msra.mxu1 %v10258_v30  ;;  %2359 = vmatpush2.bf16.msra.mxu0 %v10259_v19 }
 0x3a1   :  { %2319 = vmatprep.subr.bf16.mxu1 %v10260_v9  ;;  %2360 = vmatprep.subr.bf16.mxu0 %v10261_v33 }
 0x3a4   :  { %2320 = vmatpush2.bf16.msra.mxu1 %v10262_v49  ;;  %2361 = vmatpush2.bf16.msra.mxu0 %v10263_v47 }
 0x3a5   :  { %2321 = vmatprep.subr.bf16.mxu1 %v10139_v51  ;;  %2362 = vmatprep.subr.bf16.mxu0 %v10264_v57  ;;  %v10270_v51 = vld [vmem:[#allocation137_spill] sm:$0xff] }
 0x3a8   :  { %2322 = vmatpush2.bf16.msra.mxu1 %v10141_v15  ;;  %2363 = vmatpush2.bf16.msra.mxu0 %v10265_v62  ;;  %v10271_v15 = vld [vmem:[#allocation139_spill] sm:$0xff] }
 0x3a9   :  { %2323 = vmatprep.subr.bf16.mxu1 %v10266_v63  ;;  %2364 = vmatprep.subr.bf16.mxu0 %v10267_v56 }
 0x3ac   :  { %2324 = vmatpush2.bf16.msra.mxu1 %v10145_v7  ;;  %2365 = vmatpush2.bf16.msra.mxu0 %v10268_v2  ;;  %v10272_v7 = vld [vmem:[#allocation143_spill] sm:$0xff] }
 0x3ad   :  { %2325 = vmatprep.subr.bf16.mxu1 %v10147_v21  ;;  %2366 = vmatprep.subr.bf16.mxu0 %v10269_v27  ;;  %v10273_v21 = vld [vmem:[#allocation145_spill] sm:$0xff]  ;;  %v10376_v2 = vld [vmem:[#allocation175_spill] sm:$0xff] }
 0x3b0   :  { %2326 = vmatpush2.bf16.msra.mxu1 %v10149_v5  ;;  %2367 = vmatpush2.bf16.msra.mxu0 %v10270_v51  ;;  %v10274_v51 = vld [vmem:[#allocation101_spill] sm:$0xff] }
 0x3b1   :  { %2327 = vmatprep.subr.bf16.mxu1 %v10150_v32  ;;  %2368 = vmatprep.subr.bf16.mxu0 %v10271_v15  ;;  %v10275_v32 = vld [vmem:[#allocation149_spill] sm:$0xff]  ;;  %v10276_v15 = vld [vmem:[#allocation104_spill] sm:$0xff] }
 0x3b4   :  { %2328 = vmatpush2.bf16.msra.mxu1 %v10151_v39  ;;  %2369 = vmatpush2.bf16.msra.mxu0 %v10152_v18  ;;  %v8178_v39 = vld [vmem:[#allocation14 + $0x74] ss:$8 sps:$4 sm:$0xff]  }
 0x3b5   :  { %2329 = vmatprep.subr.bf16.mxu1 %v10153_v37  ;;  %2370 = vmatprep.subr.bf16.mxu0 %v10272_v7  ;;  %10277 = vst [vmem:[#allocation102_spill] sm:$0xff] %v8178_v39 }
 0x3b8   :  { %2330 = vmatpush2.bf16.msra.mxu1 %v10154_v34  ;;  %2371 = vmatpush2.bf16.msra.mxu0 %v10273_v21 }
 0x3b9   :  { %2331 = vmatprep.subr.bf16.mxu1 %v10155_v29  ;;  %2372 = vmatprep.subr.bf16.mxu0 %v7479_v55  ;;  %v8186_v55 = vld [vmem:[#allocation14 + $0x70] ss:$8 sps:$4 sm:$0xff]  }
 0x3ba   :  { %10278 = vst [vmem:[#allocation60_spill] sm:$0xff] %v8186_v55  ;;  %v10314_v29 = vld [vmem:[#allocation146_spill] sm:$0xff] }
 0x3bc   :  { %2332 = vmatpush2.bf16.msra.mxu1 %v10274_v51  ;;  %2373 = vmatpush2.bf16.msra.mxu0 %v10275_v32  ;;  %v8189_v32 = vld [vmem:[#allocation14 + $0x64] ss:$8 sps:$4 sm:$0xff]   ;;  %v10310_v51 = vld [vmem:[#allocation142_spill] sm:$0xff] }
 0x3bd   :  { %2383 = vmatprep.subr.bf16.mxu1 %v10276_v15  ;;  %2482 = vmatprep.subr.bf16.mxu0 %v8178_v39  ;;  %10279 = vst [vmem:[#allocation103_spill] sm:$0xff] %v8189_v32  ;;  %v8194_v39 = vld [vmem:[#allocation14 + $0x60] ss:$8 sps:$4 sm:$0xff]  }
 0x3be   :  { %10280 = vst [vmem:[#allocation62_spill] sm:$0xff] %v8194_v39  ;;  %v10308_v15 = vld [vmem:[#allocation206_spill] sm:$0xff] }
 0x3bf   :  { %2334 = vmatmul.mubr.bf16.vlgmr.msra.gmra.mxu1 %v8107_v14  ;;  %2375 = vmatmul.mubr.bf16.vlgmr.msra.gmra.mxu0 %v8107_v14 }
 0x3c0   :  { %2384 = vmatpush1.bf16.msra.mxu1 %v10158_v6  ;;  %2415 = vmatprep.mubr.bf16.mxu1 %v8105_v61  ;;  %v8197_v6 = vld [vmem:[#allocation14 + $0x54] ss:$8 sps:$4 sm:$0xff]  }
 0x3c1   :  { %2385 = vmatprep.subr.bf16.mxu1 %v10159_v46  ;;  %2483 = vmatpush1.bf16.msra.mxu0 %v8186_v55  ;;  %10281 = vst [vmem:[#allocation105_spill] sm:$0xff] %v8197_v6  ;;  %v10282_v61 = vld [vmem:[#allocation114_spill] sm:$0xff]  ;;  %v10283_v46 = vld [vmem:[#allocation116_spill] sm:$0xff] }
 0x3c2   :  { %2484 = vmatprep.subr.bf16.mxu0 %v8189_v32  ;;  %v8202_v55 = vld [vmem:[#allocation14 + $0x50] ss:$8 sps:$4 sm:$0xff]   ;;  %v8205_v32 = vld [vmem:[#allocation14 + $0x44] ss:$8 sps:$4 sm:$0xff]  }
 0x3c3   :  { %10284 = vst [vmem:[#allocation64_spill] sm:$0xff] %v8202_v55  ;;  %10285 = vst [vmem:[#allocation107_spill] sm:$0xff] %v8205_v32 }
 0x3c4   :  { %2386 = vmatpush1.bf16.msra.mxu1 %v10160_v20  ;;  %v10287_v20 = vld [vmem:[#allocation120_spill] sm:$0xff] }
 0x3c5   :  { %2387 = vmatprep.subr.bf16.mxu1 %v10161_v4  ;;  %2485 = vmatpush1.bf16.msra.mxu0 %v8194_v39  ;;  %v10286_v4 = vld [vmem:[#allocation118_spill] sm:$0xff] }
 0x3c6   :  { %2486 = vmatprep.subr.bf16.mxu0 %v8197_v6  ;;  %v8210_v39 = vld [vmem:[#allocation14 + $0x40] ss:$8 sps:$4 sm:$0xff]   ;;  %v8213_v6 = vld [vmem:[#allocation14 + $0x34] ss:$8 sps:$4 sm:$0xff]  }
 0x3c7   :  { %10288 = vst [vmem:[#allocation66_spill] sm:$0xff] %v8210_v39  ;;  %10289 = vst [vmem:[#allocation109_spill] sm:$0xff] %v8213_v6 }
 0x3c8   :  { %2388 = vmatpush1.bf16.msra.mxu1 %v10282_v61  ;;  %v10291_v61 = vld [vmem:[#allocation124_spill] sm:$0xff] }
 0x3c9   :  { %2389 = vmatprep.subr.bf16.mxu1 %v10283_v46  ;;  %2487 = vmatpush1.bf16.msra.mxu0 %v8202_v55  ;;  %v10290_v46 = vld [vmem:[#allocation122_spill] sm:$0xff] }
 0x3ca   :  { %2488 = vmatprep.subr.bf16.mxu0 %v8205_v32  ;;  %v8218_v55 = vld [vmem:[#allocation14 + $0x30] ss:$8 sps:$4 sm:$0xff]   ;;  %v8221_v32 = vld [vmem:[#allocation14 + $0x24] ss:$8 sps:$4 sm:$0xff]  }
 0x3cb   :  { %10292 = vst [vmem:[#allocation68_spill] sm:$0xff] %v8218_v55  ;;  %10293 = vst [vmem:[#allocation111_spill] sm:$0xff] %v8221_v32 }
 0x3cc   :  { %2390 = vmatpush1.bf16.msra.mxu1 %v10286_v4  ;;  %v10295_v4 = vld [vmem:[#allocation128_spill] sm:$0xff] }
 0x3cd   :  { %2391 = vmatprep.subr.bf16.mxu1 %v10287_v20  ;;  %2489 = vmatpush1.bf16.msra.mxu0 %v8210_v39  ;;  %v10294_v20 = vld [vmem:[#allocation126_spill] sm:$0xff] }
 0x3ce   :  { %2490 = vmatprep.subr.bf16.mxu0 %v8213_v6  ;;  %v8226_v39 = vld [vmem:[#allocation14 + $0x20] ss:$8 sps:$4 sm:$0xff]   ;;  %v8229_v6 = vld [vmem:[#allocation14 + $0x14] ss:$8 sps:$4 sm:$0xff]  }
 0x3cf   :  { %10296 = vst [vmem:[#allocation70_spill] sm:$0xff] %v8226_v39  ;;  %10297 = vst [vmem:[#allocation166_spill] sm:$0xff] %v8229_v6 }
 0x3d0   :  { %2392 = vmatpush1.bf16.msra.mxu1 %v10290_v46  ;;  %v10299_v46 = vld [vmem:[#allocation132_spill] sm:$0xff] }
 0x3d1   :  { %2393 = vmatprep.subr.bf16.mxu1 %v10291_v61  ;;  %2491 = vmatpush1.bf16.msra.mxu0 %v8218_v55  ;;  %v10298_v61 = vld [vmem:[#allocation130_spill] sm:$0xff] }
 0x3d2   :  { %2492 = vmatprep.subr.bf16.mxu0 %v8221_v32  ;;  %v8234_v55 = vld [vmem:[#allocation14 + $0x10] ss:$8 sps:$4 sm:$0xff]   ;;  %v8237_v32 = vld [vmem:[#allocation14 + $0x4] ss:$8 sps:$4 sm:$0xff]  }
 0x3d3   :  { %10300 = vst [vmem:[#allocation168_spill] sm:$0xff] %v8234_v55  ;;  %10301 = vst [vmem:[#allocation171_spill] sm:$0xff] %v8237_v32 }
 0x3d4   :  { %2394 = vmatpush1.bf16.msra.mxu1 %v10294_v20  ;;  %v10303_v20 = vld [vmem:[#allocation136_spill] sm:$0xff] }
 0x3d5   :  { %2395 = vmatprep.subr.bf16.mxu1 %v10295_v4  ;;  %2493 = vmatpush1.bf16.msra.mxu0 %v8226_v39  ;;  %v10302_v4 = vld [vmem:[#allocation134_spill] sm:$0xff] }
 0x3d6   :  { %2494 = vmatprep.subr.bf16.mxu0 %v8229_v6  ;;  %v8242_v39 = vld [vmem:[#allocation14] ss:$8 sps:$4 sm:$0xff]  }
 0x3d7   :  { %10304 = vst [vmem:[#allocation186_spill] sm:$0xff] %v8242_v39  ;;  %v10305_v6 = vld [vmem:[#allocation203_spill] sm:$0xff] }
 0x3d8   :  { %2396 = vmatpush1.bf16.msra.mxu1 %v10298_v61  ;;  %v10306_v61 = vld [vmem:[#allocation138_spill] sm:$0xff] }
 0x3d9   :  { %2397 = vmatprep.subr.bf16.mxu1 %v10299_v46  ;;  %2495 = vmatpush1.bf16.msra.mxu0 %v8234_v55  ;;  %v10307_v46 = vld [vmem:[#allocation140_spill] sm:$0xff]  ;;  %v10309_v55 = vld [vmem:[#allocation209_spill] sm:$0xff] }
 0x3da   :  { %2496 = vmatprep.subr.bf16.mxu0 %v8237_v32  ;;  %v10311_v32 = vld [vmem:[#allocation144_spill] sm:$0xff] }
 0x3dc   :  { %2398 = vmatpush1.bf16.msra.mxu1 %v10302_v4  ;;  %v10312_v4 = vld [vmem:[#allocation212_spill] sm:$0xff] }
 0x3dd   :  { %2399 = vmatprep.subr.bf16.mxu1 %v10303_v20  ;;  %2497 = vmatpush1.bf16.msra.mxu0 %v8242_v39  ;;  %v10313_v20 = vld [vmem:[#allocation215_spill] sm:$0xff]  ;;  %v10315_v39 = vld [vmem:[#allocation148_spill] sm:$0xff] }
 0x3de   :  { %2498 = vmatprep.subr.bf16.mxu0 %v10305_v6  ;;  %v10316_v6 = vld [vmem:[#allocation217_spill] sm:$0xff] }
 0x3e0   :  { %2400 = vmatpush2.bf16.msra.mxu1 %v10306_v61  ;;  %v10317_v61 = vld [vmem:[#allocation219_spill] sm:$0xff] }
 0x3e1   :  { %2401 = vmatprep.subr.bf16.mxu1 %v10307_v46  ;;  %2499 = vmatpush2.bf16.msra.mxu0 %v10308_v15  ;;  %v10318_v46 = vld [vmem:[#allocation150_spill] sm:$0xff]  ;;  %v10319_v15 = vld [vmem:[#allocation151_spill] sm:$0xff] }
 0x3e2   :  { %2500 = vmatprep.subr.bf16.mxu0 %v10309_v55  ;;  %v10320_v55 = vld [vmem:[#allocation221_spill] sm:$0xff] }
 0x3e4   :  { %2402 = vmatpush2.bf16.msra.mxu1 %v10310_v51  ;;  %v10321_v51 = vld [vmem:[#allocation223_spill] sm:$0xff] }
 0x3e5   :  { %2403 = vmatprep.subr.bf16.mxu1 %v10311_v32  ;;  %2501 = vmatpush2.bf16.msra.mxu0 %v10312_v4  ;;  %v10322_v32 = vld [vmem:[#allocation152_spill] sm:$0xff]  ;;  %v10323_v4 = vld [vmem:[#allocation153_spill] sm:$0xff] }
 0x3e6   :  { %2502 = vmatprep.subr.bf16.mxu0 %v10313_v20  ;;  %v10324_v20 = vld [vmem:[#allocation224_spill] sm:$0xff] }
 0x3e8   :  { %2404 = vmatpush2.bf16.msra.mxu1 %v10314_v29  ;;  %v10325_v29 = vld [vmem:[#allocation225_spill] sm:$0xff] }
 0x3e9   :  { %2405 = vmatprep.subr.bf16.mxu1 %v10315_v39  ;;  %2503 = vmatpush2.bf16.msra.mxu0 %v10316_v6  ;;  %v10326_v39 = vld [vmem:[#allocation154_spill] sm:$0xff]  ;;  %v10327_v6 = vld [vmem:[#allocation155_spill] sm:$0xff] }
 0x3ea   :  { %2504 = vmatprep.subr.bf16.mxu0 %v10317_v61  ;;  %v10328_v61 = vld [vmem:[#allocation228_spill] sm:$0xff] }
 0x3ec   :  { %2406 = vmatpush2.bf16.msra.mxu1 %v10318_v46  ;;  %v10329_v46 = vld [vmem:[#allocation229_spill] sm:$0xff] }
 0x3ed   :  { %2407 = vmatprep.subr.bf16.mxu1 %v10319_v15  ;;  %2505 = vmatpush2.bf16.msra.mxu0 %v10320_v55  ;;  %v10330_v15 = vld [vmem:[#allocation156_spill] sm:$0xff]  ;;  %v10331_v55 = vld [vmem:[#allocation157_spill] sm:$0xff] }
 0x3ee   :  { %2506 = vmatprep.subr.bf16.mxu0 %v10321_v51  ;;  %v10332_v51 = vld [vmem:[#allocation232_spill] sm:$0xff] }
 0x3f0   :  { %2408 = vmatpush2.bf16.msra.mxu1 %v10322_v32  ;;  %v10333_v32 = vld [vmem:[#allocation233_spill] sm:$0xff] }
 0x3f1   :  { %2409 = vmatprep.subr.bf16.mxu1 %v10323_v4  ;;  %2507 = vmatpush2.bf16.msra.mxu0 %v10324_v20  ;;  %v10334_v4 = vld [vmem:[#allocation158_spill] sm:$0xff]  ;;  %v10335_v20 = vld [vmem:[#allocation40_spill] sm:$0xff] }
 0x3f2   :  { %2508 = vmatprep.subr.bf16.mxu0 %v10325_v29  ;;  %v10336_v29 = vld [vmem:[#allocation234_spill] sm:$0xff] }
 0x3f4   :  { %2410 = vmatpush2.bf16.msra.mxu1 %v10326_v39  ;;  %v10337_v39 = vld [vmem:[#allocation41_spill] sm:$0xff] }
 0x3f5   :  { %2411 = vmatprep.subr.bf16.mxu1 %v10327_v6  ;;  %2509 = vmatpush2.bf16.msra.mxu0 %v10328_v61  ;;  %v10338_v61 = vld [vmem:[#allocation42_spill] sm:$0xff] }
 0x3f6   :  { %2510 = vmatprep.subr.bf16.mxu0 %v10329_v46  ;;  %v10339_v46 = vld [vmem:[#allocation43_spill] sm:$0xff]  ;;  %v10370_v6 = vld [vmem:[#allocation98_spill] sm:$0xff] }
 0x3f8   :  { %2412 = vmatpush2.bf16.msra.mxu1 %v10330_v15  ;;  %v10340_v15 = vld [vmem:[#allocation44_spill] sm:$0xff] }
 0x3f9   :  { %2413 = vmatprep.subr.bf16.mxu1 %v10331_v55  ;;  %2511 = vmatpush2.bf16.msra.mxu0 %v10332_v51  ;;  %v10341_v55 = vld [vmem:[#allocation45_spill] sm:$0xff]  ;;  %v10342_v51 = vld [vmem:[#allocation46_spill] sm:$0xff] }
 0x3fa   :  { %2512 = vmatprep.subr.bf16.mxu0 %v10333_v32  ;;  %v10343_v32 = vld [vmem:[#allocation47_spill] sm:$0xff] }
 0x3fc   :  { %2414 = vmatpush2.bf16.msra.mxu1 %v10334_v4  ;;  %v10344_v4 = vld [vmem:[#allocation48_spill] sm:$0xff] }
 0x3fd   :  { %2539 = vmatprep.subr.bf16.mxu1 %v10335_v20  ;;  %2513 = vmatpush2.bf16.msra.mxu0 %v10336_v29  ;;  %v10345_v20 = vld [vmem:[#allocation49_spill] sm:$0xff]  ;;  %v10346_v29 = vld [vmem:[#allocation50_spill] sm:$0xff] }
 0x3fe   :  { %2580 = vmatprep.subr.bf16.mxu0 %v10337_v39  ;;  %v10347_v39 = vld [vmem:[#allocation51_spill] sm:$0xff] }
 0x3ff   :  { %2416 = vmatmul.mubr.bf16.vlgmr.msra.gmra.mxu1 %v8107_v14  ;;  %v10348_v14 = vld [vmem:[#allocation52_spill] sm:$0xff] }
 0x400   :  { %2540 = vmatpush1.bf16.msra.mxu1 %v10338_v61  ;;  %v10349_v61 = vld [vmem:[#allocation53_spill] sm:$0xff] }
 0x401   :  { %2541 = vmatprep.subr.bf16.mxu1 %v10339_v46  ;;  %v10350_v46 = vld [vmem:[#allocation54_spill] sm:$0xff] }
 0x404   :  { %2542 = vmatpush1.bf16.msra.mxu1 %v10340_v15  ;;  %v10351_v15 = vld [vmem:[#allocation55_spill] sm:$0xff] }
 0x405   :  { %2543 = vmatprep.subr.bf16.mxu1 %v10341_v55  ;;  %v10352_v55 = vld [vmem:[#allocation57_spill] sm:$0xff] }
 0x408   :  { %2544 = vmatpush1.bf16.msra.mxu1 %v10342_v51  ;;  %v10353_v51 = vld [vmem:[#allocation59_spill] sm:$0xff] }
 0x409   :  { %2545 = vmatprep.subr.bf16.mxu1 %v10343_v32  ;;  %v10354_v32 = vld [vmem:[#allocation61_spill] sm:$0xff] }
 0x40c   :  { %2546 = vmatpush1.bf16.msra.mxu1 %v10344_v4  ;;  %v10355_v4 = vld [vmem:[#allocation63_spill] sm:$0xff] }
 0x40d   :  { %2547 = vmatprep.subr.bf16.mxu1 %v10345_v20  ;;  %v10356_v20 = vld [vmem:[#allocation65_spill] sm:$0xff] }
 0x410   :  { %2548 = vmatpush1.bf16.msra.mxu1 %v10346_v29  ;;  %v10357_v29 = vld [vmem:[#allocation67_spill] sm:$0xff] }
 0x411   :  { %2549 = vmatprep.subr.bf16.mxu1 %v10347_v39  ;;  %v10358_v39 = vld [vmem:[#allocation69_spill] sm:$0xff] }
 0x414   :  { %2550 = vmatpush1.bf16.msra.mxu1 %v10348_v14  ;;  %v10359_v14 = vld [vmem:[#allocation71_spill] sm:$0xff] }
 0x415   :  { %2551 = vmatprep.subr.bf16.mxu1 %v10349_v61  ;;  %v10360_v61 = vld [vmem:[#allocation73_spill] sm:$0xff] }
 0x418   :  { %2552 = vmatpush1.bf16.msra.mxu1 %v10350_v46  ;;  %v10361_v46 = vld [vmem:[#allocation75_spill] sm:$0xff] }
 0x419   :  { %2553 = vmatprep.subr.bf16.mxu1 %v10351_v15  ;;  %v10362_v15 = vld [vmem:[#allocation77_spill] sm:$0xff] }
 0x41c   :  { %2554 = vmatpush1.bf16.msra.mxu1 %v10352_v55  ;;  %v10363_v55 = vld [vmem:[#allocation79_spill] sm:$0xff] }
 0x41d   :  { %2555 = vmatprep.subr.bf16.mxu1 %v10353_v51  ;;  %v10364_v51 = vld [vmem:[#allocation81_spill] sm:$0xff] }
 0x420   :  { %2556 = vmatpush2.bf16.msra.mxu1 %v10354_v32  ;;  %v10365_v32 = vld [vmem:[#allocation83_spill] sm:$0xff] }
 0x421   :  { %2557 = vmatprep.subr.bf16.mxu1 %v10355_v4  ;;  %v10366_v4 = vld [vmem:[#allocation85_spill] sm:$0xff] }
 0x424   :  { %2558 = vmatpush2.bf16.msra.mxu1 %v10356_v20  ;;  %v10367_v20 = vld [vmem:[#allocation87_spill] sm:$0xff] }
 0x425   :  { %2559 = vmatprep.subr.bf16.mxu1 %v10357_v29  ;;  %v10368_v29 = vld [vmem:[#allocation89_spill] sm:$0xff] }
 0x428   :  { %2560 = vmatpush2.bf16.msra.mxu1 %v10358_v39  ;;  %v10369_v39 = vld [vmem:[#allocation92_spill] sm:$0xff] }
 0x429   :  { %2561 = vmatprep.subr.bf16.mxu1 %v10359_v14 }
 0x42c   :  { %2562 = vmatpush2.bf16.msra.mxu1 %v10360_v61 }
 0x42d   :  { %2563 = vmatprep.subr.bf16.mxu1 %v10361_v46 }
 0x430   :  { %2564 = vmatpush2.bf16.msra.mxu1 %v10362_v15  ;;  %v10372_v15 = vld [vmem:[#allocation169_spill] sm:$0xff] }
 0x431   :  { %2565 = vmatprep.subr.bf16.mxu1 %v10363_v55 }
 0x434   :  { %2566 = vmatpush2.bf16.msra.mxu1 %v10364_v51  ;;  %v10373_v51 = vld [vmem:[#allocation56_spill] sm:$0xff] }
 0x435   :  { %2567 = vmatprep.subr.bf16.mxu1 %v10365_v32  ;;  %v10375_v32 = vld [vmem:[#allocation170_spill] sm:$0xff] }
 0x438   :  { %2568 = vmatpush2.bf16.msra.mxu1 %v10366_v4 }
 0x439   :  { %2569 = vmatprep.subr.bf16.mxu1 %v10367_v20 }
 0x43c   :  { %2570 = vmatpush2.bf16.msra.mxu1 %v10368_v29 }
 0x43d   :  { %2621 = vmatprep.subr.bf16.mxu1 %v10369_v39 }
 0x43f   :  { %v2237_v14 = vpop.f32.mrf.mxu1  ;;  %v2294_v61 = vpop.f32.mrf.mxu0 }
 0x440   :  { %v8312_v46 = vadd.f32 %v2237_v14, %v10370_v6  ;;  %v2424_v21 = vadd.f32 %v2294_v61, %v10372_v15 }
 0x441   :  { %v2239_v55 = vpop.f32.mrf.mxu1  ;;  %v2296_v34 = vpop.f32.mrf.mxu0 }
 0x442   :  { %10371 = vst [vmem:[#allocation173_spill] sm:$0xff] %v8312_v46  ;;  %v8316_v7 = vadd.f32 %v2239_v55, %v10373_v51  ;;  %v2425_v4 = vadd.f32 %v2296_v34, %v10375_v32  ;;  %v5746_v5 = vmul.f32 -1.442695, %v2424_v21  ;;  %v10377_v55 = vld [vmem:[#allocation190_spill] sm:$0xff] }
 0x443   :  { %v2241_v37 = vpop.f32.mrf.mxu1  ;;  %v2298_v20 = vpop.f32.mrf.mxu0 }
 0x444   :  { %10374 = vst [vmem:[#allocation188_spill] sm:$0xff] %v8316_v7  ;;  %v5747_v39 = vmul.f32 -1.442695, %v2425_v4  ;;  %6146 = vpow2.f32 %v5746_v5  ;;  %v10379_v4 = vld [vmem:[#allocation192_spill] sm:$0xff] }
 0x445   :  { %v2242_v18 = vpop.f32.mrf.mxu1  ;;  %v2299_v29 = vpop.f32.mrf.mxu0 }
 0x446   :  { %6148 = vpow2.f32 %v5747_v39  ;;  %v10378_v18 = vld [vmem:[#allocation177_spill] sm:$0xff] }
 0x451   :  { %v6147_v27 = vpop.eup %6146 }
 0x452   :  { %v2444_v46 = vadd.f32 1.0, %v6147_v27 }
 0x453   :  { %v6149_v14 = vpop.eup %6148 }
 0x454   :  { %v2445_v6 = vadd.f32 1.0, %v6149_v14  ;;  %6150 = vrcp.f32 %v2444_v46 }
 0x47f   :  { %v2335_v15 = vpop.f32.mrf.mxu1  ;;  %v2376_v61 = vpop.f32.mrf.mxu0 }
 0x480   :  { %v2426_v56 = vadd.f32 %v2335_v15, %v10376_v2  ;;  %v2428_v7 = vadd.f32 %v2376_v61, %v10377_v55  ;;  %v6151_v2 = vpop.eup %6150 }
 0x481   :  { %v2337_v34 = vpop.f32.mrf.mxu1  ;;  %v2378_v37 = vpop.f32.mrf.mxu0 }
 0x482   :  { %v5748_v20 = vmul.f32 -1.442695, %v2426_v56  ;;  %6152 = vtanh.f32 %v2428_v7  ;;  %v2427_v21 = vadd.f32 %v2337_v34, %v10378_v18  ;;  %v2429_v5 = vadd.f32 %v2378_v37, %v10379_v4 }
 0x483   :  { %6154 = vrcp.f32 %v2445_v6  ;;  %v2339_v39 = vpop.f32.mrf.mxu1  ;;  %v2380_v32 = vpop.f32.mrf.mxu0 }
 0x484   :  { %6156 = vpow2.f32 %v5748_v20  ;;  %v5749_v27 = vmul.f32 -1.442695, %v2427_v21  ;;  %v10380_v32 = vld [vmem:[#allocation204_spill] sm:$0xff] }
 0x485   :  { %6158 = vtanh.f32 %v2429_v5  ;;  %v2340_v29 = vpop.f32.mrf.mxu1  ;;  %v2381_v14 = vpop.f32.mrf.mxu0 }
 0x486   :  { %6160 = vpow2.f32 %v5749_v27 }
 0x48f   :  { %v6153_v15 = vpop.eup %6152 }
 0x490   :  { %v6155_v46 = vpop.eup %6154  ;;  %v2472_v61 = vmul.f32 %v6153_v15, %v6151_v2  ;;  %v10381_v2 = vld [vmem:[#allocation207_spill] sm:$0xff] }
 0x491   :  { %v6157_v55 = vpop.eup %6156 }
 0x492   :  { %v6159_v56 = vpop.eup %6158  ;;  %v2446_v7 = vadd.f32 1.0, %v6157_v55 }
 0x493   :  { %v6161_v51 = vpop.eup %6160  ;;  %v2473_v34 = vmul.f32 %v6159_v56, %v6155_v46 }
 0x494   :  { %6162 = vrcp.f32 %v2446_v7  ;;  %v2447_v37 = vadd.f32 1.0, %v6161_v51 }
 0x496   :  { %6164 = vrcp.f32 %v2447_v37 }
 0x4a1   :  { %v6163_v6 = vpop.eup %6162 }
 0x4a2   :  { %v2470_v20 = vmul.f32 %v6163_v6, %v8096_v50 }
 0x4a3   :  { %v6165_v18 = vpop.eup %6164 }
 0x4a4   :  { %v8324_v21 = vadd.f32 %v2472_v61, %v2470_v20  ;;  %v2471_v4 = vmul.f32 %v6165_v18, %v8099_v24 }
 0x4a6   :  { %v8327_v5 = vadd.f32 %v2473_v34, %v2471_v4 }
 0x4bf   :  { %v2417_v39 = vpop.f32.mrf.mxu1 }
 0x4c0   :  { %v2430_v27 = vadd.f32 %v2417_v39, %v10380_v32  ;;  %v10382_v32 = vld [vmem:[#allocation84_spill] sm:$0xff] }
 0x4c1   :  { %v2419_v29 = vpop.f32.mrf.mxu1 }
 0x4c2   :  { %v5750_v14 = vmul.f32 -1.442695, %v2430_v27  ;;  %v2431_v15 = vadd.f32 %v2419_v29, %v10381_v2  ;;  %v10383_v27 = vld [vmem:[#allocation86_spill] sm:$0xff]  ;;  %v10384_v29 = vld [vmem:[#allocation131_spill] sm:$0xff]  ;;  %v10386_v2 = vld [vmem:[#allocation133_spill] sm:$0xff] }
 0x4c3   :  { %v2421_v46 = vpop.f32.mrf.mxu1 }
 0x4c4   :  { %6166 = vpow2.f32 %v5750_v14  ;;  %v5751_v51 = vmul.f32 -1.442695, %v2431_v15  ;;  %v10385_v14 = vld [vmem:[#allocation90_spill] sm:$0xff]  ;;  %v10387_v15 = vld [vmem:[#allocation91_spill] sm:$0xff] }
 0x4c5   :  { %v2422_v55 = vpop.f32.mrf.mxu1  ;;  %v10388_v46 = vld [vmem:[#allocation135_spill] sm:$0xff] }
 0x4c6   :  { %6168 = vpow2.f32 %v5751_v51  ;;  %v10389_v51 = vld [vmem:[#allocation93_spill] sm:$0xff] }
 0x4c7   :  { %6170 = vtanh.f32 %v8324_v21  ;;  %v10390_v55 = vld [vmem:[#allocation137_spill] sm:$0xff] }
 0x4d1   :  { %v6167_v50 = vpop.eup %6166 }
 0x4d2   :  { %v2464_v56 = vadd.f32 1.0, %v6167_v50  ;;  %v10391_v50 = vld [vmem:[#allocation94_spill] sm:$0xff] }
 0x4d3   :  { %v6169_v61 = vpop.eup %6168 }
 0x4d4   :  { %6172 = vrcp.f32 %v2464_v56  ;;  %v2465_v24 = vadd.f32 1.0, %v6169_v61  ;;  %v6171_v7 = vpop.eup %6170  ;;  %v10392_v56 = vld [vmem:[#allocation139_spill] sm:$0xff] }
 0x4d5   :  { %6174 = vtanh.f32 %v8327_v5  ;;  %v10393_v61 = vld [vmem:[#allocation95_spill] sm:$0xff] }
 0x4d6   :  { %6176 = vrcp.f32 %v2465_v24  ;;  %v10394_v24 = vld [vmem:[#allocation141_spill] sm:$0xff] }
 0x4e1   :  { %v6173_v34 = vpop.eup %6172 }
 0x4e2   :  { %v6175_v37 = vpop.eup %6174  ;;  %v2478_v20 = vmul.f32 %v6173_v34, %v6171_v7  ;;  %v10395_v7 = vld [vmem:[#allocation96_spill] sm:$0xff]  ;;  %v10396_v34 = vld [vmem:[#allocation143_spill] sm:$0xff] }
 0x4e3   :  { %v6177_v6 = vpop.eup %6176 }
 0x4e4   :  { %v2479_v18 = vmul.f32 %v6177_v6, %v6175_v37  ;;  %v8335_v39 = vpack.c.bf16 %v2478_v20, %v2478_v20  ;;  %v10397_v37 = vld [vmem:[#allocation97_spill] sm:$0xff]  ;;  %v10399_v20 = vld [vmem:[#allocation99_spill] sm:$0xff] }
 0x4e5   :  { %v10398_v6 = vld [vmem:[#allocation145_spill] sm:$0xff] }
 0x4e6   :  { %v8333_v4 = vpack.c.bf16 %v2479_v18, %v2479_v18  ;;  %v10400_v18 = vld [vmem:[#allocation147_spill] sm:$0xff] }
 0x4e8   :  { %2514 = vmatprep.mubr.bf16.mxu0 %v8333_v4  ;;  %2571 = vmatprep.mubr.bf16.mxu1 %v8333_v4 }
 0x4e9   :  { %2515 = vmatmul.mubr.bf16.vlgmr.msra.gmra.mxu0 %v8335_v39  ;;  %2572 = vmatmul.mubr.bf16.vlgmr.msra.gmra.mxu1 %v8335_v39 }
 0x4ea   :  { %2581 = vmatpush1.bf16.msra.mxu0 %v7142_v8  ;;  %2622 = vmatpush1.bf16.msra.mxu1 %v7303_v11 }
 0x4eb   :  { %2612 = vmatprep.mubr.bf16.mxu0 %v8333_v4  ;;  %2653 = vmatprep.mubr.bf16.mxu1 %v8333_v4 }
 0x4ec   :  { %2582 = vmatprep.subr.bf16.mxu0 %v7147_v10  ;;  %2623 = vmatprep.subr.bf16.mxu1 %v7309_v13 }
 0x4ee   :  { %2583 = vmatpush1.bf16.msra.mxu0 %v7157_v16  ;;  %2624 = vmatpush1.bf16.msra.mxu1 %v7316_v35 }
 0x4ef   :  { %2584 = vmatprep.subr.bf16.mxu0 %v7163_v23  ;;  %2625 = vmatprep.subr.bf16.mxu1 %v7322_v28 }
 0x4f2   :  { %2585 = vmatpush1.bf16.msra.mxu0 %v7171_v25  ;;  %2626 = vmatpush1.bf16.msra.mxu1 %v10110_v17 }
 0x4f3   :  { %2586 = vmatprep.subr.bf16.mxu0 %v10111_v45  ;;  %2627 = vmatprep.subr.bf16.mxu1 %v10112_v54 }
 0x4f6   :  { %2587 = vmatpush1.bf16.msra.mxu0 %v10113_v31  ;;  %2628 = vmatpush1.bf16.msra.mxu1 %v10114_v52 }
 0x4f7   :  { %2588 = vmatprep.subr.bf16.mxu0 %v10115_v44  ;;  %2629 = vmatprep.subr.bf16.mxu1 %v10116_v43 }
 0x4fa   :  { %2589 = vmatpush1.bf16.msra.mxu0 %v10117_v48  ;;  %2630 = vmatpush1.bf16.msra.mxu1 %v10118_v0 }
 0x4fb   :  { %2590 = vmatprep.subr.bf16.mxu0 %v10119_v59  ;;  %2631 = vmatprep.subr.bf16.mxu1 %v10120_v12 }
 0x4fe   :  { %2591 = vmatpush1.bf16.msra.mxu0 %v10121_v26  ;;  %2632 = vmatpush1.bf16.msra.mxu1 %v10122_v1 }
 0x4ff   :  { %2592 = vmatprep.subr.bf16.mxu0 %v10123_v42  ;;  %2633 = vmatprep.subr.bf16.mxu1 %v10124_v3 }
 0x502   :  { %2593 = vmatpush1.bf16.msra.mxu0 %v10125_v22  ;;  %2634 = vmatpush1.bf16.msra.mxu1 %v10251_v41 }
 0x503   :  { %2594 = vmatprep.subr.bf16.mxu0 %v10252_v38  ;;  %2635 = vmatprep.subr.bf16.mxu1 %v10253_v36 }
 0x506   :  { %2595 = vmatpush1.bf16.msra.mxu0 %v10254_v58  ;;  %2636 = vmatpush1.bf16.msra.mxu1 %v10255_v60 }
 0x507   :  { %2596 = vmatprep.subr.bf16.mxu0 %v10256_v40  ;;  %2637 = vmatprep.subr.bf16.mxu1 %v10257_v53 }
 0x50a   :  { %2597 = vmatpush2.bf16.msra.mxu0 %v10258_v30  ;;  %2638 = vmatpush2.bf16.msra.mxu1 %v10259_v19 }
 0x50b   :  { %2598 = vmatprep.subr.bf16.mxu0 %v10260_v9  ;;  %2639 = vmatprep.subr.bf16.mxu1 %v10261_v33 }
 0x50e   :  { %2599 = vmatpush2.bf16.msra.mxu0 %v10262_v49  ;;  %2640 = vmatpush2.bf16.msra.mxu1 %v10263_v47 }
 0x50f   :  { %2600 = vmatprep.subr.bf16.mxu0 %v10382_v32  ;;  %2641 = vmatprep.subr.bf16.mxu1 %v10264_v57 }
 0x512   :  { %2601 = vmatpush2.bf16.msra.mxu0 %v10383_v27  ;;  %2642 = vmatpush2.bf16.msra.mxu1 %v10265_v62 }
 0x513   :  { %2602 = vmatprep.subr.bf16.mxu0 %v10266_v63  ;;  %2643 = vmatprep.subr.bf16.mxu1 %v10384_v29  ;;  %v10507_v63 = vld [vmem:[#allocation179_spill] sm:$0xff] }
 0x516   :  { %2603 = vmatpush2.bf16.msra.mxu0 %v10385_v14  ;;  %2644 = vmatpush2.bf16.msra.mxu1 %v10386_v2 }
 0x517   :  { %2604 = vmatprep.subr.bf16.mxu0 %v10387_v15  ;;  %2645 = vmatprep.subr.bf16.mxu1 %v10388_v46 }
 0x51a   :  { %2605 = vmatpush2.bf16.msra.mxu0 %v10389_v51  ;;  %2646 = vmatpush2.bf16.msra.mxu1 %v10390_v55  ;;  %v10401_v55 = vld [vmem:[#allocation101_spill] sm:$0xff] }
 0x51b   :  { %2606 = vmatprep.subr.bf16.mxu0 %v10391_v50  ;;  %2647 = vmatprep.subr.bf16.mxu1 %v10392_v56  ;;  %v10402_v50 = vld [vmem:[#allocation149_spill] sm:$0xff]  ;;  %v10403_v56 = vld [vmem:[#allocation104_spill] sm:$0xff] }
 0x51e   :  { %2607 = vmatpush2.bf16.msra.mxu0 %v10393_v61  ;;  %2648 = vmatpush2.bf16.msra.mxu1 %v10394_v24  ;;  %v10404_v61 = vld [vmem:[#allocation102_spill] sm:$0xff] }
 0x51f   :  { %2608 = vmatprep.subr.bf16.mxu0 %v10395_v7  ;;  %2649 = vmatprep.subr.bf16.mxu1 %v10396_v34  ;;  %v10405_v34 = vld [vmem:[#allocation106_spill] sm:$0xff]  ;;  %v10414_v7 = vld [vmem:[#allocation116_spill] sm:$0xff] }
 0x522   :  { %2609 = vmatpush2.bf16.msra.mxu0 %v10397_v37  ;;  %2650 = vmatpush2.bf16.msra.mxu1 %v10398_v6  ;;  %v10406_v6 = vld [vmem:[#allocation108_spill] sm:$0xff]  ;;  %v10413_v37 = vld [vmem:[#allocation114_spill] sm:$0xff] }
 0x523   :  { %2610 = vmatprep.subr.bf16.mxu0 %v10399_v20  ;;  %2651 = vmatprep.subr.bf16.mxu1 %v10400_v18  ;;  %v10407_v20 = vld [vmem:[#allocation60_spill] sm:$0xff]  ;;  %v10408_v18 = vld [vmem:[#allocation103_spill] sm:$0xff] }
 0x526   :  { %2611 = vmatpush2.bf16.msra.mxu0 %v10401_v55  ;;  %2652 = vmatpush2.bf16.msra.mxu1 %v10402_v50  ;;  %v10409_v55 = vld [vmem:[#allocation110_spill] sm:$0xff]  ;;  %v10410_v50 = vld [vmem:[#allocation112_spill] sm:$0xff] }
 0x527   :  { %2662 = vmatprep.subr.bf16.mxu0 %v10403_v56  ;;  %2761 = vmatprep.subr.bf16.mxu1 %v10404_v61  ;;  %v10411_v56 = vld [vmem:[#allocation62_spill] sm:$0xff]  ;;  %v10412_v61 = vld [vmem:[#allocation105_spill] sm:$0xff] }
 0x529   :  { %2613 = vmatmul.mubr.bf16.vlgmr.msra.gmra.mxu0 %v8335_v39  ;;  %2654 = vmatmul.mubr.bf16.vlgmr.msra.gmra.mxu1 %v8335_v39 }
 0x52a   :  { %2663 = vmatpush1.bf16.msra.mxu0 %v10405_v34  ;;  %2694 = vmatprep.mubr.bf16.mxu0 %v8333_v4  ;;  %v10415_v34 = vld [vmem:[#allocation64_spill] sm:$0xff]  ;;  %v10416_v4 = vld [vmem:[#allocation107_spill] sm:$0xff] }
 0x52b   :  { %2664 = vmatprep.subr.bf16.mxu0 %v10406_v6  ;;  %2762 = vmatpush1.bf16.msra.mxu1 %v10407_v20  ;;  %v10417_v6 = vld [vmem:[#allocation118_spill] sm:$0xff]  ;;  %v10418_v20 = vld [vmem:[#allocation120_spill] sm:$0xff] }
 0x52c   :  { %2763 = vmatprep.subr.bf16.mxu1 %v10408_v18  ;;  %v10419_v18 = vld [vmem:[#allocation66_spill] sm:$0xff] }
 0x52e   :  { %2665 = vmatpush1.bf16.msra.mxu0 %v10409_v55  ;;  %v10420_v55 = vld [vmem:[#allocation109_spill] sm:$0xff] }
 0x52f   :  { %2666 = vmatprep.subr.bf16.mxu0 %v10410_v50  ;;  %2764 = vmatpush1.bf16.msra.mxu1 %v10411_v56  ;;  %v10421_v50 = vld [vmem:[#allocation122_spill] sm:$0xff]  ;;  %v10422_v56 = vld [vmem:[#allocation124_spill] sm:$0xff] }
 0x530   :  { %2765 = vmatprep.subr.bf16.mxu1 %v10412_v61  ;;  %v10423_v61 = vld [vmem:[#allocation68_spill] sm:$0xff] }
 0x532   :  { %2667 = vmatpush1.bf16.msra.mxu0 %v10413_v37  ;;  %v10424_v37 = vld [vmem:[#allocation111_spill] sm:$0xff] }
 0x533   :  { %2668 = vmatprep.subr.bf16.mxu0 %v10414_v7  ;;  %2766 = vmatpush1.bf16.msra.mxu1 %v10415_v34  ;;  %v10425_v7 = vld [vmem:[#allocation126_spill] sm:$0xff]  ;;  %v10426_v34 = vld [vmem:[#allocation128_spill] sm:$0xff] }
 0x534   :  { %2767 = vmatprep.subr.bf16.mxu1 %v10416_v4  ;;  %v10427_v4 = vld [vmem:[#allocation70_spill] sm:$0xff] }
 0x536   :  { %2669 = vmatpush1.bf16.msra.mxu0 %v10417_v6  ;;  %v10428_v6 = vld [vmem:[#allocation166_spill] sm:$0xff] }
 0x537   :  { %2670 = vmatprep.subr.bf16.mxu0 %v10418_v20  ;;  %2768 = vmatpush1.bf16.msra.mxu1 %v10419_v18  ;;  %v10429_v20 = vld [vmem:[#allocation130_spill] sm:$0xff]  ;;  %v10430_v18 = vld [vmem:[#allocation132_spill] sm:$0xff] }
 0x538   :  { %2769 = vmatprep.subr.bf16.mxu1 %v10420_v55  ;;  %v10431_v55 = vld [vmem:[#allocation168_spill] sm:$0xff] }
 0x53a   :  { %2671 = vmatpush1.bf16.msra.mxu0 %v10421_v50  ;;  %v10432_v50 = vld [vmem:[#allocation171_spill] sm:$0xff] }
 0x53b   :  { %2672 = vmatprep.subr.bf16.mxu0 %v10422_v56  ;;  %2770 = vmatpush1.bf16.msra.mxu1 %v10423_v61  ;;  %v10433_v56 = vld [vmem:[#allocation134_spill] sm:$0xff]  ;;  %v10434_v61 = vld [vmem:[#allocation136_spill] sm:$0xff] }
 0x53c   :  { %2771 = vmatprep.subr.bf16.mxu1 %v10424_v37  ;;  %v10435_v37 = vld [vmem:[#allocation186_spill] sm:$0xff] }
 0x53e   :  { %2673 = vmatpush1.bf16.msra.mxu0 %v10425_v7  ;;  %v8441_v7 = vld [vmem:[#allocation14 + $0xf4] ss:$8 sps:$4 sm:$0xff]  }
 0x53f   :  { %2674 = vmatprep.subr.bf16.mxu0 %v10426_v34  ;;  %2772 = vmatpush1.bf16.msra.mxu1 %v10427_v4  ;;  %10436 = vst [vmem:[#allocation199_spill] sm:$0xff] %v8441_v7  ;;  %v10437_v4 = vld [vmem:[#allocation138_spill] sm:$0xff] }
 0x540   :  { %2773 = vmatprep.subr.bf16.mxu1 %v10428_v6  ;;  %v10438_v6 = vld [vmem:[#allocation140_spill] sm:$0xff]  ;;  %v10501_v34 = vld [vmem:[#allocation98_spill] sm:$0xff] }
 0x542   :  { %2675 = vmatpush1.bf16.msra.mxu0 %v10429_v20  ;;  %v8446_v20 = vld [vmem:[#allocation14 + $0xf0] ss:$8 sps:$4 sm:$0xff]  }
 0x543   :  { %2676 = vmatprep.subr.bf16.mxu0 %v10430_v18  ;;  %2774 = vmatpush1.bf16.msra.mxu1 %v10431_v55  ;;  %10439 = vst [vmem:[#allocation201_spill] sm:$0xff] %v8446_v20  ;;  %v8449_v55 = vld [vmem:[#allocation14 + $0xe4] ss:$8 sps:$4 sm:$0xff]   ;;  %v10476_v18 = vld [vmem:[#allocation49_spill] sm:$0xff] }
 0x544   :  { %2775 = vmatprep.subr.bf16.mxu1 %v10432_v50  ;;  %10440 = vst [vmem:[#allocation113_spill] sm:$0xff] %v8449_v55  ;;  %v10472_v50 = vld [vmem:[#allocation45_spill] sm:$0xff] }
 0x546   :  { %2677 = vmatpush1.bf16.msra.mxu0 %v10433_v56  ;;  %v10441_v56 = vld [vmem:[#allocation142_spill] sm:$0xff] }
 0x547   :  { %2678 = vmatprep.subr.bf16.mxu0 %v10434_v61  ;;  %2776 = vmatpush1.bf16.msra.mxu1 %v10435_v37  ;;  %v10442_v61 = vld [vmem:[#allocation144_spill] sm:$0xff] }
 0x548   :  { %2777 = vmatprep.subr.bf16.mxu1 %v8441_v7  ;;  %v8454_v37 = vld [vmem:[#allocation14 + $0xe0] ss:$8 sps:$4 sm:$0xff]   ;;  %v8457_v7 = vld [vmem:[#allocation14 + $0xd4] ss:$8 sps:$4 sm:$0xff]  }
 0x549   :  { %10443 = vst [vmem:[#allocation72_spill] sm:$0xff] %v8454_v37  ;;  %10444 = vst [vmem:[#allocation115_spill] sm:$0xff] %v8457_v7 }
 0x54a   :  { %2679 = vmatpush2.bf16.msra.mxu0 %v10437_v4  ;;  %v10446_v4 = vld [vmem:[#allocation148_spill] sm:$0xff] }
 0x54b   :  { %2680 = vmatprep.subr.bf16.mxu0 %v10438_v6  ;;  %2778 = vmatpush2.bf16.msra.mxu1 %v8446_v20  ;;  %v10445_v6 = vld [vmem:[#allocation146_spill] sm:$0xff] }
 0x54c   :  { %2779 = vmatprep.subr.bf16.mxu1 %v8449_v55  ;;  %v8462_v20 = vld [vmem:[#allocation14 + $0xd0] ss:$8 sps:$4 sm:$0xff]   ;;  %v8465_v55 = vld [vmem:[#allocation14 + $0xc4] ss:$8 sps:$4 sm:$0xff]  }
 0x54d   :  { %10447 = vst [vmem:[#allocation74_spill] sm:$0xff] %v8462_v20  ;;  %10448 = vst [vmem:[#allocation117_spill] sm:$0xff] %v8465_v55 }
 0x54e   :  { %2681 = vmatpush2.bf16.msra.mxu0 %v10441_v56  ;;  %v10450_v56 = vld [vmem:[#allocation151_spill] sm:$0xff] }
 0x54f   :  { %2682 = vmatprep.subr.bf16.mxu0 %v10442_v61  ;;  %2780 = vmatpush2.bf16.msra.mxu1 %v8454_v37  ;;  %v10449_v61 = vld [vmem:[#allocation150_spill] sm:$0xff] }
 0x550   :  { %2781 = vmatprep.subr.bf16.mxu1 %v8457_v7  ;;  %v8470_v37 = vld [vmem:[#allocation14 + $0xc0] ss:$8 sps:$4 sm:$0xff]   ;;  %v8473_v7 = vld [vmem:[#allocation14 + $0xb4] ss:$8 sps:$4 sm:$0xff]  }
 0x551   :  { %10451 = vst [vmem:[#allocation76_spill] sm:$0xff] %v8470_v37  ;;  %10452 = vst [vmem:[#allocation119_spill] sm:$0xff] %v8473_v7 }
 0x552   :  { %2683 = vmatpush2.bf16.msra.mxu0 %v10445_v6  ;;  %v10454_v6 = vld [vmem:[#allocation153_spill] sm:$0xff] }
 0x553   :  { %2684 = vmatprep.subr.bf16.mxu0 %v10446_v4  ;;  %2782 = vmatpush2.bf16.msra.mxu1 %v8462_v20  ;;  %v10453_v4 = vld [vmem:[#allocation152_spill] sm:$0xff] }
 0x554   :  { %2783 = vmatprep.subr.bf16.mxu1 %v8465_v55  ;;  %v8478_v20 = vld [vmem:[#allocation14 + $0xb0] ss:$8 sps:$4 sm:$0xff]   ;;  %v8481_v55 = vld [vmem:[#allocation14 + $0xa4] ss:$8 sps:$4 sm:$0xff]  }
 0x555   :  { %10455 = vst [vmem:[#allocation78_spill] sm:$0xff] %v8478_v20  ;;  %10456 = vst [vmem:[#allocation121_spill] sm:$0xff] %v8481_v55 }
 0x556   :  { %2685 = vmatpush2.bf16.msra.mxu0 %v10449_v61  ;;  %v10458_v61 = vld [vmem:[#allocation155_spill] sm:$0xff] }
 0x557   :  { %2686 = vmatprep.subr.bf16.mxu0 %v10450_v56  ;;  %2784 = vmatpush2.bf16.msra.mxu1 %v8470_v37  ;;  %v10457_v56 = vld [vmem:[#allocation154_spill] sm:$0xff] }
 0x558   :  { %2785 = vmatprep.subr.bf16.mxu1 %v8473_v7  ;;  %v8486_v37 = vld [vmem:[#allocation14 + $0xa0] ss:$8 sps:$4 sm:$0xff]   ;;  %v8489_v7 = vld [vmem:[#allocation14 + $0x94] ss:$8 sps:$4 sm:$0xff]  }
 0x559   :  { %10459 = vst [vmem:[#allocation80_spill] sm:$0xff] %v8486_v37  ;;  %10460 = vst [vmem:[#allocation123_spill] sm:$0xff] %v8489_v7 }
 0x55a   :  { %2687 = vmatpush2.bf16.msra.mxu0 %v10453_v4  ;;  %v10462_v4 = vld [vmem:[#allocation157_spill] sm:$0xff] }
 0x55b   :  { %2688 = vmatprep.subr.bf16.mxu0 %v10454_v6  ;;  %2786 = vmatpush2.bf16.msra.mxu1 %v8478_v20  ;;  %v10461_v6 = vld [vmem:[#allocation156_spill] sm:$0xff] }
 0x55c   :  { %2787 = vmatprep.subr.bf16.mxu1 %v8481_v55  ;;  %v8494_v20 = vld [vmem:[#allocation14 + $0x90] ss:$8 sps:$4 sm:$0xff]   ;;  %v8497_v55 = vld [vmem:[#allocation14 + $0x84] ss:$8 sps:$4 sm:$0xff]  }
 0x55d   :  { %10463 = vst [vmem:[#allocation82_spill] sm:$0xff] %v8494_v20  ;;  %10464 = vst [vmem:[#allocation125_spill] sm:$0xff] %v8497_v55 }
 0x55e   :  { %2689 = vmatpush2.bf16.msra.mxu0 %v10457_v56  ;;  %v10466_v56 = vld [vmem:[#allocation40_spill] sm:$0xff] }
 0x55f   :  { %2690 = vmatprep.subr.bf16.mxu0 %v10458_v61  ;;  %2788 = vmatpush2.bf16.msra.mxu1 %v8486_v37  ;;  %v10465_v61 = vld [vmem:[#allocation158_spill] sm:$0xff] }
 0x560   :  { %2789 = vmatprep.subr.bf16.mxu1 %v8489_v7  ;;  %v8502_v37 = vld [vmem:[#allocation14 + $0x80] ss:$8 sps:$4 sm:$0xff]   ;;  %v10468_v7 = vld [vmem:[#allocation41_spill] sm:$0xff] }
 0x561   :  { %10467 = vst [vmem:[#allocation127_spill] sm:$0xff] %v8502_v37 }
 0x562   :  { %2691 = vmatpush2.bf16.msra.mxu0 %v10461_v6  ;;  %v10470_v6 = vld [vmem:[#allocation43_spill] sm:$0xff] }
 0x563   :  { %2692 = vmatprep.subr.bf16.mxu0 %v10462_v4  ;;  %2790 = vmatpush2.bf16.msra.mxu1 %v8494_v20  ;;  %v10469_v4 = vld [vmem:[#allocation42_spill] sm:$0xff]  ;;  %v10471_v20 = vld [vmem:[#allocation44_spill] sm:$0xff] }
 0x564   :  { %2791 = vmatprep.subr.bf16.mxu1 %v8497_v55  ;;  %v10473_v55 = vld [vmem:[#allocation46_spill] sm:$0xff] }
 0x566   :  { %2693 = vmatpush2.bf16.msra.mxu0 %v10465_v61  ;;  %v10474_v61 = vld [vmem:[#allocation47_spill] sm:$0xff] }
 0x567   :  { %2818 = vmatprep.subr.bf16.mxu0 %v10466_v56  ;;  %2792 = vmatpush2.bf16.msra.mxu1 %v8502_v37  ;;  %v10475_v56 = vld [vmem:[#allocation48_spill] sm:$0xff]  ;;  %v10477_v37 = vld [vmem:[#allocation50_spill] sm:$0xff] }
 0x568   :  { %2859 = vmatprep.subr.bf16.mxu1 %v10468_v7  ;;  %v10478_v7 = vld [vmem:[#allocation51_spill] sm:$0xff] }
 0x569   :  { %2695 = vmatmul.mubr.bf16.vlgmr.msra.gmra.mxu0 %v8335_v39  ;;  %v10479_v39 = vld [vmem:[#allocation52_spill] sm:$0xff] }
 0x56a   :  { %2819 = vmatpush1.bf16.msra.mxu0 %v10469_v4  ;;  %v10480_v4 = vld [vmem:[#allocation53_spill] sm:$0xff] }
 0x56b   :  { %2820 = vmatprep.subr.bf16.mxu0 %v10470_v6  ;;  %v10481_v6 = vld [vmem:[#allocation54_spill] sm:$0xff] }
 0x56e   :  { %2821 = vmatpush1.bf16.msra.mxu0 %v10471_v20  ;;  %v10482_v20 = vld [vmem:[#allocation55_spill] sm:$0xff] }
 0x56f   :  { %2822 = vmatprep.subr.bf16.mxu0 %v10472_v50  ;;  %v10483_v50 = vld [vmem:[#allocation57_spill] sm:$0xff] }
 0x572   :  { %2823 = vmatpush1.bf16.msra.mxu0 %v10473_v55  ;;  %v10484_v55 = vld [vmem:[#allocation59_spill] sm:$0xff] }
 0x573   :  { %2824 = vmatprep.subr.bf16.mxu0 %v10474_v61  ;;  %v10485_v61 = vld [vmem:[#allocation61_spill] sm:$0xff] }
 0x576   :  { %2825 = vmatpush1.bf16.msra.mxu0 %v10475_v56  ;;  %v10486_v56 = vld [vmem:[#allocation63_spill] sm:$0xff] }
 0x577   :  { %2826 = vmatprep.subr.bf16.mxu0 %v10476_v18  ;;  %v10487_v18 = vld [vmem:[#allocation65_spill] sm:$0xff] }
 0x57a   :  { %2827 = vmatpush1.bf16.msra.mxu0 %v10477_v37  ;;  %v10488_v37 = vld [vmem:[#allocation67_spill] sm:$0xff] }
 0x57b   :  { %2828 = vmatprep.subr.bf16.mxu0 %v10478_v7  ;;  %v10489_v7 = vld [vmem:[#allocation69_spill] sm:$0xff] }
 0x57e   :  { %2829 = vmatpush1.bf16.msra.mxu0 %v10479_v39  ;;  %v10490_v39 = vld [vmem:[#allocation71_spill] sm:$0xff] }
 0x57f   :  { %2830 = vmatprep.subr.bf16.mxu0 %v10480_v4  ;;  %v10491_v4 = vld [vmem:[#allocation73_spill] sm:$0xff] }
 0x582   :  { %2831 = vmatpush1.bf16.msra.mxu0 %v10481_v6  ;;  %v10492_v6 = vld [vmem:[#allocation75_spill] sm:$0xff] }
 0x583   :  { %2832 = vmatprep.subr.bf16.mxu0 %v10482_v20  ;;  %v10493_v20 = vld [vmem:[#allocation77_spill] sm:$0xff] }
 0x586   :  { %2833 = vmatpush1.bf16.msra.mxu0 %v10483_v50  ;;  %v10494_v50 = vld [vmem:[#allocation79_spill] sm:$0xff] }
 0x587   :  { %2834 = vmatprep.subr.bf16.mxu0 %v10484_v55  ;;  %v10495_v55 = vld [vmem:[#allocation81_spill] sm:$0xff] }
 0x58a   :  { %2835 = vmatpush2.bf16.msra.mxu0 %v10485_v61  ;;  %v10496_v61 = vld [vmem:[#allocation83_spill] sm:$0xff] }
 0x58b   :  { %2836 = vmatprep.subr.bf16.mxu0 %v10486_v56  ;;  %v10497_v56 = vld [vmem:[#allocation85_spill] sm:$0xff] }
 0x58e   :  { %2837 = vmatpush2.bf16.msra.mxu0 %v10487_v18  ;;  %v10498_v18 = vld [vmem:[#allocation87_spill] sm:$0xff] }
 0x58f   :  { %2838 = vmatprep.subr.bf16.mxu0 %v10488_v37  ;;  %v10499_v37 = vld [vmem:[#allocation89_spill] sm:$0xff] }
 0x592   :  { %2839 = vmatpush2.bf16.msra.mxu0 %v10489_v7  ;;  %v10500_v7 = vld [vmem:[#allocation92_spill] sm:$0xff] }
 0x593   :  { %2840 = vmatprep.subr.bf16.mxu0 %v10490_v39 }
 0x596   :  { %2841 = vmatpush2.bf16.msra.mxu0 %v10491_v4 }
 0x597   :  { %2842 = vmatprep.subr.bf16.mxu0 %v10492_v6 }
 0x59a   :  { %2843 = vmatpush2.bf16.msra.mxu0 %v10493_v20  ;;  %v10503_v20 = vld [vmem:[#allocation172_spill] sm:$0xff] }
 0x59b   :  { %2844 = vmatprep.subr.bf16.mxu0 %v10494_v50 }
 0x59e   :  { %2845 = vmatpush2.bf16.msra.mxu0 %v10495_v55  ;;  %v10504_v55 = vld [vmem:[#allocation56_spill] sm:$0xff] }
 0x59f   :  { %2846 = vmatprep.subr.bf16.mxu0 %v10496_v61  ;;  %v10506_v61 = vld [vmem:[#allocation174_spill] sm:$0xff] }
 0x5a2   :  { %2847 = vmatpush2.bf16.msra.mxu0 %v10497_v56 }
 0x5a3   :  { %2848 = vmatprep.subr.bf16.mxu0 %v10498_v18 }
 0x5a6   :  { %2849 = vmatpush2.bf16.msra.mxu0 %v10499_v37 }
 0x5a7   :  { %2900 = vmatprep.subr.bf16.mxu0 %v10500_v7 }
 0x5a9   :  { %v2516_v39 = vpop.f32.mrf.mxu0  ;;  %v2573_v4 = vpop.f32.mrf.mxu1 }
 0x5aa   :  { %v8540_v6 = vadd.f32 %v2516_v39, %v10501_v34  ;;  %v2703_v24 = vadd.f32 %v2573_v4, %v10503_v20 }
 0x5ab   :  { %v2518_v50 = vpop.f32.mrf.mxu0  ;;  %v2575_v51 = vpop.f32.mrf.mxu1 }
 0x5ac   :  { %10502 = vst [vmem:[#allocation203_spill] sm:$0xff] %v8540_v6  ;;  %v8544_v46 = vadd.f32 %v2518_v50, %v10504_v55  ;;  %v2704_v56 = vadd.f32 %v2575_v51, %v10506_v61  ;;  %v5752_v14 = vmul.f32 -1.442695, %v2703_v24  ;;  %v10508_v50 = vld [vmem:[#allocation194_spill] sm:$0xff] }
 0x5ad   :  { %v2520_v15 = vpop.f32.mrf.mxu0  ;;  %v2577_v18 = vpop.f32.mrf.mxu1 }
 0x5ae   :  { %10505 = vst [vmem:[#allocation206_spill] sm:$0xff] %v8544_v46  ;;  %v5753_v7 = vmul.f32 -1.442695, %v2704_v56  ;;  %6178 = vpow2.f32 %v5752_v14  ;;  %v10510_v56 = vld [vmem:[#allocation196_spill] sm:$0xff] }
 0x5af   :  { %v2521_v2 = vpop.f32.mrf.mxu0  ;;  %v2578_v37 = vpop.f32.mrf.mxu1 }
 0x5b0   :  { %6180 = vpow2.f32 %v5753_v7  ;;  %v10509_v2 = vld [vmem:[#allocation181_spill] sm:$0xff] }
 0x5bb   :  { %v6179_v29 = vpop.eup %6178 }
 0x5bc   :  { %v2723_v6 = vadd.f32 1.0, %v6179_v29 }
 0x5bd   :  { %v6181_v39 = vpop.eup %6180 }
 0x5be   :  { %v2724_v34 = vadd.f32 1.0, %v6181_v39  ;;  %6182 = vrcp.f32 %v2723_v6 }
 0x5e9   :  { %v2614_v20 = vpop.f32.mrf.mxu0  ;;  %v2655_v4 = vpop.f32.mrf.mxu1 }
 0x5ea   :  { %v2705_v62 = vadd.f32 %v2614_v20, %v10507_v63  ;;  %v2707_v46 = vadd.f32 %v2655_v4, %v10508_v50  ;;  %v6183_v63 = vpop.eup %6182 }
 0x5eb   :  { %v2616_v51 = vpop.f32.mrf.mxu0  ;;  %v2657_v15 = vpop.f32.mrf.mxu1 }
 0x5ec   :  { %v5754_v61 = vmul.f32 -1.442695, %v2705_v62  ;;  %6184 = vtanh.f32 %v2707_v46  ;;  %v2706_v24 = vadd.f32 %v2616_v51, %v10509_v2  ;;  %v2708_v14 = vadd.f32 %v2657_v15, %v10510_v56 }
 0x5ed   :  { %6186 = vrcp.f32 %v2724_v34  ;;  %v2618_v7 = vpop.f32.mrf.mxu0  ;;  %v2659_v37 = vpop.f32.mrf.mxu1 }
 0x5ee   :  { %6188 = vpow2.f32 %v5754_v61  ;;  %v5755_v29 = vmul.f32 -1.442695, %v2706_v24  ;;  %v10511_v37 = vld [vmem:[#allocation210_spill] sm:$0xff] }
 0x5ef   :  { %6190 = vtanh.f32 %v2708_v14  ;;  %v2619_v18 = vpop.f32.mrf.mxu0  ;;  %v2660_v39 = vpop.f32.mrf.mxu1 }
 0x5f0   :  { %6192 = vpow2.f32 %v5755_v29 }
 0x5f9   :  { %v6185_v20 = vpop.eup %6184 }
 0x5fa   :  { %v6187_v6 = vpop.eup %6186  ;;  %v2751_v4 = vmul.f32 %v6185_v20, %v6183_v63  ;;  %v10512_v63 = vld [vmem:[#allocation213_spill] sm:$0xff] }
 0x5fb   :  { %v6189_v50 = vpop.eup %6188 }
 0x5fc   :  { %v6191_v62 = vpop.eup %6190  ;;  %v2725_v46 = vadd.f32 1.0, %v6189_v50 }
 0x5fd   :  { %v6193_v55 = vpop.eup %6192  ;;  %v2752_v51 = vmul.f32 %v6191_v62, %v6187_v6 }
 0x5fe   :  { %6194 = vrcp.f32 %v2725_v46  ;;  %v2726_v15 = vadd.f32 1.0, %v6193_v55 }
 0x600   :  { %6196 = vrcp.f32 %v2726_v15 }
 0x60b   :  { %v6195_v34 = vpop.eup %6194 }
 0x60c   :  { %v2749_v61 = vmul.f32 %v6195_v34, %v8324_v21 }
 0x60d   :  { %v6197_v2 = vpop.eup %6196 }
 0x60e   :  { %v8552_v24 = vadd.f32 %v2751_v4, %v2749_v61  ;;  %v2750_v56 = vmul.f32 %v6197_v2, %v8327_v5 }
 0x610   :  { %v8555_v14 = vadd.f32 %v2752_v51, %v2750_v56 }
 0x629   :  { %v2696_v7 = vpop.f32.mrf.mxu0 }
 0x62a   :  { %v2709_v29 = vadd.f32 %v2696_v7, %v10511_v37  ;;  %v10513_v37 = vld [vmem:[#allocation129_spill] sm:$0xff] }
 0x62b   :  { %v2698_v18 = vpop.f32.mrf.mxu0 }
 0x62c   :  { %v5756_v39 = vmul.f32 -1.442695, %v2709_v29  ;;  %v2710_v20 = vadd.f32 %v2698_v18, %v10512_v63  ;;  %v10514_v29 = vld [vmem:[#allocation88_spill] sm:$0xff]  ;;  %v10515_v18 = vld [vmem:[#allocation131_spill] sm:$0xff]  ;;  %v10517_v63 = vld [vmem:[#allocation133_spill] sm:$0xff] }
 0x62d   :  { %v2700_v6 = vpop.f32.mrf.mxu0 }
 0x62e   :  { %6198 = vpow2.f32 %v5756_v39  ;;  %v5757_v55 = vmul.f32 -1.442695, %v2710_v20  ;;  %v10516_v39 = vld [vmem:[#allocation90_spill] sm:$0xff]  ;;  %v10518_v20 = vld [vmem:[#allocation91_spill] sm:$0xff] }
 0x62f   :  { %v2701_v50 = vpop.f32.mrf.mxu0  ;;  %v10519_v6 = vld [vmem:[#allocation135_spill] sm:$0xff] }
 0x630   :  { %6200 = vpow2.f32 %v5757_v55  ;;  %v10520_v55 = vld [vmem:[#allocation93_spill] sm:$0xff] }
 0x631   :  { %6202 = vtanh.f32 %v8552_v24  ;;  %v10521_v50 = vld [vmem:[#allocation137_spill] sm:$0xff] }
 0x63b   :  { %v6199_v21 = vpop.eup %6198 }
 0x63c   :  { %v2743_v62 = vadd.f32 1.0, %v6199_v21  ;;  %v10522_v21 = vld [vmem:[#allocation94_spill] sm:$0xff] }
 0x63d   :  { %v6201_v4 = vpop.eup %6200 }
 0x63e   :  { %6204 = vrcp.f32 %v2743_v62  ;;  %v2744_v5 = vadd.f32 1.0, %v6201_v4  ;;  %v6203_v46 = vpop.eup %6202  ;;  %v10523_v62 = vld [vmem:[#allocation139_spill] sm:$0xff] }
 0x63f   :  { %6206 = vtanh.f32 %v8555_v14  ;;  %v10524_v4 = vld [vmem:[#allocation95_spill] sm:$0xff] }
 0x640   :  { %6208 = vrcp.f32 %v2744_v5  ;;  %v10525_v5 = vld [vmem:[#allocation141_spill] sm:$0xff] }
 0x64b   :  { %v6205_v51 = vpop.eup %6204 }
 0x64c   :  { %v6207_v15 = vpop.eup %6206  ;;  %v2757_v61 = vmul.f32 %v6205_v51, %v6203_v46  ;;  %v10526_v46 = vld [vmem:[#allocation96_spill] sm:$0xff]  ;;  %v10527_v51 = vld [vmem:[#allocation143_spill] sm:$0xff] }
 0x64d   :  { %v6209_v34 = vpop.eup %6208 }
 0x64e   :  { %v2758_v2 = vmul.f32 %v6209_v34, %v6207_v15  ;;  %v8563_v7 = vpack.c.bf16 %v2757_v61, %v2757_v61  ;;  %v10528_v15 = vld [vmem:[#allocation97_spill] sm:$0xff]  ;;  %v10530_v61 = vld [vmem:[#allocation99_spill] sm:$0xff] }
 0x64f   :  { %v10529_v34 = vld [vmem:[#allocation145_spill] sm:$0xff] }
 0x650   :  { %v8561_v56 = vpack.c.bf16 %v2758_v2, %v2758_v2  ;;  %v10531_v2 = vld [vmem:[#allocation147_spill] sm:$0xff] }
 0x652   :  { %2793 = vmatprep.mubr.bf16.mxu1 %v8561_v56  ;;  %2850 = vmatprep.mubr.bf16.mxu0 %v8561_v56 }
 0x653   :  { %2794 = vmatmul.mubr.bf16.vlgmr.msra.gmra.mxu1 %v8563_v7  ;;  %2851 = vmatmul.mubr.bf16.vlgmr.msra.gmra.mxu0 %v8563_v7 }
 0x654   :  { %2860 = vmatpush1.bf16.msra.mxu1 %v7142_v8  ;;  %2901 = vmatpush1.bf16.msra.mxu0 %v7303_v11 }
 0x655   :  { %2891 = vmatprep.mubr.bf16.mxu1 %v8561_v56  ;;  %2932 = vmatprep.mubr.bf16.mxu0 %v8561_v56 }
 0x656   :  { %2861 = vmatprep.subr.bf16.mxu1 %v7147_v10  ;;  %2902 = vmatprep.subr.bf16.mxu0 %v7309_v13 }
 0x658   :  { %2862 = vmatpush1.bf16.msra.mxu1 %v7157_v16  ;;  %2903 = vmatpush1.bf16.msra.mxu0 %v7316_v35 }
 0x659   :  { %2863 = vmatprep.subr.bf16.mxu1 %v7163_v23  ;;  %2904 = vmatprep.subr.bf16.mxu0 %v7322_v28 }
 0x65c   :  { %2864 = vmatpush1.bf16.msra.mxu1 %v7171_v25  ;;  %2905 = vmatpush1.bf16.msra.mxu0 %v10110_v17 }
 0x65d   :  { %2865 = vmatprep.subr.bf16.mxu1 %v10111_v45  ;;  %2906 = vmatprep.subr.bf16.mxu0 %v10112_v54 }
 0x660   :  { %2866 = vmatpush1.bf16.msra.mxu1 %v10113_v31  ;;  %2907 = vmatpush1.bf16.msra.mxu0 %v10114_v52 }
 0x661   :  { %2867 = vmatprep.subr.bf16.mxu1 %v10115_v44  ;;  %2908 = vmatprep.subr.bf16.mxu0 %v10116_v43 }
 0x664   :  { %2868 = vmatpush1.bf16.msra.mxu1 %v10117_v48  ;;  %2909 = vmatpush1.bf16.msra.mxu0 %v10118_v0 }
 0x665   :  { %2869 = vmatprep.subr.bf16.mxu1 %v10119_v59  ;;  %2910 = vmatprep.subr.bf16.mxu0 %v10120_v12 }
 0x668   :  { %2870 = vmatpush1.bf16.msra.mxu1 %v10121_v26  ;;  %2911 = vmatpush1.bf16.msra.mxu0 %v10122_v1 }
 0x669   :  { %2871 = vmatprep.subr.bf16.mxu1 %v10123_v42  ;;  %2912 = vmatprep.subr.bf16.mxu0 %v10124_v3 }
 0x66c   :  { %2872 = vmatpush1.bf16.msra.mxu1 %v10125_v22  ;;  %2913 = vmatpush1.bf16.msra.mxu0 %v10251_v41 }
 0x66d   :  { %2873 = vmatprep.subr.bf16.mxu1 %v10252_v38  ;;  %2914 = vmatprep.subr.bf16.mxu0 %v10253_v36 }
 0x670   :  { %2874 = vmatpush1.bf16.msra.mxu1 %v10254_v58  ;;  %2915 = vmatpush1.bf16.msra.mxu0 %v10255_v60 }
 0x671   :  { %2875 = vmatprep.subr.bf16.mxu1 %v10256_v40  ;;  %2916 = vmatprep.subr.bf16.mxu0 %v10257_v53 }
 0x674   :  { %2876 = vmatpush2.bf16.msra.mxu1 %v10258_v30  ;;  %2917 = vmatpush2.bf16.msra.mxu0 %v10259_v19 }
 0x675   :  { %2877 = vmatprep.subr.bf16.mxu1 %v10260_v9  ;;  %2918 = vmatprep.subr.bf16.mxu0 %v10261_v33 }
 0x678   :  { %2878 = vmatpush2.bf16.msra.mxu1 %v10262_v49  ;;  %2919 = vmatpush2.bf16.msra.mxu0 %v10263_v47 }
 0x679   :  { %2879 = vmatprep.subr.bf16.mxu1 %v10382_v32  ;;  %2920 = vmatprep.subr.bf16.mxu0 %v10264_v57 }
 0x67c   :  { %2880 = vmatpush2.bf16.msra.mxu1 %v10383_v27  ;;  %2921 = vmatpush2.bf16.msra.mxu0 %v10513_v37 }
 0x67d   :  { %2881 = vmatprep.subr.bf16.mxu1 %v10514_v29  ;;  %2922 = vmatprep.subr.bf16.mxu0 %v10515_v18  ;;  %v10638_v29 = vld [vmem:[#allocation183_spill] sm:$0xff] }
 0x680   :  { %2882 = vmatpush2.bf16.msra.mxu1 %v10516_v39  ;;  %2923 = vmatpush2.bf16.msra.mxu0 %v10517_v63 }
 0x681   :  { %2883 = vmatprep.subr.bf16.mxu1 %v10518_v20  ;;  %2924 = vmatprep.subr.bf16.mxu0 %v10519_v6 }
 0x684   :  { %2884 = vmatpush2.bf16.msra.mxu1 %v10520_v55  ;;  %2925 = vmatpush2.bf16.msra.mxu0 %v10521_v50  ;;  %v10532_v50 = vld [vmem:[#allocation101_spill] sm:$0xff] }
 0x685   :  { %2885 = vmatprep.subr.bf16.mxu1 %v10522_v21  ;;  %2926 = vmatprep.subr.bf16.mxu0 %v10523_v62  ;;  %v10533_v21 = vld [vmem:[#allocation149_spill] sm:$0xff]  ;;  %v10534_v62 = vld [vmem:[#allocation104_spill] sm:$0xff] }
 0x688   :  { %2886 = vmatpush2.bf16.msra.mxu1 %v10524_v4  ;;  %2927 = vmatpush2.bf16.msra.mxu0 %v10525_v5  ;;  %v10535_v4 = vld [vmem:[#allocation102_spill] sm:$0xff] }
 0x689   :  { %2887 = vmatprep.subr.bf16.mxu1 %v10526_v46  ;;  %2928 = vmatprep.subr.bf16.mxu0 %v10527_v51  ;;  %v10536_v51 = vld [vmem:[#allocation106_spill] sm:$0xff]  ;;  %v10545_v46 = vld [vmem:[#allocation116_spill] sm:$0xff] }
 0x68c   :  { %2888 = vmatpush2.bf16.msra.mxu1 %v10528_v15  ;;  %2929 = vmatpush2.bf16.msra.mxu0 %v10529_v34  ;;  %v10537_v34 = vld [vmem:[#allocation108_spill] sm:$0xff]  ;;  %v10544_v15 = vld [vmem:[#allocation114_spill] sm:$0xff] }
 0x68d   :  { %2889 = vmatprep.subr.bf16.mxu1 %v10530_v61  ;;  %2930 = vmatprep.subr.bf16.mxu0 %v10531_v2  ;;  %v10538_v61 = vld [vmem:[#allocation60_spill] sm:$0xff]  ;;  %v10539_v2 = vld [vmem:[#allocation103_spill] sm:$0xff] }
 0x690   :  { %2890 = vmatpush2.bf16.msra.mxu1 %v10532_v50  ;;  %2931 = vmatpush2.bf16.msra.mxu0 %v10533_v21  ;;  %v10540_v50 = vld [vmem:[#allocation110_spill] sm:$0xff]  ;;  %v10541_v21 = vld [vmem:[#allocation112_spill] sm:$0xff] }
 0x691   :  { %2941 = vmatprep.subr.bf16.mxu1 %v10534_v62  ;;  %3040 = vmatprep.subr.bf16.mxu0 %v10535_v4  ;;  %v10542_v62 = vld [vmem:[#allocation62_spill] sm:$0xff]  ;;  %v10543_v4 = vld [vmem:[#allocation105_spill] sm:$0xff] }
 0x693   :  { %2892 = vmatmul.mubr.bf16.vlgmr.msra.gmra.mxu1 %v8563_v7  ;;  %2933 = vmatmul.mubr.bf16.vlgmr.msra.gmra.mxu0 %v8563_v7 }
 0x694   :  { %2942 = vmatpush1.bf16.msra.mxu1 %v10536_v51  ;;  %2973 = vmatprep.mubr.bf16.mxu1 %v8561_v56  ;;  %v10546_v51 = vld [vmem:[#allocation64_spill] sm:$0xff]  ;;  %v10547_v56 = vld [vmem:[#allocation107_spill] sm:$0xff] }
 0x695   :  { %2943 = vmatprep.subr.bf16.mxu1 %v10537_v34  ;;  %3041 = vmatpush1.bf16.msra.mxu0 %v10538_v61  ;;  %v10548_v34 = vld [vmem:[#allocation118_spill] sm:$0xff]  ;;  %v10549_v61 = vld [vmem:[#allocation120_spill] sm:$0xff] }
 0x696   :  { %3042 = vmatprep.subr.bf16.mxu0 %v10539_v2  ;;  %v10550_v2 = vld [vmem:[#allocation66_spill] sm:$0xff] }
 0x698   :  { %2944 = vmatpush1.bf16.msra.mxu1 %v10540_v50  ;;  %v10551_v50 = vld [vmem:[#allocation109_spill] sm:$0xff] }
 0x699   :  { %2945 = vmatprep.subr.bf16.mxu1 %v10541_v21  ;;  %3043 = vmatpush1.bf16.msra.mxu0 %v10542_v62  ;;  %v10552_v21 = vld [vmem:[#allocation122_spill] sm:$0xff]  ;;  %v10553_v62 = vld [vmem:[#allocation124_spill] sm:$0xff] }
 0x69a   :  { %3044 = vmatprep.subr.bf16.mxu0 %v10543_v4  ;;  %v10554_v4 = vld [vmem:[#allocation68_spill] sm:$0xff] }
 0x69c   :  { %2946 = vmatpush1.bf16.msra.mxu1 %v10544_v15  ;;  %v10555_v15 = vld [vmem:[#allocation111_spill] sm:$0xff] }
 0x69d   :  { %2947 = vmatprep.subr.bf16.mxu1 %v10545_v46  ;;  %3045 = vmatpush1.bf16.msra.mxu0 %v10546_v51  ;;  %v10556_v46 = vld [vmem:[#allocation126_spill] sm:$0xff]  ;;  %v10557_v51 = vld [vmem:[#allocation128_spill] sm:$0xff] }
 0x69e   :  { %3046 = vmatprep.subr.bf16.mxu0 %v10547_v56  ;;  %v10558_v56 = vld [vmem:[#allocation70_spill] sm:$0xff] }
 0x6a0   :  { %2948 = vmatpush1.bf16.msra.mxu1 %v10548_v34  ;;  %v10559_v34 = vld [vmem:[#allocation166_spill] sm:$0xff] }
 0x6a1   :  { %2949 = vmatprep.subr.bf16.mxu1 %v10549_v61  ;;  %3047 = vmatpush1.bf16.msra.mxu0 %v10550_v2  ;;  %v10560_v61 = vld [vmem:[#allocation130_spill] sm:$0xff]  ;;  %v10561_v2 = vld [vmem:[#allocation132_spill] sm:$0xff] }
 0x6a2   :  { %3048 = vmatprep.subr.bf16.mxu0 %v10551_v50  ;;  %v10562_v50 = vld [vmem:[#allocation168_spill] sm:$0xff] }
 0x6a4   :  { %2950 = vmatpush1.bf16.msra.mxu1 %v10552_v21  ;;  %v10563_v21 = vld [vmem:[#allocation171_spill] sm:$0xff] }
 0x6a5   :  { %2951 = vmatprep.subr.bf16.mxu1 %v10553_v62  ;;  %3049 = vmatpush1.bf16.msra.mxu0 %v10554_v4  ;;  %v10564_v62 = vld [vmem:[#allocation134_spill] sm:$0xff]  ;;  %v10565_v4 = vld [vmem:[#allocation136_spill] sm:$0xff] }
 0x6a6   :  { %3050 = vmatprep.subr.bf16.mxu0 %v10555_v15  ;;  %v10566_v15 = vld [vmem:[#allocation186_spill] sm:$0xff] }
 0x6a8   :  { %2952 = vmatpush1.bf16.msra.mxu1 %v10556_v46  ;;  %v10567_v46 = vld [vmem:[#allocation199_spill] sm:$0xff] }
 0x6a9   :  { %2953 = vmatprep.subr.bf16.mxu1 %v10557_v51  ;;  %3051 = vmatpush1.bf16.msra.mxu0 %v10558_v56  ;;  %v10568_v51 = vld [vmem:[#allocation138_spill] sm:$0xff]  ;;  %v10569_v56 = vld [vmem:[#allocation140_spill] sm:$0xff] }
 0x6aa   :  { %3052 = vmatprep.subr.bf16.mxu0 %v10559_v34  ;;  %v10570_v34 = vld [vmem:[#allocation201_spill] sm:$0xff] }
 0x6ac   :  { %2954 = vmatpush1.bf16.msra.mxu1 %v10560_v61  ;;  %v10571_v61 = vld [vmem:[#allocation113_spill] sm:$0xff] }
 0x6ad   :  { %2955 = vmatprep.subr.bf16.mxu1 %v10561_v2  ;;  %3053 = vmatpush1.bf16.msra.mxu0 %v10562_v50  ;;  %v10572_v2 = vld [vmem:[#allocation142_spill] sm:$0xff]  ;;  %v10573_v50 = vld [vmem:[#allocation144_spill] sm:$0xff] }
 0x6ae   :  { %3054 = vmatprep.subr.bf16.mxu0 %v10563_v21  ;;  %v10574_v21 = vld [vmem:[#allocation72_spill] sm:$0xff] }
 0x6b0   :  { %2956 = vmatpush1.bf16.msra.mxu1 %v10564_v62  ;;  %v10575_v62 = vld [vmem:[#allocation115_spill] sm:$0xff] }
 0x6b1   :  { %2957 = vmatprep.subr.bf16.mxu1 %v10565_v4  ;;  %3055 = vmatpush1.bf16.msra.mxu0 %v10566_v15  ;;  %v10576_v4 = vld [vmem:[#allocation146_spill] sm:$0xff]  ;;  %v10577_v15 = vld [vmem:[#allocation148_spill] sm:$0xff] }
 0x6b2   :  { %3056 = vmatprep.subr.bf16.mxu0 %v10567_v46  ;;  %v10578_v46 = vld [vmem:[#allocation74_spill] sm:$0xff] }
 0x6b4   :  { %2958 = vmatpush2.bf16.msra.mxu1 %v10568_v51  ;;  %v10579_v51 = vld [vmem:[#allocation117_spill] sm:$0xff] }
 0x6b5   :  { %2959 = vmatprep.subr.bf16.mxu1 %v10569_v56  ;;  %3057 = vmatpush2.bf16.msra.mxu0 %v10570_v34  ;;  %v10580_v56 = vld [vmem:[#allocation150_spill] sm:$0xff]  ;;  %v10581_v34 = vld [vmem:[#allocation151_spill] sm:$0xff] }
 0x6b6   :  { %3058 = vmatprep.subr.bf16.mxu0 %v10571_v61  ;;  %v10582_v61 = vld [vmem:[#allocation76_spill] sm:$0xff] }
 0x6b8   :  { %2960 = vmatpush2.bf16.msra.mxu1 %v10572_v2  ;;  %v10583_v2 = vld [vmem:[#allocation119_spill] sm:$0xff] }
 0x6b9   :  { %2961 = vmatprep.subr.bf16.mxu1 %v10573_v50  ;;  %3059 = vmatpush2.bf16.msra.mxu0 %v10574_v21  ;;  %v10584_v50 = vld [vmem:[#allocation152_spill] sm:$0xff]  ;;  %v10585_v21 = vld [vmem:[#allocation153_spill] sm:$0xff] }
 0x6ba   :  { %3060 = vmatprep.subr.bf16.mxu0 %v10575_v62  ;;  %v10586_v62 = vld [vmem:[#allocation78_spill] sm:$0xff] }
 0x6bc   :  { %2962 = vmatpush2.bf16.msra.mxu1 %v10576_v4  ;;  %v10587_v4 = vld [vmem:[#allocation121_spill] sm:$0xff] }
 0x6bd   :  { %2963 = vmatprep.subr.bf16.mxu1 %v10577_v15  ;;  %3061 = vmatpush2.bf16.msra.mxu0 %v10578_v46  ;;  %v10588_v15 = vld [vmem:[#allocation154_spill] sm:$0xff]  ;;  %v10589_v46 = vld [vmem:[#allocation155_spill] sm:$0xff] }
 0x6be   :  { %3062 = vmatprep.subr.bf16.mxu0 %v10579_v51  ;;  %v10590_v51 = vld [vmem:[#allocation80_spill] sm:$0xff] }
 0x6c0   :  { %2964 = vmatpush2.bf16.msra.mxu1 %v10580_v56  ;;  %v10591_v56 = vld [vmem:[#allocation123_spill] sm:$0xff] }
 0x6c1   :  { %2965 = vmatprep.subr.bf16.mxu1 %v10581_v34  ;;  %3063 = vmatpush2.bf16.msra.mxu0 %v10582_v61  ;;  %v10592_v34 = vld [vmem:[#allocation156_spill] sm:$0xff]  ;;  %v10593_v61 = vld [vmem:[#allocation157_spill] sm:$0xff] }
 0x6c2   :  { %3064 = vmatprep.subr.bf16.mxu0 %v10583_v2  ;;  %v10594_v2 = vld [vmem:[#allocation82_spill] sm:$0xff] }
 0x6c4   :  { %2966 = vmatpush2.bf16.msra.mxu1 %v10584_v50  ;;  %v10595_v50 = vld [vmem:[#allocation125_spill] sm:$0xff] }
 0x6c5   :  { %2967 = vmatprep.subr.bf16.mxu1 %v10585_v21  ;;  %3065 = vmatpush2.bf16.msra.mxu0 %v10586_v62  ;;  %v10596_v21 = vld [vmem:[#allocation158_spill] sm:$0xff]  ;;  %v10597_v62 = vld [vmem:[#allocation40_spill] sm:$0xff] }
 0x6c6   :  { %3066 = vmatprep.subr.bf16.mxu0 %v10587_v4  ;;  %v10598_v4 = vld [vmem:[#allocation127_spill] sm:$0xff] }
 0x6c8   :  { %2968 = vmatpush2.bf16.msra.mxu1 %v10588_v15  ;;  %v10599_v15 = vld [vmem:[#allocation41_spill] sm:$0xff] }
 0x6c9   :  { %2969 = vmatprep.subr.bf16.mxu1 %v10589_v46  ;;  %3067 = vmatpush2.bf16.msra.mxu0 %v10590_v51  ;;  %v10600_v51 = vld [vmem:[#allocation42_spill] sm:$0xff] }
 0x6ca   :  { %3068 = vmatprep.subr.bf16.mxu0 %v10591_v56  ;;  %v10601_v56 = vld [vmem:[#allocation43_spill] sm:$0xff]  ;;  %v10632_v46 = vld [vmem:[#allocation98_spill] sm:$0xff] }
 0x6cc   :  { %2970 = vmatpush2.bf16.msra.mxu1 %v10592_v34  ;;  %v10602_v34 = vld [vmem:[#allocation44_spill] sm:$0xff] }
 0x6cd   :  { %2971 = vmatprep.subr.bf16.mxu1 %v10593_v61  ;;  %3069 = vmatpush2.bf16.msra.mxu0 %v10594_v2  ;;  %v10603_v61 = vld [vmem:[#allocation45_spill] sm:$0xff]  ;;  %v10604_v2 = vld [vmem:[#allocation46_spill] sm:$0xff] }
 0x6ce   :  { %3070 = vmatprep.subr.bf16.mxu0 %v10595_v50  ;;  %v10605_v50 = vld [vmem:[#allocation47_spill] sm:$0xff] }
 0x6d0   :  { %2972 = vmatpush2.bf16.msra.mxu1 %v10596_v21  ;;  %v10606_v21 = vld [vmem:[#allocation48_spill] sm:$0xff] }
 0x6d1   :  { %3097 = vmatprep.subr.bf16.mxu1 %v10597_v62  ;;  %3071 = vmatpush2.bf16.msra.mxu0 %v10598_v4  ;;  %v10607_v62 = vld [vmem:[#allocation49_spill] sm:$0xff]  ;;  %v10608_v4 = vld [vmem:[#allocation50_spill] sm:$0xff] }
 0x6d2   :  { %3138 = vmatprep.subr.bf16.mxu0 %v10599_v15  ;;  %v10609_v15 = vld [vmem:[#allocation51_spill] sm:$0xff] }
 0x6d3   :  { %2974 = vmatmul.mubr.bf16.vlgmr.msra.gmra.mxu1 %v8563_v7  ;;  %v10610_v7 = vld [vmem:[#allocation52_spill] sm:$0xff] }
 0x6d4   :  { %3098 = vmatpush1.bf16.msra.mxu1 %v10600_v51  ;;  %v10611_v51 = vld [vmem:[#allocation53_spill] sm:$0xff] }
 0x6d5   :  { %3099 = vmatprep.subr.bf16.mxu1 %v10601_v56  ;;  %v10612_v56 = vld [vmem:[#allocation54_spill] sm:$0xff] }
 0x6d8   :  { %3100 = vmatpush1.bf16.msra.mxu1 %v10602_v34  ;;  %v10613_v34 = vld [vmem:[#allocation55_spill] sm:$0xff] }
 0x6d9   :  { %3101 = vmatprep.subr.bf16.mxu1 %v10603_v61  ;;  %v10614_v61 = vld [vmem:[#allocation57_spill] sm:$0xff] }
 0x6dc   :  { %3102 = vmatpush1.bf16.msra.mxu1 %v10604_v2  ;;  %v10615_v2 = vld [vmem:[#allocation59_spill] sm:$0xff] }
 0x6dd   :  { %3103 = vmatprep.subr.bf16.mxu1 %v10605_v50  ;;  %v10616_v50 = vld [vmem:[#allocation61_spill] sm:$0xff] }
 0x6e0   :  { %3104 = vmatpush1.bf16.msra.mxu1 %v10606_v21  ;;  %v10617_v21 = vld [vmem:[#allocation63_spill] sm:$0xff] }
 0x6e1   :  { %3105 = vmatprep.subr.bf16.mxu1 %v10607_v62  ;;  %v10618_v62 = vld [vmem:[#allocation65_spill] sm:$0xff] }
 0x6e4   :  { %3106 = vmatpush1.bf16.msra.mxu1 %v10608_v4  ;;  %v10619_v4 = vld [vmem:[#allocation67_spill] sm:$0xff] }
 0x6e5   :  { %3107 = vmatprep.subr.bf16.mxu1 %v10609_v15  ;;  %v10620_v15 = vld [vmem:[#allocation69_spill] sm:$0xff] }
 0x6e8   :  { %3108 = vmatpush1.bf16.msra.mxu1 %v10610_v7  ;;  %v10621_v7 = vld [vmem:[#allocation71_spill] sm:$0xff] }
 0x6e9   :  { %3109 = vmatprep.subr.bf16.mxu1 %v10611_v51  ;;  %v10622_v51 = vld [vmem:[#allocation73_spill] sm:$0xff] }
 0x6ec   :  { %3110 = vmatpush1.bf16.msra.mxu1 %v10612_v56  ;;  %v10623_v56 = vld [vmem:[#allocation75_spill] sm:$0xff] }
 0x6ed   :  { %3111 = vmatprep.subr.bf16.mxu1 %v10613_v34  ;;  %v10624_v34 = vld [vmem:[#allocation77_spill] sm:$0xff] }
 0x6f0   :  { %3112 = vmatpush1.bf16.msra.mxu1 %v10614_v61  ;;  %v10625_v61 = vld [vmem:[#allocation79_spill] sm:$0xff] }
 0x6f1   :  { %3113 = vmatprep.subr.bf16.mxu1 %v10615_v2  ;;  %v10626_v2 = vld [vmem:[#allocation81_spill] sm:$0xff] }
 0x6f4   :  { %3114 = vmatpush2.bf16.msra.mxu1 %v10616_v50  ;;  %v10627_v50 = vld [vmem:[#allocation83_spill] sm:$0xff] }
 0x6f5   :  { %3115 = vmatprep.subr.bf16.mxu1 %v10617_v21  ;;  %v10628_v21 = vld [vmem:[#allocation85_spill] sm:$0xff] }
 0x6f8   :  { %3116 = vmatpush2.bf16.msra.mxu1 %v10618_v62  ;;  %v10629_v62 = vld [vmem:[#allocation87_spill] sm:$0xff] }
 0x6f9   :  { %3117 = vmatprep.subr.bf16.mxu1 %v10619_v4  ;;  %v10630_v4 = vld [vmem:[#allocation89_spill] sm:$0xff] }
 0x6fc   :  { %3118 = vmatpush2.bf16.msra.mxu1 %v10620_v15  ;;  %v10631_v15 = vld [vmem:[#allocation92_spill] sm:$0xff] }
 0x6fd   :  { %3119 = vmatprep.subr.bf16.mxu1 %v10621_v7 }
 0x700   :  { %3120 = vmatpush2.bf16.msra.mxu1 %v10622_v51 }
 0x701   :  { %3121 = vmatprep.subr.bf16.mxu1 %v10623_v56 }
 0x704   :  { %3122 = vmatpush2.bf16.msra.mxu1 %v10624_v34  ;;  %v10634_v34 = vld [vmem:[#allocation176_spill] sm:$0xff] }
 0x705   :  { %3123 = vmatprep.subr.bf16.mxu1 %v10625_v61 }
 0x708   :  { %3124 = vmatpush2.bf16.msra.mxu1 %v10626_v2  ;;  %v10635_v2 = vld [vmem:[#allocation56_spill] sm:$0xff] }
 0x709   :  { %3125 = vmatprep.subr.bf16.mxu1 %v10627_v50  ;;  %v10637_v50 = vld [vmem:[#allocation178_spill] sm:$0xff] }
 0x70c   :  { %3126 = vmatpush2.bf16.msra.mxu1 %v10628_v21 }
 0x70d   :  { %3127 = vmatprep.subr.bf16.mxu1 %v10629_v62 }
 0x710   :  { %3128 = vmatpush2.bf16.msra.mxu1 %v10630_v4 }
 0x711   :  { %3179 = vmatprep.subr.bf16.mxu1 %v10631_v15 }
 0x713   :  { %v2795_v7 = vpop.f32.mrf.mxu1  ;;  %v2852_v51 = vpop.f32.mrf.mxu0 }
 0x714   :  { %v8736_v56 = vadd.f32 %v2795_v7, %v10632_v46  ;;  %v2982_v5 = vadd.f32 %v2852_v51, %v10634_v34 }
 0x715   :  { %v2797_v61 = vpop.f32.mrf.mxu1  ;;  %v2854_v55 = vpop.f32.mrf.mxu0 }
 0x716   :  { %10633 = vst [vmem:[#allocation209_spill] sm:$0xff] %v8736_v56  ;;  %v8740_v6 = vadd.f32 %v2797_v61, %v10635_v2  ;;  %v2983_v21 = vadd.f32 %v2854_v55, %v10637_v50  ;;  %v5758_v39 = vmul.f32 -1.442695, %v2982_v5  ;;  %v10639_v61 = vld [vmem:[#allocation197_spill] sm:$0xff] }
 0x717   :  { %v2799_v20 = vpop.f32.mrf.mxu1  ;;  %v2856_v62 = vpop.f32.mrf.mxu0 }
 0x718   :  { %10636 = vst [vmem:[#allocation212_spill] sm:$0xff] %v8740_v6  ;;  %v5759_v15 = vmul.f32 -1.442695, %v2983_v21  ;;  %6210 = vpow2.f32 %v5758_v39 }
 0x719   :  { %v2800_v63 = vpop.f32.mrf.mxu1  ;;  %v2857_v4 = vpop.f32.mrf.mxu0 }
 0x71a   :  { %6212 = vpow2.f32 %v5759_v15  ;;  %v10640_v63 = vld [vmem:[#allocation184_spill] sm:$0xff]  ;;  %v10641_v4 = vld [vmem:[#allocation198_spill] sm:$0xff] }
 0x725   :  { %v6211_v18 = vpop.eup %6210 }
 0x726   :  { %v3002_v56 = vadd.f32 1.0, %v6211_v18 }
 0x727   :  { %v6213_v7 = vpop.eup %6212 }
 0x728   :  { %v3003_v46 = vadd.f32 1.0, %v6213_v7  ;;  %6214 = vrcp.f32 %v3002_v56 }
 0x753   :  { %v2893_v51 = vpop.f32.mrf.mxu1  ;;  %v2934_v34 = vpop.f32.mrf.mxu0 }
 0x754   :  { %v2984_v37 = vadd.f32 %v2893_v51, %v10638_v29  ;;  %v2986_v6 = vadd.f32 %v2934_v34, %v10639_v61  ;;  %v6215_v29 = vpop.eup %6214 }
 0x755   :  { %v2895_v55 = vpop.f32.mrf.mxu1  ;;  %v2936_v20 = vpop.f32.mrf.mxu0 }
 0x756   :  { %v5760_v62 = vmul.f32 -1.442695, %v2984_v37  ;;  %6216 = vtanh.f32 %v2986_v6  ;;  %v2985_v5 = vadd.f32 %v2895_v55, %v10640_v63  ;;  %v2987_v39 = vadd.f32 %v2936_v20, %v10641_v4 }
 0x757   :  { %6218 = vrcp.f32 %v3003_v46  ;;  %v2897_v50 = vpop.f32.mrf.mxu1  ;;  %v2938_v21 = vpop.f32.mrf.mxu0 }
 0x758   :  { %6220 = vpow2.f32 %v5760_v62  ;;  %v5761_v18 = vmul.f32 -1.442695, %v2985_v5  ;;  %v10642_v21 = vld [vmem:[#allocation216_spill] sm:$0xff] }
 0x759   :  { %6222 = vtanh.f32 %v2987_v39  ;;  %v2898_v15 = vpop.f32.mrf.mxu1  ;;  %v2939_v7 = vpop.f32.mrf.mxu0 }
 0x75a   :  { %6224 = vpow2.f32 %v5761_v18 }
 0x763   :  { %v6217_v51 = vpop.eup %6216 }
 0x764   :  { %v6219_v56 = vpop.eup %6218  ;;  %v3030_v34 = vmul.f32 %v6217_v51, %v6215_v29  ;;  %v10643_v29 = vld [vmem:[#allocation218_spill] sm:$0xff] }
 0x765   :  { %v6221_v61 = vpop.eup %6220 }
 0x766   :  { %v6223_v37 = vpop.eup %6222  ;;  %v3004_v6 = vadd.f32 1.0, %v6221_v61 }
 0x767   :  { %v6225_v2 = vpop.eup %6224  ;;  %v3031_v55 = vmul.f32 %v6223_v37, %v6219_v56 }
 0x768   :  { %6226 = vrcp.f32 %v3004_v6  ;;  %v3005_v20 = vadd.f32 1.0, %v6225_v2 }
 0x76a   :  { %6228 = vrcp.f32 %v3005_v20 }
 0x775   :  { %v6227_v46 = vpop.eup %6226 }
 0x776   :  { %v3028_v62 = vmul.f32 %v6227_v46, %v8552_v24 }
 0x777   :  { %v6229_v63 = vpop.eup %6228 }
 0x778   :  { %v8748_v5 = vadd.f32 %v3030_v34, %v3028_v62  ;;  %v3029_v4 = vmul.f32 %v6229_v63, %v8555_v14 }
 0x77a   :  { %v8751_v39 = vadd.f32 %v3031_v55, %v3029_v4 }
 0x793   :  { %v2975_v50 = vpop.f32.mrf.mxu1 }
 0x794   :  { %v2988_v18 = vadd.f32 %v2975_v50, %v10642_v21  ;;  %v10644_v21 = vld [vmem:[#allocation129_spill] sm:$0xff] }
 0x795   :  { %v2977_v15 = vpop.f32.mrf.mxu1 }
 0x796   :  { %v5762_v7 = vmul.f32 -1.442695, %v2988_v18  ;;  %v2989_v51 = vadd.f32 %v2977_v15, %v10643_v29  ;;  %v10645_v18 = vld [vmem:[#allocation88_spill] sm:$0xff]  ;;  %v10646_v15 = vld [vmem:[#allocation131_spill] sm:$0xff]  ;;  %v10648_v29 = vld [vmem:[#allocation133_spill] sm:$0xff] }
 0x797   :  { %v2979_v56 = vpop.f32.mrf.mxu1 }
 0x798   :  { %6230 = vpow2.f32 %v5762_v7  ;;  %v5763_v2 = vmul.f32 -1.442695, %v2989_v51  ;;  %v10647_v7 = vld [vmem:[#allocation90_spill] sm:$0xff]  ;;  %v10649_v51 = vld [vmem:[#allocation91_spill] sm:$0xff] }
 0x799   :  { %v2980_v61 = vpop.f32.mrf.mxu1  ;;  %v10650_v56 = vld [vmem:[#allocation135_spill] sm:$0xff] }
 0x79a   :  { %6232 = vpow2.f32 %v5763_v2  ;;  %v10651_v2 = vld [vmem:[#allocation93_spill] sm:$0xff] }
 0x79b   :  { %6234 = vtanh.f32 %v8748_v5  ;;  %v10652_v61 = vld [vmem:[#allocation137_spill] sm:$0xff] }
 0x7a5   :  { %v6231_v24 = vpop.eup %6230 }
 0x7a6   :  { %v3022_v37 = vadd.f32 1.0, %v6231_v24  ;;  %v10653_v24 = vld [vmem:[#allocation94_spill] sm:$0xff] }
 0x7a7   :  { %v6233_v34 = vpop.eup %6232 }
 0x7a8   :  { %6236 = vrcp.f32 %v3022_v37  ;;  %v3023_v14 = vadd.f32 1.0, %v6233_v34  ;;  %v6235_v6 = vpop.eup %6234  ;;  %v10654_v37 = vld [vmem:[#allocation139_spill] sm:$0xff] }
 0x7a9   :  { %6238 = vtanh.f32 %v8751_v39  ;;  %v10655_v34 = vld [vmem:[#allocation95_spill] sm:$0xff] }
 0x7aa   :  { %6240 = vrcp.f32 %v3023_v14  ;;  %v10656_v14 = vld [vmem:[#allocation141_spill] sm:$0xff] }
 0x7b5   :  { %v6237_v55 = vpop.eup %6236 }
 0x7b6   :  { %v6239_v20 = vpop.eup %6238  ;;  %v3036_v62 = vmul.f32 %v6237_v55, %v6235_v6  ;;  %v10657_v6 = vld [vmem:[#allocation96_spill] sm:$0xff]  ;;  %v10658_v55 = vld [vmem:[#allocation143_spill] sm:$0xff] }
 0x7b7   :  { %v6241_v46 = vpop.eup %6240 }
 0x7b8   :  { %v3037_v63 = vmul.f32 %v6241_v46, %v6239_v20  ;;  %v8759_v50 = vpack.c.bf16 %v3036_v62, %v3036_v62  ;;  %v10659_v20 = vld [vmem:[#allocation97_spill] sm:$0xff]  ;;  %v10661_v62 = vld [vmem:[#allocation99_spill] sm:$0xff] }
 0x7b9   :  { %v10660_v46 = vld [vmem:[#allocation145_spill] sm:$0xff] }
 0x7ba   :  { %v8757_v4 = vpack.c.bf16 %v3037_v63, %v3037_v63  ;;  %v10662_v63 = vld [vmem:[#allocation147_spill] sm:$0xff] }
 0x7bc   :  { %3072 = vmatprep.mubr.bf16.mxu0 %v8757_v4  ;;  %3129 = vmatprep.mubr.bf16.mxu1 %v8757_v4 }
 0x7bd   :  { %3073 = vmatmul.mubr.bf16.vlgmr.msra.gmra.mxu0 %v8759_v50  ;;  %3130 = vmatmul.mubr.bf16.vlgmr.msra.gmra.mxu1 %v8759_v50 }
 0x7be   :  { %3139 = vmatpush1.bf16.msra.mxu0 %v7142_v8  ;;  %3180 = vmatpush1.bf16.msra.mxu1 %v7303_v11 }
 0x7bf   :  { %3170 = vmatprep.mubr.bf16.mxu0 %v8757_v4  ;;  %3211 = vmatprep.mubr.bf16.mxu1 %v8757_v4 }
 0x7c0   :  { %3140 = vmatprep.subr.bf16.mxu0 %v7147_v10  ;;  %3181 = vmatprep.subr.bf16.mxu1 %v7309_v13 }
 0x7c2   :  { %3141 = vmatpush1.bf16.msra.mxu0 %v7157_v16  ;;  %3182 = vmatpush1.bf16.msra.mxu1 %v7316_v35 }
 0x7c3   :  { %3142 = vmatprep.subr.bf16.mxu0 %v7163_v23  ;;  %3183 = vmatprep.subr.bf16.mxu1 %v7322_v28 }
 0x7c6   :  { %3143 = vmatpush1.bf16.msra.mxu0 %v7171_v25  ;;  %3184 = vmatpush1.bf16.msra.mxu1 %v10110_v17 }
 0x7c7   :  { %3144 = vmatprep.subr.bf16.mxu0 %v10111_v45  ;;  %3185 = vmatprep.subr.bf16.mxu1 %v10112_v54 }
 0x7ca   :  { %3145 = vmatpush1.bf16.msra.mxu0 %v10113_v31  ;;  %3186 = vmatpush1.bf16.msra.mxu1 %v10114_v52 }
 0x7cb   :  { %3146 = vmatprep.subr.bf16.mxu0 %v10115_v44  ;;  %3187 = vmatprep.subr.bf16.mxu1 %v10116_v43 }
 0x7ce   :  { %3147 = vmatpush1.bf16.msra.mxu0 %v10117_v48  ;;  %3188 = vmatpush1.bf16.msra.mxu1 %v10118_v0 }
 0x7cf   :  { %3148 = vmatprep.subr.bf16.mxu0 %v10119_v59  ;;  %3189 = vmatprep.subr.bf16.mxu1 %v10120_v12 }
 0x7d2   :  { %3149 = vmatpush1.bf16.msra.mxu0 %v10121_v26  ;;  %3190 = vmatpush1.bf16.msra.mxu1 %v10122_v1 }
 0x7d3   :  { %3150 = vmatprep.subr.bf16.mxu0 %v10123_v42  ;;  %3191 = vmatprep.subr.bf16.mxu1 %v10124_v3 }
 0x7d6   :  { %3151 = vmatpush1.bf16.msra.mxu0 %v10125_v22  ;;  %3192 = vmatpush1.bf16.msra.mxu1 %v10251_v41 }
 0x7d7   :  { %3152 = vmatprep.subr.bf16.mxu0 %v10252_v38  ;;  %3193 = vmatprep.subr.bf16.mxu1 %v10253_v36 }
 0x7da   :  { %3153 = vmatpush1.bf16.msra.mxu0 %v10254_v58  ;;  %3194 = vmatpush1.bf16.msra.mxu1 %v10255_v60 }
 0x7db   :  { %3154 = vmatprep.subr.bf16.mxu0 %v10256_v40  ;;  %3195 = vmatprep.subr.bf16.mxu1 %v10257_v53 }
 0x7de   :  { %3155 = vmatpush2.bf16.msra.mxu0 %v10258_v30  ;;  %3196 = vmatpush2.bf16.msra.mxu1 %v10259_v19 }
 0x7df   :  { %3156 = vmatprep.subr.bf16.mxu0 %v10260_v9  ;;  %3197 = vmatprep.subr.bf16.mxu1 %v10261_v33 }
 0x7e2   :  { %3157 = vmatpush2.bf16.msra.mxu0 %v10262_v49  ;;  %3198 = vmatpush2.bf16.msra.mxu1 %v10263_v47 }
 0x7e3   :  { %3158 = vmatprep.subr.bf16.mxu0 %v10382_v32  ;;  %3199 = vmatprep.subr.bf16.mxu1 %v10264_v57 }
 0x7e6   :  { %3159 = vmatpush2.bf16.msra.mxu0 %v10383_v27  ;;  %3200 = vmatpush2.bf16.msra.mxu1 %v10644_v21 }
 0x7e7   :  { %3160 = vmatprep.subr.bf16.mxu0 %v10645_v18  ;;  %3201 = vmatprep.subr.bf16.mxu1 %v10646_v15  ;;  %v10769_v18 = vld [vmem:[#allocation185_spill] sm:$0xff] }
 0x7ea   :  { %3161 = vmatpush2.bf16.msra.mxu0 %v10647_v7  ;;  %3202 = vmatpush2.bf16.msra.mxu1 %v10648_v29 }
 0x7eb   :  { %3162 = vmatprep.subr.bf16.mxu0 %v10649_v51  ;;  %3203 = vmatprep.subr.bf16.mxu1 %v10650_v56 }
 0x7ee   :  { %3163 = vmatpush2.bf16.msra.mxu0 %v10651_v2  ;;  %3204 = vmatpush2.bf16.msra.mxu1 %v10652_v61  ;;  %v10663_v61 = vld [vmem:[#allocation101_spill] sm:$0xff] }
 0x7ef   :  { %3164 = vmatprep.subr.bf16.mxu0 %v10653_v24  ;;  %3205 = vmatprep.subr.bf16.mxu1 %v10654_v37  ;;  %v10664_v24 = vld [vmem:[#allocation149_spill] sm:$0xff]  ;;  %v10665_v37 = vld [vmem:[#allocation104_spill] sm:$0xff] }
 0x7f2   :  { %3165 = vmatpush2.bf16.msra.mxu0 %v10655_v34  ;;  %3206 = vmatpush2.bf16.msra.mxu1 %v10656_v14  ;;  %v8830_v34 = vld [vmem:[#allocation14 + $0x74] ss:$8 sps:$4 sm:$0xff]  }
 0x7f3   :  { %3166 = vmatprep.subr.bf16.mxu0 %v10657_v6  ;;  %3207 = vmatprep.subr.bf16.mxu1 %v10658_v55  ;;  %10666 = vst [vmem:[#allocation215_spill] sm:$0xff] %v8830_v34  ;;  %v10703_v55 = vld [vmem:[#allocation142_spill] sm:$0xff] }
 0x7f4   :  { %v10707_v6 = vld [vmem:[#allocation146_spill] sm:$0xff] }
 0x7f6   :  { %3167 = vmatpush2.bf16.msra.mxu0 %v10659_v20  ;;  %3208 = vmatpush2.bf16.msra.mxu1 %v10660_v46  ;;  %v10667_v20 = vld [vmem:[#allocation106_spill] sm:$0xff]  ;;  %v10701_v46 = vld [vmem:[#allocation201_spill] sm:$0xff] }
 0x7f7   :  { %3168 = vmatprep.subr.bf16.mxu0 %v10661_v62  ;;  %3209 = vmatprep.subr.bf16.mxu1 %v10662_v63  ;;  %v10668_v62 = vld [vmem:[#allocation108_spill] sm:$0xff] }
 0x7f8   :  { %v8838_v63 = vld [vmem:[#allocation14 + $0x70] ss:$8 sps:$4 sm:$0xff]  }
 0x7f9   :  { %10669 = vst [vmem:[#allocation217_spill] sm:$0xff] %v8838_v63 }
 0x7fa   :  { %3169 = vmatpush2.bf16.msra.mxu0 %v10663_v61  ;;  %3210 = vmatpush2.bf16.msra.mxu1 %v10664_v24  ;;  %v8841_v24 = vld [vmem:[#allocation14 + $0x64] ss:$8 sps:$4 sm:$0xff]   ;;  %v8846_v61 = vld [vmem:[#allocation14 + $0x60] ss:$8 sps:$4 sm:$0xff]  }
 0x7fb   :  { %3220 = vmatprep.subr.bf16.mxu0 %v10665_v37  ;;  %3319 = vmatprep.subr.bf16.mxu1 %v8830_v34  ;;  %10670 = vst [vmem:[#allocation219_spill] sm:$0xff] %v8841_v24  ;;  %v10671_v37 = vld [vmem:[#allocation110_spill] sm:$0xff]  ;;  %v10672_v34 = vld [vmem:[#allocation112_spill] sm:$0xff]  ;;  %10673 = vst [vmem:[#allocation221_spill] sm:$0xff] %v8846_v61 }
 0x7fd   :  { %3171 = vmatmul.mubr.bf16.vlgmr.msra.gmra.mxu0 %v8759_v50  ;;  %3212 = vmatmul.mubr.bf16.vlgmr.msra.gmra.mxu1 %v8759_v50 }
 0x7fe   :  { %3221 = vmatpush1.bf16.msra.mxu0 %v10667_v20  ;;  %3252 = vmatprep.mubr.bf16.mxu0 %v8757_v4  ;;  %v8849_v20 = vld [vmem:[#allocation14 + $0x54] ss:$8 sps:$4 sm:$0xff]  }
 0x7ff   :  { %3222 = vmatprep.subr.bf16.mxu0 %v10668_v62  ;;  %3320 = vmatpush1.bf16.msra.mxu1 %v8838_v63  ;;  %10674 = vst [vmem:[#allocation223_spill] sm:$0xff] %v8849_v20  ;;  %v10675_v4 = vld [vmem:[#allocation114_spill] sm:$0xff]  ;;  %v10676_v62 = vld [vmem:[#allocation116_spill] sm:$0xff] }
 0x800   :  { %3321 = vmatprep.subr.bf16.mxu1 %v8841_v24  ;;  %v8854_v63 = vld [vmem:[#allocation14 + $0x50] ss:$8 sps:$4 sm:$0xff]   ;;  %v8857_v24 = vld [vmem:[#allocation14 + $0x44] ss:$8 sps:$4 sm:$0xff]  }
 0x801   :  { %10677 = vst [vmem:[#allocation224_spill] sm:$0xff] %v8854_v63  ;;  %10678 = vst [vmem:[#allocation225_spill] sm:$0xff] %v8857_v24 }
 0x802   :  { %3223 = vmatpush1.bf16.msra.mxu0 %v10671_v37  ;;  %v10680_v37 = vld [vmem:[#allocation120_spill] sm:$0xff] }
 0x803   :  { %3224 = vmatprep.subr.bf16.mxu0 %v10672_v34  ;;  %3322 = vmatpush1.bf16.msra.mxu1 %v8846_v61  ;;  %v10679_v34 = vld [vmem:[#allocation118_spill] sm:$0xff] }
 0x804   :  { %3323 = vmatprep.subr.bf16.mxu1 %v8849_v20  ;;  %v8862_v61 = vld [vmem:[#allocation14 + $0x40] ss:$8 sps:$4 sm:$0xff]   ;;  %v8865_v20 = vld [vmem:[#allocation14 + $0x34] ss:$8 sps:$4 sm:$0xff]  }
 0x805   :  { %10681 = vst [vmem:[#allocation228_spill] sm:$0xff] %v8862_v61  ;;  %10682 = vst [vmem:[#allocation229_spill] sm:$0xff] %v8865_v20 }
 0x806   :  { %3225 = vmatpush1.bf16.msra.mxu0 %v10675_v4  ;;  %v10684_v4 = vld [vmem:[#allocation124_spill] sm:$0xff] }
 0x807   :  { %3226 = vmatprep.subr.bf16.mxu0 %v10676_v62  ;;  %3324 = vmatpush1.bf16.msra.mxu1 %v8854_v63  ;;  %v10683_v62 = vld [vmem:[#allocation122_spill] sm:$0xff] }
 0x808   :  { %3325 = vmatprep.subr.bf16.mxu1 %v8857_v24  ;;  %v8870_v63 = vld [vmem:[#allocation14 + $0x30] ss:$8 sps:$4 sm:$0xff]   ;;  %v8873_v24 = vld [vmem:[#allocation14 + $0x24] ss:$8 sps:$4 sm:$0xff]  }
 0x809   :  { %10685 = vst [vmem:[#allocation232_spill] sm:$0xff] %v8870_v63  ;;  %10686 = vst [vmem:[#allocation233_spill] sm:$0xff] %v8873_v24 }
 0x80a   :  { %3227 = vmatpush1.bf16.msra.mxu0 %v10679_v34  ;;  %v10688_v34 = vld [vmem:[#allocation128_spill] sm:$0xff] }
 0x80b   :  { %3228 = vmatprep.subr.bf16.mxu0 %v10680_v37  ;;  %3326 = vmatpush1.bf16.msra.mxu1 %v8862_v61  ;;  %v10687_v37 = vld [vmem:[#allocation126_spill] sm:$0xff] }
 0x80c   :  { %3327 = vmatprep.subr.bf16.mxu1 %v8865_v20  ;;  %v8878_v61 = vld [vmem:[#allocation14 + $0x20] ss:$8 sps:$4 sm:$0xff]   ;;  %v8881_v20 = vld [vmem:[#allocation14 + $0x14] ss:$8 sps:$4 sm:$0xff]  }
 0x80d   :  { %10689 = vst [vmem:[#allocation234_spill] sm:$0xff] %v8878_v61  ;;  %10690 = vst [vmem:[#allocation169_spill] sm:$0xff] %v8881_v20 }
 0x80e   :  { %3229 = vmatpush1.bf16.msra.mxu0 %v10683_v62  ;;  %v10692_v62 = vld [vmem:[#allocation132_spill] sm:$0xff] }
 0x80f   :  { %3230 = vmatprep.subr.bf16.mxu0 %v10684_v4  ;;  %3328 = vmatpush1.bf16.msra.mxu1 %v8870_v63  ;;  %v10691_v4 = vld [vmem:[#allocation130_spill] sm:$0xff] }
 0x810   :  { %3329 = vmatprep.subr.bf16.mxu1 %v8873_v24  ;;  %v8886_v63 = vld [vmem:[#allocation14 + $0x10] ss:$8 sps:$4 sm:$0xff]   ;;  %v8889_v24 = vld [vmem:[#allocation14 + $0x4] ss:$8 sps:$4 sm:$0xff]  }
 0x811   :  { %10693 = vst [vmem:[#allocation170_spill] sm:$0xff] %v8886_v63  ;;  %10694 = vst [vmem:[#allocation175_spill] sm:$0xff] %v8889_v24 }
 0x812   :  { %3231 = vmatpush1.bf16.msra.mxu0 %v10687_v37  ;;  %v10696_v37 = vld [vmem:[#allocation136_spill] sm:$0xff] }
 0x813   :  { %3232 = vmatprep.subr.bf16.mxu0 %v10688_v34  ;;  %3330 = vmatpush1.bf16.msra.mxu1 %v8878_v61  ;;  %v10695_v34 = vld [vmem:[#allocation134_spill] sm:$0xff] }
 0x814   :  { %3331 = vmatprep.subr.bf16.mxu1 %v8881_v20  ;;  %v8894_v61 = vld [vmem:[#allocation14] ss:$8 sps:$4 sm:$0xff]  }
 0x815   :  { %10697 = vst [vmem:[#allocation190_spill] sm:$0xff] %v8894_v61  ;;  %v10698_v20 = vld [vmem:[#allocation199_spill] sm:$0xff] }
 0x816   :  { %3233 = vmatpush1.bf16.msra.mxu0 %v10691_v4  ;;  %v10699_v4 = vld [vmem:[#allocation138_spill] sm:$0xff] }
 0x817   :  { %3234 = vmatprep.subr.bf16.mxu0 %v10692_v62  ;;  %3332 = vmatpush1.bf16.msra.mxu1 %v8886_v63  ;;  %v10700_v62 = vld [vmem:[#allocation140_spill] sm:$0xff]  ;;  %v10702_v63 = vld [vmem:[#allocation113_spill] sm:$0xff] }
 0x818   :  { %3333 = vmatprep.subr.bf16.mxu1 %v8889_v24  ;;  %v10704_v24 = vld [vmem:[#allocation144_spill] sm:$0xff] }
 0x81a   :  { %3235 = vmatpush1.bf16.msra.mxu0 %v10695_v34  ;;  %v10705_v34 = vld [vmem:[#allocation72_spill] sm:$0xff] }
 0x81b   :  { %3236 = vmatprep.subr.bf16.mxu0 %v10696_v37  ;;  %3334 = vmatpush1.bf16.msra.mxu1 %v8894_v61  ;;  %v10706_v37 = vld [vmem:[#allocation115_spill] sm:$0xff]  ;;  %v10708_v61 = vld [vmem:[#allocation148_spill] sm:$0xff] }
 0x81c   :  { %3335 = vmatprep.subr.bf16.mxu1 %v10698_v20  ;;  %v10709_v20 = vld [vmem:[#allocation74_spill] sm:$0xff] }
 0x81e   :  { %3237 = vmatpush2.bf16.msra.mxu0 %v10699_v4  ;;  %v10710_v4 = vld [vmem:[#allocation117_spill] sm:$0xff] }
 0x81f   :  { %3238 = vmatprep.subr.bf16.mxu0 %v10700_v62  ;;  %3336 = vmatpush2.bf16.msra.mxu1 %v10701_v46  ;;  %v10711_v62 = vld [vmem:[#allocation150_spill] sm:$0xff]  ;;  %v10712_v46 = vld [vmem:[#allocation151_spill] sm:$0xff] }
 0x820   :  { %3337 = vmatprep.subr.bf16.mxu1 %v10702_v63  ;;  %v10713_v63 = vld [vmem:[#allocation76_spill] sm:$0xff] }
 0x822   :  { %3239 = vmatpush2.bf16.msra.mxu0 %v10703_v55  ;;  %v10714_v55 = vld [vmem:[#allocation119_spill] sm:$0xff] }
 0x823   :  { %3240 = vmatprep.subr.bf16.mxu0 %v10704_v24  ;;  %3338 = vmatpush2.bf16.msra.mxu1 %v10705_v34  ;;  %v10715_v24 = vld [vmem:[#allocation152_spill] sm:$0xff]  ;;  %v10716_v34 = vld [vmem:[#allocation153_spill] sm:$0xff] }
 0x824   :  { %3339 = vmatprep.subr.bf16.mxu1 %v10706_v37  ;;  %v10717_v37 = vld [vmem:[#allocation78_spill] sm:$0xff] }
 0x826   :  { %3241 = vmatpush2.bf16.msra.mxu0 %v10707_v6  ;;  %v10718_v6 = vld [vmem:[#allocation121_spill] sm:$0xff] }
 0x827   :  { %3242 = vmatprep.subr.bf16.mxu0 %v10708_v61  ;;  %3340 = vmatpush2.bf16.msra.mxu1 %v10709_v20  ;;  %v10719_v61 = vld [vmem:[#allocation154_spill] sm:$0xff]  ;;  %v10720_v20 = vld [vmem:[#allocation155_spill] sm:$0xff] }
 0x828   :  { %3341 = vmatprep.subr.bf16.mxu1 %v10710_v4  ;;  %v10721_v4 = vld [vmem:[#allocation80_spill] sm:$0xff] }
 0x82a   :  { %3243 = vmatpush2.bf16.msra.mxu0 %v10711_v62  ;;  %v10722_v62 = vld [vmem:[#allocation123_spill] sm:$0xff] }
 0x82b   :  { %3244 = vmatprep.subr.bf16.mxu0 %v10712_v46  ;;  %3342 = vmatpush2.bf16.msra.mxu1 %v10713_v63  ;;  %v10723_v46 = vld [vmem:[#allocation156_spill] sm:$0xff]  ;;  %v10724_v63 = vld [vmem:[#allocation157_spill] sm:$0xff] }
 0x82c   :  { %3343 = vmatprep.subr.bf16.mxu1 %v10714_v55  ;;  %v10725_v55 = vld [vmem:[#allocation82_spill] sm:$0xff] }
 0x82e   :  { %3245 = vmatpush2.bf16.msra.mxu0 %v10715_v24  ;;  %v10726_v24 = vld [vmem:[#allocation125_spill] sm:$0xff] }
 0x82f   :  { %3246 = vmatprep.subr.bf16.mxu0 %v10716_v34  ;;  %3344 = vmatpush2.bf16.msra.mxu1 %v10717_v37  ;;  %v10727_v34 = vld [vmem:[#allocation158_spill] sm:$0xff]  ;;  %v10728_v37 = vld [vmem:[#allocation40_spill] sm:$0xff] }
 0x830   :  { %3345 = vmatprep.subr.bf16.mxu1 %v10718_v6  ;;  %v10729_v6 = vld [vmem:[#allocation127_spill] sm:$0xff] }
 0x832   :  { %3247 = vmatpush2.bf16.msra.mxu0 %v10719_v61  ;;  %v10730_v61 = vld [vmem:[#allocation41_spill] sm:$0xff] }
 0x833   :  { %3248 = vmatprep.subr.bf16.mxu0 %v10720_v20  ;;  %3346 = vmatpush2.bf16.msra.mxu1 %v10721_v4  ;;  %v10731_v4 = vld [vmem:[#allocation42_spill] sm:$0xff] }
 0x834   :  { %3347 = vmatprep.subr.bf16.mxu1 %v10722_v62  ;;  %v10732_v62 = vld [vmem:[#allocation43_spill] sm:$0xff]  ;;  %v10763_v20 = vld [vmem:[#allocation98_spill] sm:$0xff] }
 0x836   :  { %3249 = vmatpush2.bf16.msra.mxu0 %v10723_v46  ;;  %v10733_v46 = vld [vmem:[#allocation44_spill] sm:$0xff] }
 0x837   :  { %3250 = vmatprep.subr.bf16.mxu0 %v10724_v63  ;;  %3348 = vmatpush2.bf16.msra.mxu1 %v10725_v55  ;;  %v10734_v63 = vld [vmem:[#allocation45_spill] sm:$0xff]  ;;  %v10735_v55 = vld [vmem:[#allocation46_spill] sm:$0xff] }
 0x838   :  { %3349 = vmatprep.subr.bf16.mxu1 %v10726_v24  ;;  %v10736_v24 = vld [vmem:[#allocation47_spill] sm:$0xff] }
 0x83a   :  { %3251 = vmatpush2.bf16.msra.mxu0 %v10727_v34  ;;  %v10737_v34 = vld [vmem:[#allocation48_spill] sm:$0xff] }
 0x83b   :  { %3376 = vmatprep.subr.bf16.mxu0 %v10728_v37  ;;  %3350 = vmatpush2.bf16.msra.mxu1 %v10729_v6  ;;  %v10738_v37 = vld [vmem:[#allocation49_spill] sm:$0xff]  ;;  %v10739_v6 = vld [vmem:[#allocation50_spill] sm:$0xff] }
 0x83c   :  { %3417 = vmatprep.subr.bf16.mxu1 %v10730_v61  ;;  %v10740_v61 = vld [vmem:[#allocation51_spill] sm:$0xff] }
 0x83d   :  { %3253 = vmatmul.mubr.bf16.vlgmr.msra.gmra.mxu0 %v8759_v50  ;;  %v10741_v50 = vld [vmem:[#allocation52_spill] sm:$0xff] }
 0x83e   :  { %3377 = vmatpush1.bf16.msra.mxu0 %v10731_v4  ;;  %v10742_v4 = vld [vmem:[#allocation53_spill] sm:$0xff] }
 0x83f   :  { %3378 = vmatprep.subr.bf16.mxu0 %v10732_v62  ;;  %v10743_v62 = vld [vmem:[#allocation54_spill] sm:$0xff] }
 0x842   :  { %3379 = vmatpush1.bf16.msra.mxu0 %v10733_v46  ;;  %v10744_v46 = vld [vmem:[#allocation55_spill] sm:$0xff] }
 0x843   :  { %3380 = vmatprep.subr.bf16.mxu0 %v10734_v63  ;;  %v10745_v63 = vld [vmem:[#allocation57_spill] sm:$0xff] }
 0x846   :  { %3381 = vmatpush1.bf16.msra.mxu0 %v10735_v55  ;;  %v10746_v55 = vld [vmem:[#allocation59_spill] sm:$0xff] }
 0x847   :  { %3382 = vmatprep.subr.bf16.mxu0 %v10736_v24  ;;  %v10747_v24 = vld [vmem:[#allocation61_spill] sm:$0xff] }
 0x84a   :  { %3383 = vmatpush1.bf16.msra.mxu0 %v10737_v34  ;;  %v10748_v34 = vld [vmem:[#allocation63_spill] sm:$0xff] }
 0x84b   :  { %3384 = vmatprep.subr.bf16.mxu0 %v10738_v37  ;;  %v10749_v37 = vld [vmem:[#allocation65_spill] sm:$0xff] }
 0x84e   :  { %3385 = vmatpush1.bf16.msra.mxu0 %v10739_v6  ;;  %v10750_v6 = vld [vmem:[#allocation67_spill] sm:$0xff] }
 0x84f   :  { %3386 = vmatprep.subr.bf16.mxu0 %v10740_v61  ;;  %v10751_v61 = vld [vmem:[#allocation69_spill] sm:$0xff] }
 0x852   :  { %3387 = vmatpush1.bf16.msra.mxu0 %v10741_v50  ;;  %v10752_v50 = vld [vmem:[#allocation71_spill] sm:$0xff] }
 0x853   :  { %3388 = vmatprep.subr.bf16.mxu0 %v10742_v4  ;;  %v10753_v4 = vld [vmem:[#allocation73_spill] sm:$0xff] }
 0x856   :  { %3389 = vmatpush1.bf16.msra.mxu0 %v10743_v62  ;;  %v10754_v62 = vld [vmem:[#allocation75_spill] sm:$0xff] }
 0x857   :  { %3390 = vmatprep.subr.bf16.mxu0 %v10744_v46  ;;  %v10755_v46 = vld [vmem:[#allocation77_spill] sm:$0xff] }
 0x85a   :  { %3391 = vmatpush1.bf16.msra.mxu0 %v10745_v63  ;;  %v10756_v63 = vld [vmem:[#allocation79_spill] sm:$0xff] }
 0x85b   :  { %3392 = vmatprep.subr.bf16.mxu0 %v10746_v55  ;;  %v10757_v55 = vld [vmem:[#allocation81_spill] sm:$0xff] }
 0x85e   :  { %3393 = vmatpush2.bf16.msra.mxu0 %v10747_v24  ;;  %v10758_v24 = vld [vmem:[#allocation83_spill] sm:$0xff] }
 0x85f   :  { %3394 = vmatprep.subr.bf16.mxu0 %v10748_v34  ;;  %v10759_v34 = vld [vmem:[#allocation85_spill] sm:$0xff] }
 0x862   :  { %3395 = vmatpush2.bf16.msra.mxu0 %v10749_v37  ;;  %v10760_v37 = vld [vmem:[#allocation87_spill] sm:$0xff] }
 0x863   :  { %3396 = vmatprep.subr.bf16.mxu0 %v10750_v6  ;;  %v10761_v6 = vld [vmem:[#allocation89_spill] sm:$0xff] }
 0x866   :  { %3397 = vmatpush2.bf16.msra.mxu0 %v10751_v61  ;;  %v10762_v61 = vld [vmem:[#allocation92_spill] sm:$0xff] }
 0x867   :  { %3398 = vmatprep.subr.bf16.mxu0 %v10752_v50 }
 0x86a   :  { %3399 = vmatpush2.bf16.msra.mxu0 %v10753_v4 }
 0x86b   :  { %3400 = vmatprep.subr.bf16.mxu0 %v10754_v62 }
 0x86e   :  { %3401 = vmatpush2.bf16.msra.mxu0 %v10755_v46  ;;  %v10765_v46 = vld [vmem:[#allocation180_spill] sm:$0xff] }
 0x86f   :  { %3402 = vmatprep.subr.bf16.mxu0 %v10756_v63 }
 0x872   :  { %3403 = vmatpush2.bf16.msra.mxu0 %v10757_v55  ;;  %v10766_v55 = vld [vmem:[#allocation56_spill] sm:$0xff] }
 0x873   :  { %3404 = vmatprep.subr.bf16.mxu0 %v10758_v24  ;;  %v10768_v24 = vld [vmem:[#allocation182_spill] sm:$0xff] }
 0x876   :  { %3405 = vmatpush2.bf16.msra.mxu0 %v10759_v34 }
 0x877   :  { %3406 = vmatprep.subr.bf16.mxu0 %v10760_v37 }
 0x87a   :  { %3407 = vmatpush2.bf16.msra.mxu0 %v10761_v6 }
 0x87b   :  { %3458 = vmatprep.subr.bf16.mxu0 %v10762_v61 }
 0x87d   :  { %v3074_v50 = vpop.f32.mrf.mxu0  ;;  %v3131_v4 = vpop.f32.mrf.mxu1 }
 0x87e   :  { %v8964_v62 = vadd.f32 %v3074_v50, %v10763_v20  ;;  %v3261_v14 = vadd.f32 %v3131_v4, %v10765_v46 }
 0x87f   :  { %v3076_v63 = vpop.f32.mrf.mxu0  ;;  %v3133_v2 = vpop.f32.mrf.mxu1 }
 0x880   :  { %10764 = vst [vmem:[#allocation177_spill] sm:$0xff] %v8964_v62  ;;  %v8968_v56 = vadd.f32 %v3076_v63, %v10766_v55  ;;  %v3262_v34 = vadd.f32 %v3133_v2, %v10768_v24  ;;  %v5764_v7 = vmul.f32 -1.442695, %v3261_v14  ;;  %v10770_v63 = vld [vmem:[#allocation200_spill] sm:$0xff] }
 0x881   :  { %v3078_v51 = vpop.f32.mrf.mxu0  ;;  %v3135_v37 = vpop.f32.mrf.mxu1 }
 0x882   :  { %10767 = vst [vmem:[#allocation192_spill] sm:$0xff] %v8968_v56  ;;  %v5765_v61 = vmul.f32 -1.442695, %v3262_v34  ;;  %6242 = vpow2.f32 %v5764_v7  ;;  %v10772_v34 = vld [vmem:[#allocation202_spill] sm:$0xff] }
 0x883   :  { %v3079_v29 = vpop.f32.mrf.mxu0  ;;  %v3136_v6 = vpop.f32.mrf.mxu1 }
 0x884   :  { %6244 = vpow2.f32 %v5765_v61  ;;  %v10771_v29 = vld [vmem:[#allocation187_spill] sm:$0xff] }
 0x88f   :  { %v6243_v15 = vpop.eup %6242 }
 0x890   :  { %v3281_v62 = vadd.f32 1.0, %v6243_v15 }
 0x891   :  { %v6245_v50 = vpop.eup %6244 }
 0x892   :  { %v3282_v20 = vadd.f32 1.0, %v6245_v50  ;;  %6246 = vrcp.f32 %v3281_v62 }
 0x8bd   :  { %v3172_v46 = vpop.f32.mrf.mxu0  ;;  %v3213_v4 = vpop.f32.mrf.mxu1 }
 0x8be   :  { %v3263_v21 = vadd.f32 %v3172_v46, %v10769_v18  ;;  %v3265_v56 = vadd.f32 %v3213_v4, %v10770_v63  ;;  %v6247_v18 = vpop.eup %6246 }
 0x8bf   :  { %v3174_v2 = vpop.f32.mrf.mxu0  ;;  %v3215_v51 = vpop.f32.mrf.mxu1 }
 0x8c0   :  { %v5766_v37 = vmul.f32 -1.442695, %v3263_v21  ;;  %6248 = vtanh.f32 %v3265_v56  ;;  %v3264_v14 = vadd.f32 %v3174_v2, %v10771_v29  ;;  %v3266_v7 = vadd.f32 %v3215_v51, %v10772_v34 }
 0x8c1   :  { %6250 = vrcp.f32 %v3282_v20  ;;  %v3176_v61 = vpop.f32.mrf.mxu0  ;;  %v3217_v24 = vpop.f32.mrf.mxu1 }
 0x8c2   :  { %6252 = vpow2.f32 %v5766_v37  ;;  %v5767_v15 = vmul.f32 -1.442695, %v3264_v14  ;;  %v10773_v24 = vld [vmem:[#allocation220_spill] sm:$0xff] }
 0x8c3   :  { %6254 = vtanh.f32 %v3266_v7  ;;  %v3177_v6 = vpop.f32.mrf.mxu0  ;;  %v3218_v50 = vpop.f32.mrf.mxu1 }
 0x8c4   :  { %6256 = vpow2.f32 %v5767_v15 }
 0x8cd   :  { %v6249_v46 = vpop.eup %6248 }
 0x8ce   :  { %v6251_v62 = vpop.eup %6250  ;;  %v3309_v4 = vmul.f32 %v6249_v46, %v6247_v18  ;;  %v10774_v18 = vld [vmem:[#allocation222_spill] sm:$0xff] }
 0x8cf   :  { %v6253_v63 = vpop.eup %6252 }
 0x8d0   :  { %v6255_v21 = vpop.eup %6254  ;;  %v3283_v56 = vadd.f32 1.0, %v6253_v63 }
 0x8d1   :  { %v6257_v55 = vpop.eup %6256  ;;  %v3310_v2 = vmul.f32 %v6255_v21, %v6251_v62 }
 0x8d2   :  { %6258 = vrcp.f32 %v3283_v56  ;;  %v3284_v51 = vadd.f32 1.0, %v6257_v55 }
 0x8d4   :  { %6260 = vrcp.f32 %v3284_v51 }
 0x8df   :  { %v6259_v20 = vpop.eup %6258 }
 0x8e0   :  { %v3307_v37 = vmul.f32 %v6259_v20, %v8748_v5 }
 0x8e1   :  { %v6261_v29 = vpop.eup %6260 }
 0x8e2   :  { %v8976_v14 = vadd.f32 %v3309_v4, %v3307_v37  ;;  %v3308_v34 = vmul.f32 %v6261_v29, %v8751_v39 }
 0x8e4   :  { %v8979_v7 = vadd.f32 %v3310_v2, %v3308_v34 }
 0x8fd   :  { %v3254_v61 = vpop.f32.mrf.mxu0 }
 0x8fe   :  { %v3267_v15 = vadd.f32 %v3254_v61, %v10773_v24  ;;  %v10775_v24 = vld [vmem:[#allocation129_spill] sm:$0xff] }
 0x8ff   :  { %v3256_v6 = vpop.f32.mrf.mxu0 }
 0x900   :  { %v5768_v50 = vmul.f32 -1.442695, %v3267_v15  ;;  %v3268_v46 = vadd.f32 %v3256_v6, %v10774_v18  ;;  %v10776_v15 = vld [vmem:[#allocation88_spill] sm:$0xff]  ;;  %v10777_v6 = vld [vmem:[#allocation131_spill] sm:$0xff]  ;;  %v10779_v18 = vld [vmem:[#allocation133_spill] sm:$0xff] }
 0x901   :  { %v3258_v62 = vpop.f32.mrf.mxu0 }
 0x902   :  { %6262 = vpow2.f32 %v5768_v50  ;;  %v5769_v55 = vmul.f32 -1.442695, %v3268_v46  ;;  %v10778_v50 = vld [vmem:[#allocation90_spill] sm:$0xff]  ;;  %v10780_v46 = vld [vmem:[#allocation91_spill] sm:$0xff] }
 0x903   :  { %v3259_v63 = vpop.f32.mrf.mxu0  ;;  %v10781_v62 = vld [vmem:[#allocation135_spill] sm:$0xff] }
 0x904   :  { %6264 = vpow2.f32 %v5769_v55  ;;  %v10782_v55 = vld [vmem:[#allocation93_spill] sm:$0xff] }
 0x905   :  { %6266 = vtanh.f32 %v8976_v14  ;;  %v10783_v63 = vld [vmem:[#allocation137_spill] sm:$0xff] }
 0x90f   :  { %v6263_v5 = vpop.eup %6262 }
 0x910   :  { %v3301_v21 = vadd.f32 1.0, %v6263_v5  ;;  %v10784_v5 = vld [vmem:[#allocation94_spill] sm:$0xff] }
 0x911   :  { %v6265_v4 = vpop.eup %6264 }
 0x912   :  { %6268 = vrcp.f32 %v3301_v21  ;;  %v3302_v39 = vadd.f32 1.0, %v6265_v4  ;;  %v6267_v56 = vpop.eup %6266  ;;  %v10785_v21 = vld [vmem:[#allocation139_spill] sm:$0xff] }
 0x913   :  { %6270 = vtanh.f32 %v8979_v7  ;;  %v10786_v4 = vld [vmem:[#allocation95_spill] sm:$0xff] }
 0x914   :  { %6272 = vrcp.f32 %v3302_v39  ;;  %v10787_v39 = vld [vmem:[#allocation141_spill] sm:$0xff] }
 0x91f   :  { %v6269_v2 = vpop.eup %6268 }
 0x920   :  { %v6271_v51 = vpop.eup %6270  ;;  %v3315_v37 = vmul.f32 %v6269_v2, %v6267_v56  ;;  %v10788_v56 = vld [vmem:[#allocation96_spill] sm:$0xff]  ;;  %v10789_v2 = vld [vmem:[#allocation143_spill] sm:$0xff] }
 0x921   :  { %v6273_v20 = vpop.eup %6272 }
 0x922   :  { %v3316_v29 = vmul.f32 %v6273_v20, %v6271_v51  ;;  %v8987_v61 = vpack.c.bf16 %v3315_v37, %v3315_v37  ;;  %v10790_v51 = vld [vmem:[#allocation97_spill] sm:$0xff]  ;;  %v10792_v37 = vld [vmem:[#allocation99_spill] sm:$0xff] }
 0x923   :  { %v10791_v20 = vld [vmem:[#allocation145_spill] sm:$0xff] }
 0x924   :  { %v8985_v34 = vpack.c.bf16 %v3316_v29, %v3316_v29  ;;  %v10793_v29 = vld [vmem:[#allocation147_spill] sm:$0xff] }
 0x926   :  { %3351 = vmatprep.mubr.bf16.mxu1 %v8985_v34  ;;  %3408 = vmatprep.mubr.bf16.mxu0 %v8985_v34 }
 0x927   :  { %3352 = vmatmul.mubr.bf16.vlgmr.msra.gmra.mxu1 %v8987_v61  ;;  %3409 = vmatmul.mubr.bf16.vlgmr.msra.gmra.mxu0 %v8987_v61 }
 0x928   :  { %3418 = vmatpush1.bf16.msra.mxu1 %v7142_v8  ;;  %3459 = vmatpush1.bf16.msra.mxu0 %v7303_v11 }
 0x929   :  { %3449 = vmatprep.mubr.bf16.mxu1 %v8985_v34  ;;  %3490 = vmatprep.mubr.bf16.mxu0 %v8985_v34 }
 0x92a   :  { %3419 = vmatprep.subr.bf16.mxu1 %v7147_v10  ;;  %3460 = vmatprep.subr.bf16.mxu0 %v7309_v13 }
 0x92c   :  { %3420 = vmatpush1.bf16.msra.mxu1 %v7157_v16  ;;  %3461 = vmatpush1.bf16.msra.mxu0 %v7316_v35 }
 0x92d   :  { %3421 = vmatprep.subr.bf16.mxu1 %v7163_v23  ;;  %3462 = vmatprep.subr.bf16.mxu0 %v7322_v28 }
 0x930   :  { %3422 = vmatpush1.bf16.msra.mxu1 %v7171_v25  ;;  %3463 = vmatpush1.bf16.msra.mxu0 %v10110_v17 }
 0x931   :  { %3423 = vmatprep.subr.bf16.mxu1 %v10111_v45  ;;  %3464 = vmatprep.subr.bf16.mxu0 %v10112_v54 }
 0x934   :  { %3424 = vmatpush1.bf16.msra.mxu1 %v10113_v31  ;;  %3465 = vmatpush1.bf16.msra.mxu0 %v10114_v52 }
 0x935   :  { %3425 = vmatprep.subr.bf16.mxu1 %v10115_v44  ;;  %3466 = vmatprep.subr.bf16.mxu0 %v10116_v43 }
 0x938   :  { %3426 = vmatpush1.bf16.msra.mxu1 %v10117_v48  ;;  %3467 = vmatpush1.bf16.msra.mxu0 %v10118_v0 }
 0x939   :  { %3427 = vmatprep.subr.bf16.mxu1 %v10119_v59  ;;  %3468 = vmatprep.subr.bf16.mxu0 %v10120_v12 }
 0x93c   :  { %3428 = vmatpush1.bf16.msra.mxu1 %v10121_v26  ;;  %3469 = vmatpush1.bf16.msra.mxu0 %v10122_v1 }
 0x93d   :  { %3429 = vmatprep.subr.bf16.mxu1 %v10123_v42  ;;  %3470 = vmatprep.subr.bf16.mxu0 %v10124_v3 }
 0x940   :  { %3430 = vmatpush1.bf16.msra.mxu1 %v10125_v22  ;;  %3471 = vmatpush1.bf16.msra.mxu0 %v10251_v41 }
 0x941   :  { %3431 = vmatprep.subr.bf16.mxu1 %v10252_v38  ;;  %3472 = vmatprep.subr.bf16.mxu0 %v10253_v36 }
 0x944   :  { %3432 = vmatpush1.bf16.msra.mxu1 %v10254_v58  ;;  %3473 = vmatpush1.bf16.msra.mxu0 %v10255_v60 }
 0x945   :  { %3433 = vmatprep.subr.bf16.mxu1 %v10256_v40  ;;  %3474 = vmatprep.subr.bf16.mxu0 %v10257_v53 }
 0x948   :  { %3434 = vmatpush2.bf16.msra.mxu1 %v10258_v30  ;;  %3475 = vmatpush2.bf16.msra.mxu0 %v10259_v19 }
 0x949   :  { %3435 = vmatprep.subr.bf16.mxu1 %v10260_v9  ;;  %3476 = vmatprep.subr.bf16.mxu0 %v10261_v33 }
 0x94c   :  { %3436 = vmatpush2.bf16.msra.mxu1 %v10262_v49  ;;  %3477 = vmatpush2.bf16.msra.mxu0 %v10263_v47 }
 0x94d   :  { %3437 = vmatprep.subr.bf16.mxu1 %v10382_v32  ;;  %3478 = vmatprep.subr.bf16.mxu0 %v10264_v57 }
 0x950   :  { %3438 = vmatpush2.bf16.msra.mxu1 %v10383_v27  ;;  %3479 = vmatpush2.bf16.msra.mxu0 %v10775_v24 }
 0x951   :  { %3439 = vmatprep.subr.bf16.mxu1 %v10776_v15  ;;  %3480 = vmatprep.subr.bf16.mxu0 %v10777_v6  ;;  %v10900_v15 = vld [vmem:[#allocation189_spill] sm:$0xff] }
 0x954   :  { %3440 = vmatpush2.bf16.msra.mxu1 %v10778_v50  ;;  %3481 = vmatpush2.bf16.msra.mxu0 %v10779_v18 }
 0x955   :  { %3441 = vmatprep.subr.bf16.mxu1 %v10780_v46  ;;  %3482 = vmatprep.subr.bf16.mxu0 %v10781_v62 }
 0x958   :  { %3442 = vmatpush2.bf16.msra.mxu1 %v10782_v55  ;;  %3483 = vmatpush2.bf16.msra.mxu0 %v10783_v63  ;;  %v10794_v63 = vld [vmem:[#allocation101_spill] sm:$0xff] }
 0x959   :  { %3443 = vmatprep.subr.bf16.mxu1 %v10784_v5  ;;  %3484 = vmatprep.subr.bf16.mxu0 %v10785_v21  ;;  %v10795_v5 = vld [vmem:[#allocation149_spill] sm:$0xff]  ;;  %v10796_v21 = vld [vmem:[#allocation104_spill] sm:$0xff] }
 0x95c   :  { %3444 = vmatpush2.bf16.msra.mxu1 %v10786_v4  ;;  %3485 = vmatpush2.bf16.msra.mxu0 %v10787_v39  ;;  %v10797_v4 = vld [vmem:[#allocation215_spill] sm:$0xff] }
 0x95d   :  { %3445 = vmatprep.subr.bf16.mxu1 %v10788_v56  ;;  %3486 = vmatprep.subr.bf16.mxu0 %v10789_v2  ;;  %v10798_v2 = vld [vmem:[#allocation106_spill] sm:$0xff]  ;;  %v10807_v56 = vld [vmem:[#allocation116_spill] sm:$0xff] }
 0x960   :  { %3446 = vmatpush2.bf16.msra.mxu1 %v10790_v51  ;;  %3487 = vmatpush2.bf16.msra.mxu0 %v10791_v20  ;;  %v10799_v20 = vld [vmem:[#allocation108_spill] sm:$0xff]  ;;  %v10806_v51 = vld [vmem:[#allocation114_spill] sm:$0xff] }
 0x961   :  { %3447 = vmatprep.subr.bf16.mxu1 %v10792_v37  ;;  %3488 = vmatprep.subr.bf16.mxu0 %v10793_v29  ;;  %v10800_v37 = vld [vmem:[#allocation217_spill] sm:$0xff]  ;;  %v10801_v29 = vld [vmem:[#allocation219_spill] sm:$0xff] }
 0x964   :  { %3448 = vmatpush2.bf16.msra.mxu1 %v10794_v63  ;;  %3489 = vmatpush2.bf16.msra.mxu0 %v10795_v5  ;;  %v10802_v63 = vld [vmem:[#allocation110_spill] sm:$0xff]  ;;  %v10803_v5 = vld [vmem:[#allocation112_spill] sm:$0xff] }
 0x965   :  { %3499 = vmatprep.subr.bf16.mxu1 %v10796_v21  ;;  %3598 = vmatprep.subr.bf16.mxu0 %v10797_v4  ;;  %v10804_v21 = vld [vmem:[#allocation221_spill] sm:$0xff]  ;;  %v10805_v4 = vld [vmem:[#allocation223_spill] sm:$0xff] }
 0x967   :  { %3450 = vmatmul.mubr.bf16.vlgmr.msra.gmra.mxu1 %v8987_v61  ;;  %3491 = vmatmul.mubr.bf16.vlgmr.msra.gmra.mxu0 %v8987_v61 }
 0x968   :  { %3500 = vmatpush1.bf16.msra.mxu1 %v10798_v2  ;;  %3531 = vmatprep.mubr.bf16.mxu1 %v8985_v34  ;;  %v10808_v2 = vld [vmem:[#allocation224_spill] sm:$0xff]  ;;  %v10809_v34 = vld [vmem:[#allocation225_spill] sm:$0xff] }
 0x969   :  { %3501 = vmatprep.subr.bf16.mxu1 %v10799_v20  ;;  %3599 = vmatpush1.bf16.msra.mxu0 %v10800_v37  ;;  %v10810_v20 = vld [vmem:[#allocation118_spill] sm:$0xff]  ;;  %v10811_v37 = vld [vmem:[#allocation120_spill] sm:$0xff] }
 0x96a   :  { %3600 = vmatprep.subr.bf16.mxu0 %v10801_v29  ;;  %v10812_v29 = vld [vmem:[#allocation228_spill] sm:$0xff] }
 0x96c   :  { %3502 = vmatpush1.bf16.msra.mxu1 %v10802_v63  ;;  %v10813_v63 = vld [vmem:[#allocation229_spill] sm:$0xff] }
 0x96d   :  { %3503 = vmatprep.subr.bf16.mxu1 %v10803_v5  ;;  %3601 = vmatpush1.bf16.msra.mxu0 %v10804_v21  ;;  %v10814_v5 = vld [vmem:[#allocation122_spill] sm:$0xff]  ;;  %v10815_v21 = vld [vmem:[#allocation124_spill] sm:$0xff] }
 0x96e   :  { %3602 = vmatprep.subr.bf16.mxu0 %v10805_v4  ;;  %v10816_v4 = vld [vmem:[#allocation232_spill] sm:$0xff] }
 0x970   :  { %3504 = vmatpush1.bf16.msra.mxu1 %v10806_v51  ;;  %v10817_v51 = vld [vmem:[#allocation233_spill] sm:$0xff] }
 0x971   :  { %3505 = vmatprep.subr.bf16.mxu1 %v10807_v56  ;;  %3603 = vmatpush1.bf16.msra.mxu0 %v10808_v2  ;;  %v10818_v56 = vld [vmem:[#allocation126_spill] sm:$0xff]  ;;  %v10819_v2 = vld [vmem:[#allocation128_spill] sm:$0xff] }
 0x972   :  { %3604 = vmatprep.subr.bf16.mxu0 %v10809_v34  ;;  %v10820_v34 = vld [vmem:[#allocation234_spill] sm:$0xff] }
 0x974   :  { %3506 = vmatpush1.bf16.msra.mxu1 %v10810_v20  ;;  %v10821_v20 = vld [vmem:[#allocation169_spill] sm:$0xff] }
 0x975   :  { %3507 = vmatprep.subr.bf16.mxu1 %v10811_v37  ;;  %3605 = vmatpush1.bf16.msra.mxu0 %v10812_v29  ;;  %v10822_v37 = vld [vmem:[#allocation130_spill] sm:$0xff]  ;;  %v10823_v29 = vld [vmem:[#allocation132_spill] sm:$0xff] }
 0x976   :  { %3606 = vmatprep.subr.bf16.mxu0 %v10813_v63  ;;  %v10824_v63 = vld [vmem:[#allocation170_spill] sm:$0xff] }
 0x978   :  { %3508 = vmatpush1.bf16.msra.mxu1 %v10814_v5  ;;  %v10825_v5 = vld [vmem:[#allocation175_spill] sm:$0xff] }
 0x979   :  { %3509 = vmatprep.subr.bf16.mxu1 %v10815_v21  ;;  %3607 = vmatpush1.bf16.msra.mxu0 %v10816_v4  ;;  %v10826_v21 = vld [vmem:[#allocation134_spill] sm:$0xff]  ;;  %v10827_v4 = vld [vmem:[#allocation136_spill] sm:$0xff] }
 0x97a   :  { %3608 = vmatprep.subr.bf16.mxu0 %v10817_v51  ;;  %v10828_v51 = vld [vmem:[#allocation190_spill] sm:$0xff] }
 0x97c   :  { %3510 = vmatpush1.bf16.msra.mxu1 %v10818_v56  ;;  %v9093_v56 = vld [vmem:[#allocation14 + $0xf4] ss:$8 sps:$4 sm:$0xff]  }
 0x97d   :  { %3511 = vmatprep.subr.bf16.mxu1 %v10819_v2  ;;  %3609 = vmatpush1.bf16.msra.mxu0 %v10820_v34  ;;  %10829 = vst [vmem:[#allocation204_spill] sm:$0xff] %v9093_v56  ;;  %v10830_v34 = vld [vmem:[#allocation138_spill] sm:$0xff] }
 0x97e   :  { %3610 = vmatprep.subr.bf16.mxu0 %v10821_v20  ;;  %v10831_v20 = vld [vmem:[#allocation140_spill] sm:$0xff]  ;;  %v10894_v2 = vld [vmem:[#allocation98_spill] sm:$0xff] }
 0x980   :  { %3512 = vmatpush1.bf16.msra.mxu1 %v10822_v37  ;;  %v9098_v37 = vld [vmem:[#allocation14 + $0xf0] ss:$8 sps:$4 sm:$0xff]  }
 0x981   :  { %3513 = vmatprep.subr.bf16.mxu1 %v10823_v29  ;;  %3611 = vmatpush1.bf16.msra.mxu0 %v10824_v63  ;;  %10832 = vst [vmem:[#allocation207_spill] sm:$0xff] %v9098_v37  ;;  %v9101_v63 = vld [vmem:[#allocation14 + $0xe4] ss:$8 sps:$4 sm:$0xff]   ;;  %v10869_v29 = vld [vmem:[#allocation49_spill] sm:$0xff] }
 0x982   :  { %3612 = vmatprep.subr.bf16.mxu0 %v10825_v5  ;;  %10833 = vst [vmem:[#allocation84_spill] sm:$0xff] %v9101_v63  ;;  %v10865_v5 = vld [vmem:[#allocation45_spill] sm:$0xff] }
 0x984   :  { %3514 = vmatpush1.bf16.msra.mxu1 %v10826_v21  ;;  %v10834_v21 = vld [vmem:[#allocation142_spill] sm:$0xff] }
 0x985   :  { %3515 = vmatprep.subr.bf16.mxu1 %v10827_v4  ;;  %3613 = vmatpush1.bf16.msra.mxu0 %v10828_v51  ;;  %v10835_v4 = vld [vmem:[#allocation144_spill] sm:$0xff] }
 0x986   :  { %3614 = vmatprep.subr.bf16.mxu0 %v9093_v56  ;;  %v9106_v51 = vld [vmem:[#allocation14 + $0xe0] ss:$8 sps:$4 sm:$0xff]   ;;  %v9109_v56 = vld [vmem:[#allocation14 + $0xd4] ss:$8 sps:$4 sm:$0xff]  }
 0x987   :  { %10836 = vst [vmem:[#allocation86_spill] sm:$0xff] %v9106_v51  ;;  %10837 = vst [vmem:[#allocation172_spill] sm:$0xff] %v9109_v56 }
 0x988   :  { %3516 = vmatpush2.bf16.msra.mxu1 %v10830_v34  ;;  %v10839_v34 = vld [vmem:[#allocation148_spill] sm:$0xff] }
 0x989   :  { %3517 = vmatprep.subr.bf16.mxu1 %v10831_v20  ;;  %3615 = vmatpush2.bf16.msra.mxu0 %v9098_v37  ;;  %v10838_v20 = vld [vmem:[#allocation146_spill] sm:$0xff] }
 0x98a   :  { %3616 = vmatprep.subr.bf16.mxu0 %v9101_v63  ;;  %v9114_v37 = vld [vmem:[#allocation14 + $0xd0] ss:$8 sps:$4 sm:$0xff]   ;;  %v9117_v63 = vld [vmem:[#allocation14 + $0xc4] ss:$8 sps:$4 sm:$0xff]  }
 0x98b   :  { %10840 = vst [vmem:[#allocation174_spill] sm:$0xff] %v9114_v37  ;;  %10841 = vst [vmem:[#allocation179_spill] sm:$0xff] %v9117_v63 }
 0x98c   :  { %3518 = vmatpush2.bf16.msra.mxu1 %v10834_v21  ;;  %v10843_v21 = vld [vmem:[#allocation151_spill] sm:$0xff] }
 0x98d   :  { %3519 = vmatprep.subr.bf16.mxu1 %v10835_v4  ;;  %3617 = vmatpush2.bf16.msra.mxu0 %v9106_v51  ;;  %v10842_v4 = vld [vmem:[#allocation150_spill] sm:$0xff] }
 0x98e   :  { %3618 = vmatprep.subr.bf16.mxu0 %v9109_v56  ;;  %v9122_v51 = vld [vmem:[#allocation14 + $0xc0] ss:$8 sps:$4 sm:$0xff]   ;;  %v9125_v56 = vld [vmem:[#allocation14 + $0xb4] ss:$8 sps:$4 sm:$0xff]  }
 0x98f   :  { %10844 = vst [vmem:[#allocation194_spill] sm:$0xff] %v9122_v51  ;;  %10845 = vst [vmem:[#allocation181_spill] sm:$0xff] %v9125_v56 }
 0x990   :  { %3520 = vmatpush2.bf16.msra.mxu1 %v10838_v20  ;;  %v10847_v20 = vld [vmem:[#allocation153_spill] sm:$0xff] }
 0x991   :  { %3521 = vmatprep.subr.bf16.mxu1 %v10839_v34  ;;  %3619 = vmatpush2.bf16.msra.mxu0 %v9114_v37  ;;  %v10846_v34 = vld [vmem:[#allocation152_spill] sm:$0xff] }
 0x992   :  { %3620 = vmatprep.subr.bf16.mxu0 %v9117_v63  ;;  %v9130_v37 = vld [vmem:[#allocation14 + $0xb0] ss:$8 sps:$4 sm:$0xff]   ;;  %v9133_v63 = vld [vmem:[#allocation14 + $0xa4] ss:$8 sps:$4 sm:$0xff]  }
 0x993   :  { %10848 = vst [vmem:[#allocation196_spill] sm:$0xff] %v9130_v37  ;;  %10849 = vst [vmem:[#allocation210_spill] sm:$0xff] %v9133_v63 }
 0x994   :  { %3522 = vmatpush2.bf16.msra.mxu1 %v10842_v4  ;;  %v10851_v4 = vld [vmem:[#allocation155_spill] sm:$0xff] }
 0x995   :  { %3523 = vmatprep.subr.bf16.mxu1 %v10843_v21  ;;  %3621 = vmatpush2.bf16.msra.mxu0 %v9122_v51  ;;  %v10850_v21 = vld [vmem:[#allocation154_spill] sm:$0xff] }
 0x996   :  { %3622 = vmatprep.subr.bf16.mxu0 %v9125_v56  ;;  %v9138_v51 = vld [vmem:[#allocation14 + $0xa0] ss:$8 sps:$4 sm:$0xff]   ;;  %v9141_v56 = vld [vmem:[#allocation14 + $0x94] ss:$8 sps:$4 sm:$0xff]  }
 0x997   :  { %10852 = vst [vmem:[#allocation213_spill] sm:$0xff] %v9138_v51  ;;  %10853 = vst [vmem:[#allocation102_spill] sm:$0xff] %v9141_v56 }
 0x998   :  { %3524 = vmatpush2.bf16.msra.mxu1 %v10846_v34  ;;  %v10855_v34 = vld [vmem:[#allocation157_spill] sm:$0xff] }
 0x999   :  { %3525 = vmatprep.subr.bf16.mxu1 %v10847_v20  ;;  %3623 = vmatpush2.bf16.msra.mxu0 %v9130_v37  ;;  %v10854_v20 = vld [vmem:[#allocation156_spill] sm:$0xff] }
 0x99a   :  { %3624 = vmatprep.subr.bf16.mxu0 %v9133_v63  ;;  %v9146_v37 = vld [vmem:[#allocation14 + $0x90] ss:$8 sps:$4 sm:$0xff]   ;;  %v9149_v63 = vld [vmem:[#allocation14 + $0x84] ss:$8 sps:$4 sm:$0xff]  }
 0x99b   :  { %10856 = vst [vmem:[#allocation60_spill] sm:$0xff] %v9146_v37  ;;  %10857 = vst [vmem:[#allocation103_spill] sm:$0xff] %v9149_v63 }
 0x99c   :  { %3526 = vmatpush2.bf16.msra.mxu1 %v10850_v21  ;;  %v10859_v21 = vld [vmem:[#allocation40_spill] sm:$0xff] }
 0x99d   :  { %3527 = vmatprep.subr.bf16.mxu1 %v10851_v4  ;;  %3625 = vmatpush2.bf16.msra.mxu0 %v9138_v51  ;;  %v10858_v4 = vld [vmem:[#allocation158_spill] sm:$0xff] }
 0x99e   :  { %3626 = vmatprep.subr.bf16.mxu0 %v9141_v56  ;;  %v9154_v51 = vld [vmem:[#allocation14 + $0x80] ss:$8 sps:$4 sm:$0xff]   ;;  %v10861_v56 = vld [vmem:[#allocation41_spill] sm:$0xff] }
 0x99f   :  { %10860 = vst [vmem:[#allocation62_spill] sm:$0xff] %v9154_v51 }
 0x9a0   :  { %3528 = vmatpush2.bf16.msra.mxu1 %v10854_v20  ;;  %v10863_v20 = vld [vmem:[#allocation43_spill] sm:$0xff] }
 0x9a1   :  { %3529 = vmatprep.subr.bf16.mxu1 %v10855_v34  ;;  %3627 = vmatpush2.bf16.msra.mxu0 %v9146_v37  ;;  %v10862_v34 = vld [vmem:[#allocation42_spill] sm:$0xff]  ;;  %v10864_v37 = vld [vmem:[#allocation44_spill] sm:$0xff] }
 0x9a2   :  { %3628 = vmatprep.subr.bf16.mxu0 %v9149_v63  ;;  %v10866_v63 = vld [vmem:[#allocation46_spill] sm:$0xff] }
 0x9a4   :  { %3530 = vmatpush2.bf16.msra.mxu1 %v10858_v4  ;;  %v10867_v4 = vld [vmem:[#allocation47_spill] sm:$0xff] }
 0x9a5   :  { %3655 = vmatprep.subr.bf16.mxu1 %v10859_v21  ;;  %3629 = vmatpush2.bf16.msra.mxu0 %v9154_v51  ;;  %v10868_v21 = vld [vmem:[#allocation48_spill] sm:$0xff]  ;;  %v10870_v51 = vld [vmem:[#allocation50_spill] sm:$0xff] }
 0x9a6   :  { %3696 = vmatprep.subr.bf16.mxu0 %v10861_v56  ;;  %v10871_v56 = vld [vmem:[#allocation51_spill] sm:$0xff] }
 0x9a7   :  { %3532 = vmatmul.mubr.bf16.vlgmr.msra.gmra.mxu1 %v8987_v61  ;;  %v10872_v61 = vld [vmem:[#allocation52_spill] sm:$0xff] }
 0x9a8   :  { %3656 = vmatpush1.bf16.msra.mxu1 %v10862_v34  ;;  %v10873_v34 = vld [vmem:[#allocation53_spill] sm:$0xff] }
 0x9a9   :  { %3657 = vmatprep.subr.bf16.mxu1 %v10863_v20  ;;  %v10874_v20 = vld [vmem:[#allocation54_spill] sm:$0xff] }
 0x9ac   :  { %3658 = vmatpush1.bf16.msra.mxu1 %v10864_v37  ;;  %v10875_v37 = vld [vmem:[#allocation55_spill] sm:$0xff] }
 0x9ad   :  { %3659 = vmatprep.subr.bf16.mxu1 %v10865_v5  ;;  %v10876_v5 = vld [vmem:[#allocation57_spill] sm:$0xff] }
 0x9b0   :  { %3660 = vmatpush1.bf16.msra.mxu1 %v10866_v63  ;;  %v10877_v63 = vld [vmem:[#allocation59_spill] sm:$0xff] }
 0x9b1   :  { %3661 = vmatprep.subr.bf16.mxu1 %v10867_v4  ;;  %v10878_v4 = vld [vmem:[#allocation61_spill] sm:$0xff] }
 0x9b4   :  { %3662 = vmatpush1.bf16.msra.mxu1 %v10868_v21  ;;  %v10879_v21 = vld [vmem:[#allocation63_spill] sm:$0xff] }
 0x9b5   :  { %3663 = vmatprep.subr.bf16.mxu1 %v10869_v29  ;;  %v10880_v29 = vld [vmem:[#allocation65_spill] sm:$0xff] }
 0x9b8   :  { %3664 = vmatpush1.bf16.msra.mxu1 %v10870_v51  ;;  %v10881_v51 = vld [vmem:[#allocation67_spill] sm:$0xff] }
 0x9b9   :  { %3665 = vmatprep.subr.bf16.mxu1 %v10871_v56  ;;  %v10882_v56 = vld [vmem:[#allocation69_spill] sm:$0xff] }
 0x9bc   :  { %3666 = vmatpush1.bf16.msra.mxu1 %v10872_v61  ;;  %v10883_v61 = vld [vmem:[#allocation71_spill] sm:$0xff] }
 0x9bd   :  { %3667 = vmatprep.subr.bf16.mxu1 %v10873_v34  ;;  %v10884_v34 = vld [vmem:[#allocation73_spill] sm:$0xff] }
 0x9c0   :  { %3668 = vmatpush1.bf16.msra.mxu1 %v10874_v20  ;;  %v10885_v20 = vld [vmem:[#allocation75_spill] sm:$0xff] }
 0x9c1   :  { %3669 = vmatprep.subr.bf16.mxu1 %v10875_v37  ;;  %v10886_v37 = vld [vmem:[#allocation77_spill] sm:$0xff] }
 0x9c4   :  { %3670 = vmatpush1.bf16.msra.mxu1 %v10876_v5  ;;  %v10887_v5 = vld [vmem:[#allocation79_spill] sm:$0xff] }
 0x9c5   :  { %3671 = vmatprep.subr.bf16.mxu1 %v10877_v63  ;;  %v10888_v63 = vld [vmem:[#allocation81_spill] sm:$0xff] }
 0x9c8   :  { %3672 = vmatpush2.bf16.msra.mxu1 %v10878_v4  ;;  %v10889_v4 = vld [vmem:[#allocation83_spill] sm:$0xff] }
 0x9c9   :  { %3673 = vmatprep.subr.bf16.mxu1 %v10879_v21  ;;  %v10890_v21 = vld [vmem:[#allocation85_spill] sm:$0xff] }
 0x9cc   :  { %3674 = vmatpush2.bf16.msra.mxu1 %v10880_v29  ;;  %v10891_v29 = vld [vmem:[#allocation87_spill] sm:$0xff] }
 0x9cd   :  { %3675 = vmatprep.subr.bf16.mxu1 %v10881_v51  ;;  %v10892_v51 = vld [vmem:[#allocation89_spill] sm:$0xff] }
 0x9d0   :  { %3676 = vmatpush2.bf16.msra.mxu1 %v10882_v56  ;;  %v10893_v56 = vld [vmem:[#allocation92_spill] sm:$0xff] }
 0x9d1   :  { %3677 = vmatprep.subr.bf16.mxu1 %v10883_v61 }
 0x9d4   :  { %3678 = vmatpush2.bf16.msra.mxu1 %v10884_v34 }
 0x9d5   :  { %3679 = vmatprep.subr.bf16.mxu1 %v10885_v20 }
 0x9d8   :  { %3680 = vmatpush2.bf16.msra.mxu1 %v10886_v37  ;;  %v10896_v37 = vld [vmem:[#allocation163_spill] sm:$0xff] }
 0x9d9   :  { %3681 = vmatprep.subr.bf16.mxu1 %v10887_v5 }
 0x9dc   :  { %3682 = vmatpush2.bf16.msra.mxu1 %v10888_v63  ;;  %v10897_v63 = vld [vmem:[#allocation56_spill] sm:$0xff] }
 0x9dd   :  { %3683 = vmatprep.subr.bf16.mxu1 %v10889_v4  ;;  %v10899_v4 = vld [vmem:[#allocation164_spill] sm:$0xff] }
 0x9e0   :  { %3684 = vmatpush2.bf16.msra.mxu1 %v10890_v21 }
 0x9e1   :  { %3685 = vmatprep.subr.bf16.mxu1 %v10891_v29 }
 0x9e4   :  { %3686 = vmatpush2.bf16.msra.mxu1 %v10892_v51 }
 0x9e5   :  { %3737 = vmatprep.subr.bf16.mxu1 %v10893_v56 }
 0x9e7   :  { %v3353_v61 = vpop.f32.mrf.mxu1  ;;  %v3410_v34 = vpop.f32.mrf.mxu0 }
 0x9e8   :  { %v9192_v20 = vadd.f32 %v3353_v61, %v10894_v2  ;;  %v3540_v39 = vadd.f32 %v3410_v34, %v10896_v37 }
 0x9e9   :  { %v3355_v5 = vpop.f32.mrf.mxu1  ;;  %v3412_v55 = vpop.f32.mrf.mxu0 }
 0x9ea   :  { %10895 = vst [vmem:[#allocation105_spill] sm:$0xff] %v9192_v20  ;;  %v9196_v62 = vadd.f32 %v3355_v5, %v10897_v63  ;;  %v3541_v21 = vadd.f32 %v3412_v55, %v10899_v4  ;;  %v5770_v50 = vmul.f32 -1.442695, %v3540_v39  ;;  %v10901_v5 = vld [vmem:[#allocation205_spill] sm:$0xff] }
 0x9eb   :  { %v3357_v46 = vpop.f32.mrf.mxu1  ;;  %v3414_v29 = vpop.f32.mrf.mxu0 }
 0x9ec   :  { %10898 = vst [vmem:[#allocation64_spill] sm:$0xff] %v9196_v62  ;;  %v5771_v56 = vmul.f32 -1.442695, %v3541_v21  ;;  %6274 = vpow2.f32 %v5770_v50  ;;  %v10903_v21 = vld [vmem:[#allocation208_spill] sm:$0xff] }
 0x9ed   :  { %v3358_v18 = vpop.f32.mrf.mxu1  ;;  %v3415_v51 = vpop.f32.mrf.mxu0 }
 0x9ee   :  { %6276 = vpow2.f32 %v5771_v56  ;;  %v10902_v18 = vld [vmem:[#allocation191_spill] sm:$0xff] }
 0x9f9   :  { %v6275_v6 = vpop.eup %6274 }
 0x9fa   :  { %v3560_v20 = vadd.f32 1.0, %v6275_v6 }
 0x9fb   :  { %v6277_v61 = vpop.eup %6276 }
 0x9fc   :  { %v3561_v2 = vadd.f32 1.0, %v6277_v61  ;;  %6278 = vrcp.f32 %v3560_v20 }
 0xa27   :  { %v3451_v34 = vpop.f32.mrf.mxu1  ;;  %v3492_v37 = vpop.f32.mrf.mxu0 }
 0xa28   :  { %v3542_v24 = vadd.f32 %v3451_v34, %v10900_v15  ;;  %v3544_v62 = vadd.f32 %v3492_v37, %v10901_v5  ;;  %v6279_v15 = vpop.eup %6278 }
 0xa29   :  { %v3453_v55 = vpop.f32.mrf.mxu1  ;;  %v3494_v46 = vpop.f32.mrf.mxu0 }
 0xa2a   :  { %v5772_v4 = vmul.f32 -1.442695, %v3542_v24  ;;  %6280 = vtanh.f32 %v3544_v62  ;;  %v3543_v39 = vadd.f32 %v3453_v55, %v10902_v18  ;;  %v3545_v50 = vadd.f32 %v3494_v46, %v10903_v21 }
 0xa2b   :  { %6282 = vrcp.f32 %v3561_v2  ;;  %v3455_v29 = vpop.f32.mrf.mxu1  ;;  %v3496_v51 = vpop.f32.mrf.mxu0 }
 0xa2c   :  { %6284 = vpow2.f32 %v5772_v4  ;;  %v5773_v6 = vmul.f32 -1.442695, %v3543_v39  ;;  %v10904_v51 = vld [vmem:[#allocation226_spill] sm:$0xff] }
 0xa2d   :  { %6286 = vtanh.f32 %v3545_v50  ;;  %v3456_v56 = vpop.f32.mrf.mxu1  ;;  %v3497_v61 = vpop.f32.mrf.mxu0 }
 0xa2e   :  { %6288 = vpow2.f32 %v5773_v6 }
 0xa37   :  { %v6281_v34 = vpop.eup %6280 }
 0xa38   :  { %v6283_v20 = vpop.eup %6282  ;;  %v3588_v37 = vmul.f32 %v6281_v34, %v6279_v15  ;;  %v10905_v15 = vld [vmem:[#allocation227_spill] sm:$0xff] }
 0xa39   :  { %v6285_v5 = vpop.eup %6284 }
 0xa3a   :  { %v6287_v24 = vpop.eup %6286  ;;  %v3562_v62 = vadd.f32 1.0, %v6285_v5 }
 0xa3b   :  { %v6289_v63 = vpop.eup %6288  ;;  %v3589_v55 = vmul.f32 %v6287_v24, %v6283_v20 }
 0xa3c   :  { %6290 = vrcp.f32 %v3562_v62  ;;  %v3563_v46 = vadd.f32 1.0, %v6289_v63 }
 0xa3e   :  { %6292 = vrcp.f32 %v3563_v46 }
 0xa49   :  { %v6291_v2 = vpop.eup %6290 }
 0xa4a   :  { %v3586_v4 = vmul.f32 %v6291_v2, %v8976_v14 }
 0xa4b   :  { %v6293_v18 = vpop.eup %6292 }
 0xa4c   :  { %v9204_v39 = vadd.f32 %v3588_v37, %v3586_v4  ;;  %v3587_v21 = vmul.f32 %v6293_v18, %v8979_v7 }
 0xa4e   :  { %v9207_v50 = vadd.f32 %v3589_v55, %v3587_v21 }
 0xa67   :  { %v3533_v29 = vpop.f32.mrf.mxu1 }
 0xa68   :  { %v3546_v6 = vadd.f32 %v3533_v29, %v10904_v51  ;;  %v10947_v51 = vld [vmem:[#allocation232_spill] sm:$0xff] }
 0xa69   :  { %v3535_v56 = vpop.f32.mrf.mxu1 }
 0xa6a   :  { %v5774_v61 = vmul.f32 -1.442695, %v3546_v6  ;;  %v3547_v34 = vadd.f32 %v3535_v56, %v10905_v15  ;;  %v10948_v6 = vld [vmem:[#allocation233_spill] sm:$0xff]  ;;  %v10949_v56 = vld [vmem:[#allocation126_spill] sm:$0xff] }
 0xa6b   :  { %v3537_v20 = vpop.f32.mrf.mxu1  ;;  %v10951_v15 = vld [vmem:[#allocation234_spill] sm:$0xff] }
 0xa6c   :  { %6294 = vpow2.f32 %v5774_v61  ;;  %v5775_v63 = vmul.f32 -1.442695, %v3547_v34  ;;  %v10950_v61 = vld [vmem:[#allocation128_spill] sm:$0xff]  ;;  %v10952_v34 = vld [vmem:[#allocation169_spill] sm:$0xff]  ;;  %v10953_v20 = vld [vmem:[#allocation130_spill] sm:$0xff] }
 0xa6d   :  { %v3538_v5 = vpop.f32.mrf.mxu1 }
 0xa6e   :  { %6296 = vpow2.f32 %v5775_v63  ;;  %v10954_v63 = vld [vmem:[#allocation132_spill] sm:$0xff]  ;;  %v10955_v5 = vld [vmem:[#allocation170_spill] sm:$0xff] }
 0xa6f   :  { %6298 = vtanh.f32 %v9204_v39 }
 0xa79   :  { %v6295_v14 = vpop.eup %6294 }
 0xa7a   :  { %v3580_v24 = vadd.f32 1.0, %v6295_v14  ;;  %v10956_v14 = vld [vmem:[#allocation175_spill] sm:$0xff] }
 0xa7b   :  { %v6297_v37 = vpop.eup %6296 }
 0xa7c   :  { %6300 = vrcp.f32 %v3580_v24  ;;  %v3581_v7 = vadd.f32 1.0, %v6297_v37  ;;  %v6299_v62 = vpop.eup %6298  ;;  %v10957_v24 = vld [vmem:[#allocation134_spill] sm:$0xff]  ;;  %v10958_v37 = vld [vmem:[#allocation136_spill] sm:$0xff] }
 0xa7d   :  { %6302 = vtanh.f32 %v9207_v50 }
 0xa7e   :  { %6304 = vrcp.f32 %v3581_v7  ;;  %v10959_v7 = vld [vmem:[#allocation190_spill] sm:$0xff] }
 0xa89   :  { %v6301_v55 = vpop.eup %6300 }
 0xa8a   :  { %v6303_v46 = vpop.eup %6302  ;;  %v3594_v4 = vmul.f32 %v6301_v55, %v6299_v62  ;;  %v10960_v62 = vld [vmem:[#allocation204_spill] sm:$0xff]  ;;  %v10961_v55 = vld [vmem:[#allocation138_spill] sm:$0xff] }
 0xa8b   :  { %v6305_v2 = vpop.eup %6304 }
 0xa8c   :  { %v3595_v18 = vmul.f32 %v6305_v2, %v6303_v46  ;;  %v9215_v29 = vpack.c.bf16 %v3594_v4, %v3594_v4  ;;  %v10962_v46 = vld [vmem:[#allocation140_spill] sm:$0xff]  ;;  %v10963_v2 = vld [vmem:[#allocation207_spill] sm:$0xff] }
 0xa8d   :  { %v10964_v4 = vld [vmem:[#allocation84_spill] sm:$0xff] }
 0xa8e   :  { %v9213_v21 = vpack.c.bf16 %v3595_v18, %v3595_v18  ;;  %v10965_v18 = vld [vmem:[#allocation142_spill] sm:$0xff] }
 0xa90   :  { %3630 = vmatprep.mubr.bf16.mxu0 %v9213_v21  ;;  %3687 = vmatprep.mubr.bf16.mxu1 %v9213_v21 }
 0xa91   :  { %3631 = vmatmul.mubr.bf16.vlgmr.msra.gmra.mxu0 %v9215_v29  ;;  %3688 = vmatmul.mubr.bf16.vlgmr.msra.gmra.mxu1 %v9215_v29 }
 0xa92   :  { %3697 = vmatpush1.bf16.msra.mxu0 %v7142_v8  ;;  %3738 = vmatpush1.bf16.msra.mxu1 %v7303_v11  ;;  %v10906_v8 = vld [vmem:[#allocation129_spill] sm:$0xff]  ;;  %v10911_v11 = vld [vmem:[#allocation91_spill] sm:$0xff] }
 0xa93   :  { %3728 = vmatprep.mubr.bf16.mxu0 %v9213_v21  ;;  %3769 = vmatprep.mubr.bf16.mxu1 %v9213_v21 }
 0xa94   :  { %3698 = vmatprep.subr.bf16.mxu0 %v7147_v10  ;;  %3739 = vmatprep.subr.bf16.mxu1 %v7309_v13  ;;  %v10907_v10 = vld [vmem:[#allocation88_spill] sm:$0xff]  ;;  %v10912_v13 = vld [vmem:[#allocation135_spill] sm:$0xff] }
 0xa96   :  { %3699 = vmatpush1.bf16.msra.mxu0 %v7157_v16  ;;  %3740 = vmatpush1.bf16.msra.mxu1 %v7316_v35  ;;  %v10908_v16 = vld [vmem:[#allocation131_spill] sm:$0xff]  ;;  %v10913_v35 = vld [vmem:[#allocation93_spill] sm:$0xff] }
 0xa97   :  { %3700 = vmatprep.subr.bf16.mxu0 %v7163_v23  ;;  %3741 = vmatprep.subr.bf16.mxu1 %v7322_v28  ;;  %v10909_v23 = vld [vmem:[#allocation90_spill] sm:$0xff]  ;;  %v10914_v28 = vld [vmem:[#allocation137_spill] sm:$0xff] }
 0xa9a   :  { %3701 = vmatpush1.bf16.msra.mxu0 %v7171_v25  ;;  %3742 = vmatpush1.bf16.msra.mxu1 %v10110_v17  ;;  %v10910_v25 = vld [vmem:[#allocation133_spill] sm:$0xff]  ;;  %v10915_v17 = vld [vmem:[#allocation94_spill] sm:$0xff] }
 0xa9b   :  { %3702 = vmatprep.subr.bf16.mxu0 %v10111_v45  ;;  %3743 = vmatprep.subr.bf16.mxu1 %v10112_v54  ;;  %v10916_v45 = vld [vmem:[#allocation139_spill] sm:$0xff] }
 0xa9c   :  { %v10917_v54 = vld [vmem:[#allocation95_spill] sm:$0xff] }
 0xa9e   :  { %3703 = vmatpush1.bf16.msra.mxu0 %v10113_v31  ;;  %3744 = vmatpush1.bf16.msra.mxu1 %v10114_v52  ;;  %v10918_v31 = vld [vmem:[#allocation141_spill] sm:$0xff]  ;;  %v10919_v52 = vld [vmem:[#allocation96_spill] sm:$0xff] }
 0xa9f   :  { %3704 = vmatprep.subr.bf16.mxu0 %v10115_v44  ;;  %3745 = vmatprep.subr.bf16.mxu1 %v10116_v43  ;;  %v10920_v44 = vld [vmem:[#allocation143_spill] sm:$0xff]  ;;  %v10921_v43 = vld [vmem:[#allocation97_spill] sm:$0xff] }
 0xaa2   :  { %3705 = vmatpush1.bf16.msra.mxu0 %v10117_v48  ;;  %3746 = vmatpush1.bf16.msra.mxu1 %v10118_v0  ;;  %v10922_v48 = vld [vmem:[#allocation145_spill] sm:$0xff]  ;;  %v10923_v0 = vld [vmem:[#allocation99_spill] sm:$0xff] }
 0xaa3   :  { %3706 = vmatprep.subr.bf16.mxu0 %v10119_v59  ;;  %3747 = vmatprep.subr.bf16.mxu1 %v10120_v12  ;;  %v10924_v59 = vld [vmem:[#allocation147_spill] sm:$0xff]  ;;  %v10925_v12 = vld [vmem:[#allocation101_spill] sm:$0xff] }
 0xaa6   :  { %3707 = vmatpush1.bf16.msra.mxu0 %v10121_v26  ;;  %3748 = vmatpush1.bf16.msra.mxu1 %v10122_v1  ;;  %v10926_v26 = vld [vmem:[#allocation149_spill] sm:$0xff]  ;;  %v10927_v1 = vld [vmem:[#allocation104_spill] sm:$0xff] }
 0xaa7   :  { %3708 = vmatprep.subr.bf16.mxu0 %v10123_v42  ;;  %3749 = vmatprep.subr.bf16.mxu1 %v10124_v3  ;;  %v10928_v42 = vld [vmem:[#allocation215_spill] sm:$0xff]  ;;  %v10929_v3 = vld [vmem:[#allocation106_spill] sm:$0xff] }
 0xaaa   :  { %3709 = vmatpush1.bf16.msra.mxu0 %v10125_v22  ;;  %3750 = vmatpush1.bf16.msra.mxu1 %v10251_v41  ;;  %v10930_v22 = vld [vmem:[#allocation108_spill] sm:$0xff]  ;;  %v10931_v41 = vld [vmem:[#allocation217_spill] sm:$0xff] }
 0xaab   :  { %3710 = vmatprep.subr.bf16.mxu0 %v10252_v38  ;;  %3751 = vmatprep.subr.bf16.mxu1 %v10253_v36  ;;  %v10932_v38 = vld [vmem:[#allocation219_spill] sm:$0xff]  ;;  %v10933_v36 = vld [vmem:[#allocation110_spill] sm:$0xff] }
 0xaae   :  { %3711 = vmatpush1.bf16.msra.mxu0 %v10254_v58  ;;  %3752 = vmatpush1.bf16.msra.mxu1 %v10255_v60  ;;  %v10934_v58 = vld [vmem:[#allocation112_spill] sm:$0xff]  ;;  %v10935_v60 = vld [vmem:[#allocation221_spill] sm:$0xff] }
 0xaaf   :  { %3712 = vmatprep.subr.bf16.mxu0 %v10256_v40  ;;  %3753 = vmatprep.subr.bf16.mxu1 %v10257_v53  ;;  %v10936_v40 = vld [vmem:[#allocation223_spill] sm:$0xff]  ;;  %v10937_v53 = vld [vmem:[#allocation114_spill] sm:$0xff] }
 0xab2   :  { %3713 = vmatpush2.bf16.msra.mxu0 %v10258_v30  ;;  %3754 = vmatpush2.bf16.msra.mxu1 %v10259_v19  ;;  %v10938_v30 = vld [vmem:[#allocation116_spill] sm:$0xff] }
 0xab3   :  { %3714 = vmatprep.subr.bf16.mxu0 %v10260_v9  ;;  %3755 = vmatprep.subr.bf16.mxu1 %v10261_v33  ;;  %v10939_v19 = vld [vmem:[#allocation224_spill] sm:$0xff]  ;;  %v10940_v9 = vld [vmem:[#allocation225_spill] sm:$0xff]  ;;  %v10941_v33 = vld [vmem:[#allocation118_spill] sm:$0xff] }
 0xab6   :  { %3715 = vmatpush2.bf16.msra.mxu0 %v10262_v49  ;;  %3756 = vmatpush2.bf16.msra.mxu1 %v10263_v47  ;;  %v10942_v49 = vld [vmem:[#allocation120_spill] sm:$0xff] }
 0xab7   :  { %3716 = vmatprep.subr.bf16.mxu0 %v10382_v32  ;;  %3757 = vmatprep.subr.bf16.mxu1 %v10264_v57  ;;  %v10943_v47 = vld [vmem:[#allocation228_spill] sm:$0xff]  ;;  %v10944_v57 = vld [vmem:[#allocation229_spill] sm:$0xff]  ;;  %v10945_v32 = vld [vmem:[#allocation122_spill] sm:$0xff] }
 0xaba   :  { %3717 = vmatpush2.bf16.msra.mxu0 %v10383_v27  ;;  %3758 = vmatpush2.bf16.msra.mxu1 %v10906_v8  ;;  %v10946_v27 = vld [vmem:[#allocation124_spill] sm:$0xff]  ;;  %v10967_v8 = vld [vmem:[#allocation86_spill] sm:$0xff] }
 0xabb   :  { %3718 = vmatprep.subr.bf16.mxu0 %v10907_v10  ;;  %3759 = vmatprep.subr.bf16.mxu1 %v10908_v16  ;;  %v10968_v10 = vld [vmem:[#allocation172_spill] sm:$0xff]  ;;  %v10969_v16 = vld [vmem:[#allocation146_spill] sm:$0xff] }
 0xabe   :  { %3719 = vmatpush2.bf16.msra.mxu0 %v10909_v23  ;;  %3760 = vmatpush2.bf16.msra.mxu1 %v10910_v25  ;;  %v10970_v23 = vld [vmem:[#allocation148_spill] sm:$0xff]  ;;  %v10971_v25 = vld [vmem:[#allocation174_spill] sm:$0xff] }
 0xabf   :  { %3720 = vmatprep.subr.bf16.mxu0 %v10911_v11  ;;  %3761 = vmatprep.subr.bf16.mxu1 %v10912_v13  ;;  %v10972_v11 = vld [vmem:[#allocation179_spill] sm:$0xff]  ;;  %v10973_v13 = vld [vmem:[#allocation150_spill] sm:$0xff] }
 0xac2   :  { %3721 = vmatpush2.bf16.msra.mxu0 %v10913_v35  ;;  %3762 = vmatpush2.bf16.msra.mxu1 %v10914_v28  ;;  %v10974_v35 = vld [vmem:[#allocation151_spill] sm:$0xff]  ;;  %v10975_v28 = vld [vmem:[#allocation194_spill] sm:$0xff] }
 0xac3   :  { %3722 = vmatprep.subr.bf16.mxu0 %v10915_v17  ;;  %3763 = vmatprep.subr.bf16.mxu1 %v10916_v45  ;;  %v10976_v17 = vld [vmem:[#allocation181_spill] sm:$0xff]  ;;  %v10977_v45 = vld [vmem:[#allocation152_spill] sm:$0xff] }
 0xac6   :  { %3723 = vmatpush2.bf16.msra.mxu0 %v10917_v54  ;;  %3764 = vmatpush2.bf16.msra.mxu1 %v10918_v31  ;;  %v10978_v54 = vld [vmem:[#allocation153_spill] sm:$0xff]  ;;  %v10979_v31 = vld [vmem:[#allocation196_spill] sm:$0xff] }
 0xac7   :  { %3724 = vmatprep.subr.bf16.mxu0 %v10919_v52  ;;  %3765 = vmatprep.subr.bf16.mxu1 %v10920_v44  ;;  %v10980_v52 = vld [vmem:[#allocation210_spill] sm:$0xff] }
 0xac8   :  { %v10981_v44 = vld [vmem:[#allocation154_spill] sm:$0xff] }
 0xaca   :  { %3725 = vmatpush2.bf16.msra.mxu0 %v10921_v43  ;;  %3766 = vmatpush2.bf16.msra.mxu1 %v10922_v48  ;;  %v10982_v43 = vld [vmem:[#allocation155_spill] sm:$0xff]  ;;  %v10983_v48 = vld [vmem:[#allocation213_spill] sm:$0xff] }
 0xacb   :  { %3726 = vmatprep.subr.bf16.mxu0 %v10923_v0  ;;  %3767 = vmatprep.subr.bf16.mxu1 %v10924_v59  ;;  %v10984_v0 = vld [vmem:[#allocation102_spill] sm:$0xff]  ;;  %v10985_v59 = vld [vmem:[#allocation156_spill] sm:$0xff] }
 0xace   :  { %3727 = vmatpush2.bf16.msra.mxu0 %v10925_v12  ;;  %3768 = vmatpush2.bf16.msra.mxu1 %v10926_v26  ;;  %v10986_v12 = vld [vmem:[#allocation157_spill] sm:$0xff]  ;;  %v10987_v26 = vld [vmem:[#allocation60_spill] sm:$0xff] }
 0xacf   :  { %3778 = vmatprep.subr.bf16.mxu0 %v10927_v1  ;;  %3877 = vmatprep.subr.bf16.mxu1 %v10928_v42  ;;  %v10988_v1 = vld [vmem:[#allocation103_spill] sm:$0xff]  ;;  %v10989_v42 = vld [vmem:[#allocation158_spill] sm:$0xff] }
 0xad1   :  { %3729 = vmatmul.mubr.bf16.vlgmr.msra.gmra.mxu0 %v9215_v29  ;;  %3770 = vmatmul.mubr.bf16.vlgmr.msra.gmra.mxu1 %v9215_v29 }
 0xad2   :  { %3779 = vmatpush1.bf16.msra.mxu0 %v10929_v3  ;;  %3810 = vmatprep.mubr.bf16.mxu0 %v9213_v21  ;;  %v10966_v21 = vld [vmem:[#allocation144_spill] sm:$0xff]  ;;  %v10990_v3 = vld [vmem:[#allocation62_spill] sm:$0xff] }
 0xad3   :  { %3780 = vmatprep.subr.bf16.mxu0 %v10930_v22  ;;  %3878 = vmatpush1.bf16.msra.mxu1 %v10931_v41 }
 0xad4   :  { %3879 = vmatprep.subr.bf16.mxu1 %v10932_v38  ;;  %v10991_v38 = vld [vmem:[#allocation162_spill] sm:$0xff] }
 0xad6   :  { %3781 = vmatpush1.bf16.msra.mxu0 %v10933_v36  ;;  %v10992_v36 = vld [vmem:[#allocation167_spill] sm:$0xff] }
 0xad7   :  { %3782 = vmatprep.subr.bf16.mxu0 %v10934_v58  ;;  %3880 = vmatpush1.bf16.msra.mxu1 %v10935_v60  ;;  %v434_v58 = vadd.f32 %v10992_v36, %v10991_v38  ;;  %v10993_v60 = vld [vmem:[#allocation98_spill] sm:$0xff] }
 0xad8   :  { %3881 = vmatprep.subr.bf16.mxu1 %v10936_v40 }
 0xada   :  { %3783 = vmatpush1.bf16.msra.mxu0 %v10937_v53  ;;  %v10994_v53 = vld [vmem:[#allocation165_spill] sm:$0xff] }
 0xadb   :  { %3784 = vmatprep.subr.bf16.mxu0 %v10938_v30  ;;  %3882 = vmatpush1.bf16.msra.mxu1 %v10939_v19 }
 0xadc   :  { %3883 = vmatprep.subr.bf16.mxu1 %v10940_v9 }
 0xade   :  { %3785 = vmatpush1.bf16.msra.mxu0 %v10941_v33  ;;  %v10995_v33 = vld [vmem:[#allocation56_spill] sm:$0xff] }
 0xadf   :  { %3786 = vmatprep.subr.bf16.mxu0 %v10942_v49  ;;  %3884 = vmatpush1.bf16.msra.mxu1 %v10943_v47 }
 0xae0   :  { %3885 = vmatprep.subr.bf16.mxu1 %v10944_v57 }
 0xae2   :  { %3787 = vmatpush1.bf16.msra.mxu0 %v10945_v32 }
 0xae3   :  { %3788 = vmatprep.subr.bf16.mxu0 %v10946_v27  ;;  %3886 = vmatpush1.bf16.msra.mxu1 %v10947_v51 }
 0xae4   :  { %3887 = vmatprep.subr.bf16.mxu1 %v10948_v6 }
 0xae6   :  { %3789 = vmatpush1.bf16.msra.mxu0 %v10949_v56 }
 0xae7   :  { %3790 = vmatprep.subr.bf16.mxu0 %v10950_v61  ;;  %3888 = vmatpush1.bf16.msra.mxu1 %v10951_v15 }
 0xae8   :  { %3889 = vmatprep.subr.bf16.mxu1 %v10952_v34 }
 0xaea   :  { %3791 = vmatpush1.bf16.msra.mxu0 %v10953_v20 }
 0xaeb   :  { %3792 = vmatprep.subr.bf16.mxu0 %v10954_v63  ;;  %3890 = vmatpush1.bf16.msra.mxu1 %v10955_v5  ;;  %v10996_v5 = vld [vmem:[#allocation193_spill] sm:$0xff] }
 0xaec   :  { %3891 = vmatprep.subr.bf16.mxu1 %v10956_v14 }
 0xaee   :  { %3793 = vmatpush1.bf16.msra.mxu0 %v10957_v24  ;;  %v10997_v24 = vld [vmem:[#allocation211_spill] sm:$0xff] }
 0xaef   :  { %3794 = vmatprep.subr.bf16.mxu0 %v10958_v37  ;;  %3892 = vmatpush1.bf16.msra.mxu1 %v10959_v7 }
 0xaf0   :  { %3893 = vmatprep.subr.bf16.mxu1 %v10960_v62 }
 0xaf2   :  { %3795 = vmatpush2.bf16.msra.mxu0 %v10961_v55 }
 0xaf3   :  { %3796 = vmatprep.subr.bf16.mxu0 %v10962_v46  ;;  %3894 = vmatpush2.bf16.msra.mxu1 %v10963_v2  ;;  %v10998_v46 = vld [vmem:[#allocation195_spill] sm:$0xff] }
 0xaf4   :  { %3895 = vmatprep.subr.bf16.mxu1 %v10964_v4  ;;  %v10999_v4 = vld [vmem:[#allocation214_spill] sm:$0xff] }
 0xaf6   :  { %3797 = vmatpush2.bf16.msra.mxu0 %v10965_v18 }
 0xaf7   :  { %3798 = vmatprep.subr.bf16.mxu0 %v10966_v21  ;;  %3896 = vmatpush2.bf16.msra.mxu1 %v10967_v8 }
 0xaf8   :  { %3897 = vmatprep.subr.bf16.mxu1 %v10968_v10 }
 0xafa   :  { %3799 = vmatpush2.bf16.msra.mxu0 %v10969_v16 }
 0xafb   :  { %3800 = vmatprep.subr.bf16.mxu0 %v10970_v23  ;;  %3898 = vmatpush2.bf16.msra.mxu1 %v10971_v25 }
 0xafc   :  { %3899 = vmatprep.subr.bf16.mxu1 %v10972_v11 }
 0xafe   :  { %3801 = vmatpush2.bf16.msra.mxu0 %v10973_v13 }
 0xaff   :  { %3802 = vmatprep.subr.bf16.mxu0 %v10974_v35  ;;  %3900 = vmatpush2.bf16.msra.mxu1 %v10975_v28 }
 0xb00   :  { %3901 = vmatprep.subr.bf16.mxu1 %v10976_v17 }
 0xb02   :  { %3803 = vmatpush2.bf16.msra.mxu0 %v10977_v45 }
 0xb03   :  { %3804 = vmatprep.subr.bf16.mxu0 %v10978_v54  ;;  %3902 = vmatpush2.bf16.msra.mxu1 %v10979_v31 }
 0xb04   :  { %3903 = vmatprep.subr.bf16.mxu1 %v10980_v52 }
 0xb06   :  { %3805 = vmatpush2.bf16.msra.mxu0 %v10981_v44 }
 0xb07   :  { %3806 = vmatprep.subr.bf16.mxu0 %v10982_v43  ;;  %3904 = vmatpush2.bf16.msra.mxu1 %v10983_v48 }
 0xb08   :  { %3905 = vmatprep.subr.bf16.mxu1 %v10984_v0 }
 0xb0a   :  { %3807 = vmatpush2.bf16.msra.mxu0 %v10985_v59 }
 0xb0b   :  { %3808 = vmatprep.subr.bf16.mxu0 %v10986_v12  ;;  %3906 = vmatpush2.bf16.msra.mxu1 %v10987_v26 }
 0xb0c   :  { %3907 = vmatprep.subr.bf16.mxu1 %v10988_v1  ;;  %v11000_v1 = vld [vmem:[#allocation230_spill] sm:$0xff] }
 0xb0e   :  { %3809 = vmatpush2.bf16.msra.mxu0 %v10989_v42 }
 0xb0f   :  { %3908 = vmatpush2.bf16.msra.mxu1 %v10990_v3 }
 0xb11   :  { %3811 = vmatmul.mubr.bf16.vlgmr.msra.gmra.mxu0 %v9215_v29 }
 0xb51   :  { %v3632_v22 = vpop.f32.mrf.mxu0  ;;  %v3689_v41 = vpop.f32.mrf.mxu1 }
 0xb52   :  { %v9356_v40 = vadd.f32 %v3632_v22, %v10993_v60  ;;  %v3819_v30 = vadd.f32 %v3689_v41, %v10994_v53  ;;  %v11001_v41 = vld [vmem:[#allocation231_spill] sm:$0xff] }
 0xb53   :  { %v3634_v19 = vpop.f32.mrf.mxu0  ;;  %v3691_v9 = vpop.f32.mrf.mxu1 }
 0xb54   :  { %v9360_v49 = vadd.f32 %v3634_v19, %v10995_v33  ;;  %v3820_v47 = vadd.f32 %v3691_v9, %v434_v58  ;;  %v5776_v51 = vmul.f32 -1.442695, %v3819_v30 }
 0xb55   :  { %v3636_v57 = vpop.f32.mrf.mxu0  ;;  %v3693_v32 = vpop.f32.mrf.mxu1 }
 0xb56   :  { %v5777_v6 = vmul.f32 -1.442695, %v3820_v47  ;;  %6306 = vpow2.f32 %v5776_v51 }
 0xb57   :  { %v3637_v27 = vpop.f32.mrf.mxu0  ;;  %v3694_v29 = vpop.f32.mrf.mxu1 }
 0xb58   :  { %6308 = vpow2.f32 %v5777_v6 }
 0xb63   :  { %v6307_v56 = vpop.eup %6306 }
 0xb64   :  { %v3839_v15 = vadd.f32 1.0, %v6307_v56 }
 0xb65   :  { %v6309_v61 = vpop.eup %6308 }
 0xb66   :  { %v3840_v34 = vadd.f32 1.0, %v6309_v61  ;;  %6310 = vrcp.f32 %v3839_v15 }
 0xb73   :  { %v6311_v25 = vpop.eup %6310 }
 0xb91   :  { %v3730_v20 = vpop.f32.mrf.mxu0  ;;  %v3771_v63 = vpop.f32.mrf.mxu1 }
 0xb92   :  { %v3821_v14 = vadd.f32 %v3730_v20, %v10996_v5  ;;  %v3823_v37 = vadd.f32 %v3771_v63, %v10997_v24 }
 0xb93   :  { %v3732_v7 = vpop.f32.mrf.mxu0  ;;  %v3773_v62 = vpop.f32.mrf.mxu1 }
 0xb94   :  { %v5778_v55 = vmul.f32 -1.442695, %v3821_v14  ;;  %6312 = vtanh.f32 %v3823_v37  ;;  %v3822_v2 = vadd.f32 %v3732_v7, %v10998_v46  ;;  %v3824_v18 = vadd.f32 %v3773_v62, %v10999_v4 }
 0xb95   :  { %6314 = vrcp.f32 %v3840_v34  ;;  %v3734_v21 = vpop.f32.mrf.mxu0  ;;  %v3775_v8 = vpop.f32.mrf.mxu1 }
 0xb96   :  { %6316 = vpow2.f32 %v5778_v55  ;;  %v5779_v10 = vmul.f32 -1.442695, %v3822_v2 }
 0xb97   :  { %6318 = vtanh.f32 %v3824_v18  ;;  %v3735_v16 = vpop.f32.mrf.mxu0  ;;  %v3776_v23 = vpop.f32.mrf.mxu1 }
 0xb98   :  { %6320 = vpow2.f32 %v5779_v10 }
 0xba1   :  { %v6313_v11 = vpop.eup %6312 }
 0xba2   :  { %v6315_v13 = vpop.eup %6314  ;;  %v3867_v35 = vmul.f32 %v6313_v11, %v6311_v25 }
 0xba3   :  { %v6317_v28 = vpop.eup %6316 }
 0xba4   :  { %v6319_v17 = vpop.eup %6318  ;;  %v3841_v45 = vadd.f32 1.0, %v6317_v28 }
 0xba5   :  { %v6321_v54 = vpop.eup %6320  ;;  %v3868_v31 = vmul.f32 %v6319_v17, %v6315_v13 }
 0xba6   :  { %6322 = vrcp.f32 %v3841_v45  ;;  %v3842_v52 = vadd.f32 1.0, %v6321_v54 }
 0xba8   :  { %6324 = vrcp.f32 %v3842_v52 }
 0xbb3   :  { %v6323_v44 = vpop.eup %6322 }
 0xbb4   :  { %v3865_v43 = vmul.f32 %v6323_v44, %v9204_v39 }
 0xbb5   :  { %v6325_v48 = vpop.eup %6324 }
 0xbb6   :  { %v3869_v0 = vadd.f32 %v3867_v35, %v3865_v43  ;;  %v3866_v59 = vmul.f32 %v6325_v48, %v9207_v50 }
 0xbb8   :  { %v3870_v12 = vadd.f32 %v3868_v31, %v3866_v59 }
 0xbd1   :  { %v3812_v26 = vpop.f32.mrf.mxu0 }
 0xbd2   :  { %v3825_v42 = vadd.f32 %v3812_v26, %v11000_v1 }
 0xbd3   :  { %v3814_v3 = vpop.f32.mrf.mxu0 }
 0xbd4   :  { %v5780_v22 = vmul.f32 -1.442695, %v3825_v42  ;;  %v3826_v38 = vadd.f32 %v3814_v3, %v11001_v41 }
 0xbd5   :  { %v3816_v36 = vpop.f32.mrf.mxu0 }
 0xbd6   :  { %6326 = vpow2.f32 %v5780_v22  ;;  %v5781_v58 = vmul.f32 -1.442695, %v3826_v38 }
 0xbd7   :  { %v3817_v53 = vpop.f32.mrf.mxu0 }
 0xbd8   :  { %6328 = vpow2.f32 %v5781_v58 }
 0xbd9   :  { %6330 = vtanh.f32 %v3869_v0 }
 0xbe3   :  { %v6327_v30 = vpop.eup %6326 }
 0xbe4   :  { %v3859_v19 = vadd.f32 1.0, %v6327_v30 }
 0xbe5   :  { %v6329_v39 = vpop.eup %6328 }
 0xbe6   :  { %6332 = vrcp.f32 %v3859_v19  ;;  %v3860_v9 = vadd.f32 1.0, %v6329_v39  ;;  %v6331_v50 = vpop.eup %6330 }
 0xbe7   :  { %6334 = vtanh.f32 %v3870_v12 }
 0xbe8   :  { %6336 = vrcp.f32 %v3860_v9 }
 0xbf3   :  { %v6333_v47 = vpop.eup %6332 }
 0xbf4   :  { %v6335_v57 = vpop.eup %6334  ;;  %v3873_v32 = vmul.f32 %v6333_v47, %v6331_v50 }
 0xbf5   :  { %v6337_v27 = vpop.eup %6336 }
 0xbf6   :  { %v3874_v29 = vmul.f32 %v6337_v27, %v6335_v57  ;;  %v3875_v6 = vpack.c.bf16 %v3873_v32, %v3873_v32 }
 0xbf8   :  { %v3876_v51 = vpack.c.bf16 %v3874_v29, %v3874_v29 }
 0xbfa   :  { %3909 = vmatprep.mubr.bf16.mxu1 %v3876_v51 }
 0xbfb   :  { %3910 = vmatmul.mubr.bf16.vlgmr.msra.gmra.mxu1 %v3875_v6 }
 0xbfc   :  { %6853 = shalt.err (!%p6850_p12)  }
 0xbfd   :  { %247 = dma.hbm_to_vmem [thread:$0]  %s9500_s13, 1024, %s245_s7, [#allocation8 + $0x3] }
 0xcbb   :  { %v3911_v56 = vpop.f32.mrf.mxu1 }
 0xcbc   :  { %v9374_v61 = vadd.f32 %v3911_v56, %v10993_v60 }
 0xcbd   :  { %v3913_v15 = vpop.f32.mrf.mxu1 }
 0xcbe   :  { %v9377_v34 = vadd.f32 %v3913_v15, %v10995_v33 }
 0xcbf   :  { %v3915_v20 = vpop.f32.mrf.mxu1 }
 0xcc1   :  { %v3916_v63 = vpop.f32.mrf.mxu1 }
 0xcc2   :  { %6864 = dma.done.wait [#allocation8], 8192 }
 0xcc3   :  { %6865 = vsyncadd [#allocation8], 4294959104 }
 0xcc4   :  { %6866 = dma.done.wait [#allocation8 + $0x1], 8192 }
 0xcc5   :  { %6867 = vsyncadd [#allocation8 + $0x1], 4294959104 }
 0xcc6   :  { %6868 = dma.done.wait [#allocation8 + $0x2], 2048 }
 0xcc7   :  { %6869 = vsyncadd [#allocation8 + $0x2], 4294965248 }
 0xcc8   :  { %6870 = dma.done.wait [#allocation8 + $0x3], 1024 }
 0xcc9   :  { %6871 = vsyncadd [#allocation8 + $0x3], 4294966272  ;;  %v11002_v5 = vld [vmem:[#allocation58_spill] sm:$0xff]  ;;  %v11003_v14 = vld [vmem:[#allocation188_spill] sm:$0xff] }
 0xcca   :  { %v3955_v24 = vpack.c.bf16 %v11003_v14, %v11002_v5  ;;  %v6402_v60 = vld [vmem:[#allocation4 + $0xe4] ss:$16 sps:$4 sm:$0xff]   ;;  %v6404_v37 = vld [vmem:[#allocation4 + $0xec] ss:$16 sps:$4 sm:$0xff]   ;;  %v6406_v33 = vld [vmem:[#allocation4 + $0xe0] ss:$16 sps:$4 sm:$0xff]  }
 0xccb   :  { %4368 = vmatprep.subr.bf16.mxu0 %v6402_v60  ;;  %v6407_v7 = vld [vmem:[#allocation4 + $0xe8] ss:$16 sps:$4 sm:$0xff]   ;;  %4441 = vmatprep.subr.bf16.mxu1 %v6404_v37  ;;  %v6408_v62 = vld [vmem:[#allocation4 + $0xc4] ss:$16 sps:$4 sm:$0xff]   ;;  %v6410_v55 = vld [vmem:[#allocation4 + $0xcc] ss:$16 sps:$4 sm:$0xff]  }
 0xccc   :  { %4400 = vmatprep.mubr.bf16.mxu0 %v3955_v24  ;;  %4473 = vmatprep.mubr.bf16.mxu1 %v3955_v24  ;;  %v6412_v46 = vld [vmem:[#allocation4 + $0xc0] ss:$16 sps:$4 sm:$0xff]   ;;  %v6413_v2 = vld [vmem:[#allocation4 + $0xc8] ss:$16 sps:$4 sm:$0xff]   ;;  %v6414_v4 = vld [vmem:[#allocation4 + $0xa4] ss:$16 sps:$4 sm:$0xff]  }
 0xccd   :  { %4369 = vmatpush1.bf16.msra.mxu0 %v6406_v33  ;;  %4442 = vmatpush1.bf16.msra.mxu1 %v6407_v7  ;;  %v6416_v18 = vld [vmem:[#allocation4 + $0xac] ss:$16 sps:$4 sm:$0xff]   ;;  %v6418_v21 = vld [vmem:[#allocation4 + $0xa0] ss:$16 sps:$4 sm:$0xff]   ;;  %v6419_v8 = vld [vmem:[#allocation4 + $0xa8] ss:$16 sps:$4 sm:$0xff]  }
 0xcce   :  { %4370 = vmatprep.subr.bf16.mxu0 %v6408_v62  ;;  %4443 = vmatprep.subr.bf16.mxu1 %v6410_v55  ;;  %v6420_v10 = vld [vmem:[#allocation4 + $0x84] ss:$16 sps:$4 sm:$0xff]   ;;  %v6422_v16 = vld [vmem:[#allocation4 + $0x8c] ss:$16 sps:$4 sm:$0xff]   ;;  %v6424_v23 = vld [vmem:[#allocation4 + $0x80] ss:$16 sps:$4 sm:$0xff]  }
 0xccf   :  { %v6425_v25 = vld [vmem:[#allocation4 + $0x88] ss:$16 sps:$4 sm:$0xff]   ;;  %v6426_v11 = vld [vmem:[#allocation4 + $0x64] ss:$16 sps:$4 sm:$0xff]   ;;  %v6428_v13 = vld [vmem:[#allocation4 + $0x6c] ss:$16 sps:$4 sm:$0xff]  }
 0xcd0   :  { %v6430_v35 = vld [vmem:[#allocation4 + $0x60] ss:$16 sps:$4 sm:$0xff]   ;;  %v6431_v28 = vld [vmem:[#allocation4 + $0x68] ss:$16 sps:$4 sm:$0xff]   ;;  %v6432_v17 = vld [vmem:[#allocation4 + $0x44] ss:$16 sps:$4 sm:$0xff]  }
 0xcd1   :  { %4371 = vmatpush1.bf16.msra.mxu0 %v6412_v46  ;;  %4444 = vmatpush1.bf16.msra.mxu1 %v6413_v2  ;;  %v6434_v45 = vld [vmem:[#allocation4 + $0x4c] ss:$16 sps:$4 sm:$0xff]   ;;  %v6436_v54 = vld [vmem:[#allocation4 + $0x40] ss:$16 sps:$4 sm:$0xff]   ;;  %v6437_v31 = vld [vmem:[#allocation4 + $0x48] ss:$16 sps:$4 sm:$0xff]  }
 0xcd2   :  { %4372 = vmatprep.subr.bf16.mxu0 %v6414_v4  ;;  %4445 = vmatprep.subr.bf16.mxu1 %v6416_v18  ;;  %v6438_v52 = vld [vmem:[#allocation4 + $0x24] ss:$16 sps:$4 sm:$0xff]   ;;  %v6440_v44 = vld [vmem:[#allocation4 + $0x2c] ss:$16 sps:$4 sm:$0xff]   ;;  %v6442_v43 = vld [vmem:[#allocation4 + $0x20] ss:$16 sps:$4 sm:$0xff]  }
 0xcd3   :  { %v6443_v48 = vld [vmem:[#allocation4 + $0x28] ss:$16 sps:$4 sm:$0xff]   ;;  %v6444_v0 = vld [vmem:[#allocation4 + $0x4] ss:$16 sps:$4 sm:$0xff]   ;;  %v6446_v59 = vld [vmem:[#allocation4 + $0xc] ss:$16 sps:$4 sm:$0xff]  }
 0xcd4   :  { %v6448_v12 = vld [vmem:[#allocation4] ss:$16 sps:$4 sm:$0xff]   ;;  %v6449_v26 = vld [vmem:[#allocation4 + $0x8] ss:$16 sps:$4 sm:$0xff]   ;;  %v6450_v1 = vld [vmem:[#allocation4 + $0x1e4] ss:$16 sps:$4 sm:$0xff]  }
 0xcd5   :  { %4373 = vmatpush1.bf16.msra.mxu0 %v6418_v21  ;;  %4446 = vmatpush1.bf16.msra.mxu1 %v6419_v8  ;;  %v6452_v42 = vld [vmem:[#allocation4 + $0x1ec] ss:$16 sps:$4 sm:$0xff]   ;;  %v6454_v3 = vld [vmem:[#allocation4 + $0x1e0] ss:$16 sps:$4 sm:$0xff]   ;;  %v6455_v22 = vld [vmem:[#allocation4 + $0x1e8] ss:$16 sps:$4 sm:$0xff]  }
 0xcd6   :  { %4374 = vmatprep.subr.bf16.mxu0 %v6420_v10  ;;  %4447 = vmatprep.subr.bf16.mxu1 %v6422_v16  ;;  %v6456_v41 = vld [vmem:[#allocation4 + $0x1c4] ss:$16 sps:$4 sm:$0xff]   ;;  %v6458_v38 = vld [vmem:[#allocation4 + $0x1cc] ss:$16 sps:$4 sm:$0xff]   ;;  %v6460_v36 = vld [vmem:[#allocation4 + $0x1c0] ss:$16 sps:$4 sm:$0xff]  }
 0xcd7   :  { %v6461_v58 = vld [vmem:[#allocation4 + $0x1c8] ss:$16 sps:$4 sm:$0xff]   ;;  %v6462_v53 = vld [vmem:[#allocation4 + $0x1a4] ss:$16 sps:$4 sm:$0xff]   ;;  %v6464_v30 = vld [vmem:[#allocation4 + $0x1ac] ss:$16 sps:$4 sm:$0xff]  }
 0xcd8   :  { %v6466_v19 = vld [vmem:[#allocation4 + $0x1a0] ss:$16 sps:$4 sm:$0xff]   ;;  %v6467_v39 = vld [vmem:[#allocation4 + $0x1a8] ss:$16 sps:$4 sm:$0xff]   ;;  %v6468_v9 = vld [vmem:[#allocation4 + $0x184] ss:$16 sps:$4 sm:$0xff]  }
 0xcd9   :  { %4375 = vmatpush1.bf16.msra.mxu0 %v6424_v23  ;;  %4448 = vmatpush1.bf16.msra.mxu1 %v6425_v25  ;;  %v6470_v50 = vld [vmem:[#allocation4 + $0x18c] ss:$16 sps:$4 sm:$0xff]   ;;  %v6472_v47 = vld [vmem:[#allocation4 + $0x180] ss:$16 sps:$4 sm:$0xff]   ;;  %v6473_v57 = vld [vmem:[#allocation4 + $0x188] ss:$16 sps:$4 sm:$0xff]  }
 0xcda   :  { %4376 = vmatprep.subr.bf16.mxu0 %v6426_v11  ;;  %4449 = vmatprep.subr.bf16.mxu1 %v6428_v13  ;;  %v6474_v32 = vld [vmem:[#allocation4 + $0x164] ss:$16 sps:$4 sm:$0xff]   ;;  %v6476_v27 = vld [vmem:[#allocation4 + $0x16c] ss:$16 sps:$4 sm:$0xff]   ;;  %v6478_v29 = vld [vmem:[#allocation4 + $0x160] ss:$16 sps:$4 sm:$0xff]  }
 0xcdb   :  { %v6479_v51 = vld [vmem:[#allocation4 + $0x168] ss:$16 sps:$4 sm:$0xff]   ;;  %v6480_v6 = vld [vmem:[#allocation4 + $0x144] ss:$16 sps:$4 sm:$0xff]   ;;  %v6482_v56 = vld [vmem:[#allocation4 + $0x14c] ss:$16 sps:$4 sm:$0xff]  }
 0xcdc   :  { %v6484_v15 = vld [vmem:[#allocation4 + $0x140] ss:$16 sps:$4 sm:$0xff]   ;;  %v6485_v20 = vld [vmem:[#allocation4 + $0x148] ss:$16 sps:$4 sm:$0xff]   ;;  %v6486_v63 = vld [vmem:[#allocation4 + $0x124] ss:$16 sps:$4 sm:$0xff]  }
 0xcdd   :  { %4377 = vmatpush1.bf16.msra.mxu0 %v6430_v35  ;;  %4450 = vmatpush1.bf16.msra.mxu1 %v6431_v28  ;;  %v6488_v5 = vld [vmem:[#allocation4 + $0x12c] ss:$16 sps:$4 sm:$0xff]   ;;  %v6490_v14 = vld [vmem:[#allocation4 + $0x120] ss:$16 sps:$4 sm:$0xff]   ;;  %v6491_v24 = vld [vmem:[#allocation4 + $0x128] ss:$16 sps:$4 sm:$0xff]  }
 0xcde   :  { %4378 = vmatprep.subr.bf16.mxu0 %v6432_v17  ;;  %4451 = vmatprep.subr.bf16.mxu1 %v6434_v45  ;;  %v6492_v60 = vld [vmem:[#allocation4 + $0x104] ss:$16 sps:$4 sm:$0xff]   ;;  %v6494_v37 = vld [vmem:[#allocation4 + $0x10c] ss:$16 sps:$4 sm:$0xff]   ;;  %v6496_v33 = vld [vmem:[#allocation4 + $0x100] ss:$16 sps:$4 sm:$0xff]  }
 0xcdf   :  { %v6497_v7 = vld [vmem:[#allocation4 + $0x108] ss:$16 sps:$4 sm:$0xff]   ;;  %v6500_v62 = vld [vmem:[#allocation5 + $0x74] ss:$8 sps:$4 sm:$0xff]   ;;  %v6506_v23 = vld [vmem:[#allocation5 + $0x64] ss:$8 sps:$4 sm:$0xff]  }
 0xce0   :  { %v6503_v55 = vld [vmem:[#allocation5 + $0x174] ss:$8 sps:$4 sm:$0xff]   ;;  %v11006_v18 = vld [vmem:[#allocation206_spill] sm:$0xff]  ;;  %v6498_v10 = vld [vmem:[#allocation5 + $0x70] ss:$8 sps:$4 sm:$0xff]  }
 0xce1   :  { %4379 = vmatpush1.bf16.msra.mxu0 %v6436_v54  ;;  %4452 = vmatpush1.bf16.msra.mxu1 %v6437_v31  ;;  %v11004_v46 = vld [vmem:[#allocation100_spill] sm:$0xff]  ;;  %v11005_v2 = vld [vmem:[#allocation173_spill] sm:$0xff]  ;;  %v6509_v25 = vld [vmem:[#allocation5 + $0x164] ss:$8 sps:$4 sm:$0xff]  }
 0xce2   :  { %4380 = vmatprep.subr.bf16.mxu0 %v6438_v52  ;;  %4453 = vmatprep.subr.bf16.mxu1 %v6440_v44  ;;  %v3954_v4 = vpack.c.bf16 %v11005_v2, %v11004_v46  ;;  %v11007_v21 = vld [vmem:[#allocation212_spill] sm:$0xff]  ;;  %v6504_v11 = vld [vmem:[#allocation5 + $0x60] ss:$8 sps:$4 sm:$0xff]  }
 0xce3   :  { %v3957_v8 = vpack.c.bf16 %v11007_v21, %v11006_v18  ;;  %v6501_v16 = vld [vmem:[#allocation5 + $0x170] ss:$8 sps:$4 sm:$0xff]   ;;  %v6507_v13 = vld [vmem:[#allocation5 + $0x160] ss:$8 sps:$4 sm:$0xff]   ;;  %v6512_v35 = vld [vmem:[#allocation5 + $0x54] ss:$8 sps:$4 sm:$0xff]  }
 0xce4   :  { %v6515_v28 = vld [vmem:[#allocation5 + $0x154] ss:$8 sps:$4 sm:$0xff]   ;;  %v11008_v17 = vld [vmem:[#allocation203_spill] sm:$0xff] }
 0xce5   :  { %4381 = vmatpush1.bf16.msra.mxu0 %v6442_v43  ;;  %4454 = vmatpush1.bf16.msra.mxu1 %v6443_v48  ;;  %v11009_v45 = vld [vmem:[#allocation209_spill] sm:$0xff]  ;;  %v11010_v31 = vld [vmem:[#allocation192_spill] sm:$0xff]  ;;  %v6578_v18 = vld [vmem:[#allocation5 + $0xa4] ss:$8 sps:$4 sm:$0xff]  }
 0xce6   :  { %4382 = vmatprep.subr.bf16.mxu0 %v6444_v0  ;;  %4455 = vmatprep.subr.bf16.mxu1 %v6446_v59  ;;  %v3956_v54 = vpack.c.bf16 %v11009_v45, %v11008_v17  ;;  %v11011_v52 = vld [vmem:[#allocation64_spill] sm:$0xff]  ;;  %v6518_v0 = vld [vmem:[#allocation5 + $0x44] ss:$8 sps:$4 sm:$0xff]   ;;  %v6591_v17 = vld [vmem:[#allocation5 + $0x180] ss:$8 sps:$4 sm:$0xff]  }
 0xce7   :  { %v3959_v44 = vpack.c.bf16 %v11011_v52, %v11010_v31  ;;  %v6510_v43 = vld [vmem:[#allocation5 + $0x50] ss:$8 sps:$4 sm:$0xff]   ;;  %v6521_v59 = vld [vmem:[#allocation5 + $0x144] ss:$8 sps:$4 sm:$0xff]   ;;  %v6575_v46 = vld [vmem:[#allocation5 + $0x1b4] ss:$8 sps:$4 sm:$0xff]  }
 0xce8   :  { %v6513_v48 = vld [vmem:[#allocation5 + $0x150] ss:$8 sps:$4 sm:$0xff]   ;;  %v6581_v21 = vld [vmem:[#allocation5 + $0x1a4] ss:$8 sps:$4 sm:$0xff]  }
 0xce9   :  { %4383 = vmatpush1.bf16.msra.mxu0 %v6448_v12  ;;  %4456 = vmatpush1.bf16.msra.mxu1 %v6449_v26  ;;  %v6516_v12 = vld [vmem:[#allocation5 + $0x40] ss:$8 sps:$4 sm:$0xff]   ;;  %v6570_v2 = vld [vmem:[#allocation5 + $0xb0] ss:$8 sps:$4 sm:$0xff]  }
 0xcea   :  { %4384 = vmatprep.subr.bf16.mxu0 %v6450_v1  ;;  %4457 = vmatprep.subr.bf16.mxu1 %v6452_v42  ;;  %v6519_v26 = vld [vmem:[#allocation5 + $0x140] ss:$8 sps:$4 sm:$0xff]   ;;  %v6524_v1 = vld [vmem:[#allocation5 + $0x34] ss:$8 sps:$4 sm:$0xff]  }
 0xceb   :  { %v6527_v42 = vld [vmem:[#allocation5 + $0x134] ss:$8 sps:$4 sm:$0xff]  }
 0xcec   :  { %v6594_v45 = vld [vmem:[#allocation6 + $0x78] sm:$0xff]  }
 0xced   :  { %4385 = vmatpush2.bf16.msra.mxu0 %v6454_v3  ;;  %4458 = vmatpush2.bf16.msra.mxu1 %v6455_v22  ;;  %v11012_v3 = vld [vmem:[#allocation177_spill] sm:$0xff] }
 0xcee   :  { %4386 = vmatprep.subr.bf16.mxu0 %v6456_v41  ;;  %4459 = vmatprep.subr.bf16.mxu1 %v6458_v38  ;;  %v11013_v22 = vld [vmem:[#allocation105_spill] sm:$0xff] }
 0xcef   :  { %v3958_v41 = vpack.c.bf16 %v11013_v22, %v11012_v3  ;;  %v6522_v38 = vld [vmem:[#allocation5 + $0x30] ss:$8 sps:$4 sm:$0xff]  }
 0xcf1   :  { %4387 = vmatpush2.bf16.msra.mxu0 %v6460_v36  ;;  %4460 = vmatpush2.bf16.msra.mxu1 %v6461_v58  ;;  %v6525_v36 = vld [vmem:[#allocation5 + $0x130] ss:$8 sps:$4 sm:$0xff]   ;;  %v3961_v58 = vpack.c.bf16 %v9377_v34, %v9360_v49  ;;  %v3960_v49 = vpack.c.bf16 %v9374_v61, %v9356_v40  ;;  %v6554_v61 = vld [vmem:[#allocation5 + $0xe4] ss:$8 sps:$4 sm:$0xff]  }
 0xcf2   :  { %4388 = vmatprep.subr.bf16.mxu0 %v6462_v53  ;;  %4461 = vmatprep.subr.bf16.mxu1 %v6464_v30  ;;  %v6530_v53 = vld [vmem:[#allocation5 + $0x24] ss:$8 sps:$4 sm:$0xff]   ;;  %v6534_v34 = vld [vmem:[#allocation5 + $0x10] ss:$8 sps:$4 sm:$0xff]  }
 0xcf3   :  { %v6533_v30 = vld [vmem:[#allocation5 + $0x124] ss:$8 sps:$4 sm:$0xff]   ;;  %v6549_v40 = vld [vmem:[#allocation5 + $0x1f0] ss:$8 sps:$4 sm:$0xff]  }
 0xcf5   :  { %4389 = vmatpush2.bf16.msra.mxu0 %v6466_v19  ;;  %4462 = vmatpush2.bf16.msra.mxu1 %v6467_v39  ;;  %v6528_v19 = vld [vmem:[#allocation5 + $0x20] ss:$8 sps:$4 sm:$0xff]  }
 0xcf6   :  { %4390 = vmatprep.subr.bf16.mxu0 %v6468_v9  ;;  %4463 = vmatprep.subr.bf16.mxu1 %v6470_v50  ;;  %v6531_v39 = vld [vmem:[#allocation5 + $0x120] ss:$8 sps:$4 sm:$0xff]   ;;  %v6536_v9 = vld [vmem:[#allocation5 + $0x14] ss:$8 sps:$4 sm:$0xff]  }
 0xcf7   :  { %v6539_v50 = vld [vmem:[#allocation5 + $0x114] ss:$8 sps:$4 sm:$0xff]  }
 0xcf9   :  { %4391 = vmatpush2.bf16.msra.mxu0 %v6472_v47  ;;  %4464 = vmatpush2.bf16.msra.mxu1 %v6473_v57  ;;  %v6537_v47 = vld [vmem:[#allocation5 + $0x110] ss:$8 sps:$4 sm:$0xff]   ;;  %v6542_v57 = vld [vmem:[#allocation5 + $0x4] ss:$8 sps:$4 sm:$0xff]  }
 0xcfa   :  { %4392 = vmatprep.subr.bf16.mxu0 %v6474_v32  ;;  %4465 = vmatprep.subr.bf16.mxu1 %v6476_v27  ;;  %v6545_v32 = vld [vmem:[#allocation5 + $0x104] ss:$8 sps:$4 sm:$0xff]   ;;  %v6540_v27 = vld [vmem:[#allocation5] ss:$8 sps:$4 sm:$0xff]  }
 0xcfd   :  { %4393 = vmatpush2.bf16.msra.mxu0 %v6478_v29  ;;  %4466 = vmatpush2.bf16.msra.mxu1 %v6479_v51  ;;  %v6543_v29 = vld [vmem:[#allocation5 + $0x100] ss:$8 sps:$4 sm:$0xff]   ;;  %v6548_v51 = vld [vmem:[#allocation5 + $0xf4] ss:$8 sps:$4 sm:$0xff]  }
 0xcfe   :  { %4394 = vmatprep.subr.bf16.mxu0 %v6480_v6  ;;  %4467 = vmatprep.subr.bf16.mxu1 %v6482_v56  ;;  %v6551_v6 = vld [vmem:[#allocation5 + $0x1f4] ss:$8 sps:$4 sm:$0xff]   ;;  %v6546_v56 = vld [vmem:[#allocation5 + $0xf0] ss:$8 sps:$4 sm:$0xff]  }
 0xd01   :  { %4395 = vmatpush2.bf16.msra.mxu0 %v6484_v15  ;;  %4468 = vmatpush2.bf16.msra.mxu1 %v6485_v20  ;;  %v6557_v15 = vld [vmem:[#allocation5 + $0x1e4] ss:$8 sps:$4 sm:$0xff]   ;;  %v6552_v20 = vld [vmem:[#allocation5 + $0xe0] ss:$8 sps:$4 sm:$0xff]  }
 0xd02   :  { %4396 = vmatprep.subr.bf16.mxu0 %v6486_v63  ;;  %4469 = vmatprep.subr.bf16.mxu1 %v6488_v5  ;;  %v6555_v63 = vld [vmem:[#allocation5 + $0x1e0] ss:$8 sps:$4 sm:$0xff]   ;;  %v6560_v5 = vld [vmem:[#allocation5 + $0xd4] ss:$8 sps:$4 sm:$0xff]  }
 0xd05   :  { %4397 = vmatpush2.bf16.msra.mxu0 %v6490_v14  ;;  %4470 = vmatpush2.bf16.msra.mxu1 %v6491_v24  ;;  %v6563_v14 = vld [vmem:[#allocation5 + $0x1d4] ss:$8 sps:$4 sm:$0xff]   ;;  %v6558_v24 = vld [vmem:[#allocation5 + $0xd0] ss:$8 sps:$4 sm:$0xff]  }
 0xd06   :  { %4398 = vmatprep.subr.bf16.mxu0 %v6492_v60  ;;  %4471 = vmatprep.subr.bf16.mxu1 %v6494_v37  ;;  %v6561_v60 = vld [vmem:[#allocation5 + $0x1d0] ss:$8 sps:$4 sm:$0xff]   ;;  %v6566_v37 = vld [vmem:[#allocation5 + $0xc4] ss:$8 sps:$4 sm:$0xff]  }
 0xd09   :  { %4399 = vmatpush2.bf16.msra.mxu0 %v6496_v33  ;;  %4472 = vmatpush2.bf16.msra.mxu1 %v6497_v7  ;;  %v6569_v33 = vld [vmem:[#allocation5 + $0x1c4] ss:$8 sps:$4 sm:$0xff]   ;;  %v6564_v7 = vld [vmem:[#allocation5 + $0xc0] ss:$8 sps:$4 sm:$0xff]  }
 0xd0a   :  { %4958 = vmatprep.subr.bf16.mxu0 %v6500_v62  ;;  %5031 = vmatprep.subr.bf16.mxu1 %v6503_v55  ;;  %v6567_v62 = vld [vmem:[#allocation5 + $0x1c0] ss:$8 sps:$4 sm:$0xff]   ;;  %v6572_v55 = vld [vmem:[#allocation5 + $0xb4] ss:$8 sps:$4 sm:$0xff]  }
 0xd0c   :  { %4401 = vmatmul.mubr.bf16.vlgmr.msra.gmra.mxu0 %v3954_v4  ;;  %4474 = vmatmul.mubr.bf16.vlgmr.msra.gmra.mxu1 %v3954_v4  ;;  %v6573_v4 = vld [vmem:[#allocation5 + $0x1b0] ss:$8 sps:$4 sm:$0xff]  }
 0xd0d   :  { %4410 = vmatprep.mubr.bf16.mxu0 %v3957_v8  ;;  %4483 = vmatprep.mubr.bf16.mxu1 %v3957_v8  ;;  %v6576_v8 = vld [vmem:[#allocation5 + $0xa0] ss:$8 sps:$4 sm:$0xff]  }
 0xd0e   :  { %4959 = vmatpush1.bf16.msra.mxu0 %v6498_v10  ;;  %5032 = vmatpush1.bf16.msra.mxu1 %v6501_v16  ;;  %v6579_v10 = vld [vmem:[#allocation5 + $0x1a0] ss:$8 sps:$4 sm:$0xff]   ;;  %v6584_v16 = vld [vmem:[#allocation5 + $0x94] ss:$8 sps:$4 sm:$0xff]  }
 0xd0f   :  { %4960 = vmatprep.subr.bf16.mxu0 %v6506_v23  ;;  %5033 = vmatprep.subr.bf16.mxu1 %v6509_v25  ;;  %v6587_v23 = vld [vmem:[#allocation5 + $0x194] ss:$8 sps:$4 sm:$0xff]   ;;  %v6582_v25 = vld [vmem:[#allocation5 + $0x90] ss:$8 sps:$4 sm:$0xff]  }
 0xd12   :  { %4961 = vmatpush1.bf16.msra.mxu0 %v6504_v11  ;;  %5034 = vmatpush1.bf16.msra.mxu1 %v6507_v13  ;;  %v6585_v11 = vld [vmem:[#allocation5 + $0x190] ss:$8 sps:$4 sm:$0xff]   ;;  %v6590_v13 = vld [vmem:[#allocation5 + $0x84] ss:$8 sps:$4 sm:$0xff]  }
 0xd13   :  { %4962 = vmatprep.subr.bf16.mxu0 %v6512_v35  ;;  %5035 = vmatprep.subr.bf16.mxu1 %v6515_v28  ;;  %v6593_v35 = vld [vmem:[#allocation5 + $0x184] ss:$8 sps:$4 sm:$0xff]   ;;  %v6588_v28 = vld [vmem:[#allocation5 + $0x80] ss:$8 sps:$4 sm:$0xff]  }
 0xd14   :  { %4411 = vmatmul.mubr.bf16.gmra.mxu0 %v3956_v54  ;;  %4484 = vmatmul.mubr.bf16.gmra.mxu1 %v3956_v54  ;;  %v4026_v54 = vld [vmem:[#allocation16] sm:$0xf] }
 0xd15   :  { %4420 = vmatprep.mubr.bf16.mxu0 %v3959_v44  ;;  %4493 = vmatprep.mubr.bf16.mxu1 %v3959_v44  ;;  %v11014_v44 = vld [vmem:[#allocation161_spill] sm:$0xff] }
 0xd16   :  { %4963 = vmatpush1.bf16.msra.mxu0 %v6510_v43  ;;  %5036 = vmatpush1.bf16.msra.mxu1 %v6513_v48  ;;  %v9396_v43 = vrot.slane %v4026_v54, %v11014_v44  ;;  %v11015_v48 = vld [vmem:[#allocation159_spill] sm:$0xff] }
 0xd17   :  { %4964 = vmatprep.subr.bf16.mxu0 %v6518_v0  ;;  %5037 = vmatprep.subr.bf16.mxu1 %v6521_v59  ;;  %v11016_v0 = vsub.s32 3, %v11015_v48 }
 0xd19   :  { %v9400_v59 = vrot.slane %v4026_v54, %v11016_v0 }
 0xd1a   :  { %4965 = vmatpush1.bf16.msra.mxu0 %v6516_v12  ;;  %5038 = vmatpush1.bf16.msra.mxu1 %v6519_v26  ;;  %v11017_v12 = vld [vmem:[#allocation160_spill] sm:$0xff] }
 0xd1b   :  { %4966 = vmatprep.subr.bf16.mxu0 %v6524_v1  ;;  %5039 = vmatprep.subr.bf16.mxu1 %v6527_v42  ;;  %v9403_v26 = vrot.slane %v4026_v54, %v11017_v12  ;;  %v11018_v1 = vsub.s32 2, %v11015_v48 }
 0xd1c   :  { %4421 = vmatmul.mubr.bf16.gmra.mxu0 %v3958_v41  ;;  %4494 = vmatmul.mubr.bf16.gmra.mxu1 %v3958_v41 }
 0xd1d   :  { %4430 = vmatprep.mubr.bf16.mxu0 %v3961_v58  ;;  %4503 = vmatprep.mubr.bf16.mxu1 %v3961_v58  ;;  %v9407_v42 = vrot.slane %v4026_v54, %v11018_v1 }
 0xd1e   :  { %4967 = vmatpush1.bf16.msra.mxu0 %v6522_v38  ;;  %5040 = vmatpush1.bf16.msra.mxu1 %v6525_v36 }
 0xd1f   :  { %4968 = vmatprep.subr.bf16.mxu0 %v6530_v53  ;;  %5041 = vmatprep.subr.bf16.mxu1 %v6533_v30 }
 0xd22   :  { %4969 = vmatpush1.bf16.msra.mxu0 %v6528_v19  ;;  %5042 = vmatpush1.bf16.msra.mxu1 %v6531_v39 }
 0xd23   :  { %4970 = vmatprep.subr.bf16.mxu0 %v6536_v9  ;;  %5043 = vmatprep.subr.bf16.mxu1 %v6539_v50 }
 0xd24   :  { %4431 = vmatmul.mubr.bf16.gmra.mxu0 %v3960_v49  ;;  %4504 = vmatmul.mubr.bf16.gmra.mxu1 %v3960_v49 }
 0xd26   :  { %4971 = vmatpush1.bf16.msra.mxu0 %v6534_v34  ;;  %5044 = vmatpush1.bf16.msra.mxu1 %v6537_v47 }
 0xd27   :  { %4972 = vmatprep.subr.bf16.mxu0 %v6542_v57  ;;  %5045 = vmatprep.subr.bf16.mxu1 %v6545_v32 }
 0xd2a   :  { %4973 = vmatpush1.bf16.msra.mxu0 %v6540_v27  ;;  %5046 = vmatpush1.bf16.msra.mxu1 %v6543_v29 }
 0xd2b   :  { %4974 = vmatprep.subr.bf16.mxu0 %v6548_v51  ;;  %5047 = vmatprep.subr.bf16.mxu1 %v6551_v6 }
 0xd2e   :  { %4975 = vmatpush2.bf16.msra.mxu0 %v6546_v56  ;;  %5048 = vmatpush2.bf16.msra.mxu1 %v6549_v40 }
 0xd2f   :  { %4976 = vmatprep.subr.bf16.mxu0 %v6554_v61  ;;  %5049 = vmatprep.subr.bf16.mxu1 %v6557_v15 }
 0xd32   :  { %4977 = vmatpush2.bf16.msra.mxu0 %v6552_v20  ;;  %5050 = vmatpush2.bf16.msra.mxu1 %v6555_v63 }
 0xd33   :  { %4978 = vmatprep.subr.bf16.mxu0 %v6560_v5  ;;  %5051 = vmatprep.subr.bf16.mxu1 %v6563_v14  ;;  %v6595_v14 = vld [vmem:[#allocation6 + $0x38] sm:$0xff]  }
 0xd36   :  { %4979 = vmatpush2.bf16.msra.mxu0 %v6558_v24  ;;  %5052 = vmatpush2.bf16.msra.mxu1 %v6561_v60 }
 0xd37   :  { %4980 = vmatprep.subr.bf16.mxu0 %v6566_v37  ;;  %5053 = vmatprep.subr.bf16.mxu1 %v6569_v33 }
 0xd3a   :  { %4981 = vmatpush2.bf16.msra.mxu0 %v6564_v7  ;;  %5054 = vmatpush2.bf16.msra.mxu1 %v6567_v62  ;;  %v6596_v62 = vld [vmem:[#allocation6 + $0x70] sm:$0xff]  }
 0xd3b   :  { %4982 = vmatprep.subr.bf16.mxu0 %v6572_v55  ;;  %5055 = vmatprep.subr.bf16.mxu1 %v6575_v46 }
 0xd3e   :  { %4983 = vmatpush2.bf16.msra.mxu0 %v6570_v2  ;;  %5056 = vmatpush2.bf16.msra.mxu1 %v6573_v4 }
 0xd3f   :  { %4984 = vmatprep.subr.bf16.mxu0 %v6578_v18  ;;  %5057 = vmatprep.subr.bf16.mxu1 %v6581_v21 }
 0xd42   :  { %4985 = vmatpush2.bf16.msra.mxu0 %v6576_v8  ;;  %5058 = vmatpush2.bf16.msra.mxu1 %v6579_v10 }
 0xd43   :  { %4986 = vmatprep.subr.bf16.mxu0 %v6584_v16  ;;  %5059 = vmatprep.subr.bf16.mxu1 %v6587_v23  ;;  %v6597_v23 = vld [vmem:[#allocation6 + $0x30] sm:$0xff]  }
 0xd46   :  { %4987 = vmatpush2.bf16.msra.mxu0 %v6582_v25  ;;  %5060 = vmatpush2.bf16.msra.mxu1 %v6585_v11 }
 0xd47   :  { %4988 = vmatprep.subr.bf16.mxu0 %v6590_v13  ;;  %5061 = vmatprep.subr.bf16.mxu1 %v6593_v35 }
 0xd4a   :  { %4989 = vmatpush2.bf16.msra.mxu0 %v6588_v28  ;;  %5062 = vmatpush2.bf16.msra.mxu1 %v6591_v17  ;;  %v6598_v28 = vld [vmem:[#allocation6 + $0x68] sm:$0xff]  }
 0xd4b   :  { %5940 = vmatprep.subr.bf16.mxu0 %v6594_v45 }
 0xdcc   :  { %v4402_v31 = vpop.f32.mrf.mxu0  ;;  %v4475_v52 = vpop.f32.mrf.mxu1 }
 0xdcd   :  { %v4403_v19 = vadd.f32 %v4402_v31, %v9403_v26  ;;  %v4476_v39 = vadd.f32 %v4475_v52, %v9407_v42 }
 0xdce   :  { %v4404_v3 = vpop.f32.mrf.mxu0  ;;  %v4477_v22 = vpop.f32.mrf.mxu1 }
 0xdcf   :  { %v4405_v36 = vadd.f32 %v4404_v3, %v9396_v43  ;;  %v4478_v58 = vadd.f32 %v4477_v22, %v9400_v59  ;;  %v4514_v40 = vmax.f32 %v4403_v19, 0.0  ;;  %v4516_v61 = vmax.f32 %v4476_v39, 0.0  ;;  %v6600_v19 = vld [vmem:[#allocation6 + $0x60] sm:$0xff]  }
 0xdd0   :  { %v4406_v41 = vpop.f32.mrf.mxu0  ;;  %v4479_v38 = vpop.f32.mrf.mxu1 }
 0xdd1   :  { %v4407_v53 = vadd.f32 %v4406_v41, %v9403_v26  ;;  %v4480_v30 = vadd.f32 %v4479_v38, %v9407_v42  ;;  %v4515_v29 = vmax.f32 %v4405_v36, 0.0  ;;  %v4517_v51 = vmax.f32 %v4478_v58, 0.0  ;;  %v6599_v41 = vld [vmem:[#allocation6 + $0x28] sm:$0xff]  }
 0xdd2   :  { %v4408_v9 = vpop.f32.mrf.mxu0  ;;  %v4481_v50 = vpop.f32.mrf.mxu1 }
 0xdd3   :  { %v4409_v49 = vadd.f32 %v4408_v9, %v9396_v43  ;;  %v4482_v34 = vadd.f32 %v4481_v50, %v9400_v59  ;;  %v4518_v47 = vmax.f32 %v4407_v53, 0.0  ;;  %v4520_v57 = vmax.f32 %v4480_v30, 0.0 }
 0xdd4   :  { %v4412_v32 = vpop.f32.mrf.mxu0  ;;  %v4485_v27 = vpop.f32.mrf.mxu1 }
 0xdd5   :  { %v4519_v6 = vmax.f32 %v4409_v49, 0.0  ;;  %v4521_v56 = vmax.f32 %v4482_v34, 0.0  ;;  %v4546_v24 = vpack.c.bf16 %v4518_v47, %v4514_v40  ;;  %v4548_v60 = vpack.c.bf16 %v4520_v57, %v4516_v61  ;;  %v6602_v61 = vld [vmem:[#allocation6 + $0x58] sm:$0xff]  }
 0xdd6   :  { %v4414_v15 = vpop.f32.mrf.mxu0  ;;  %v4487_v20 = vpop.f32.mrf.mxu1  ;;  %v4413_v4 = vadd.f32 %v4412_v32, %v9403_v26  ;;  %v4486_v18 = vadd.f32 %v4485_v27, %v9407_v42 }
 0xdd7   :  { %v4547_v63 = vpack.c.bf16 %v4519_v6, %v4515_v29  ;;  %v4549_v5 = vpack.c.bf16 %v4521_v56, %v4517_v51  ;;  %v4415_v37 = vadd.f32 %v4414_v15, %v9396_v43  ;;  %v4488_v55 = vadd.f32 %v4487_v20, %v9400_v59  ;;  %v6601_v29 = vld [vmem:[#allocation6 + $0x20] sm:$0xff]  }
 0xdd8   :  { %v4416_v33 = vpop.f32.mrf.mxu0  ;;  %v4489_v7 = vpop.f32.mrf.mxu1  ;;  %v4522_v52 = vmax.f32 %v4413_v4, 0.0  ;;  %v4524_v48 = vmax.f32 %v4486_v18, 0.0 }
 0xdd9   :  { %v4417_v46 = vadd.f32 %v4416_v33, %v9403_v26  ;;  %v4490_v2 = vadd.f32 %v4489_v7, %v9407_v42  ;;  %4990 = vmatprep.mubr.bf16.mxu0 %v4547_v63  ;;  %5063 = vmatprep.mubr.bf16.mxu1 %v4549_v5  ;;  %v4523_v17 = vmax.f32 %v4415_v37, 0.0  ;;  %v4525_v45 = vmax.f32 %v4488_v55, 0.0 }
 0xdda   :  { %v4418_v21 = vpop.f32.mrf.mxu0  ;;  %v4491_v8 = vpop.f32.mrf.mxu1  ;;  %4991 = vmatmul.mubr.bf16.vlgmr.msra.gmra.mxu0 %v4546_v24  ;;  %5064 = vmatmul.mubr.bf16.vlgmr.msra.gmra.mxu1 %v4548_v60 }
 0xddb   :  { %v4419_v10 = vadd.f32 %v4418_v21, %v9396_v43  ;;  %v4492_v16 = vadd.f32 %v4491_v8, %v9400_v59  ;;  %5941 = vmatpush3.bf16.msra.mxu0 %v6595_v14  ;;  %v4526_v25 = vmax.f32 %v4417_v46, 0.0  ;;  %v4528_v11 = vmax.f32 %v4490_v2, 0.0 }
 0xddc   :  { %v4422_v13 = vpop.f32.mrf.mxu0  ;;  %v4495_v35 = vpop.f32.mrf.mxu1  ;;  %5942 = vmatprep.subr.bf16.mxu0 %v6596_v62 }
 0xddd   :  { %v4527_v54 = vmax.f32 %v4419_v10, 0.0  ;;  %v4529_v31 = vmax.f32 %v4492_v16, 0.0  ;;  %v4550_v38 = vpack.c.bf16 %v4526_v25, %v4522_v52  ;;  %v4552_v36 = vpack.c.bf16 %v4528_v11, %v4524_v48 }
 0xdde   :  { %v4424_v0 = vpop.f32.mrf.mxu0  ;;  %v4497_v1 = vpop.f32.mrf.mxu1  ;;  %v4423_v49 = vadd.f32 %v4422_v13, %v9403_v26  ;;  %v4496_v34 = vadd.f32 %v4495_v35, %v9407_v42 }
 0xddf   :  { %v4551_v3 = vpack.c.bf16 %v4527_v54, %v4523_v17  ;;  %v4553_v22 = vpack.c.bf16 %v4529_v31, %v4525_v45  ;;  %5943 = vmatpush3.bf16.msra.mxu0 %v6597_v23  ;;  %v4425_v58 = vadd.f32 %v4424_v0, %v9396_v43  ;;  %v4498_v39 = vadd.f32 %v4497_v1, %v9400_v59 }
 0xde0   :  { %v4426_v53 = vpop.f32.mrf.mxu0  ;;  %v4499_v30 = vpop.f32.mrf.mxu1  ;;  %5944 = vmatprep.subr.bf16.mxu0 %v6598_v28  ;;  %v4530_v14 = vmax.f32 %v4423_v49, 0.0  ;;  %v4532_v24 = vmax.f32 %v4496_v34, 0.0 }
 0xde1   :  { %v4427_v9 = vadd.f32 %v4426_v53, %v9403_v26  ;;  %v4500_v50 = vadd.f32 %v4499_v30, %v9407_v42  ;;  %5000 = vmatprep.mubr.bf16.mxu0 %v4551_v3  ;;  %5073 = vmatprep.mubr.bf16.mxu1 %v4553_v22  ;;  %v4531_v15 = vmax.f32 %v4425_v58, 0.0  ;;  %v4533_v20 = vmax.f32 %v4498_v39, 0.0  ;;  %v6603_v3 = vld [vmem:[#allocation6 + $0x18] sm:$0xff]   ;;  %v6606_v22 = vld [vmem:[#allocation6 + $0x48] sm:$0xff]   ;;  %v6611_v53 = vld [vmem:[#allocation7 + $0x30] sm:$0xff]  }
 0xde2   :  { %v4428_v47 = vpop.f32.mrf.mxu0  ;;  %v4501_v57 = vpop.f32.mrf.mxu1  ;;  %5001 = vmatmul.mubr.bf16.gmra.mxu0 %v4550_v38  ;;  %5074 = vmatmul.mubr.bf16.gmra.mxu1 %v4552_v36  ;;  %v6608_v38 = vld [vmem:[#allocation6 + $0x40] sm:$0xff]   ;;  %v6610_v58 = vld [vmem:[#allocation7 + $0x38] sm:$0xff]   ;;  %v6612_v30 = vld [vmem:[#allocation7 + $0x28] sm:$0xff]  }
 0xde3   :  { %v4429_v32 = vadd.f32 %v4428_v47, %v9396_v43  ;;  %v4502_v27 = vadd.f32 %v4501_v57, %v9400_v59  ;;  %5945 = vmatpush3.bf16.msra.mxu0 %v6599_v41  ;;  %v4534_v51 = vmax.f32 %v4427_v9, 0.0  ;;  %v4536_v6 = vmax.f32 %v4500_v50, 0.0  ;;  %v6607_v41 = vld [vmem:[#allocation6 + $0x8] sm:$0xff]   ;;  %v6609_v36 = vld [vmem:[#allocation6] sm:$0xff]   ;;  %5992 = vmatprep.subr.bf16.mxu1 %v6610_v58 }
 0xde4   :  { %v4432_v56 = vpop.f32.mrf.mxu0  ;;  %v4505_v40 = vpop.f32.mrf.mxu1  ;;  %5946 = vmatprep.subr.bf16.mxu0 %v6600_v19  ;;  %5993 = vmatpush3.bf16.msra.mxu1 %v6610_v58  ;;  %v4626_v19 = vld [vmem:[#allocation17] sm:$0x3] }
 0xde5   :  { %v4535_v63 = vmax.f32 %v4429_v32, 0.0  ;;  %v4537_v5 = vmax.f32 %v4502_v27, 0.0  ;;  %v4554_v62 = vpack.c.bf16 %v4534_v51, %v4530_v14  ;;  %v4556_v55 = vpack.c.bf16 %v4536_v6, %v4532_v24  ;;  %5994 = vmatprep.subr.bf16.mxu1 %v6611_v53 }
 0xde6   :  { %v4434_v60 = vpop.f32.mrf.mxu0  ;;  %v4507_v37 = vpop.f32.mrf.mxu1  ;;  %v4433_v10 = vadd.f32 %v4432_v56, %v9403_v26  ;;  %v4506_v16 = vadd.f32 %v4505_v40, %v9407_v42  ;;  %v9442_v39 = vrot.slane %v4626_v19, %v11014_v44  ;;  %v9445_v9 = vrot.slane %v4626_v19, %v11017_v12 }
 0xde7   :  { %v4555_v33 = vpack.c.bf16 %v4535_v63, %v4531_v15  ;;  %v4557_v7 = vpack.c.bf16 %v4537_v5, %v4533_v20  ;;  %5947 = vmatpush3.bf16.msra.mxu0 %v6601_v29  ;;  %v4435_v46 = vadd.f32 %v4434_v60, %v9396_v43  ;;  %v4508_v18 = vadd.f32 %v4507_v37, %v9400_v59 }
 0xde8   :  { %v4436_v2 = vpop.f32.mrf.mxu0  ;;  %v4509_v4 = vpop.f32.mrf.mxu1  ;;  %5948 = vmatprep.subr.bf16.mxu0 %v6602_v61  ;;  %v4538_v52 = vmax.f32 %v4433_v10, 0.0  ;;  %v4540_v48 = vmax.f32 %v4506_v16, 0.0  ;;  %5995 = vmatpush3.bf16.msra.mxu1 %v6611_v53 }
 0xde9   :  { %v4437_v21 = vadd.f32 %v4436_v2, %v9403_v26  ;;  %v4510_v8 = vadd.f32 %v4509_v4, %v9407_v42  ;;  %5010 = vmatprep.mubr.bf16.mxu0 %v4555_v33  ;;  %5083 = vmatprep.mubr.bf16.mxu1 %v4557_v7  ;;  %v4539_v17 = vmax.f32 %v4435_v46, 0.0  ;;  %v4541_v45 = vmax.f32 %v4508_v18, 0.0 }
 0xdea   :  { %v4438_v23 = vpop.f32.mrf.mxu0  ;;  %v4511_v25 = vpop.f32.mrf.mxu1  ;;  %5011 = vmatmul.mubr.bf16.gmra.mxu0 %v4554_v62  ;;  %5084 = vmatmul.mubr.bf16.gmra.mxu1 %v4556_v55 }
 0xdeb   :  { %v4439_v11 = vadd.f32 %v4438_v23, %v9396_v43  ;;  %v4512_v13 = vadd.f32 %v4511_v25, %v9400_v59  ;;  %v4542_v35 = vmax.f32 %v4437_v21, 0.0  ;;  %v4544_v28 = vmax.f32 %v4510_v8, 0.0  ;;  %5949 = vmatpush3.bf16.msra.mxu0 %v6603_v3  ;;  %v6604_v43 = vld [vmem:[#allocation6 + $0x50] sm:$0xff]   ;;  %5996 = vmatprep.subr.bf16.mxu1 %v6612_v30 }
 0xdec   :  { %v6605_v59 = vld [vmem:[#allocation6 + $0x10] sm:$0xff]   ;;  %5950 = vmatprep.subr.bf16.mxu0 %v6604_v43  ;;  %5997 = vmatpush3.bf16.msra.mxu1 %v6612_v30 }
 0xded   :  { %v4543_v54 = vmax.f32 %v4439_v11, 0.0  ;;  %v4545_v31 = vmax.f32 %v4512_v13, 0.0  ;;  %v4558_v1 = vpack.c.bf16 %v4542_v35, %v4538_v52  ;;  %v4560_v42 = vpack.c.bf16 %v4544_v28, %v4540_v48 }
 0xdef   :  { %v4559_v0 = vpack.c.bf16 %v4543_v54, %v4539_v17  ;;  %v4561_v26 = vpack.c.bf16 %v4545_v31, %v4541_v45  ;;  %5951 = vmatpush3.bf16.msra.mxu0 %v6605_v59 }
 0xdf0   :  { %5952 = vmatprep.subr.bf16.mxu0 %v6606_v22 }
 0xdf1   :  { %5020 = vmatprep.mubr.bf16.mxu0 %v4559_v0  ;;  %5093 = vmatprep.mubr.bf16.mxu1 %v4561_v26 }
 0xdf2   :  { %5021 = vmatmul.mubr.bf16.gmra.mxu0 %v4558_v1  ;;  %5094 = vmatmul.mubr.bf16.gmra.mxu1 %v4560_v42 }
 0xdf3   :  { %5953 = vmatpush3.bf16.msra.mxu0 %v6607_v41 }
 0xdf4   :  { %5954 = vmatprep.subr.bf16.mxu0 %v6608_v38 }
 0xdf7   :  { %5955 = vmatpush3.bf16.msra.mxu0 %v6609_v36 }
 0xe9a   :  { %v4992_v50 = vpop.f32.mrf.mxu0  ;;  %v5065_v49 = vpop.f32.mrf.mxu1 }
 0xe9b   :  { %v4993_v32 = vadd.f32 %v4992_v50, %v9445_v9 }
 0xe9c   :  { %v4994_v34 = vpop.f32.mrf.mxu0  ;;  %v5067_v47 = vpop.f32.mrf.mxu1 }
 0xe9d   :  { %v4995_v57 = vadd.f32 %v4994_v34, %v9442_v39  ;;  %v5066_v12 = vadd.f32 %v5065_v49, %v4993_v32 }
 0xe9e   :  { %v4996_v27 = vpop.f32.mrf.mxu0  ;;  %v5069_v29 = vpop.f32.mrf.mxu1 }
 0xe9f   :  { %v4997_v51 = vadd.f32 %v4996_v27, %v9445_v9  ;;  %v5068_v40 = vadd.f32 %v5067_v47, %v4995_v57  ;;  %v5104_v7 = vmax.f32 %v5066_v12, 0.0 }
 0xea0   :  { %v4998_v6 = vpop.f32.mrf.mxu0  ;;  %v5071_v56 = vpop.f32.mrf.mxu1 }
 0xea1   :  { %v5070_v44 = vadd.f32 %v5069_v29, %v4997_v51  ;;  %v4999_v61 = vadd.f32 %v4998_v6, %v9442_v39  ;;  %v5105_v60 = vmax.f32 %v5068_v40, 0.0 }
 0xea2   :  { %v5002_v15 = vpop.f32.mrf.mxu0  ;;  %v5075_v20 = vpop.f32.mrf.mxu1 }
 0xea3   :  { %v5072_v63 = vadd.f32 %v5071_v56, %v4999_v61  ;;  %v5106_v5 = vmax.f32 %v5070_v44, 0.0  ;;  %v5003_v62 = vadd.f32 %v5002_v15, %v9445_v9 }
 0xea4   :  { %v5004_v14 = vpop.f32.mrf.mxu0  ;;  %v5077_v24 = vpop.f32.mrf.mxu1 }
 0xea5   :  { %v5107_v37 = vmax.f32 %v5072_v63, 0.0  ;;  %v5005_v33 = vadd.f32 %v5004_v14, %v9442_v39  ;;  %v5120_v18 = vpack.c.bf16 %v5106_v5, %v5104_v7  ;;  %v5076_v25 = vadd.f32 %v5075_v20, %v5003_v62 }
 0xea6   :  { %v5006_v55 = vpop.f32.mrf.mxu0  ;;  %v5079_v46 = vpop.f32.mrf.mxu1 }
 0xea7   :  { %v5121_v2 = vpack.c.bf16 %v5107_v37, %v5105_v60  ;;  %v5007_v4 = vadd.f32 %v5006_v55, %v9445_v9  ;;  %v5078_v10 = vadd.f32 %v5077_v24, %v5005_v33  ;;  %v5108_v48 = vmax.f32 %v5076_v25, 0.0  ;;  %v6614_v55 = vld [vmem:[#allocation7 + $0x18] sm:$0xff]  }
 0xea8   :  { %v5008_v21 = vpop.f32.mrf.mxu0  ;;  %v5081_v8 = vpop.f32.mrf.mxu1 }
 0xea9   :  { %v5080_v16 = vadd.f32 %v5079_v46, %v5007_v4  ;;  %v5009_v23 = vadd.f32 %v5008_v21, %v9442_v39  ;;  %5295 = vmatprep.mubr.bf16.mxu0 %v5121_v2  ;;  %v5109_v54 = vmax.f32 %v5078_v10, 0.0  ;;  %v6616_v46 = vld [vmem:[#allocation7 + $0x8] sm:$0xff]   ;;  %v6617_v2 = vld [vmem:[#allocation7] sm:$0xff]  }
 0xeaa   :  { %v5012_v11 = vpop.f32.mrf.mxu0  ;;  %v5085_v13 = vpop.f32.mrf.mxu1  ;;  %5296 = vmatmul.mubr.bf16.vlgmr.msra.gmra.mxu0 %v5120_v18 }
 0xeab   :  { %v5082_v35 = vadd.f32 %v5081_v8, %v5009_v23  ;;  %v5110_v28 = vmax.f32 %v5080_v16, 0.0  ;;  %v5013_v0 = vadd.f32 %v5012_v11, %v9445_v9  ;;  %v5910_v8 = vld [vmem:[#allocation19] ss:$0 sm:$0xff] }
 0xeac   :  { %v5014_v17 = vpop.f32.mrf.mxu0  ;;  %v5087_v45 = vpop.f32.mrf.mxu1 }
 0xead   :  { %v5111_v31 = vmax.f32 %v5082_v35, 0.0  ;;  %v5015_v52 = vadd.f32 %v5014_v17, %v9442_v39  ;;  %v5122_v43 = vpack.c.bf16 %v5110_v28, %v5108_v48  ;;  %v5086_v58 = vadd.f32 %v5085_v13, %v5013_v0 }
 0xeae   :  { %v5016_v26 = vpop.f32.mrf.mxu0  ;;  %v5089_v1 = vpop.f32.mrf.mxu1 }
 0xeaf   :  { %v5123_v42 = vpack.c.bf16 %v5111_v31, %v5109_v54  ;;  %v5017_v3 = vadd.f32 %v5016_v26, %v9445_v9  ;;  %v5088_v41 = vadd.f32 %v5087_v45, %v5015_v52  ;;  %v5112_v27 = vmax.f32 %v5086_v58, 0.0 }
 0xeb0   :  { %v5018_v59 = vpop.f32.mrf.mxu0  ;;  %v5091_v22 = vpop.f32.mrf.mxu1 }
 0xeb1   :  { %v5090_v38 = vadd.f32 %v5089_v1, %v5017_v3  ;;  %v5019_v36 = vadd.f32 %v5018_v59, %v9442_v39  ;;  %5303 = vmatprep.mubr.bf16.mxu0 %v5123_v42  ;;  %v5113_v47 = vmax.f32 %v5088_v41, 0.0 }
 0xeb2   :  { %v5022_v53 = vpop.f32.mrf.mxu0  ;;  %v5095_v30 = vpop.f32.mrf.mxu1  ;;  %5304 = vmatmul.mubr.bf16.gmra.mxu0 %v5122_v43 }
 0xeb3   :  { %v5092_v19 = vadd.f32 %v5091_v22, %v5019_v36  ;;  %v5114_v50 = vmax.f32 %v5090_v38, 0.0  ;;  %v5023_v29 = vadd.f32 %v5022_v53, %v9445_v9 }
 0xeb4   :  { %v5024_v49 = vpop.f32.mrf.mxu0  ;;  %v5097_v34 = vpop.f32.mrf.mxu1 }
 0xeb5   :  { %v5115_v57 = vmax.f32 %v5092_v19, 0.0  ;;  %v5025_v32 = vadd.f32 %v5024_v49, %v9442_v39  ;;  %v5124_v44 = vpack.c.bf16 %v5114_v50, %v5112_v27  ;;  %v5096_v63 = vadd.f32 %v5095_v30, %v5023_v29 }
 0xeb6   :  { %v5026_v51 = vpop.f32.mrf.mxu0  ;;  %v5099_v6 = vpop.f32.mrf.mxu1 }
 0xeb7   :  { %v5125_v56 = vpack.c.bf16 %v5115_v57, %v5113_v47  ;;  %v5027_v40 = vadd.f32 %v5026_v51, %v9445_v9  ;;  %v5098_v12 = vadd.f32 %v5097_v34, %v5025_v32  ;;  %v5116_v33 = vmax.f32 %v5096_v63, 0.0  ;;  %v6613_v9 = vld [vmem:[#allocation7 + $0x20] sm:$0xff]  }
 0xeb8   :  { %v5028_v61 = vpop.f32.mrf.mxu0  ;;  %v5101_v5 = vpop.f32.mrf.mxu1  ;;  %5998 = vmatprep.subr.bf16.mxu1 %v6613_v9 }
 0xeb9   :  { %v5100_v15 = vadd.f32 %v5099_v6, %v5027_v40  ;;  %v5029_v20 = vadd.f32 %v5028_v61, %v9442_v39  ;;  %5311 = vmatprep.mubr.bf16.mxu0 %v5125_v56  ;;  %v5117_v60 = vmax.f32 %v5098_v12, 0.0  ;;  %5999 = vmatpush3.bf16.msra.mxu1 %v6613_v9  ;;  %v6615_v39 = vld [vmem:[#allocation7 + $0x10] sm:$0xff]  }
 0xeba   :  { %5312 = vmatmul.mubr.bf16.gmra.mxu0 %v5124_v44  ;;  %6000 = vmatprep.subr.bf16.mxu1 %v6614_v55  ;;  %v5927_v44 = vld [vmem:[#allocation20] ss:$0 sm:$0xff] }
 0xebb   :  { %v5102_v14 = vadd.f32 %v5101_v5, %v5029_v20  ;;  %v5118_v24 = vmax.f32 %v5100_v15, 0.0 }
 0xebd   :  { %v5119_v37 = vmax.f32 %v5102_v14, 0.0  ;;  %v5126_v62 = vpack.c.bf16 %v5118_v24, %v5116_v33  ;;  %6001 = vmatpush3.bf16.msra.mxu1 %v6614_v55 }
 0xebe   :  { %6002 = vmatprep.subr.bf16.mxu1 %v6615_v39 }
 0xebf   :  { %v5127_v7 = vpack.c.bf16 %v5119_v37, %v5117_v60 }
 0xec1   :  { %5319 = vmatprep.mubr.bf16.mxu0 %v5127_v7  ;;  %6003 = vmatpush3.bf16.msra.mxu1 %v6615_v39 }
 0xec2   :  { %5320 = vmatmul.mubr.bf16.gmra.mxu0 %v5126_v62  ;;  %6004 = vmatprep.subr.bf16.mxu1 %v6616_v46 }
 0xec5   :  { %6005 = vmatpush3.bf16.msra.mxu1 %v6616_v46 }
 0xec6   :  { %6006 = vmatprep.subr.bf16.mxu1 %v6617_v2 }
 0xec9   :  { %6007 = vmatpush3.bf16.msra.mxu1 %v6617_v2 }
 0xf6a   :  { %v5956_v4 = vpop.f32.mrf.mxu0 }
 0xf6c   :  { %v5957_v18 = vpop.f32.mrf.mxu0 }
 0xf6d   :  { %v5958_v21 = vadd.f32 %v5957_v18, %v5956_v4 }
 0xf6e   :  { %v5959_v10 = vpop.f32.mrf.mxu0 }
 0xf6f   :  { %v5298_v23 = vadd.f32 %v5958_v21, %v5910_v8 }
 0xf70   :  { %v5960_v16 = vpop.f32.mrf.mxu0 }
 0xf71   :  { %v5961_v25 = vadd.f32 %v5960_v16, %v5959_v10  ;;  %v5328_v28 = vmax.f32 %v5298_v23, 0.0 }
 0xf72   :  { %v5962_v11 = vpop.f32.mrf.mxu0 }
 0xf73   :  { %v5301_v13 = vadd.f32 %v5961_v25, %v5910_v8 }
 0xf74   :  { %v5963_v35 = vpop.f32.mrf.mxu0 }
 0xf75   :  { %v5329_v17 = vmax.f32 %v5301_v13, 0.0  ;;  %v5964_v45 = vadd.f32 %v5963_v35, %v5962_v11 }
 0xf76   :  { %v5965_v54 = vpop.f32.mrf.mxu0 }
 0xf77   :  { %v5336_v31 = vpack.c.bf16 %v5329_v17, %v5328_v28  ;;  %v5306_v48 = vadd.f32 %v5964_v45, %v5910_v8 }
 0xf78   :  { %v5966_v52 = vpop.f32.mrf.mxu0 }
 0xf79   :  { %v5967_v0 = vadd.f32 %v5966_v52, %v5965_v54  ;;  %6008 = vmatprep.mubr.bf16.mxu1 %v5336_v31  ;;  %v5330_v3 = vmax.f32 %v5306_v48, 0.0 }
 0xf7a   :  { %v5968_v26 = vpop.f32.mrf.mxu0 }
 0xf7b   :  { %v5309_v1 = vadd.f32 %v5967_v0, %v5910_v8 }
 0xf7c   :  { %v5969_v42 = vpop.f32.mrf.mxu0 }
 0xf7d   :  { %v5331_v43 = vmax.f32 %v5309_v1, 0.0  ;;  %v5970_v59 = vadd.f32 %v5969_v42, %v5968_v26 }
 0xf7e   :  { %v5971_v22 = vpop.f32.mrf.mxu0 }
 0xf7f   :  { %v5337_v41 = vpack.c.bf16 %v5331_v43, %v5330_v3  ;;  %v5314_v36 = vadd.f32 %v5970_v59, %v5910_v8 }
 0xf80   :  { %v5972_v38 = vpop.f32.mrf.mxu0 }
 0xf81   :  { %v5973_v58 = vadd.f32 %v5972_v38, %v5971_v22  ;;  %6009 = vmatmul.mubr.bf16.vlgmr.msra.gmra.mxu1 %v5337_v41  ;;  %v5332_v50 = vmax.f32 %v5314_v36, 0.0 }
 0xf82   :  { %v5974_v53 = vpop.f32.mrf.mxu0 }
 0xf83   :  { %v5317_v30 = vadd.f32 %v5973_v58, %v5910_v8 }
 0xf84   :  { %v5975_v19 = vpop.f32.mrf.mxu0 }
 0xf85   :  { %v5333_v49 = vmax.f32 %v5317_v30, 0.0  ;;  %v5976_v34 = vadd.f32 %v5975_v19, %v5974_v53 }
 0xf86   :  { %v5977_v47 = vpop.f32.mrf.mxu0 }
 0xf87   :  { %v5338_v57 = vpack.c.bf16 %v5333_v49, %v5332_v50  ;;  %v5322_v27 = vadd.f32 %v5976_v34, %v5910_v8 }
 0xf88   :  { %v5978_v32 = vpop.f32.mrf.mxu0 }
 0xf89   :  { %v5979_v29 = vadd.f32 %v5978_v32, %v5977_v47  ;;  %6012 = vmatprep.mubr.bf16.mxu1 %v5338_v57  ;;  %v5334_v6 = vmax.f32 %v5322_v27, 0.0 }
 0xf8b   :  { %v5325_v51 = vadd.f32 %v5979_v29, %v5910_v8 }
 0xf8d   :  { %v5335_v56 = vmax.f32 %v5325_v51, 0.0 }
 0xf8f   :  { %v5339_v40 = vpack.c.bf16 %v5335_v56, %v5334_v6 }
 0xf91   :  { %6013 = vmatmul.mubr.bf16.gmra.mxu1 %v5339_v40 }
0x1041   :  { %v6010_v61 = vpop.f32.mrf.mxu1 }
0x1042   :  { %v5454_v12 = vadd.f32 %v6010_v61, %v5927_v44 }
0x1043   :  { %v5445_v15 = vpop.f32.mrf.mxu1 }
0x1044   :  { %6618 = vtanh.f32 %v5454_v12  ;;  %v5446_v20 = vadd.f32 %v5927_v44, %v5445_v15 }
0x1045   :  { %v6011_v63 = vpop.f32.mrf.mxu1 }
0x1046   :  { %6620 = vtanh.f32 %v5446_v20  ;;  %v5457_v5 = vadd.f32 %v6011_v63, %v5927_v44 }
0x1047   :  { %v5448_v14 = vpop.f32.mrf.mxu1 }
0x1048   :  { %6622 = vtanh.f32 %v5457_v5  ;;  %v5449_v24 = vadd.f32 %v5927_v44, %v5448_v14 }
0x104a   :  { %6624 = vtanh.f32 %v5449_v24 }
0x1051   :  { %v6619_v60 = vpop.eup %6618  ;;  %v6014_v37 = vpop.f32.mrf.mxu1 }
0x1052   :  { %5486 = vst [vmem:[%s9501_s14 + $0x10] sm:$0xff] %v6619_v60  ;;  %v5470_v33 = vadd.f32 %v6014_v37, %v5927_v44 }
0x1053   :  { %v6621_v7 = vpop.eup %6620  ;;  %v5461_v62 = vpop.f32.mrf.mxu1 }
0x1054   :  { %5484 = vst [vmem:[%s9501_s14] sm:$0xff] %v6621_v7  ;;  %6626 = vtanh.f32 %v5470_v33  ;;  %v5462_v9 = vadd.f32 %v5927_v44, %v5461_v62 }
0x1055   :  { %v6623_v55 = vpop.eup %6622  ;;  %v6015_v39 = vpop.f32.mrf.mxu1 }
0x1056   :  { %5487 = vst [vmem:[%s9501_s14 + $0x18] sm:$0xff] %v6623_v55  ;;  %6628 = vtanh.f32 %v5462_v9  ;;  %v5473_v46 = vadd.f32 %v6015_v39, %v5927_v44 }
0x1057   :  { %v6625_v2 = vpop.eup %6624  ;;  %v5464_v4 = vpop.f32.mrf.mxu1 }
0x1058   :  { %5485 = vst [vmem:[%s9501_s14 + $0x8] sm:$0xff] %v6625_v2  ;;  %6630 = vtanh.f32 %v5473_v46  ;;  %v5465_v18 = vadd.f32 %v5927_v44, %v5464_v4 }
0x105a   :  { %6632 = vtanh.f32 %v5465_v18 }
0x1061   :  { %v6627_v21 = vpop.eup %6626 }
0x1062   :  { %5490 = vst [vmem:[%s9501_s14 + $0x30] sm:$0xff] %v6627_v21 }
0x1063   :  { %v6629_v8 = vpop.eup %6628 }
0x1064   :  { %5488 = vst [vmem:[%s9501_s14 + $0x20] sm:$0xff] %v6629_v8 }
0x1065   :  { %v6631_v10 = vpop.eup %6630 }
0x1066   :  { %5491 = vst [vmem:[%s9501_s14 + $0x38] sm:$0xff] %v6631_v10 }
0x1067   :  { %v6633_v16 = vpop.eup %6632 }
0x1068   :  { %5489 = vst [vmem:[%s9501_s14 + $0x28] sm:$0xff] %v6633_v16 }
0x1069   :  { %5496 = vsyncpa [#allocation10], 1 }
0x106a   :  { %5497 = vsyncpa [#allocation12], 1 }
0x106b   :  { %5498 = vsyncpa [#allocation15], 1 }
0x106c   :  { %5499 = vsyncpa [#allocation18], 1 }
0x106d   :  { %5500 = vsyncpa [#allocation21], 1 }
0x106e   :  { %5501 = vsyncmov [#allocation8] }
0x1071   :  { %s5502_s4 = vpop.sfrf %5501 }
0x1072   :  { %p5936_p13 = scmp.ne.s32.totalorder %s5502_s4, 0 }
0x1074   :  { %5506 = shalt.err (%p5936_p13)  }
0x1075   :  { %5508 = vsyncmov [#allocation8 + $0x1] }
0x1078   :  { %s5509_s16 = vpop.sfrf %5508 }
0x1079   :  { %p5937_p0 = scmp.ne.s32.totalorder %s5509_s16, 0 }
0x107b   :  { %5513 = shalt.err (%p5937_p0)  }
0x107c   :  { %5515 = vsyncmov [#allocation8 + $0x2] }
0x107f   :  { %s5516_s8 = vpop.sfrf %5515 }
0x1080   :  { %p5938_p1 = scmp.ne.s32.totalorder %s5516_s8, 0 }
0x1082   :  { %5520 = shalt.err (%p5938_p1)  }
0x1083   :  { %5522 = vsyncmov [#allocation8 + $0x3] }
0x1086   :  { %s5523_s21 = vpop.sfrf %5522 }
0x1087   :  { %p5939_p2 = scmp.ne.s32.totalorder %s5523_s21, 0 }
0x1089   :  { %5527 = shalt.err (%p5939_p2)  }

</bundles_post_ra>
